<compile_context>
chip_gen: v5e
topology: v5e:2x2
jax: 0.10.0
libtpu: 0.0.40
codegen_flags: <defaults>
</compile_context>

<pallas_src>
import math

import jax
import jax.numpy as jnp
import numpy as np
from jax import lax
from jax.experimental import pallas as pl
from jax.experimental.pallas import tpu as pltpu

LEAK = 0.2
INV_SQRT2 = 1.0 / math.sqrt(2.0)


def _leaky(v):
    # nn.LeakyReLU(0.2)
    return jnp.where(v > 0, v, LEAK * v)


# ------------------------------ kernel helpers ------------------------------


def _zero_border(ref):
    """Zero the 1-pixel border of a (H+2, W+2, C) scratch."""
    Hp, Wp, C = ref.shape
    ref[0:1, :, :] = jnp.zeros((1, Wp, C), ref.dtype)
    ref[Hp - 1:Hp, :, :] = jnp.zeros((1, Wp, C), ref.dtype)
    ref[:, 0:1, :] = jnp.zeros((Hp, 1, C), ref.dtype)
    ref[:, Wp - 1:Wp, :] = jnp.zeros((Hp, 1, C), ref.dtype)


def _conv3x3(pad_ref, w_ref, b_ref):
    """3x3 conv from an already-padded scratch; single im2col matmul.

    Operands are cast to the weight dtype (bf16) for the MXU, accumulation is
    f32.  Returns (H*W, Co) f32 (bias added).
    """
    Hp, Wp, C = pad_ref.shape
    H, W = Hp - 2, Wp - 2
    taps = [pad_ref[dy:dy + H, dx:dx + W, :] for dy in range(3) for dx in range(3)]
    patch = jnp.concatenate(taps, axis=-1).reshape(H * W, 9 * C)
    acc = jnp.dot(patch.astype(w_ref.dtype), w_ref[...],
                  preferred_element_type=jnp.float32)
    return acc + b_ref[...]


def _blur3x3(pad_ref):
    """Depthwise [1,2,1]x[1,2,1]/16 blur; reflect border already in scratch.

    All arithmetic in f32 (VPU).  Returns (H, W, C) f32.
    """
    Hp, Wp, C = pad_ref.shape
    H, W = Hp - 2, Wp - 2
    k = ((1.0, 2.0, 1.0), (2.0, 4.0, 2.0), (1.0, 2.0, 1.0))
    acc = jnp.zeros((H, W, C), jnp.float32)
    for dy in range(3):
        for dx in range(3):
            acc = acc + (k[dy][dx] / 16.0) * pad_ref[dy:dy + H, dx:dx + W, :]
    return acc


def _store_reflect(pad_ref, y):
    """Write y (H, W, C) into the scratch interior plus a 1-pixel reflect border."""
    Hp, Wp, _ = pad_ref.shape
    H, W = Hp - 2, Wp - 2
    pad_ref[1:H + 1, 1:W + 1, :] = y
    pad_ref[0:1, 1:W + 1, :] = y[1:2]
    pad_ref[H + 1:H + 2, 1:W + 1, :] = y[H - 2:H - 1]
    pad_ref[:, 0:1, :] = pad_ref[:, 2:3, :]
    pad_ref[:, W + 1:W + 2, :] = pad_ref[:, W - 1:W, :]


def _decimate_rows(v):
    """Keep even rows of the leading (H) axis: (H, W, C) -> (H//2, W, C).

    Pure leading-dim reshape + static index (no strided/tiled-dim ops).
    """
    H, W, C = v.shape
    return v.reshape(H // 2, 2, W, C)[:, 0]


# --------------------------------- kernel -----------------------------------


def disc_block_kernel(x_ref, w1_ref, b1_ref, w2_ref, b2_ref, w3r_ref, b3r_ref,
                      o_ref, padx_ref, padz_ref, padr_ref):
    # One grid program per batch element; x block = (1, H, W, Cin) in NHWC.
    H, W, Cin = x_ref.shape[1], x_ref.shape[2], x_ref.shape[3]
    F = w1_ref.shape[1]
    Ho, Wo = H // 2, W // 2
    mxu_dtype = w1_ref.dtype  # bf16

    # Stage the (bf16) input block into the zero-padded f32 scratch.
    # Borders are re-zeroed every program (cheap) so megacore sharding of the
    # batch axis cannot leave a core with an uninitialized border.
    _zero_border(padx_ref)
    _zero_border(padz_ref)
    padx_ref[1:H + 1, 1:W + 1, :] = x_ref[0].astype(jnp.float32)

    # net: Conv3x3 -> LeakyReLU -> Conv3x3 -> LeakyReLU (one matmul per conv).
    y1 = _leaky(_conv3x3(padx_ref, w1_ref, b1_ref))           # (H*W, F) f32
    padz_ref[1:H + 1, 1:W + 1, :] = y1.reshape(H, W, F)
    y2 = _leaky(_conv3x3(padz_ref, w2_ref, b2_ref)).reshape(H, W, F)

    # downsample[0]: reflect-padded, normalized depthwise blur (f32).
    _store_reflect(padr_ref, y2)
    blur = _blur3x3(padr_ref)                                  # (H, W, F) f32
    padz_ref[1:H + 1, 1:W + 1, :] = blur                       # zero border kept

    # downsample[1] (Conv3x3, stride 2, pad 1)  ⊕  conv_res (1x1, stride 2),
    # fused into a single matmul.  Taps are H-decimated in-kernel (even rows
    # only -> half the M rows); W is evaluated at stride 1 and decimated right
    # after, fused with the lane-densifying output pack.
    taps = []
    for dy in range(3):
        for dx in range(3):
            taps.append(_decimate_rows(padz_ref[dy:dy + H, dx:dx + W, :]))
    taps.append(_decimate_rows(padx_ref[1:H + 1, 1:W + 1, :]))  # residual 1x1 input
    patch = jnp.concatenate(taps, axis=-1)                      # (Ho, W, 9F+Cin)
    out = jnp.dot(patch.reshape(Ho * W, 9 * F + Cin).astype(mxu_dtype),
                  w3r_ref[...], preferred_element_type=jnp.float32)
    out = (out + b3r_ref[...]) * INV_SQRT2                      # (x + res)/sqrt(2)
    out = out.reshape(Ho, W, F)

    # Even-column decimation fused with packing (Wo, F) onto the lane axis:
    # the store is Wo*F = 64 lanes wide instead of 8 (denser vst).
    cols = [out[:, 2 * j:2 * j + 1, :] for j in range(Wo)]      # each (Ho, 1, F)
    packed = jnp.concatenate(cols, axis=-1).reshape(Ho, Wo * F)
    o_ref[0] = packed.astype(o_ref.dtype)


# --------------------------------- wrapper ----------------------------------


def discriminator_block(x_nchw, params):
    """Pallas forward of DiscriminatorBlock(input_channels, filters, downsample=True)."""
    N, Cin, H, W = x_nchw.shape
    F = params['w1'].shape[0]
    assert H % 2 == 0 and W % 2 == 0 and H >= 4 and W >= 4
    Ho, Wo = H // 2, W // 2

    # NHWC, bf16 input block (halves input DMA; matmuls run bf16 on the MXU).
    x = jnp.transpose(x_nchw, (0, 2, 3, 1)).astype(jnp.bfloat16)

    def oihw_to_im2col(w):  # (Co, Ci, 3, 3) -> (9*Ci, Co), row order (dy, dx, ci)
        return jnp.transpose(w, (2, 3, 1, 0)).reshape(-1, w.shape[0])

    w1r = oihw_to_im2col(params['w1']).astype(jnp.bfloat16)          # (9*Cin, F)
    w2r = oihw_to_im2col(params['w2']).astype(jnp.bfloat16)          # (9*F, F)
    wres2d = params['wres'].reshape(F, Cin).T                        # (Cin, F)
    # Fused [conv3 | conv_res] weights and bias.
    w3r = jnp.concatenate([oihw_to_im2col(params['w3']), wres2d],
                          axis=0).astype(jnp.bfloat16)               # (9*F+Cin, F)
    b1 = params['b1'].reshape(1, F).astype(jnp.float32)
    b2 = params['b2'].reshape(1, F).astype(jnp.float32)
    b3r = (params['b3'] + params['bres']).reshape(1, F).astype(jnp.float32)

    out = pl.pallas_call(
        disc_block_kernel,
        out_shape=jax.ShapeDtypeStruct((N, Ho, Wo * F), jnp.float32),
        grid_spec=pltpu.PrefetchScalarGridSpec(
            num_scalar_prefetch=0,
            grid=(N,),
            in_specs=[
                pl.BlockSpec((1, H, W, Cin), lambda n: (n, 0, 0, 0)),
                pl.BlockSpec((9 * Cin, F), lambda n: (0, 0)),
                pl.BlockSpec((1, F), lambda n: (0, 0)),
                pl.BlockSpec((9 * F, F), lambda n: (0, 0)),
                pl.BlockSpec((1, F), lambda n: (0, 0)),
                pl.BlockSpec((9 * F + Cin, F), lambda n: (0, 0)),
                pl.BlockSpec((1, F), lambda n: (0, 0)),
            ],
            out_specs=pl.BlockSpec((1, Ho, Wo * F), lambda n: (n, 0, 0)),
            scratch_shapes=[
                pltpu.VMEM((H + 2, W + 2, Cin), jnp.float32),  # zero-padded x
                pltpu.VMEM((H + 2, W + 2, F), jnp.float32),    # zero-padded y1 / blur
                pltpu.VMEM((H + 2, W + 2, F), jnp.float32),    # reflect-padded y2
            ],
        ),
        compiler_params=pltpu.CompilerParams(
            dimension_semantics=("parallel",),
            vmem_limit_bytes=32 * 1024 * 1024,
        ),
    )(x, w1r, b1, w2r, b2, w3r, b3r)

    # Lane-packed (N, Ho, Wo*F) -> NCHW (N, F, Ho, Wo).
    out = out.reshape(N, Ho, Wo, F)
    return jnp.transpose(out, (0, 3, 1, 2))


# -------------------------------- reference ---------------------------------


def reference_forward(x_nchw, params, matmul_dtype=None):
    """Pure-JAX (lax.conv) reference mirroring the PyTorch module.

    If `matmul_dtype` is given (e.g. bf16), conv/matmul operands are rounded to
    that dtype (with f32 accumulation), mirroring the kernel's MXU precision.
    The blur / LeakyReLU / merge always run in f32, like the kernel.
    """
    if matmul_dtype is None:
        cast = lambda a: a
    else:
        cast = lambda a: a.astype(matmul_dtype).astype(jnp.float32)
    x = jnp.transpose(x_nchw, (0, 2, 3, 1)).astype(jnp.float32)   # NHWC
    F = params['w1'].shape[0]

    def conv(inp, w_oihw, bias, stride, pad):
        w = jnp.transpose(w_oihw, (2, 3, 1, 0))                   # HWIO
        y = lax.conv_general_dilated(
            cast(inp), cast(w), (stride, stride), [(pad, pad), (pad, pad)],
            dimension_numbers=('NHWC', 'HWIO', 'NHWC'),
            preferred_element_type=jnp.float32,
            precision=lax.Precision.HIGHEST)
        return y + bias.reshape(1, 1, 1, -1)

    res = conv(x, params['wres'], params['bres'], 2, 0)
    y = _leaky(conv(x, params['w1'], params['b1'], 1, 1))
    y = _leaky(conv(y, params['w2'], params['b2'], 1, 1))
    f = jnp.array([1.0, 2.0, 1.0], jnp.float32)
    k2d = (f[:, None] * f[None, :]) / 16.0
    kw = jnp.tile(k2d[:, :, None, None], (1, 1, 1, F))            # (3,3,1,F), groups=F
    yp = jnp.pad(y, ((0, 0), (1, 1), (1, 1), (0, 0)), mode='reflect')
    y = lax.conv_general_dilated(yp, kw, (1, 1), [(0, 0), (0, 0)],
                                 dimension_numbers=('NHWC', 'HWIO', 'NHWC'),
                                 feature_group_count=F,
                                 precision=lax.Precision.HIGHEST)
    y = conv(y, params['w3'], params['b3'], 2, 1)
    out = (y + res) * INV_SQRT2
    return jnp.transpose(out, (0, 3, 1, 2))


if __name__ == "__main__":
    # DiscriminatorBlock(input_channels=4, filters=8, downsample=True)
    N, Cin, H, W, F = 2, 4, 16, 16, 8
    key = jax.random.PRNGKey(0)
    ks = jax.random.split(key, 9)
    s = 0.1
    params = {
        'wres': s * jax.random.normal(ks[0], (F, Cin, 1, 1), jnp.float32),
        'bres': s * jax.random.normal(ks[1], (F,), jnp.float32),
        'w1':   s * jax.random.normal(ks[2], (F, Cin, 3, 3), jnp.float32),
        'b1':   s * jax.random.normal(ks[3], (F,), jnp.float32),
        'w2':   s * jax.random.normal(ks[4], (F, F, 3, 3), jnp.float32),
        'b2':   s * jax.random.normal(ks[5], (F,), jnp.float32),
        'w3':   s * jax.random.normal(ks[6], (F, F, 3, 3), jnp.float32),
        'b3':   s * jax.random.normal(ks[7], (F,), jnp.float32),
    }
    x = jax.random.normal(ks[8], (N, Cin, H, W), jnp.float32)

    out = jax.block_until_ready(discriminator_block(x, params))
    assert out.shape == (N, F, H // 2, W // 2), out.shape

    # Tight check vs a reference that mirrors the kernel's bf16 MXU operands
    # (same products, f32 accumulation; only summation order differs).
    ref_bf16 = reference_forward(x, params, matmul_dtype=jnp.bfloat16)
    np.testing.assert_allclose(np.asarray(out), np.asarray(ref_bf16),
                               rtol=2e-3, atol=2e-3)

    # Sanity check vs the pure-f32 module semantics (difference bounded by the
    # bf16 operand rounding of the matmuls).
    ref_f32 = reference_forward(x, params)
    np.testing.assert_allclose(np.asarray(out), np.asarray(ref_f32),
                               rtol=5e-2, atol=5e-2)

    print("KERNEL_OK")
</pallas_src>

<mosaic_0001>
module attributes {stable_mosaic.version = 11 : i64} {
  func.func @disc_block_kernel(%arg0: i32, %arg1: memref<1x16x16x4xbf16, #tpu.memory_space<vmem>>, %arg2: memref<36x8xbf16, #tpu.memory_space<vmem>>, %arg3: memref<1x8xf32, #tpu.memory_space<vmem>>, %arg4: memref<72x8xbf16, #tpu.memory_space<vmem>>, %arg5: memref<1x8xf32, #tpu.memory_space<vmem>>, %arg6: memref<76x8xbf16, #tpu.memory_space<vmem>>, %arg7: memref<1x8xf32, #tpu.memory_space<vmem>>, %arg8: memref<1x8x64xf32, #tpu.memory_space<vmem>>, %arg9: memref<18x18x4xf32, #tpu.memory_space<vmem>>, %arg10: memref<18x18x8xf32, #tpu.memory_space<vmem>>, %arg11: memref<18x18x8xf32, #tpu.memory_space<vmem>>) attributes {dimension_semantics = [#tpu.dimension_semantics<parallel>], iteration_bounds = array<i64: 2>, scalar_prefetch = 0 : i64, scratch_operands = 3 : i64, tpu.core_type = #tpu.core_type<tc>, window_params = [{transform_indices = @transform_0, window_bounds = array<i64: 1, 16, 16, 4>}, {pipeline_mode = #tpu.pipeline_mode<synchronous>, transform_indices = @transform_1, window_bounds = array<i64: 36, 8>}, {pipeline_mode = #tpu.pipeline_mode<synchronous>, transform_indices = @transform_2, window_bounds = array<i64: 1, 8>}, {pipeline_mode = #tpu.pipeline_mode<synchronous>, transform_indices = @transform_3, window_bounds = array<i64: 72, 8>}, {pipeline_mode = #tpu.pipeline_mode<synchronous>, transform_indices = @transform_4, window_bounds = array<i64: 1, 8>}, {pipeline_mode = #tpu.pipeline_mode<synchronous>, transform_indices = @transform_5, window_bounds = array<i64: 76, 8>}, {pipeline_mode = #tpu.pipeline_mode<synchronous>, transform_indices = @transform_6, window_bounds = array<i64: 1, 8>}, {transform_indices = @transform_7, window_bounds = array<i64: 1, 8, 64>}]} {
    %cst = arith.constant 0.000000e+00 : f32
    %0 = vector.broadcast %cst : f32 to vector<1x18x4xf32>
    %c0 = arith.constant 0 : index
    %c0_0 = arith.constant 0 : index
    %c0_1 = arith.constant 0 : index
    %1 = vector.load %arg9[%c0, %c0_0, %c0_1] : memref<18x18x4xf32, #tpu.memory_space<vmem>>, vector<1x18x4xf32>
    tpu.vector_store %arg9[%c0, %c0_0, %c0_1], %0 {strides = array<i32>} : memref<18x18x4xf32, #tpu.memory_space<vmem>>, vector<1x18x4xf32>,
    %cst_2 = arith.constant 0.000000e+00 : f32
    %2 = vector.broadcast %cst_2 : f32 to vector<1x18x4xf32>
    %c17 = arith.constant 17 : index
    %c0_3 = arith.constant 0 : index
    %c0_4 = arith.constant 0 : index
    %3 = vector.load %arg9[%c17, %c0_3, %c0_4] : memref<18x18x4xf32, #tpu.memory_space<vmem>>, vector<1x18x4xf32>
    tpu.vector_store %arg9[%c17, %c0_3, %c0_4], %2 {strides = array<i32>} : memref<18x18x4xf32, #tpu.memory_space<vmem>>, vector<1x18x4xf32>,
    %cst_5 = arith.constant 0.000000e+00 : f32
    %4 = vector.broadcast %cst_5 : f32 to vector<18x1x4xf32>
    %c0_6 = arith.constant 0 : index
    %c0_7 = arith.constant 0 : index
    %c0_8 = arith.constant 0 : index
    %5 = vector.load %arg9[%c0_6, %c0_7, %c0_8] : memref<18x18x4xf32, #tpu.memory_space<vmem>>, vector<18x1x4xf32>
    tpu.vector_store %arg9[%c0_6, %c0_7, %c0_8], %4 {strides = array<i32>} : memref<18x18x4xf32, #tpu.memory_space<vmem>>, vector<18x1x4xf32>,
    %cst_9 = arith.constant 0.000000e+00 : f32
    %6 = vector.broadcast %cst_9 : f32 to vector<18x1x4xf32>
    %c0_10 = arith.constant 0 : index
    %c17_11 = arith.constant 17 : index
    %c0_12 = arith.constant 0 : index
    %7 = vector.load %arg9[%c0_10, %c17_11, %c0_12] : memref<18x18x4xf32, #tpu.memory_space<vmem>>, vector<18x1x4xf32>
    tpu.vector_store %arg9[%c0_10, %c17_11, %c0_12], %6 {strides = array<i32>} : memref<18x18x4xf32, #tpu.memory_space<vmem>>, vector<18x1x4xf32>,
    %cst_13 = arith.constant 0.000000e+00 : f32
    %8 = vector.broadcast %cst_13 : f32 to vector<1x18x8xf32>
    %c0_14 = arith.constant 0 : index
    %c0_15 = arith.constant 0 : index
    %c0_16 = arith.constant 0 : index
    %9 = vector.load %arg10[%c0_14, %c0_15, %c0_16] : memref<18x18x8xf32, #tpu.memory_space<vmem>>, vector<1x18x8xf32>
    tpu.vector_store %arg10[%c0_14, %c0_15, %c0_16], %8 {strides = array<i32>} : memref<18x18x8xf32, #tpu.memory_space<vmem>>, vector<1x18x8xf32>,
    %cst_17 = arith.constant 0.000000e+00 : f32
    %10 = vector.broadcast %cst_17 : f32 to vector<1x18x8xf32>
    %c17_18 = arith.constant 17 : index
    %c0_19 = arith.constant 0 : index
    %c0_20 = arith.constant 0 : index
    %11 = vector.load %arg10[%c17_18, %c0_19, %c0_20] : memref<18x18x8xf32, #tpu.memory_space<vmem>>, vector<1x18x8xf32>
    tpu.vector_store %arg10[%c17_18, %c0_19, %c0_20], %10 {strides = array<i32>} : memref<18x18x8xf32, #tpu.memory_space<vmem>>, vector<1x18x8xf32>,
    %cst_21 = arith.constant 0.000000e+00 : f32
    %12 = vector.broadcast %cst_21 : f32 to vector<18x1x8xf32>
    %c0_22 = arith.constant 0 : index
    %c0_23 = arith.constant 0 : index
    %c0_24 = arith.constant 0 : index
    %13 = vector.load %arg10[%c0_22, %c0_23, %c0_24] : memref<18x18x8xf32, #tpu.memory_space<vmem>>, vector<18x1x8xf32>
    tpu.vector_store %arg10[%c0_22, %c0_23, %c0_24], %12 {strides = array<i32>} : memref<18x18x8xf32, #tpu.memory_space<vmem>>, vector<18x1x8xf32>,
    %cst_25 = arith.constant 0.000000e+00 : f32
    %14 = vector.broadcast %cst_25 : f32 to vector<18x1x8xf32>
    %c0_26 = arith.constant 0 : index
    %c17_27 = arith.constant 17 : index
    %c0_28 = arith.constant 0 : index
    %15 = vector.load %arg10[%c0_26, %c17_27, %c0_28] : memref<18x18x8xf32, #tpu.memory_space<vmem>>, vector<18x1x8xf32>
    tpu.vector_store %arg10[%c0_26, %c17_27, %c0_28], %14 {strides = array<i32>} : memref<18x18x8xf32, #tpu.memory_space<vmem>>, vector<18x1x8xf32>,
    %c0_29 = arith.constant 0 : index
    %c0_30 = arith.constant 0 : index
    %c0_31 = arith.constant 0 : index
    %c0_32 = arith.constant 0 : index
    %16 = vector.load %arg1[%c0_29, %c0_30, %c0_31, %c0_32] : memref<1x16x16x4xbf16, #tpu.memory_space<vmem>>, vector<1x16x16x4xbf16>
    %17 = vector.shape_cast %16 : vector<1x16x16x4xbf16> to vector<16x16x4xbf16>
    %18 = arith.extf %17 : vector<16x16x4xbf16> to vector<16x16x4xf32>
    %c1 = arith.constant 1 : index
    %c1_33 = arith.constant 1 : index
    %c0_34 = arith.constant 0 : index
    %19 = vector.load %arg9[%c1, %c1_33, %c0_34] : memref<18x18x4xf32, #tpu.memory_space<vmem>>, vector<16x16x4xf32>
    tpu.vector_store %arg9[%c1, %c1_33, %c0_34], %18 {strides = array<i32>} : memref<18x18x4xf32, #tpu.memory_space<vmem>>, vector<16x16x4xf32>,
    %c0_35 = arith.constant 0 : index
    %c0_36 = arith.constant 0 : index
    %c0_37 = arith.constant 0 : index
    %20 = vector.load %arg9[%c0_35, %c0_36, %c0_37] : memref<18x18x4xf32, #tpu.memory_space<vmem>>, vector<16x16x4xf32>
    %c0_38 = arith.constant 0 : index
    %c1_39 = arith.constant 1 : index
    %c0_40 = arith.constant 0 : index
    %21 = vector.load %arg9[%c0_38, %c1_39, %c0_40] : memref<18x18x4xf32, #tpu.memory_space<vmem>>, vector<16x16x4xf32>
    %c0_41 = arith.constant 0 : index
    %c2 = arith.constant 2 : index
    %c0_42 = arith.constant 0 : index
    %22 = vector.load %arg9[%c0_41, %c2, %c0_42] : memref<18x18x4xf32, #tpu.memory_space<vmem>>, vector<16x16x4xf32>
    %c1_43 = arith.constant 1 : index
    %c0_44 = arith.constant 0 : index
    %c0_45 = arith.constant 0 : index
    %23 = vector.load %arg9[%c1_43, %c0_44, %c0_45] : memref<18x18x4xf32, #tpu.memory_space<vmem>>, vector<16x16x4xf32>
    %c1_46 = arith.constant 1 : index
    %c1_47 = arith.constant 1 : index
    %c0_48 = arith.constant 0 : index
    %24 = vector.load %arg9[%c1_46, %c1_47, %c0_48] : memref<18x18x4xf32, #tpu.memory_space<vmem>>, vector<16x16x4xf32>
    %c1_49 = arith.constant 1 : index
    %c2_50 = arith.constant 2 : index
    %c0_51 = arith.constant 0 : index
    %25 = vector.load %arg9[%c1_49, %c2_50, %c0_51] : memref<18x18x4xf32, #tpu.memory_space<vmem>>, vector<16x16x4xf32>
    %c2_52 = arith.constant 2 : index
    %c0_53 = arith.constant 0 : index
    %c0_54 = arith.constant 0 : index
    %26 = vector.load %arg9[%c2_52, %c0_53, %c0_54] : memref<18x18x4xf32, #tpu.memory_space<vmem>>, vector<16x16x4xf32>
    %c2_55 = arith.constant 2 : index
    %c1_56 = arith.constant 1 : index
    %c0_57 = arith.constant 0 : index
    %27 = vector.load %arg9[%c2_55, %c1_56, %c0_57] : memref<18x18x4xf32, #tpu.memory_space<vmem>>, vector<16x16x4xf32>
    %c2_58 = arith.constant 2 : index
    %c2_59 = arith.constant 2 : index
    %c0_60 = arith.constant 0 : index
    %28 = vector.load %arg9[%c2_58, %c2_59, %c0_60] : memref<18x18x4xf32, #tpu.memory_space<vmem>>, vector<16x16x4xf32>
    %29 = tpu.concatenate %20, %21, %22, %23, %24, %25, %26, %27, %28 in 2 : vector<16x16x4xf32>, vector<16x16x4xf32>, vector<16x16x4xf32>, vector<16x16x4xf32>, vector<16x16x4xf32>, vector<16x16x4xf32>, vector<16x16x4xf32>, vector<16x16x4xf32>, vector<16x16x4xf32> -> vector<16x16x36xf32>
    %30 = vector.shape_cast %29 : vector<16x16x36xf32> to vector<256x36xf32>
    %31 = arith.truncf %30 : vector<256x36xf32> to vector<256x36xbf16>
    %c0_61 = arith.constant 0 : index
    %c0_62 = arith.constant 0 : index
    %32 = vector.load %arg2[%c0_61, %c0_62] : memref<36x8xbf16, #tpu.memory_space<vmem>>, vector<36x8xbf16>
    %cst_63 = arith.constant dense<0.000000e+00> : vector<256x8xf32>
    %33 = tpu.matmul %31, %32, %cst_63 {dimension_numbers = #tpu.dot_dimension_numbers<[1], [0], [0], [1], [0, 0, 1, 1], [], []>} : vector<256x36xbf16>, vector<36x8xbf16>, vector<256x8xf32> -> vector<256x8xf32>
    %c0_64 = arith.constant 0 : index
    %c0_65 = arith.constant 0 : index
    %34 = vector.load %arg3[%c0_64, %c0_65] : memref<1x8xf32, #tpu.memory_space<vmem>>, vector<1x8xf32>
    %35 = vector.broadcast %34 : vector<1x8xf32> to vector<256x8xf32>
    %36 = arith.addf %33, %35 : vector<256x8xf32>
    %cst_66 = arith.constant 0.000000e+00 : f32
    %37 = vector.broadcast %cst_66 : f32 to vector<256x8xf32>
    %38 = arith.cmpf ogt, %36, %37 : vector<256x8xf32>
    %cst_67 = arith.constant 2.000000e-01 : f32
    %39 = vector.broadcast %cst_67 : f32 to vector<256x8xf32>
    %40 = arith.mulf %39, %36 : vector<256x8xf32>
    %41 = arith.select %38, %36, %40 : vector<256x8xi1>, vector<256x8xf32>
    %42 = vector.shape_cast %41 : vector<256x8xf32> to vector<16x16x8xf32>
    %c1_68 = arith.constant 1 : index
    %c1_69 = arith.constant 1 : index
    %c0_70 = arith.constant 0 : index
    %43 = vector.load %arg10[%c1_68, %c1_69, %c0_70] : memref<18x18x8xf32, #tpu.memory_space<vmem>>, vector<16x16x8xf32>
    tpu.vector_store %arg10[%c1_68, %c1_69, %c0_70], %42 {strides = array<i32>} : memref<18x18x8xf32, #tpu.memory_space<vmem>>, vector<16x16x8xf32>,
    %c0_71 = arith.constant 0 : index
    %c0_72 = arith.constant 0 : index
    %c0_73 = arith.constant 0 : index
    %44 = vector.load %arg10[%c0_71, %c0_72, %c0_73] : memref<18x18x8xf32, #tpu.memory_space<vmem>>, vector<16x16x8xf32>
    %c0_74 = arith.constant 0 : index
    %c1_75 = arith.constant 1 : index
    %c0_76 = arith.constant 0 : index
    %45 = vector.load %arg10[%c0_74, %c1_75, %c0_76] : memref<18x18x8xf32, #tpu.memory_space<vmem>>, vector<16x16x8xf32>
    %c0_77 = arith.constant 0 : index
    %c2_78 = arith.constant 2 : index
    %c0_79 = arith.constant 0 : index
    %46 = vector.load %arg10[%c0_77, %c2_78, %c0_79] : memref<18x18x8xf32, #tpu.memory_space<vmem>>, vector<16x16x8xf32>
    %c1_80 = arith.constant 1 : index
    %c0_81 = arith.constant 0 : index
    %c0_82 = arith.constant 0 : index
    %47 = vector.load %arg10[%c1_80, %c0_81, %c0_82] : memref<18x18x8xf32, #tpu.memory_space<vmem>>, vector<16x16x8xf32>
    %c1_83 = arith.constant 1 : index
    %c1_84 = arith.constant 1 : index
    %c0_85 = arith.constant 0 : index
    %48 = vector.load %arg10[%c1_83, %c1_84, %c0_85] : memref<18x18x8xf32, #tpu.memory_space<vmem>>, vector<16x16x8xf32>
    %c1_86 = arith.constant 1 : index
    %c2_87 = arith.constant 2 : index
    %c0_88 = arith.constant 0 : index
    %49 = vector.load %arg10[%c1_86, %c2_87, %c0_88] : memref<18x18x8xf32, #tpu.memory_space<vmem>>, vector<16x16x8xf32>
    %c2_89 = arith.constant 2 : index
    %c0_90 = arith.constant 0 : index
    %c0_91 = arith.constant 0 : index
    %50 = vector.load %arg10[%c2_89, %c0_90, %c0_91] : memref<18x18x8xf32, #tpu.memory_space<vmem>>, vector<16x16x8xf32>
    %c2_92 = arith.constant 2 : index
    %c1_93 = arith.constant 1 : index
    %c0_94 = arith.constant 0 : index
    %51 = vector.load %arg10[%c2_92, %c1_93, %c0_94] : memref<18x18x8xf32, #tpu.memory_space<vmem>>, vector<16x16x8xf32>
    %c2_95 = arith.constant 2 : index
    %c2_96 = arith.constant 2 : index
    %c0_97 = arith.constant 0 : index
    %52 = vector.load %arg10[%c2_95, %c2_96, %c0_97] : memref<18x18x8xf32, #tpu.memory_space<vmem>>, vector<16x16x8xf32>
    %53 = tpu.concatenate %44, %45, %46, %47, %48, %49, %50, %51, %52 in 2 : vector<16x16x8xf32>, vector<16x16x8xf32>, vector<16x16x8xf32>, vector<16x16x8xf32>, vector<16x16x8xf32>, vector<16x16x8xf32>, vector<16x16x8xf32>, vector<16x16x8xf32>, vector<16x16x8xf32> -> vector<16x16x72xf32>
    %54 = vector.shape_cast %53 : vector<16x16x72xf32> to vector<256x72xf32>
    %55 = arith.truncf %54 : vector<256x72xf32> to vector<256x72xbf16>
    %c0_98 = arith.constant 0 : index
    %c0_99 = arith.constant 0 : index
    %56 = vector.load %arg4[%c0_98, %c0_99] : memref<72x8xbf16, #tpu.memory_space<vmem>>, vector<72x8xbf16>
    %cst_100 = arith.constant dense<0.000000e+00> : vector<256x8xf32>
    %57 = tpu.matmul %55, %56, %cst_100 {dimension_numbers = #tpu.dot_dimension_numbers<[1], [0], [0], [1], [0, 0, 1, 1], [], []>} : vector<256x72xbf16>, vector<72x8xbf16>, vector<256x8xf32> -> vector<256x8xf32>
    %c0_101 = arith.constant 0 : index
    %c0_102 = arith.constant 0 : index
    %58 = vector.load %arg5[%c0_101, %c0_102] : memref<1x8xf32, #tpu.memory_space<vmem>>, vector<1x8xf32>
    %59 = vector.broadcast %58 : vector<1x8xf32> to vector<256x8xf32>
    %60 = arith.addf %57, %59 : vector<256x8xf32>
    %cst_103 = arith.constant 0.000000e+00 : f32
    %61 = vector.broadcast %cst_103 : f32 to vector<256x8xf32>
    %62 = arith.cmpf ogt, %60, %61 : vector<256x8xf32>
    %cst_104 = arith.constant 2.000000e-01 : f32
    %63 = vector.broadcast %cst_104 : f32 to vector<256x8xf32>
    %64 = arith.mulf %63, %60 : vector<256x8xf32>
    %65 = arith.select %62, %60, %64 : vector<256x8xi1>, vector<256x8xf32>
    %66 = vector.shape_cast %65 : vector<256x8xf32> to vector<16x16x8xf32>
    %c1_105 = arith.constant 1 : index
    %c1_106 = arith.constant 1 : index
    %c0_107 = arith.constant 0 : index
    %67 = vector.load %arg11[%c1_105, %c1_106, %c0_107] : memref<18x18x8xf32, #tpu.memory_space<vmem>>, vector<16x16x8xf32>
    tpu.vector_store %arg11[%c1_105, %c1_106, %c0_107], %66 {strides = array<i32>} : memref<18x18x8xf32, #tpu.memory_space<vmem>>, vector<16x16x8xf32>,
    %68 = vector.extract_strided_slice %66 {offsets = [1, 0, 0], sizes = [1, 16, 8], strides = [1, 1, 1]} : vector<16x16x8xf32> to vector<1x16x8xf32>
    %c0_108 = arith.constant 0 : index
    %c1_109 = arith.constant 1 : index
    %c0_110 = arith.constant 0 : index
    %69 = vector.load %arg11[%c0_108, %c1_109, %c0_110] : memref<18x18x8xf32, #tpu.memory_space<vmem>>, vector<1x16x8xf32>
    tpu.vector_store %arg11[%c0_108, %c1_109, %c0_110], %68 {strides = array<i32>} : memref<18x18x8xf32, #tpu.memory_space<vmem>>, vector<1x16x8xf32>,
    %70 = vector.extract_strided_slice %66 {offsets = [14, 0, 0], sizes = [1, 16, 8], strides = [1, 1, 1]} : vector<16x16x8xf32> to vector<1x16x8xf32>
    %c17_111 = arith.constant 17 : index
    %c1_112 = arith.constant 1 : index
    %c0_113 = arith.constant 0 : index
    %71 = vector.load %arg11[%c17_111, %c1_112, %c0_113] : memref<18x18x8xf32, #tpu.memory_space<vmem>>, vector<1x16x8xf32>
    tpu.vector_store %arg11[%c17_111, %c1_112, %c0_113], %70 {strides = array<i32>} : memref<18x18x8xf32, #tpu.memory_space<vmem>>, vector<1x16x8xf32>,
    %c0_114 = arith.constant 0 : index
    %c2_115 = arith.constant 2 : index
    %c0_116 = arith.constant 0 : index
    %72 = vector.load %arg11[%c0_114, %c2_115, %c0_116] : memref<18x18x8xf32, #tpu.memory_space<vmem>>, vector<18x1x8xf32>
    %c0_117 = arith.constant 0 : index
    %c0_118 = arith.constant 0 : index
    %c0_119 = arith.constant 0 : index
    %73 = vector.load %arg11[%c0_117, %c0_118, %c0_119] : memref<18x18x8xf32, #tpu.memory_space<vmem>>, vector<18x1x8xf32>
    tpu.vector_store %arg11[%c0_117, %c0_118, %c0_119], %72 {strides = array<i32>} : memref<18x18x8xf32, #tpu.memory_space<vmem>>, vector<18x1x8xf32>,
    %c0_120 = arith.constant 0 : index
    %c15 = arith.constant 15 : index
    %c0_121 = arith.constant 0 : index
    %74 = vector.load %arg11[%c0_120, %c15, %c0_121] : memref<18x18x8xf32, #tpu.memory_space<vmem>>, vector<18x1x8xf32>
    %c0_122 = arith.constant 0 : index
    %c17_123 = arith.constant 17 : index
    %c0_124 = arith.constant 0 : index
    %75 = vector.load %arg11[%c0_122, %c17_123, %c0_124] : memref<18x18x8xf32, #tpu.memory_space<vmem>>, vector<18x1x8xf32>
    tpu.vector_store %arg11[%c0_122, %c17_123, %c0_124], %74 {strides = array<i32>} : memref<18x18x8xf32, #tpu.memory_space<vmem>>, vector<18x1x8xf32>,
    %cst_125 = arith.constant 0.000000e+00 : f32
    %76 = vector.broadcast %cst_125 : f32 to vector<16x16x8xf32>
    %c0_126 = arith.constant 0 : index
    %c0_127 = arith.constant 0 : index
    %c0_128 = arith.constant 0 : index
    %77 = vector.load %arg11[%c0_126, %c0_127, %c0_128] : memref<18x18x8xf32, #tpu.memory_space<vmem>>, vector<16x16x8xf32>
    %cst_129 = arith.constant 6.250000e-02 : f32
    %78 = vector.broadcast %cst_129 : f32 to vector<16x16x8xf32>
    %79 = arith.mulf %78, %77 : vector<16x16x8xf32>
    %80 = arith.addf %76, %79 : vector<16x16x8xf32>
    %c0_130 = arith.constant 0 : index
    %c1_131 = arith.constant 1 : index
    %c0_132 = arith.constant 0 : index
    %81 = vector.load %arg11[%c0_130, %c1_131, %c0_132] : memref<18x18x8xf32, #tpu.memory_space<vmem>>, vector<16x16x8xf32>
    %cst_133 = arith.constant 1.250000e-01 : f32
    %82 = vector.broadcast %cst_133 : f32 to vector<16x16x8xf32>
    %83 = arith.mulf %82, %81 : vector<16x16x8xf32>
    %84 = arith.addf %80, %83 : vector<16x16x8xf32>
    %c0_134 = arith.constant 0 : index
    %c2_135 = arith.constant 2 : index
    %c0_136 = arith.constant 0 : index
    %85 = vector.load %arg11[%c0_134, %c2_135, %c0_136] : memref<18x18x8xf32, #tpu.memory_space<vmem>>, vector<16x16x8xf32>
    %cst_137 = arith.constant 6.250000e-02 : f32
    %86 = vector.broadcast %cst_137 : f32 to vector<16x16x8xf32>
    %87 = arith.mulf %86, %85 : vector<16x16x8xf32>
    %88 = arith.addf %84, %87 : vector<16x16x8xf32>
    %c1_138 = arith.constant 1 : index
    %c0_139 = arith.constant 0 : index
    %c0_140 = arith.constant 0 : index
    %89 = vector.load %arg11[%c1_138, %c0_139, %c0_140] : memref<18x18x8xf32, #tpu.memory_space<vmem>>, vector<16x16x8xf32>
    %cst_141 = arith.constant 1.250000e-01 : f32
    %90 = vector.broadcast %cst_141 : f32 to vector<16x16x8xf32>
    %91 = arith.mulf %90, %89 : vector<16x16x8xf32>
    %92 = arith.addf %88, %91 : vector<16x16x8xf32>
    %c1_142 = arith.constant 1 : index
    %c1_143 = arith.constant 1 : index
    %c0_144 = arith.constant 0 : index
    %93 = vector.load %arg11[%c1_142, %c1_143, %c0_144] : memref<18x18x8xf32, #tpu.memory_space<vmem>>, vector<16x16x8xf32>
    %cst_145 = arith.constant 2.500000e-01 : f32
    %94 = vector.broadcast %cst_145 : f32 to vector<16x16x8xf32>
    %95 = arith.mulf %94, %93 : vector<16x16x8xf32>
    %96 = arith.addf %92, %95 : vector<16x16x8xf32>
    %c1_146 = arith.constant 1 : index
    %c2_147 = arith.constant 2 : index
    %c0_148 = arith.constant 0 : index
    %97 = vector.load %arg11[%c1_146, %c2_147, %c0_148] : memref<18x18x8xf32, #tpu.memory_space<vmem>>, vector<16x16x8xf32>
    %cst_149 = arith.constant 1.250000e-01 : f32
    %98 = vector.broadcast %cst_149 : f32 to vector<16x16x8xf32>
    %99 = arith.mulf %98, %97 : vector<16x16x8xf32>
    %100 = arith.addf %96, %99 : vector<16x16x8xf32>
    %c2_150 = arith.constant 2 : index
    %c0_151 = arith.constant 0 : index
    %c0_152 = arith.constant 0 : index
    %101 = vector.load %arg11[%c2_150, %c0_151, %c0_152] : memref<18x18x8xf32, #tpu.memory_space<vmem>>, vector<16x16x8xf32>
    %cst_153 = arith.constant 6.250000e-02 : f32
    %102 = vector.broadcast %cst_153 : f32 to vector<16x16x8xf32>
    %103 = arith.mulf %102, %101 : vector<16x16x8xf32>
    %104 = arith.addf %100, %103 : vector<16x16x8xf32>
    %c2_154 = arith.constant 2 : index
    %c1_155 = arith.constant 1 : index
    %c0_156 = arith.constant 0 : index
    %105 = vector.load %arg11[%c2_154, %c1_155, %c0_156] : memref<18x18x8xf32, #tpu.memory_space<vmem>>, vector<16x16x8xf32>
    %cst_157 = arith.constant 1.250000e-01 : f32
    %106 = vector.broadcast %cst_157 : f32 to vector<16x16x8xf32>
    %107 = arith.mulf %106, %105 : vector<16x16x8xf32>
    %108 = arith.addf %104, %107 : vector<16x16x8xf32>
    %c2_158 = arith.constant 2 : index
    %c2_159 = arith.constant 2 : index
    %c0_160 = arith.constant 0 : index
    %109 = vector.load %arg11[%c2_158, %c2_159, %c0_160] : memref<18x18x8xf32, #tpu.memory_space<vmem>>, vector<16x16x8xf32>
    %cst_161 = arith.constant 6.250000e-02 : f32
    %110 = vector.broadcast %cst_161 : f32 to vector<16x16x8xf32>
    %111 = arith.mulf %110, %109 : vector<16x16x8xf32>
    %112 = arith.addf %108, %111 : vector<16x16x8xf32>
    %c1_162 = arith.constant 1 : index
    %c1_163 = arith.constant 1 : index
    %c0_164 = arith.constant 0 : index
    %113 = vector.load %arg10[%c1_162, %c1_163, %c0_164] : memref<18x18x8xf32, #tpu.memory_space<vmem>>, vector<16x16x8xf32>
    tpu.vector_store %arg10[%c1_162, %c1_163, %c0_164], %112 {strides = array<i32>} : memref<18x18x8xf32, #tpu.memory_space<vmem>>, vector<16x16x8xf32>,
    %c0_165 = arith.constant 0 : index
    %c0_166 = arith.constant 0 : index
    %c0_167 = arith.constant 0 : index
    %114 = vector.load %arg10[%c0_165, %c0_166, %c0_167] : memref<18x18x8xf32, #tpu.memory_space<vmem>>, vector<16x16x8xf32>
    %115 = vector.shape_cast %114 : vector<16x16x8xf32> to vector<8x2x16x8xf32>
    %116 = vector.extract_strided_slice %115 {offsets = [0, 0, 0, 0], sizes = [8, 1, 16, 8], strides = [1, 1, 1, 1]} : vector<8x2x16x8xf32> to vector<8x1x16x8xf32>
    %117 = vector.shape_cast %116 : vector<8x1x16x8xf32> to vector<8x16x8xf32>
    %c0_168 = arith.constant 0 : index
    %c1_169 = arith.constant 1 : index
    %c0_170 = arith.constant 0 : index
    %118 = vector.load %arg10[%c0_168, %c1_169, %c0_170] : memref<18x18x8xf32, #tpu.memory_space<vmem>>, vector<16x16x8xf32>
    %119 = vector.shape_cast %118 : vector<16x16x8xf32> to vector<8x2x16x8xf32>
    %120 = vector.extract_strided_slice %119 {offsets = [0, 0, 0, 0], sizes = [8, 1, 16, 8], strides = [1, 1, 1, 1]} : vector<8x2x16x8xf32> to vector<8x1x16x8xf32>
    %121 = vector.shape_cast %120 : vector<8x1x16x8xf32> to vector<8x16x8xf32>
    %c0_171 = arith.constant 0 : index
    %c2_172 = arith.constant 2 : index
    %c0_173 = arith.constant 0 : index
    %122 = vector.load %arg10[%c0_171, %c2_172, %c0_173] : memref<18x18x8xf32, #tpu.memory_space<vmem>>, vector<16x16x8xf32>
    %123 = vector.shape_cast %122 : vector<16x16x8xf32> to vector<8x2x16x8xf32>
    %124 = vector.extract_strided_slice %123 {offsets = [0, 0, 0, 0], sizes = [8, 1, 16, 8], strides = [1, 1, 1, 1]} : vector<8x2x16x8xf32> to vector<8x1x16x8xf32>
    %125 = vector.shape_cast %124 : vector<8x1x16x8xf32> to vector<8x16x8xf32>
    %c1_174 = arith.constant 1 : index
    %c0_175 = arith.constant 0 : index
    %c0_176 = arith.constant 0 : index
    %126 = vector.load %arg10[%c1_174, %c0_175, %c0_176] : memref<18x18x8xf32, #tpu.memory_space<vmem>>, vector<16x16x8xf32>
    %127 = vector.shape_cast %126 : vector<16x16x8xf32> to vector<8x2x16x8xf32>
    %128 = vector.extract_strided_slice %127 {offsets = [0, 0, 0, 0], sizes = [8, 1, 16, 8], strides = [1, 1, 1, 1]} : vector<8x2x16x8xf32> to vector<8x1x16x8xf32>
    %129 = vector.shape_cast %128 : vector<8x1x16x8xf32> to vector<8x16x8xf32>
    %c1_177 = arith.constant 1 : index
    %c1_178 = arith.constant 1 : index
    %c0_179 = arith.constant 0 : index
    %130 = vector.load %arg10[%c1_177, %c1_178, %c0_179] : memref<18x18x8xf32, #tpu.memory_space<vmem>>, vector<16x16x8xf32>
    %131 = vector.shape_cast %130 : vector<16x16x8xf32> to vector<8x2x16x8xf32>
    %132 = vector.extract_strided_slice %131 {offsets = [0, 0, 0, 0], sizes = [8, 1, 16, 8], strides = [1, 1, 1, 1]} : vector<8x2x16x8xf32> to vector<8x1x16x8xf32>
    %133 = vector.shape_cast %132 : vector<8x1x16x8xf32> to vector<8x16x8xf32>
    %c1_180 = arith.constant 1 : index
    %c2_181 = arith.constant 2 : index
    %c0_182 = arith.constant 0 : index
    %134 = vector.load %arg10[%c1_180, %c2_181, %c0_182] : memref<18x18x8xf32, #tpu.memory_space<vmem>>, vector<16x16x8xf32>
    %135 = vector.shape_cast %134 : vector<16x16x8xf32> to vector<8x2x16x8xf32>
    %136 = vector.extract_strided_slice %135 {offsets = [0, 0, 0, 0], sizes = [8, 1, 16, 8], strides = [1, 1, 1, 1]} : vector<8x2x16x8xf32> to vector<8x1x16x8xf32>
    %137 = vector.shape_cast %136 : vector<8x1x16x8xf32> to vector<8x16x8xf32>
    %c2_183 = arith.constant 2 : index
    %c0_184 = arith.constant 0 : index
    %c0_185 = arith.constant 0 : index
    %138 = vector.load %arg10[%c2_183, %c0_184, %c0_185] : memref<18x18x8xf32, #tpu.memory_space<vmem>>, vector<16x16x8xf32>
    %139 = vector.shape_cast %138 : vector<16x16x8xf32> to vector<8x2x16x8xf32>
    %140 = vector.extract_strided_slice %139 {offsets = [0, 0, 0, 0], sizes = [8, 1, 16, 8], strides = [1, 1, 1, 1]} : vector<8x2x16x8xf32> to vector<8x1x16x8xf32>
    %141 = vector.shape_cast %140 : vector<8x1x16x8xf32> to vector<8x16x8xf32>
    %c2_186 = arith.constant 2 : index
    %c1_187 = arith.constant 1 : index
    %c0_188 = arith.constant 0 : index
    %142 = vector.load %arg10[%c2_186, %c1_187, %c0_188] : memref<18x18x8xf32, #tpu.memory_space<vmem>>, vector<16x16x8xf32>
    %143 = vector.shape_cast %142 : vector<16x16x8xf32> to vector<8x2x16x8xf32>
    %144 = vector.extract_strided_slice %143 {offsets = [0, 0, 0, 0], sizes = [8, 1, 16, 8], strides = [1, 1, 1, 1]} : vector<8x2x16x8xf32> to vector<8x1x16x8xf32>
    %145 = vector.shape_cast %144 : vector<8x1x16x8xf32> to vector<8x16x8xf32>
    %c2_189 = arith.constant 2 : index
    %c2_190 = arith.constant 2 : index
    %c0_191 = arith.constant 0 : index
    %146 = vector.load %arg10[%c2_189, %c2_190, %c0_191] : memref<18x18x8xf32, #tpu.memory_space<vmem>>, vector<16x16x8xf32>
    %147 = vector.shape_cast %146 : vector<16x16x8xf32> to vector<8x2x16x8xf32>
    %148 = vector.extract_strided_slice %147 {offsets = [0, 0, 0, 0], sizes = [8, 1, 16, 8], strides = [1, 1, 1, 1]} : vector<8x2x16x8xf32> to vector<8x1x16x8xf32>
    %149 = vector.shape_cast %148 : vector<8x1x16x8xf32> to vector<8x16x8xf32>
    %c1_192 = arith.constant 1 : index
    %c1_193 = arith.constant 1 : index
    %c0_194 = arith.constant 0 : index
    %150 = vector.load %arg9[%c1_192, %c1_193, %c0_194] : memref<18x18x4xf32, #tpu.memory_space<vmem>>, vector<16x16x4xf32>
    %151 = vector.shape_cast %150 : vector<16x16x4xf32> to vector<8x2x16x4xf32>
    %152 = vector.extract_strided_slice %151 {offsets = [0, 0, 0, 0], sizes = [8, 1, 16, 4], strides = [1, 1, 1, 1]} : vector<8x2x16x4xf32> to vector<8x1x16x4xf32>
    %153 = vector.shape_cast %152 : vector<8x1x16x4xf32> to vector<8x16x4xf32>
    %154 = tpu.concatenate %117, %121, %125, %129, %133, %137, %141, %145, %149, %153 in 2 : vector<8x16x8xf32>, vector<8x16x8xf32>, vector<8x16x8xf32>, vector<8x16x8xf32>, vector<8x16x8xf32>, vector<8x16x8xf32>, vector<8x16x8xf32>, vector<8x16x8xf32>, vector<8x16x8xf32>, vector<8x16x4xf32> -> vector<8x16x76xf32>
    %155 = vector.shape_cast %154 : vector<8x16x76xf32> to vector<128x76xf32>
    %156 = arith.truncf %155 : vector<128x76xf32> to vector<128x76xbf16>
    %c0_195 = arith.constant 0 : index
    %c0_196 = arith.constant 0 : index
    %157 = vector.load %arg6[%c0_195, %c0_196] : memref<76x8xbf16, #tpu.memory_space<vmem>>, vector<76x8xbf16>
    %cst_197 = arith.constant dense<0.000000e+00> : vector<128x8xf32>
    %158 = tpu.matmul %156, %157, %cst_197 {dimension_numbers = #tpu.dot_dimension_numbers<[1], [0], [0], [1], [0, 0, 1, 1], [], []>} : vector<128x76xbf16>, vector<76x8xbf16>, vector<128x8xf32> -> vector<128x8xf32>
    %c0_198 = arith.constant 0 : index
    %c0_199 = arith.constant 0 : index
    %159 = vector.load %arg7[%c0_198, %c0_199] : memref<1x8xf32, #tpu.memory_space<vmem>>, vector<1x8xf32>
    %160 = vector.broadcast %159 : vector<1x8xf32> to vector<128x8xf32>
    %161 = arith.addf %158, %160 : vector<128x8xf32>
    %cst_200 = arith.constant 0.707106769 : f32
    %162 = vector.broadcast %cst_200 : f32 to vector<128x8xf32>
    %163 = arith.mulf %161, %162 : vector<128x8xf32>
    %164 = vector.shape_cast %163 : vector<128x8xf32> to vector<8x16x8xf32>
    %165 = vector.extract_strided_slice %164 {offsets = [0, 0, 0], sizes = [8, 1, 8], strides = [1, 1, 1]} : vector<8x16x8xf32> to vector<8x1x8xf32>
    %166 = vector.extract_strided_slice %164 {offsets = [0, 2, 0], sizes = [8, 1, 8], strides = [1, 1, 1]} : vector<8x16x8xf32> to vector<8x1x8xf32>
    %167 = vector.extract_strided_slice %164 {offsets = [0, 4, 0], sizes = [8, 1, 8], strides = [1, 1, 1]} : vector<8x16x8xf32> to vector<8x1x8xf32>
    %168 = vector.extract_strided_slice %164 {offsets = [0, 6, 0], sizes = [8, 1, 8], strides = [1, 1, 1]} : vector<8x16x8xf32> to vector<8x1x8xf32>
    %169 = vector.extract_strided_slice %164 {offsets = [0, 8, 0], sizes = [8, 1, 8], strides = [1, 1, 1]} : vector<8x16x8xf32> to vector<8x1x8xf32>
    %170 = vector.extract_strided_slice %164 {offsets = [0, 10, 0], sizes = [8, 1, 8], strides = [1, 1, 1]} : vector<8x16x8xf32> to vector<8x1x8xf32>
    %171 = vector.extract_strided_slice %164 {offsets = [0, 12, 0], sizes = [8, 1, 8], strides = [1, 1, 1]} : vector<8x16x8xf32> to vector<8x1x8xf32>
    %172 = vector.extract_strided_slice %164 {offsets = [0, 14, 0], sizes = [8, 1, 8], strides = [1, 1, 1]} : vector<8x16x8xf32> to vector<8x1x8xf32>
    %173 = tpu.concatenate %165, %166, %167, %168, %169, %170, %171, %172 in 2 : vector<8x1x8xf32>, vector<8x1x8xf32>, vector<8x1x8xf32>, vector<8x1x8xf32>, vector<8x1x8xf32>, vector<8x1x8xf32>, vector<8x1x8xf32>, vector<8x1x8xf32> -> vector<8x1x64xf32>
    %174 = vector.shape_cast %173 : vector<8x1x64xf32> to vector<8x64xf32>
    %c0_201 = arith.constant 0 : index
    %c0_202 = arith.constant 0 : index
    %c0_203 = arith.constant 0 : index
    %175 = vector.load %arg8[%c0_201, %c0_202, %c0_203] : memref<1x8x64xf32, #tpu.memory_space<vmem>>, vector<1x8x64xf32>
    %176 = vector.shape_cast %175 : vector<1x8x64xf32> to vector<8x64xf32>
    %177 = vector.shape_cast %174 : vector<8x64xf32> to vector<1x8x64xf32>
    tpu.vector_store %arg8[%c0_201, %c0_202, %c0_203], %177 {strides = array<i32>} : memref<1x8x64xf32, #tpu.memory_space<vmem>>, vector<1x8x64xf32>,
    return
  }
  func.func @transform_0(%arg0: i32) -> (i32, i32, i32, i32) {
    %c0_i32 = arith.constant 0 : i32
    %c0_i32_0 = arith.constant 0 : i32
    %c0_i32_1 = arith.constant 0 : i32
    %c0_i32_2 = arith.constant 0 : i32
    return %arg0, %c0_i32, %c0_i32_0, %c0_i32_1 : i32, i32, i32, i32
  }
  func.func @transform_1(%arg0: i32) -> (i32, i32) {
    %c0_i32 = arith.constant 0 : i32
    %c0_i32_0 = arith.constant 0 : i32
    %c0_i32_1 = arith.constant 0 : i32
    return %c0_i32, %c0_i32_0 : i32, i32
  }
  func.func @transform_2(%arg0: i32) -> (i32, i32) {
    %c0_i32 = arith.constant 0 : i32
    %c0_i32_0 = arith.constant 0 : i32
    %c0_i32_1 = arith.constant 0 : i32
    return %c0_i32, %c0_i32_0 : i32, i32
  }
  func.func @transform_3(%arg0: i32) -> (i32, i32) {
    %c0_i32 = arith.constant 0 : i32
    %c0_i32_0 = arith.constant 0 : i32
    %c0_i32_1 = arith.constant 0 : i32
    return %c0_i32, %c0_i32_0 : i32, i32
  }
  func.func @transform_4(%arg0: i32) -> (i32, i32) {
    %c0_i32 = arith.constant 0 : i32
    %c0_i32_0 = arith.constant 0 : i32
    %c0_i32_1 = arith.constant 0 : i32
    return %c0_i32, %c0_i32_0 : i32, i32
  }
  func.func @transform_5(%arg0: i32) -> (i32, i32) {
    %c0_i32 = arith.constant 0 : i32
    %c0_i32_0 = arith.constant 0 : i32
    %c0_i32_1 = arith.constant 0 : i32
    return %c0_i32, %c0_i32_0 : i32, i32
  }
  func.func @transform_6(%arg0: i32) -> (i32, i32) {
    %c0_i32 = arith.constant 0 : i32
    %c0_i32_0 = arith.constant 0 : i32
    %c0_i32_1 = arith.constant 0 : i32
    return %c0_i32, %c0_i32_0 : i32, i32
  }
  func.func @transform_7(%arg0: i32) -> (i32, i32, i32) {
    %c0_i32 = arith.constant 0 : i32
    %c0_i32_0 = arith.constant 0 : i32
    %c0_i32_1 = arith.constant 0 : i32
    return %arg0, %c0_i32, %c0_i32_0 : i32, i32, i32
  }
}

</mosaic_0001>

<bundles_post_ra>
// kernel: tpu_custom_call.1
= control target key start
LH: loop header
LB: loop body
LE: loop exit
PB: predicated region body
PF: predicated region fallthrough
CT: control target
= control target key end

     0   :  { %12 = vsyncpa [#allocation6], 0  ;;  %s12653_s0 = inlined_call_operand.vmem [shape: bf16[2,16,16,4], index: 0, kind: input, shape index: {}]   ;;  %s12654_s1 = inlined_call_operand.vmem [shape: bf16[36,8], index: 1, kind: input, shape index: {}]   ;;  %s12655_s2 = inlined_call_operand.vmem [shape: f32[1,8], index: 2, kind: input, shape index: {}]   ;;  %s12656_s3 = inlined_call_operand.vmem [shape: bf16[72,8], index: 3, kind: input, shape index: {}]   ;;  %s12657_s4 = inlined_call_operand.vmem [shape: f32[1,8], index: 4, kind: input, shape index: {}]   ;;  %s12658_s5 = inlined_call_operand.vmem [shape: bf16[76,8], index: 5, kind: input, shape index: {}]   ;;  %s12659_s6 = inlined_call_operand.vmem [shape: f32[1,8], index: 6, kind: input, shape index: {}]   ;;  %s12660_s7 = inlined_call_operand.hbm [shape: f32[2,8,64], index: 7, kind: output, shape index: {}]  }
   0x1   :  { %14 = vsyncpa [#allocation6 + $0x1], 0  ;;  %s8696_s24 = smov 0   ;;  %s8698_s25 = smov 0  }
   0x2   :  { %s8700_s26 = smov 0   ;;  %s8702_s27 = smov 0  }
   0x3 LB: > { %s8717_s28 = sadd.s32 4294967295, %s8640_s27   ;;  %s6646_s29 = sadd.s32 4294967294, %s8640_s27   ;;  %s8640_s27 = sphi %s8702_s27, %s13095_s27   ;;  %s8636_s26 = sphi %s8700_s26, %s13094_s26   ;;  %s8632_s25 = sphi %s8698_s25, %s13093_s25   ;;  %s8628_s24 = sphi %s8696_s24, %s13092_s24  }
   0x4   : > { %s8721_s30 = sadd.s32 1, %s8640_s27   ;;  %s179_s8 = sadd.s32 1, %s8636_s26 }
   0x5   : > { %s176_s9 = ssub.s32 %s8640_s27, %s8721_s30  ;;  %p189_p0 = scmp.ne.s32.totalorder %s8636_s26, %s8632_s25 }
   0x6   : > { %p177_p1 = scmp.eq.s32.totalorder %s176_s9, 0  ;;  %p190_p2 = scmp.eq.s32.totalorder %s8717_s28, 1 }
   0x7   : > { %p195_p3 = scmp.ne.s32.totalorder %s8632_s25, %s8628_s24  ;;  %p196_p4 = scmp.eq.s32.totalorder %s6646_s29, 1 }
   0x8   : > { %s8732_s10 = scalar_select %p177_p1, %s8636_s26, %s179_s8  }
   0x9   : > { %p8734_p5 = por %p190_p2, %p189_p0  ;;  %p8738_p6 = por %p196_p4, %p195_p3 }
   0xa   : > { %p6649_p7 = scmp.ge.s32.totalorder %s8640_s27, 1  ;;  %p240_p8 = scmp.lt.s32.totalorder %s8640_s27, 3 }
   0xc   : > { %p241_p9 = pnand %p6649_p7, %p240_p8 }
   0xe   : > { %244 = sbr.rel (%p241_p9) target bundleno = 2032 (0x7f0), region = 48 }
  0x13   : > { %vm278_vm0 = vcmask 31744   ;;  %vm281_vm1 = vcmask 25600   ;;  %v12661_v0 = vmov 0.0   ;;  %vm287_vm2 = vcmask 24576   ;;  %s8643_s13 = smov 4   ;;  %p272_p10 = scmp.lt.s32.totalorder %s8717_s28, 1 }
  0x14   : > { %279 = vst.msk [vmem:[#allocation2] sm:$0xff] %vm278_vm0, %v12661_v0  ;;  %s8644_s19 = smov 8   ;;  %s8645_s20 = smov 12   ;;  %vm324_vm3 = vcmask 64512   ;;  %vm1844_vm4 = vcmask 97280   ;;  %vm1877_vm5 = vcmask 130048  }
  0x15   : > { %280 = vst.msk [vmem:[#allocation2 + $0x8] sm:$0xff] %vm278_vm0, %v12661_v0  ;;  %s273_s14 = scalar_select %p272_p10, %s8717_s28, 1  ;;  %vm1910_vm6 = vcmask 162816   ;;  %vm1943_vm7 = vcmask 195584   ;;  %vm1976_vm8 = vcmask 228352   ;;  %vm2131_vm9 = vcmask 1041408  }
  0x16   : > { %282 = vst.msk [vmem:[#allocation2 + $0x10] sm:$0x3] %vm281_vm1, %v12661_v0  ;;  %s8646_s21 = smov 16   ;;  %s8647_s22 = smov 20   ;;  %vm2009_vm10 = vcmask 261120   ;;  %vm2082_vm11 = vcmask 293888  }
  0x17   : > { %286 = vst.msk [vmem:[#allocation2 + $0x1a8] sm:$0x3] %vm281_vm1, %v12661_v0  ;;  %s6741_s15 = sshll.u32 %s273_s14, 7  ;;  %s8648_s23 = smov 24   ;;  %vm333_vm12 = vcmask 57344   ;;  %vm327_vm14 = vcmask 58368  }
  0x18   : > { %306 = vst.msk [vmem:[#allocation2 + $0x11] sm:$0x1] %vm287_vm2, %v12661_v0  ;;  %s8812_s18 = scalar_lea.vmem %s12653_s0, %s6741_s15  ;;  %s8649_s29 = smov 28  }
  0x19   : > { %288 = vst.msk [vmem:[#allocation2] sm:$0x1] %vm287_vm2, %v12661_v0  ;;  %v6819_v4 = vld [vmem:[%s8812_s18 + $0x18] sm:$0xff]   ;;  %v6817_v6 = vld [vmem:[%s8812_s18 + $0x8] sm:$0xff]   ;;  %v6754_v8 = vld [vmem:[%s8812_s18] sm:$0xff]   ;;  %s8650_s8 = smov 32  }
  0x1a   : > { %284 = vst.msk [vmem:[#allocation2 + $0x198] sm:$0xff] %vm278_vm0, %v12661_v0  ;;  %v6767_v5 = vunpack.c.l.bf16 %v6819_v4  ;;  %v6768_v7 = vunpack.c.h.bf16 %v6819_v4  ;;  %v6759_v9 = vunpack.c.l.bf16 %v6817_v6  ;;  %v6760_v10 = vunpack.c.h.bf16 %v6817_v6  ;;  %v6820_v11 = vld [vmem:[%s8812_s18 + $0x20] sm:$0xff]   ;;  %v6818_v14 = vld [vmem:[%s8812_s18 + $0x10] sm:$0xff]   ;;  %v6821_v17 = vld [vmem:[%s8812_s18 + $0x28] sm:$0xff]   ;;  %s8653_s9 = smov 56   ;;  %s8655_s16 = smov 72  }
  0x1b   : > { %285 = vst.msk [vmem:[#allocation2 + $0x1a0] sm:$0xff] %vm278_vm0, %v12661_v0  ;;  %v6755_v12 = vunpack.c.l.bf16 %v6754_v8  ;;  %v6756_v13 = vunpack.c.h.bf16 %v6754_v8  ;;  %v6771_v15 = vunpack.c.l.bf16 %v6820_v11  ;;  %v6772_v16 = vunpack.c.h.bf16 %v6820_v11  ;;  %v6823_v20 = vld [vmem:[%s8812_s18 + $0x38] sm:$0xff]   ;;  %v6822_v25 = vld [vmem:[%s8812_s18 + $0x30] sm:$0xff]   ;;  %v6824_v30 = vld [vmem:[%s8812_s18 + $0x40] sm:$0xff]  }
  0x1c   : > { %v499_v1 = vld [vmem:[#allocation2 + $0x1] sm:$0xff]  ;;  %289 = vst.msk [vmem:[#allocation2 + $0x18] sm:$0x1] %vm287_vm2, %v12661_v0  ;;  %v6763_v18 = vunpack.c.l.bf16 %v6818_v14  ;;  %v6764_v19 = vunpack.c.h.bf16 %v6818_v14  ;;  %v6775_v22 = vunpack.c.l.bf16 %v6821_v17  ;;  %v6776_v24 = vunpack.c.h.bf16 %v6821_v17  ;;  %v6826_v36 = vld [vmem:[%s8812_s18 + $0x50] sm:$0xff]   ;;  %v6827_v48 = vld [vmem:[%s8812_s18 + $0x58] sm:$0xff]  }
  0x1d   : > { %v500_v2 = vld [vmem:[#allocation2 + $0x9] sm:$0xff]  ;;  %290 = vst.msk [vmem:[#allocation2 + $0x30] sm:$0x1] %vm287_vm2, %v12661_v0  ;;  %v6783_v27 = vunpack.c.l.bf16 %v6823_v20  ;;  %v6784_v29 = vunpack.c.h.bf16 %v6823_v20  ;;  %v6779_v32 = vunpack.c.l.bf16 %v6822_v25  ;;  %v6780_v35 = vunpack.c.h.bf16 %v6822_v25  ;;  %v6828_v60 = vld [vmem:[%s8812_s18 + $0x60] sm:$0xff]  }
  0x1e   : > { %v6893_v3 = vpack.i.bf16 %v500_v2, %v499_v1  ;;  %291 = vst.msk [vmem:[#allocation2 + $0x48] sm:$0x1] %vm287_vm2, %v12661_v0  ;;  %v6787_v38 = vunpack.c.l.bf16 %v6824_v30  ;;  %v6788_v41 = vunpack.c.h.bf16 %v6824_v30  ;;  %v6825_v42 = vld [vmem:[%s8812_s18 + $0x48] sm:$0xff]   ;;  %v6795_v44 = vunpack.c.l.bf16 %v6826_v36  ;;  %v6830_v1 = vld [vmem:[%s8812_s18 + $0x70] sm:$0xff]  }
  0x1f   : > { %292 = vst.msk [vmem:[#allocation2 + $0x60] sm:$0x1] %vm287_vm2, %v12661_v0  ;;  %v6796_v47 = vunpack.c.h.bf16 %v6826_v36  ;;  %v6791_v50 = vunpack.c.l.bf16 %v6825_v42  ;;  %v6792_v53 = vunpack.c.h.bf16 %v6825_v42  ;;  %v6829_v54 = vld [vmem:[%s8812_s18 + $0x68] sm:$0xff]   ;;  %v6799_v56 = vunpack.c.l.bf16 %v6827_v48 }
  0x20   : > { %6894 = vrot.lane.b32.xlu0 %v6893_v3, %s8643_s13  ;;  %293 = vst.msk [vmem:[#allocation2 + $0x78] sm:$0x1] %vm287_vm2, %v12661_v0  ;;  %v6800_v59 = vunpack.c.h.bf16 %v6827_v48  ;;  %v6807_v62 = vunpack.c.l.bf16 %v6829_v54  ;;  %v6808_v63 = vunpack.c.h.bf16 %v6829_v54  ;;  %v6804_v6 = vunpack.c.h.bf16 %v6828_v60  ;;  %v532_v36 = vld [vmem:[#allocation2 + $0xa] sm:$0xff] }
  0x21   : > { %294 = vst.msk [vmem:[#allocation2 + $0x90] sm:$0x1] %vm287_vm2, %v12661_v0  ;;  %v6812_v11 = vunpack.c.h.bf16 %v6830_v1 }
  0x22   : > { %295 = vst.msk [vmem:[#allocation2 + $0xa8] sm:$0x1] %vm287_vm2, %v12661_v0 }
  0x23   : > { %296 = vst.msk [vmem:[#allocation2 + $0xc0] sm:$0x1] %vm287_vm2, %v12661_v0 }
  0x24   : > { %297 = vst.msk [vmem:[#allocation2 + $0xd8] sm:$0x1] %vm287_vm2, %v12661_v0 }
  0x25   : > { %298 = vst.msk [vmem:[#allocation2 + $0xf0] sm:$0x1] %vm287_vm2, %v12661_v0 }
  0x26   : > { %299 = vst.msk [vmem:[#allocation2 + $0x108] sm:$0x1] %vm287_vm2, %v12661_v0 }
  0x27   : > { %300 = vst.msk [vmem:[#allocation2 + $0x120] sm:$0x1] %vm287_vm2, %v12661_v0 }
  0x28   : > { %301 = vst.msk [vmem:[#allocation2 + $0x138] sm:$0x1] %vm287_vm2, %v12661_v0 }
  0x29   : > { %302 = vst.msk [vmem:[#allocation2 + $0x150] sm:$0x1] %vm287_vm2, %v12661_v0 }
  0x2a   : > { %303 = vst.msk [vmem:[#allocation2 + $0x168] sm:$0x1] %vm287_vm2, %v12661_v0 }
  0x2b   : > { %304 = vst.msk [vmem:[#allocation2 + $0x180] sm:$0x1] %vm287_vm2, %v12661_v0 }
  0x2c   : > { %307 = vst.msk [vmem:[#allocation2 + $0x29] sm:$0x1] %vm287_vm2, %v12661_v0 }
  0x2d   : > { %308 = vst.msk [vmem:[#allocation2 + $0x41] sm:$0x1] %vm287_vm2, %v12661_v0 }
  0x2e   : > { %309 = vst.msk [vmem:[#allocation2 + $0x59] sm:$0x1] %vm287_vm2, %v12661_v0 }
  0x2f   : > { %310 = vst.msk [vmem:[#allocation2 + $0x71] sm:$0x1] %vm287_vm2, %v12661_v0 }
  0x30   : > { %311 = vst.msk [vmem:[#allocation2 + $0x89] sm:$0x1] %vm287_vm2, %v12661_v0 }
  0x31   : > { %312 = vst.msk [vmem:[#allocation2 + $0xa1] sm:$0x1] %vm287_vm2, %v12661_v0 }
  0x32   : > { %313 = vst.msk [vmem:[#allocation2 + $0xb9] sm:$0x1] %vm287_vm2, %v12661_v0 }
  0x33   : > { %314 = vst.msk [vmem:[#allocation2 + $0xd1] sm:$0x1] %vm287_vm2, %v12661_v0 }
  0x34   : > { %315 = vst.msk [vmem:[#allocation2 + $0xe9] sm:$0x1] %vm287_vm2, %v12661_v0 }
  0x35   : > { %316 = vst.msk [vmem:[#allocation2 + $0x101] sm:$0x1] %vm287_vm2, %v12661_v0 }
  0x36   : > { %317 = vst.msk [vmem:[#allocation2 + $0x119] sm:$0x1] %vm287_vm2, %v12661_v0 }
  0x37   : > { %318 = vst.msk [vmem:[#allocation2 + $0x131] sm:$0x1] %vm287_vm2, %v12661_v0 }
  0x38   : > { %319 = vst.msk [vmem:[#allocation2 + $0x149] sm:$0x1] %vm287_vm2, %v12661_v0 }
  0x39   : > { %320 = vst.msk [vmem:[#allocation2 + $0x161] sm:$0x1] %vm287_vm2, %v12661_v0 }
  0x3a   : > { %321 = vst.msk [vmem:[#allocation2 + $0x179] sm:$0x1] %vm287_vm2, %v12661_v0 }
  0x3b   : > { %322 = vst.msk [vmem:[#allocation2 + $0x191] sm:$0x1] %vm287_vm2, %v12661_v0 }
  0x3c   : > { %323 = vst.msk [vmem:[#allocation2 + $0x1a9] sm:$0x1] %vm287_vm2, %v12661_v0 }
  0x3d   : > { %441 = vst.msk [vmem:[#allocation2 + $0x61] sm:$0xff] %vm278_vm0, %v6767_v5  ;;  %v6803_v5 = vunpack.c.l.bf16 %v6828_v60 }
  0x3e   : > { %442 = vst.msk [vmem:[#allocation2 + $0x69] sm:$0xff] %vm278_vm0, %v6768_v7 }
  0x3f   : > { %305 = vst.msk [vmem:[#allocation2 + $0x198] sm:$0x1] %vm287_vm2, %v12661_v0 }
  0x40   : > { %437 = vst.msk [vmem:[#allocation2 + $0x31] sm:$0xff] %vm278_vm0, %v6759_v9  ;;  %v6811_v9 = vunpack.c.l.bf16 %v6830_v1 }
  0x41   : > { %438 = vst.msk [vmem:[#allocation2 + $0x39] sm:$0xff] %vm278_vm0, %v6760_v10 }
  0x42   : > { %435 = vst.msk [vmem:[#allocation2 + $0x19] sm:$0xff] %vm278_vm0, %v6755_v12 }
  0x43   : > { %436 = vst.msk [vmem:[#allocation2 + $0x21] sm:$0xff] %vm278_vm0, %v6756_v13 }
  0x44   : > { %v507_v21 = vld [vmem:[#allocation2 + $0x61] sm:$0xff]  ;;  %443 = vst.msk [vmem:[#allocation2 + $0x79] sm:$0xff] %vm278_vm0, %v6771_v15 }
  0x45   : > { %v508_v23 = vld [vmem:[#allocation2 + $0x69] sm:$0xff]  ;;  %444 = vst.msk [vmem:[#allocation2 + $0x81] sm:$0xff] %vm278_vm0, %v6772_v16 }
  0x46   : > { %v8850_v26 = vpack.i.bf16 %v508_v23, %v507_v21  ;;  %439 = vst.msk [vmem:[#allocation2 + $0x49] sm:$0xff] %vm278_vm0, %v6763_v18 }
  0x47   : > { %v503_v28 = vld [vmem:[#allocation2 + $0x31] sm:$0xff]  ;;  %440 = vst.msk [vmem:[#allocation2 + $0x51] sm:$0xff] %vm278_vm0, %v6764_v19 }
  0x48   : > { %6914 = vrot.lane.b32.xlu2 %v8850_v26, %s8643_s13  ;;  %v504_v31 = vld [vmem:[#allocation2 + $0x39] sm:$0xff]  ;;  %445 = vst.msk [vmem:[#allocation2 + $0x91] sm:$0xff] %vm278_vm0, %v6775_v22 }
  0x49   : > { %v8858_v33 = vpack.i.bf16 %v504_v31, %v503_v28  ;;  %v501_v34 = vld [vmem:[#allocation2 + $0x19] sm:$0xff]  ;;  %446 = vst.msk [vmem:[#allocation2 + $0x99] sm:$0xff] %vm278_vm0, %v6776_v24 }
  0x4a   : > { %v502_v37 = vld [vmem:[#allocation2 + $0x21] sm:$0xff]  ;;  %449 = vst.msk [vmem:[#allocation2 + $0xc1] sm:$0xff] %vm278_vm0, %v6783_v27 }
  0x4b   : > { %6904 = vrot.lane.b32.xlu1 %v8858_v33, %s8643_s13  ;;  %v8865_v39 = vpack.i.bf16 %v502_v37, %v501_v34  ;;  %v509_v40 = vld [vmem:[#allocation2 + $0x79] sm:$0xff]  ;;  %450 = vst.msk [vmem:[#allocation2 + $0xc9] sm:$0xff] %vm278_vm0, %v6784_v29  ;;  %v534_v34 = vld [vmem:[#allocation2 + $0x22] sm:$0xff] }
  0x4c   : > { %v510_v43 = vld [vmem:[#allocation2 + $0x81] sm:$0xff]  ;;  %447 = vst.msk [vmem:[#allocation2 + $0xa9] sm:$0xff] %vm278_vm0, %v6779_v32 }
  0x4d   : > { %6899 = vrot.lane.b32.xlu0 %v8865_v39, %s8643_s13  ;;  %v8872_v45 = vpack.i.bf16 %v510_v43, %v509_v40  ;;  %v505_v46 = vld [vmem:[#allocation2 + $0x49] sm:$0xff]  ;;  %448 = vst.msk [vmem:[#allocation2 + $0xb1] sm:$0xff] %vm278_vm0, %v6780_v35  ;;  %v533_v32 = vld [vmem:[#allocation2 + $0x1a] sm:$0xff] }
  0x4e   : > { %v506_v49 = vld [vmem:[#allocation2 + $0x51] sm:$0xff]  ;;  %451 = vst.msk [vmem:[#allocation2 + $0xd9] sm:$0xff] %vm278_vm0, %v6787_v38  ;;  %v531_v35 = vld [vmem:[#allocation2 + $0x2] sm:$0xff]  ;;  %v8937_v37 = vpack.i.bf16 %v534_v34, %v533_v32  ;;  %v536_v40 = vld [vmem:[#allocation2 + $0x3a] sm:$0xff] }
  0x4f   : > { %v8877_v51 = vpack.i.bf16 %v506_v49, %v505_v46  ;;  %v511_v52 = vld [vmem:[#allocation2 + $0x91] sm:$0xff]  ;;  %452 = vst.msk [vmem:[#allocation2 + $0xe1] sm:$0xff] %vm278_vm0, %v6788_v41  ;;  %v6973_v41 = vpack.i.bf16 %v532_v36, %v531_v35  ;;  %v539_v43 = vld [vmem:[#allocation2 + $0x62] sm:$0xff]  ;;  %v541_v49 = vld [vmem:[#allocation2 + $0x7a] sm:$0xff] }
  0x50   : > { %6919 = vrot.lane.b32.xlu2 %v8872_v45, %s8643_s13  ;;  %v512_v55 = vld [vmem:[#allocation2 + $0x99] sm:$0xff]  ;;  %455 = vst.msk [vmem:[#allocation2 + $0x109] sm:$0xff] %vm278_vm0, %v6795_v44  ;;  %v540_v44 = vld [vmem:[#allocation2 + $0x6a] sm:$0xff] }
  0x51   : > { %v8884_v57 = vpack.i.bf16 %v512_v55, %v511_v52  ;;  %v515_v58 = vld [vmem:[#allocation2 + $0xc1] sm:$0xff]  ;;  %456 = vst.msk [vmem:[#allocation2 + $0x111] sm:$0xff] %vm278_vm0, %v6796_v47  ;;  %v535_v38 = vld [vmem:[#allocation2 + $0x32] sm:$0xff]  ;;  %v537_v46 = vld [vmem:[#allocation2 + $0x4a] sm:$0xff]  ;;  %v8946_v48 = vpack.i.bf16 %v540_v44, %v539_v43 }
  0x52   : > { %v516_v61 = vld [vmem:[#allocation2 + $0xc9] sm:$0xff]  ;;  %453 = vst.msk [vmem:[#allocation2 + $0xf1] sm:$0xff] %vm278_vm0, %v6791_v50  ;;  %v8943_v42 = vpack.i.bf16 %v536_v40, %v535_v38  ;;  %v538_v47 = vld [vmem:[#allocation2 + $0x52] sm:$0xff]  ;;  %v9002_v43 = vld [vmem:[#allocation2 + $0x60] sm:$0xff] }
  0x53   : > { %6909 = vrot.lane.b32.xlu1 %v8877_v51, %s8643_s13  ;;  %454 = vst.msk [vmem:[#allocation2 + $0xf9] sm:$0xff] %vm278_vm0, %v6792_v53  ;;  %v8893_v2 = vpack.i.bf16 %v516_v61, %v515_v58  ;;  %v513_v3 = vld [vmem:[#allocation2 + $0xa9] sm:$0xff]  ;;  %v8950_v52 = vpack.i.bf16 %v538_v47, %v537_v46  ;;  %v544_v58 = vld [vmem:[#allocation2 + $0x9a] sm:$0xff] }
  0x54   : > { %v514_v4 = vld [vmem:[#allocation2 + $0xb1] sm:$0xff]  ;;  %457 = vst.msk [vmem:[#allocation2 + $0x121] sm:$0xff] %vm278_vm0, %v6799_v56  ;;  %v542_v50 = vld [vmem:[#allocation2 + $0x82] sm:$0xff] }
  0x55   : > { %6924 = vrot.lane.b32.xlu0 %v8884_v57, %s8643_s13  ;;  %458 = vst.msk [vmem:[#allocation2 + $0x129] sm:$0xff] %vm278_vm0, %v6800_v59  ;;  %v517_v7 = vld [vmem:[#allocation2 + $0xd9] sm:$0xff]  ;;  %v8900_v10 = vpack.i.bf16 %v514_v4, %v513_v3  ;;  %v8954_v53 = vpack.i.bf16 %v542_v50, %v541_v49  ;;  %v545_v54 = vld [vmem:[#allocation2 + $0xaa] sm:$0xff]  ;;  %v547_v60 = vld [vmem:[#allocation2 + $0xc2] sm:$0xff] }
  0x56   : > { %v518_v8 = vld [vmem:[#allocation2 + $0xe1] sm:$0xff]  ;;  %461 = vst.msk [vmem:[#allocation2 + $0x151] sm:$0xff] %vm278_vm0, %v6807_v62  ;;  %v546_v55 = vld [vmem:[#allocation2 + $0xb2] sm:$0xff]  ;;  %v548_v61 = vld [vmem:[#allocation2 + $0xca] sm:$0xff] }
  0x57   : > { %462 = vst.msk [vmem:[#allocation2 + $0x159] sm:$0xff] %vm278_vm0, %v6808_v63  ;;  %v8906_v12 = vpack.i.bf16 %v518_v8, %v517_v7  ;;  %v521_v13 = vld [vmem:[#allocation2 + $0x109] sm:$0xff]  ;;  %v543_v56 = vld [vmem:[#allocation2 + $0x92] sm:$0xff]  ;;  %v8958_v59 = vpack.i.bf16 %v546_v55, %v545_v54  ;;  %v8966_v63 = vpack.i.bf16 %v548_v61, %v547_v60  ;;  %v549_v4 = vld [vmem:[#allocation2 + $0xda] sm:$0xff] }
  0x58   : > { %6934 = vrot.lane.b32.xlu2 %v8893_v2, %s8643_s13  ;;  %459 = vst.msk [vmem:[#allocation2 + $0x139] sm:$0xff] %vm278_vm0, %v6803_v5  ;;  %v522_v14 = vld [vmem:[#allocation2 + $0x111] sm:$0xff]  ;;  %v8962_v62 = vpack.i.bf16 %v544_v58, %v543_v56  ;;  %v550_v5 = vld [vmem:[#allocation2 + $0xe2] sm:$0xff] }
  0x59   : > { %460 = vst.msk [vmem:[#allocation2 + $0x141] sm:$0xff] %vm278_vm0, %v6804_v6  ;;  %v8913_v15 = vpack.i.bf16 %v522_v14, %v521_v13  ;;  %v519_v16 = vld [vmem:[#allocation2 + $0xf1] sm:$0xff]  ;;  %v9004_v44 = vld [vmem:[#allocation2 + $0x68] sm:$0xff]  ;;  %v9018_v56 = vld [vmem:[#allocation2 + $0x80] sm:$0xff] }
  0x5a   : > { %463 = vst.msk [vmem:[#allocation2 + $0x169] sm:$0xff] %vm278_vm0, %v6811_v9  ;;  %v520_v17 = vld [vmem:[#allocation2 + $0xf9] sm:$0xff]  ;;  %v553_v7 = vld [vmem:[#allocation2 + $0x10a] sm:$0xff]  ;;  %v8974_v9 = vpack.i.bf16 %v550_v5, %v549_v4  ;;  %v9011_v54 = vpack.i.bf16 %v9004_v44, %v9002_v43 }
  0x5b   : > { %6929 = vrot.lane.b32.xlu1 %v8900_v10, %s8643_s13  ;;  %464 = vst.msk [vmem:[#allocation2 + $0x171] sm:$0xff] %vm278_vm0, %v6812_v11  ;;  %v523_v18 = vld [vmem:[#allocation2 + $0x121] sm:$0xff]  ;;  %v8917_v20 = vpack.i.bf16 %v520_v17, %v519_v16  ;;  %v551_v1 = vld [vmem:[#allocation2 + $0xf2] sm:$0xff] }
  0x5c   : > { %v524_v19 = vld [vmem:[#allocation2 + $0x129] sm:$0xff]  ;;  %v552_v3 = vld [vmem:[#allocation2 + $0xfa] sm:$0xff]  ;;  %v554_v8 = vld [vmem:[#allocation2 + $0x112] sm:$0xff]  ;;  %325 = vst.msk [vmem:[#allocation3] sm:$0xff] %vm324_vm3, %v12661_v0 }
  0x5d   : > { %6939 = vrot.lane.b32.xlu0 %v8906_v12, %s8643_s13  ;;  %v8921_v21 = vpack.i.bf16 %v524_v19, %v523_v18  ;;  %v527_v22 = vld [vmem:[#allocation2 + $0x151] sm:$0xff]  ;;  %v8970_v6 = vpack.i.bf16 %v552_v3, %v551_v1  ;;  %v8978_v11 = vpack.i.bf16 %v554_v8, %v553_v7  ;;  %v555_v16 = vld [vmem:[#allocation2 + $0x122] sm:$0xff]  ;;  %326 = vst.msk [vmem:[#allocation3 + $0x8] sm:$0xff] %vm324_vm3, %v12661_v0 }
  0x5e   : > { %v528_v23 = vld [vmem:[#allocation2 + $0x159] sm:$0xff]  ;;  %v556_v17 = vld [vmem:[#allocation2 + $0x12a] sm:$0xff]  ;;  %330 = vst.msk [vmem:[#allocation3 + $0x198] sm:$0xff] %vm324_vm3, %v12661_v0 }
  0x5f   : > { %v8925_v24 = vpack.i.bf16 %v528_v23, %v527_v22  ;;  %v525_v25 = vld [vmem:[#allocation2 + $0x139] sm:$0xff]  ;;  %v8986_v23 = vpack.i.bf16 %v556_v17, %v555_v16  ;;  %v565_v35 = vld [vmem:[#allocation2 + $0x30] sm:$0xff]  ;;  %v567_v49 = vld [vmem:[#allocation2 + $0x48] sm:$0xff]  ;;  %331 = vst.msk [vmem:[#allocation3 + $0x1a0] sm:$0xff] %vm324_vm3, %v12661_v0 }
  0x60   : > { %6949 = vrot.lane.b32.xlu2 %v8913_v15, %s8643_s13  ;;  %v526_v27 = vld [vmem:[#allocation2 + $0x141] sm:$0xff]  ;;  %v559_v19 = vld [vmem:[#allocation2 + $0x152] sm:$0xff] }
  0x61   : > { %v529_v28 = vld [vmem:[#allocation2 + $0x169] sm:$0xff]  ;;  %v8929_v30 = vpack.i.bf16 %v526_v27, %v525_v25  ;;  %v557_v13 = vld [vmem:[#allocation2 + $0x13a] sm:$0xff] }
  0x62   : > { %v530_v29 = vld [vmem:[#allocation2 + $0x171] sm:$0xff]  ;;  %v558_v14 = vld [vmem:[#allocation2 + $0x142] sm:$0xff]  ;;  %v560_v22 = vld [vmem:[#allocation2 + $0x15a] sm:$0xff] }
  0x63   : > { %6944 = vrot.lane.b32.xlu1 %v8917_v20, %s8643_s13  ;;  %v8933_v31 = vpack.i.bf16 %v530_v29, %v529_v28  ;;  %v8982_v18 = vpack.i.bf16 %v558_v14, %v557_v13  ;;  %v8990_v25 = vpack.i.bf16 %v560_v22, %v559_v19  ;;  %v563_v27 = vld [vmem:[#allocation2 + $0x18] sm:$0xff]  ;;  %v564_v28 = vld [vmem:[#allocation2 + $0x20] sm:$0xff]  ;;  %v561_v29 = vld [vmem:[#allocation2 + $0x16a] sm:$0xff] }
  0x64   : > { %v562_v32 = vld [vmem:[#allocation2 + $0x172] sm:$0xff]  ;;  %v7053_v34 = vpack.i.bf16 %v564_v28, %v563_v27  ;;  %v575_v61 = vld [vmem:[#allocation2 + $0xa8] sm:$0xff]  ;;  %v9036_v8 = vld [vmem:[#allocation2 + $0xc0] sm:$0xff] }
  0x65   : > { %6954 = vrot.lane.b32.xlu0 %v8921_v21, %s8643_s13  ;;  %v566_v36 = vld [vmem:[#allocation2 + $0x38] sm:$0xff]  ;;  %v8996_v38 = vpack.i.bf16 %v562_v32, %v561_v29  ;;  %v568_v50 = vld [vmem:[#allocation2 + $0x50] sm:$0xff]  ;;  %v9038_v13 = vld [vmem:[#allocation2 + $0xc8] sm:$0xff] }
  0x66   : > { %v6831_v40 = vld [vmem:[%s8812_s18 + $0x78] sm:$0xff]   ;;  %v9020_v58 = vpack.i.bf16 %v568_v50, %v567_v49  ;;  %v576_v1 = vld [vmem:[#allocation2 + $0xb0] sm:$0xff]  ;;  %v9046_v16 = vpack.i.bf16 %v9038_v13, %v9036_v8  ;;  %v580_v28 = vld [vmem:[#allocation2 + $0xe0] sm:$0xff] }
  0x67   : > { %v6815_v46 = vunpack.c.l.bf16 %v6831_v40  ;;  %v6816_v47 = vunpack.c.h.bf16 %v6831_v40  ;;  %v9016_v55 = vld [vmem:[#allocation2 + $0x78] sm:$0xff]  ;;  %v573_v4 = vld [vmem:[#allocation2 + $0x90] sm:$0xff]  ;;  %v9032_v7 = vpack.i.bf16 %v576_v1, %v575_v61  ;;  %v583_v32 = vld [vmem:[#allocation2 + $0x108] sm:$0xff] }
  0x68   : > { %6964 = vrot.lane.b32.xlu2 %v8925_v24, %s8643_s13  ;;  %v9026_v60 = vpack.i.bf16 %v9018_v56, %v9016_v55  ;;  %v574_v5 = vld [vmem:[#allocation2 + $0x98] sm:$0xff]  ;;  %v581_v17 = vld [vmem:[#allocation2 + $0xf0] sm:$0xff]  ;;  %v585_v49 = vld [vmem:[#allocation2 + $0x120] sm:$0xff] }
  0x69   : > { %465 = vst.msk [vmem:[#allocation2 + $0x181] sm:$0xff] %vm278_vm0, %v6815_v46  ;;  %v9040_v14 = vpack.i.bf16 %v574_v5, %v573_v4  ;;  %v582_v19 = vld [vmem:[#allocation2 + $0xf8] sm:$0xff]  ;;  %v588_v46 = vld [vmem:[#allocation2 + $0x140] sm:$0xff]  ;;  %v586_v50 = vld [vmem:[#allocation2 + $0x128] sm:$0xff] }
  0x6a   : > { %466 = vst.msk [vmem:[#allocation2 + $0x189] sm:$0xff] %vm278_vm0, %v6816_v47  ;;  %v579_v27 = vld [vmem:[#allocation2 + $0xd8] sm:$0xff]  ;;  %v9052_v29 = vpack.i.bf16 %v582_v19, %v581_v17  ;;  %v9080_v4 = vld [vmem:[#allocation2 + $0x150] sm:$0xff]  ;;  %v9084_v17 = vpack.i.bf16 %v586_v50, %v585_v49 }
  0x6b   : > { %6959 = vrot.lane.b32.xlu1 %v8929_v30, %s8643_s13  ;;  %v587_v40 = vld [vmem:[#allocation2 + $0x138] sm:$0xff] }
  0x6c   : > { %v9072_v61 = vpack.i.bf16 %v588_v46, %v587_v40  ;;  %v9082_v5 = vld [vmem:[#allocation2 + $0x158] sm:$0xff]  ;;  %v9098_v40 = vld [vmem:[#allocation2 + $0x170] sm:$0xff] }
  0x6d   : > { %6969 = vrot.lane.b32.xlu0 %v8933_v31, %s8643_s13  ;;  %v9090_v19 = vpack.i.bf16 %v9082_v5, %v9080_v4  ;;  %12807 = vst [vmem:[#allocation10_spill] sm:$0xff] %v9098_v40  ;;  %s8654_s13 = smov 64  }
  0x70   : > { %6979 = vrot.lane.b32.xlu2 %v8937_v37, %s8644_s19 }
  0x73   : > { %6974 = vrot.lane.b32.xlu1 %v6973_v41, %s8644_s19  ;;  %v9000_v41 = vpack.i.bf16 %v566_v36, %v565_v35  ;;  %v9056_v35 = vpack.i.bf16 %v580_v28, %v579_v27  ;;  %v593_v27 = vld [vmem:[#allocation2 + $0x180] sm:$0xff]  ;;  %v594_v28 = vld [vmem:[#allocation2 + $0x188] sm:$0xff] }
  0x74   : > { %v9100_v46 = vpack.i.bf16 %v594_v28, %v593_v27 }
  0x75   : > { %6984 = vrot.lane.b32.xlu0 %v8943_v42, %s8644_s19 }
  0x78   : > { %6994 = vrot.lane.b32.xlu2 %v8946_v48, %s8644_s19 }
  0x7b   : > { %6989 = vrot.lane.b32.xlu1 %v8950_v52, %s8644_s19 }
  0x7d   : > { %6999 = vrot.lane.b32.xlu0 %v8954_v53, %s8644_s19 }
  0x80   : > { %7009 = vrot.lane.b32.xlu2 %v8958_v59, %s8644_s19 }
  0x83   : > { %7004 = vrot.lane.b32.xlu1 %v8962_v62, %s8644_s19 }
  0x85   : > { %7014 = vrot.lane.b32.xlu0 %v8966_v63, %s8644_s19 }
  0x88   : > { %7024 = vrot.lane.b32.xlu2 %v8970_v6, %s8644_s19 }
  0x8b   : > { %7019 = vrot.lane.b32.xlu1 %v8974_v9, %s8644_s19 }
  0x8d   : > { %7029 = vrot.lane.b32.xlu0 %v8978_v11, %s8644_s19 }
  0x90   : > { %7039 = vrot.lane.b32.xlu2 %v8982_v18, %s8644_s19 }
  0x92   : > { %v9078_v1 = vpop.permute.xlu0 %6894 }
  0x93   : > { %7034 = vrot.lane.b32.xlu1 %v8986_v23, %s8644_s19 }
  0x95   : > { %7044 = vrot.lane.b32.xlu0 %v8990_v25, %s8644_s19 }
  0x98   : > { %7054 = vrot.lane.b32.xlu2 %v7053_v34, %s8645_s20  ;;  %v584_v34 = vld [vmem:[#allocation2 + $0x110] sm:$0xff] }
  0x99   : > { %v9060_v36 = vpack.i.bf16 %v584_v34, %v583_v32  ;;  %v9096_v34 = vld [vmem:[#allocation2 + $0x168] sm:$0xff] }
  0x9a   : > { %12806 = vst [vmem:[#allocation9_spill] sm:$0xff] %v9096_v34  ;;  %v9110_v0 = vpack.i.bf16 %v9098_v40, %v9096_v34 }
  0x9b   : > { %7049 = vrot.lane.b32.xlu1 %v8996_v38, %s8644_s19 }
  0x9d   : > { %7059 = vrot.lane.b32.xlu0 %v9000_v41, %s8645_s20 }
  0xa0   : > { %7069 = vrot.lane.b32.xlu2 %v9011_v54, %s8645_s20 }
  0xa2   : > { %v9028_v3 = vpop.permute.xlu2 %6914 }
  0xa3   : > { %7064 = vrot.lane.b32.xlu1 %v9020_v58, %s8645_s20 }
  0xa5   : > { %7074 = vrot.lane.b32.xlu0 %v9026_v60, %s8645_s20 }
  0xa8   : > { %7084 = vrot.lane.b32.xlu2 %v9032_v7, %s8645_s20 }
  0xaa   : > { %v9048_v22 = vpop.permute.xlu2 %6919 }
  0xab   : > { %7079 = vrot.lane.b32.xlu1 %v9040_v14, %s8645_s20 }
  0xad   : > { %7089 = vrot.lane.b32.xlu0 %v9046_v16, %s8645_s20 }
  0xb0   : > { %7099 = vrot.lane.b32.xlu2 %v9052_v29, %s8645_s20 }
  0xb2   : > { %v9064_v47 = vpop.permute.xlu2 %6934 }
  0xb3   : > { %7094 = vrot.lane.b32.xlu1 %v9056_v35, %s8645_s20 }
  0xb5   : > { %7104 = vrot.lane.b32.xlu0 %v9060_v36, %s8645_s20 }
  0xb8   : > { %7114 = vrot.lane.b32.xlu2 %v9072_v61, %s8645_s20 }
  0xba   : > { %v9092_v32 = vpop.permute.xlu2 %6949 }
  0xbb   : > { %12805 = vst [vmem:[#allocation8_spill] sm:$0xff] %v9092_v32  ;;  %7109 = vrot.lane.b32.xlu1 %v9084_v17, %s8645_s20 }
  0xbd   : > { %7119 = vrot.lane.b32.xlu0 %v9090_v19, %s8645_s20  ;;  %v9104_v49 = vpop.permute.xlu1 %6904 }
  0xbf   : > { %v9106_v50 = vpop.permute.xlu0 %6899 }
  0xc0   : > { %12808 = vst [vmem:[#allocation11_spill] sm:$0xff] %v9106_v50  ;;  %7129 = vrot.lane.b32.xlu2 %v9100_v46, %s8645_s20 }
  0xc2   : > { %v9114_v32 = vpop.permute.xlu2 %6964 }
  0xc3   : > { %7124 = vrot.lane.b32.xlu1 %v9110_v0, %s8645_s20 }
  0xc5   : > { %7134 = vrot.lane.b32.xlu0 %v8865_v39, %s8646_s21  ;;  %v9120_v27 = vpop.permute.xlu1 %6909 }
  0xc7   : > { %v9122_v28 = vpop.permute.xlu0 %6924 }
  0xc8   : > { %12809 = vst [vmem:[#allocation12_spill] sm:$0xff] %v9122_v28  ;;  %7144 = vrot.lane.b32.xlu2 %v8877_v51, %s8646_s21  ;;  %v698_v28 = vld [vmem:[#allocation2 + $0x79] sm:$0xff] }
  0xca   : > { %v9126_v50 = vpop.permute.xlu2 %6979 }
  0xcb   : > { %7139 = vrot.lane.b32.xlu1 %v8858_v33, %s8646_s21 }
  0xcd   : > { %7149 = vrot.lane.b32.xlu0 %v8850_v26, %s8646_s21  ;;  %v9132_v34 = vpop.permute.xlu1 %6929 }
  0xce   : > { %12810 = vst [vmem:[#allocation13_spill] sm:$0xff] %v9132_v34  ;;  %v696_v34 = vld [vmem:[#allocation2 + $0x61] sm:$0xff] }
  0xcf   : > { %v9134_v40 = vpop.permute.xlu0 %6939 }
  0xd0   : > { %12811 = vst [vmem:[#allocation14_spill] sm:$0xff] %v9134_v40  ;;  %7159 = vrot.lane.b32.xlu2 %v8884_v57, %s8646_s21 }
  0xd2   : > { %v9138_v39 = vpop.permute.xlu2 %6994 }
  0xd3   : > { %7154 = vrot.lane.b32.xlu1 %v8872_v45, %s8646_s21 }
  0xd5   : > { %7164 = vrot.lane.b32.xlu0 %v8900_v10, %s8646_s21  ;;  %v9144_v51 = vpop.permute.xlu1 %6944 }
  0xd6   : > { %12812 = vst [vmem:[#allocation15_spill] sm:$0xff] %v9144_v51  ;;  %v626_v51 = vld [vmem:[#allocation2 + $0x189] sm:$0xff] }
  0xd7   : > { %v9146_v33 = vpop.permute.xlu0 %6954 }
  0xd8   : > { %7174 = vrot.lane.b32.xlu2 %v8906_v12, %s8646_s21 }
  0xda   : > { %v9150_v26 = vpop.permute.xlu2 %7009 }
  0xdb   : > { %12813 = vst [vmem:[#allocation16_spill] sm:$0xff] %v9150_v26  ;;  %7169 = vrot.lane.b32.xlu1 %v8893_v2, %s8646_s21  ;;  %v625_v2 = vld [vmem:[#allocation2 + $0x181] sm:$0xff] }
  0xdc   : > { %v9174_v40 = vpack.i.bf16 %v626_v51, %v625_v2  ;;  %v658_v2 = vld [vmem:[#allocation2 + $0x18a] sm:$0xff] }
  0xdd   : > { %7179 = vrot.lane.b32.xlu0 %v8917_v20, %s8646_s21  ;;  %v9156_v57 = vpop.permute.xlu1 %6959 }
  0xde   : > { %12814 = vst [vmem:[#allocation17_spill] sm:$0xff] %v9156_v57  ;;  %v703_v57 = vld [vmem:[#allocation2 + $0xb1] sm:$0xff] }
  0xdf   : > { %v9158_v45 = vpop.permute.xlu0 %6969 }
  0xe0   : > { %7189 = vrot.lane.b32.xlu2 %v8921_v21, %s8646_s21 }
  0xe2   : > { %v9162_v10 = vpop.permute.xlu2 %7024 }
  0xe3   : > { %12815 = vst [vmem:[#allocation18_spill] sm:$0xff] %v9162_v10  ;;  %7184 = vrot.lane.b32.xlu1 %v8913_v15, %s8646_s21 }
  0xe5   : > { %7194 = vrot.lane.b32.xlu0 %v8929_v30, %s8646_s21  ;;  %v9168_v12 = vpop.permute.xlu1 %6974 }
  0xe7   : > { %v9170_v20 = vpop.permute.xlu0 %6984 }
  0xe8   : > { %7204 = vrot.lane.b32.xlu2 %v8933_v31, %s8646_s21 }
  0xea   : > { %v9176_v21 = vpop.permute.xlu2 %7039 }
  0xeb   : > { %12816 = vst [vmem:[#allocation19_spill] sm:$0xff] %v9176_v21  ;;  %7199 = vrot.lane.b32.xlu1 %v8925_v24, %s8646_s21 }
  0xed   : > { %7209 = vrot.lane.b32.xlu0 %v9174_v40, %s8646_s21  ;;  %v9182_v15 = vpop.permute.xlu1 %6989 }
  0xee   : > { %12817 = vst [vmem:[#allocation20_spill] sm:$0xff] %v9182_v15 }
  0xef   : > { %v9184_v30 = vpop.permute.xlu0 %6999 }
  0xf0   : > { %7219 = vrot.lane.b32.xlu2 %v8943_v42, %s8647_s22 }
  0xf2   : > { %v9188_v10 = vpop.permute.xlu2 %7054 }
  0xf3   : > { %7214 = vrot.lane.b32.xlu1 %v8937_v37, %s8647_s22 }
  0xf5   : > { %7224 = vrot.lane.b32.xlu0 %v8950_v52, %s8647_s22  ;;  %v9194_v24 = vpop.permute.xlu1 %7004 }
  0xf6   : > { %12818 = vst [vmem:[#allocation21_spill] sm:$0xff] %v9194_v24 }
  0xf7   : > { %v9196_v31 = vpop.permute.xlu0 %7014 }
  0xf8   : > { %7234 = vrot.lane.b32.xlu2 %v8954_v53, %s8647_s22 }
  0xfa   : > { %v9200_v51 = vpop.permute.xlu2 %7069 }
  0xfb   : > { %12819 = vst [vmem:[#allocation22_spill] sm:$0xff] %v9200_v51  ;;  %7229 = vrot.lane.b32.xlu1 %v8946_v48, %s8647_s22  ;;  %v741_v51 = vld [vmem:[#allocation2 + $0xfa] sm:$0xff] }
  0xfd   : > { %7239 = vrot.lane.b32.xlu0 %v8962_v62, %s8647_s22  ;;  %v9206_v42 = vpop.permute.xlu1 %7019 }
  0xfe   : > { %12820 = vst [vmem:[#allocation23_spill] sm:$0xff] %v9206_v42 }
  0xff   : > { %v9208_v37 = vpop.permute.xlu0 %7029 }
 0x100   : > { %12821 = vst [vmem:[#allocation24_spill] sm:$0xff] %v9208_v37  ;;  %7249 = vrot.lane.b32.xlu2 %v8966_v63, %s8647_s22 }
 0x102   : > { %v9212_v52 = vpop.permute.xlu2 %7084 }
 0x103   : > { %12822 = vst [vmem:[#allocation25_spill] sm:$0xff] %v9212_v52  ;;  %7244 = vrot.lane.b32.xlu1 %v8958_v59, %s8647_s22  ;;  %v697_v52 = vld [vmem:[#allocation2 + $0x69] sm:$0xff] }
 0x105   : > { %7254 = vrot.lane.b32.xlu0 %v8974_v9, %s8647_s22  ;;  %v9218_v53 = vpop.permute.xlu1 %7034 }
 0x106   : > { %12823 = vst [vmem:[#allocation26_spill] sm:$0xff] %v9218_v53  ;;  %v735_v53 = vld [vmem:[#allocation2 + $0xb2] sm:$0xff] }
 0x107   : > { %v9220_v48 = vpop.permute.xlu0 %7044 }
 0x108   : > { %7264 = vrot.lane.b32.xlu2 %v8978_v11, %s8647_s22  ;;  %v657_v11 = vld [vmem:[#allocation2 + $0x182] sm:$0xff] }
 0x10a   : > { %v9224_v62 = vpop.permute.xlu2 %7099 }
 0x10b   : > { %12824 = vst [vmem:[#allocation27_spill] sm:$0xff] %v9224_v62  ;;  %7259 = vrot.lane.b32.xlu1 %v8970_v6, %s8647_s22  ;;  %v9246_v62 = vpack.i.bf16 %v658_v2, %v657_v11 }
 0x10d   : > { %7269 = vrot.lane.b32.xlu0 %v8986_v23, %s8647_s22  ;;  %v9230_v63 = vpop.permute.xlu1 %7049 }
 0x10f   : > { %v9232_v59 = vpop.permute.xlu0 %7059 }
 0x110   : > { %7279 = vrot.lane.b32.xlu2 %v8990_v25, %s8647_s22 }
 0x112   : > { %v9236_v9 = vpop.permute.xlu2 %7114 }
 0x113   : > { %12825 = vst [vmem:[#allocation28_spill] sm:$0xff] %v9236_v9  ;;  %7274 = vrot.lane.b32.xlu1 %v8982_v18, %s8647_s22  ;;  %v717_v9 = vld [vmem:[#allocation2 + $0x159] sm:$0xff] }
 0x115   : > { %7284 = vrot.lane.b32.xlu0 %v8996_v38, %s8647_s22  ;;  %v9242_v6 = vpop.permute.xlu1 %7064 }
 0x116   : > { %12826 = vst [vmem:[#allocation29_spill] sm:$0xff] %v9242_v6 }
 0x117   : > { %v9244_v23 = vpop.permute.xlu0 %7074 }
 0x118   : > { %7294 = vrot.lane.b32.xlu2 %v9000_v41, %s8648_s23 }
 0x11a   : > { %v9250_v25 = vpop.permute.xlu2 %7129 }
 0x11b   : > { %7289 = vrot.lane.b32.xlu1 %v9246_v62, %s8647_s22  ;;  %s8651_s22 = smov 40  }
 0x11d   : > { %7299 = vrot.lane.b32.xlu0 %v9020_v58, %s8648_s23  ;;  %v9256_v18 = vpop.permute.xlu1 %7079 }
 0x11f   : > { %v9258_v38 = vpop.permute.xlu0 %7089 }
 0x120   : > { %12827 = vst [vmem:[#allocation30_spill] sm:$0xff] %v9258_v38  ;;  %7309 = vrot.lane.b32.xlu2 %v9026_v60, %s8648_s23  ;;  %v693_v38 = vld [vmem:[#allocation2 + $0x39] sm:$0xff] }
 0x122   : > { %v9262_v11 = vpop.permute.xlu2 %7144 }
 0x123   : > { %12828 = vst [vmem:[#allocation31_spill] sm:$0xff] %v9262_v11  ;;  %7304 = vrot.lane.b32.xlu1 %v9011_v54, %s8648_s23  ;;  %v711_v11 = vld [vmem:[#allocation2 + $0x111] sm:$0xff] }
 0x125   : > { %7314 = vrot.lane.b32.xlu0 %v9040_v14, %s8648_s23  ;;  %v9268_v41 = vpop.permute.xlu1 %7094 }
 0x127   : > { %v9270_v2 = vpop.permute.xlu0 %7104 }
 0x128   : > { %12829 = vst [vmem:[#allocation32_spill] sm:$0xff] %v9270_v2  ;;  %7324 = vrot.lane.b32.xlu2 %v9046_v16, %s8648_s23  ;;  %v691_v2 = vld [vmem:[#allocation2 + $0x1a0] sm:$0xff] }
 0x12a   : > { %v9274_v58 = vpop.permute.xlu2 %7159 }
 0x12b   : > { %7319 = vrot.lane.b32.xlu1 %v9032_v7, %s8648_s23 }
 0x12d   : > { %7329 = vrot.lane.b32.xlu0 %v9056_v35, %s8648_s23  ;;  %v9280_v60 = vpop.permute.xlu1 %7109  ;;  %v690_v35 = vld [vmem:[#allocation2 + $0x198] sm:$0xff] }
 0x12e   : > { %12830 = vst [vmem:[#allocation33_spill] sm:$0xff] %v9280_v60  ;;  %v705_v60 = vld [vmem:[#allocation2 + $0xc9] sm:$0xff] }
 0x12f   : > { %v9282_v54 = vpop.permute.xlu0 %7119 }
 0x130   : > { %12831 = vst [vmem:[#allocation34_spill] sm:$0xff] %v9282_v54  ;;  %7339 = vrot.lane.b32.xlu2 %v9060_v36, %s8648_s23  ;;  %v7368_v36 = vpack.i.bf16 %v691_v2, %v690_v35  ;;  %v695_v2 = vld [vmem:[#allocation2 + $0x51] sm:$0xff]  ;;  %v7383_v35 = vpack.i.bf16 %v697_v52, %v696_v34  ;;  %v699_v54 = vld [vmem:[#allocation2 + $0x81] sm:$0xff] }
 0x131   : > { %v700_v34 = vld [vmem:[#allocation2 + $0x91] sm:$0xff] }
 0x132   : > { %v9286_v14 = vpop.permute.xlu2 %7174 }
 0x133   : > { %7334 = vrot.lane.b32.xlu1 %v9052_v29, %s8648_s23 }
 0x135   : > { %7344 = vrot.lane.b32.xlu0 %v9084_v17, %s8648_s23  ;;  %v9292_v16 = vpop.permute.xlu1 %7124  ;;  %v692_v17 = vld [vmem:[#allocation2 + $0x31] sm:$0xff] }
 0x137   : > { %v9294_v7 = vpop.permute.xlu0 %7134 }
 0x138   : > { %7354 = vrot.lane.b32.xlu2 %v9090_v19, %s8648_s23  ;;  %v7373_v19 = vpack.i.bf16 %v693_v38, %v692_v17  ;;  %v702_v17 = vld [vmem:[#allocation2 + $0xa9] sm:$0xff] }
 0x139   : > { %v7398_v52 = vpack.i.bf16 %v703_v57, %v702_v17  ;;  %v707_v57 = vld [vmem:[#allocation2 + $0xe1] sm:$0xff] }
 0x13a   : > { %v9298_v42 = vpop.permute.xlu2 %7189 }
 0x13b   : > { %12832 = vst [vmem:[#allocation35_spill] sm:$0xff] %v9298_v42  ;;  %7349 = vrot.lane.b32.xlu1 %v9072_v61, %s8648_s23  ;;  %v694_v61 = vld [vmem:[#allocation2 + $0x49] sm:$0xff]  ;;  %v704_v42 = vld [vmem:[#allocation2 + $0xc1] sm:$0xff] }
 0x13c   : > { %v7378_v38 = vpack.i.bf16 %v695_v2, %v694_v61  ;;  %v709_v2 = vld [vmem:[#allocation2 + $0xf9] sm:$0xff] }
 0x13d   : > { %7359 = vrot.lane.b32.xlu0 %v9110_v0, %s8648_s23  ;;  %v9304_v29 = vpop.permute.xlu1 %7139 }
 0x13e   : > { %12833 = vst [vmem:[#allocation36_spill] sm:$0xff] %v9304_v29 }
 0x13f   : > { %v9306_v26 = vpop.permute.xlu0 %7149 }
 0x140   : > { %12834 = vst [vmem:[#allocation37_spill] sm:$0xff] %v9306_v26  ;;  %7369 = vrot.lane.b32.xlu2 %v7368_v36, %s8648_s23  ;;  %v7388_v36 = vpack.i.bf16 %v699_v54, %v698_v28  ;;  %v7403_v28 = vpack.i.bf16 %v705_v60, %v704_v42  ;;  %v708_v54 = vld [vmem:[#allocation2 + $0xf1] sm:$0xff]  ;;  %v714_v60 = vld [vmem:[#allocation2 + $0x139] sm:$0xff] }
 0x141   : > { %v7413_v17 = vpack.i.bf16 %v709_v2, %v708_v54  ;;  %v713_v54 = vld [vmem:[#allocation2 + $0x129] sm:$0xff] }
 0x142   : > { %v9309_v24 = vpop.permute.xlu2 %7204 }
 0x143   : > { %7364 = vrot.lane.b32.xlu1 %v9100_v46, %s8648_s23  ;;  %v701_v46 = vld [vmem:[#allocation2 + $0x99] sm:$0xff] }
 0x144   : > { %v7393_v61 = vpack.i.bf16 %v701_v46, %v700_v34  ;;  %v715_v46 = vld [vmem:[#allocation2 + $0x141] sm:$0xff] }
 0x145   : > { %7374 = vrot.lane.b32.xlu0 %v7373_v19, %s8649_s29  ;;  %v9314_v0 = vpop.permute.xlu1 %7154  ;;  %v7428_v2 = vpack.i.bf16 %v715_v46, %v714_v60  ;;  %v723_v60 = vld [vmem:[#allocation2 + $0x1a1] sm:$0xff] }
 0x147   : > { %v9316_v21 = vpop.permute.xlu0 %7164 }
 0x148   : > { %12835 = vst [vmem:[#allocation38_spill] sm:$0xff] %v9316_v21  ;;  %7384 = vrot.lane.b32.xlu2 %v7383_v35, %s8649_s29 }
 0x14a   : > { %v9319_v26 = vpop.permute.xlu2 %7219 }
 0x14b   : > { %12836 = vst [vmem:[#allocation39_spill] sm:$0xff] %v9319_v26  ;;  %7379 = vrot.lane.b32.xlu1 %v7378_v38, %s8649_s29  ;;  %v706_v38 = vld [vmem:[#allocation2 + $0xd9] sm:$0xff]  ;;  %v7017_v26 = vunpack.i.h.bf16 %v9196_v31 }
 0x14c   : > { %v7408_v34 = vpack.i.bf16 %v707_v57, %v706_v38  ;;  %v718_v57 = vld [vmem:[#allocation2 + $0x169] sm:$0xff] }
 0x14d   : > { %7389 = vrot.lane.b32.xlu0 %v7388_v36, %s8649_s29  ;;  %v9323_v19 = vpop.permute.xlu1 %7169 }
 0x14e   : > { %12837 = vst [vmem:[#allocation40_spill] sm:$0xff] %v9323_v19  ;;  %v710_v19 = vld [vmem:[#allocation2 + $0x109] sm:$0xff] }
 0x14f   : > { %v9325_v21 = vpop.permute.xlu0 %7179  ;;  %v7418_v42 = vpack.i.bf16 %v711_v11, %v710_v19 }
 0x150   : > { %12838 = vst [vmem:[#allocation41_spill] sm:$0xff] %v9325_v21  ;;  %7399 = vrot.lane.b32.xlu2 %v7398_v52, %s8649_s29 }
 0x152   : > { %v9328_v35 = vpop.permute.xlu2 %7234 }
 0x153   : > { %7394 = vrot.lane.b32.xlu1 %v7393_v61, %s8649_s29  ;;  %v712_v61 = vld [vmem:[#allocation2 + $0x121] sm:$0xff] }
 0x154   : > { %v7423_v38 = vpack.i.bf16 %v713_v54, %v712_v61 }
 0x155   : > { %7404 = vrot.lane.b32.xlu0 %v7403_v28, %s8649_s29  ;;  %v9332_v36 = vpop.permute.xlu1 %7184 }
 0x156   : > { %12839 = vst [vmem:[#allocation42_spill] sm:$0xff] %v9332_v36  ;;  %v716_v36 = vld [vmem:[#allocation2 + $0x151] sm:$0xff] }
 0x157   : > { %v9334_v21 = vpop.permute.xlu0 %7194  ;;  %v7433_v11 = vpack.i.bf16 %v717_v9, %v716_v36  ;;  %v726_v9 = vld [vmem:[#allocation2 + $0x4a] sm:$0xff]  ;;  %v727_v36 = vld [vmem:[#allocation2 + $0x52] sm:$0xff] }
 0x158   : > { %12840 = vst [vmem:[#allocation43_spill] sm:$0xff] %v9334_v21  ;;  %7414 = vrot.lane.b32.xlu2 %v7413_v17, %s8649_s29  ;;  %v719_v17 = vld [vmem:[#allocation2 + $0x171] sm:$0xff] }
 0x15a   : > { %v9337_v52 = vpop.permute.xlu2 %7249 }
 0x15b   : > { %12841 = vst [vmem:[#allocation44_spill] sm:$0xff] %v9337_v52  ;;  %7409 = vrot.lane.b32.xlu1 %v7408_v34, %s8649_s29  ;;  %v7438_v52 = vpack.i.bf16 %v719_v17, %v718_v57 }
 0x15d   : > { %7419 = vrot.lane.b32.xlu0 %v7418_v42, %s8649_s29  ;;  %v9341_v28 = vpop.permute.xlu1 %7199  ;;  %v722_v42 = vld [vmem:[#allocation2 + $0x199] sm:$0xff] }
 0x15e   : > { %12842 = vst [vmem:[#allocation45_spill] sm:$0xff] %v9341_v28  ;;  %v7448_v61 = vpack.i.bf16 %v723_v60, %v722_v42  ;;  %v728_v28 = vld [vmem:[#allocation2 + $0x62] sm:$0xff]  ;;  %v732_v42 = vld [vmem:[#allocation2 + $0x92] sm:$0xff]  ;;  %v733_v60 = vld [vmem:[#allocation2 + $0x9a] sm:$0xff] }
 0x15f   : > { %v9343_v21 = vpop.permute.xlu0 %7209 }
 0x160   : > { %7429 = vrot.lane.b32.xlu2 %v7428_v2, %s8649_s29  ;;  %v724_v2 = vld [vmem:[#allocation2 + $0x32] sm:$0xff] }
 0x162   : > { %v9346_v19 = vpop.permute.xlu2 %7264 }
 0x163   : > { %12843 = vst [vmem:[#allocation46_spill] sm:$0xff] %v9346_v19  ;;  %7424 = vrot.lane.b32.xlu1 %v7423_v38, %s8649_s29  ;;  %v725_v38 = vld [vmem:[#allocation2 + $0x3a] sm:$0xff] }
 0x164   : > { %v7453_v17 = vpack.i.bf16 %v725_v38, %v724_v2 }
 0x165   : > { %7434 = vrot.lane.b32.xlu0 %v7433_v11, %s8649_s29  ;;  %v9350_v34 = vpop.permute.xlu1 %7214  ;;  %v7458_v11 = vpack.i.bf16 %v727_v36, %v726_v9  ;;  %v731_v9 = vld [vmem:[#allocation2 + $0x82] sm:$0xff] }
 0x167   : > { %v9352_v46 = vpop.permute.xlu0 %7224 }
 0x168   : > { %12844 = vst [vmem:[#allocation47_spill] sm:$0xff] %v9352_v46  ;;  %7444 = vrot.lane.b32.xlu2 %v9174_v40, %s8649_s29  ;;  %v729_v46 = vld [vmem:[#allocation2 + $0x6a] sm:$0xff] }
 0x169   : > { %v7463_v40 = vpack.i.bf16 %v729_v46, %v728_v28  ;;  %v738_v46 = vld [vmem:[#allocation2 + $0xda] sm:$0xff] }
 0x16a   : > { %v9356_v54 = vpop.permute.xlu2 %7279 }
 0x16b   : > { %12845 = vst [vmem:[#allocation48_spill] sm:$0xff] %v9356_v54  ;;  %7439 = vrot.lane.b32.xlu1 %v7438_v52, %s8649_s29  ;;  %v730_v52 = vld [vmem:[#allocation2 + $0x7a] sm:$0xff] }
 0x16c   : > { %v7468_v38 = vpack.i.bf16 %v731_v9, %v730_v52  ;;  %v745_v9 = vld [vmem:[#allocation2 + $0x12a] sm:$0xff] }
 0x16d   : > { %7449 = vrot.lane.b32.xlu0 %v7448_v61, %s8649_s29  ;;  %v9360_v19 = vpop.permute.xlu1 %7229  ;;  %v7473_v61 = vpack.i.bf16 %v733_v60, %v732_v42  ;;  %v737_v42 = vld [vmem:[#allocation2 + $0xca] sm:$0xff]  ;;  %s8652_s29 = smov 48  }
 0x16e   : > { %12846 = vst [vmem:[#allocation49_spill] sm:$0xff] %v9360_v19  ;;  %v734_v19 = vld [vmem:[#allocation2 + $0xaa] sm:$0xff] }
 0x16f   : > { %v9362_v57 = vpop.permute.xlu0 %7239  ;;  %v7478_v28 = vpack.i.bf16 %v735_v53, %v734_v19  ;;  %v744_v19 = vld [vmem:[#allocation2 + $0x122] sm:$0xff] }
 0x170   : > { %7459 = vrot.lane.b32.xlu2 %v7458_v11, %s8650_s8  ;;  %v739_v11 = vld [vmem:[#allocation2 + $0xe2] sm:$0xff] }
 0x171   : > { %v7488_v60 = vpack.i.bf16 %v739_v11, %v738_v46  ;;  %v743_v46 = vld [vmem:[#allocation2 + $0x112] sm:$0xff]  ;;  %v7503_v11 = vpack.i.bf16 %v745_v9, %v744_v19  ;;  %v749_v19 = vld [vmem:[#allocation2 + $0x15a] sm:$0xff] }
 0x172   : > { %v9365_v54 = vpop.permute.xlu2 %7294 }
 0x173   : > { %7454 = vrot.lane.b32.xlu1 %v7453_v17, %s8650_s8  ;;  %v736_v17 = vld [vmem:[#allocation2 + $0xc2] sm:$0xff] }
 0x174   : > { %v7483_v52 = vpack.i.bf16 %v737_v42, %v736_v17  ;;  %v751_v42 = vld [vmem:[#allocation2 + $0x172] sm:$0xff] }
 0x175   : > { %7464 = vrot.lane.b32.xlu0 %v7463_v40, %s8650_s8  ;;  %v9369_v36 = vpop.permute.xlu1 %7244 }
 0x176   : > { %12847 = vst [vmem:[#allocation50_spill] sm:$0xff] %v9369_v36  ;;  %v740_v36 = vld [vmem:[#allocation2 + $0xf2] sm:$0xff] }
 0x177   : > { %v9371_v2 = vpop.permute.xlu0 %7254  ;;  %v7493_v53 = vpack.i.bf16 %v741_v51, %v740_v36  ;;  %v750_v36 = vld [vmem:[#allocation2 + $0x16a] sm:$0xff] }
 0x178   : > { %7474 = vrot.lane.b32.xlu2 %v7473_v61, %s8650_s8  ;;  %v7518_v9 = vpack.i.bf16 %v751_v42, %v750_v36 }
 0x17a   : > { %v9374_v6 = vpop.permute.xlu2 %7309 }
 0x17b   : > { %12848 = vst [vmem:[#allocation51_spill] sm:$0xff] %v9374_v6  ;;  %7469 = vrot.lane.b32.xlu1 %v7468_v38, %s8650_s8  ;;  %v742_v38 = vld [vmem:[#allocation2 + $0x10a] sm:$0xff]  ;;  %v747_v6 = vld [vmem:[#allocation2 + $0x142] sm:$0xff] }
 0x17c   : > { %v7498_v17 = vpack.i.bf16 %v743_v46, %v742_v38 }
 0x17d   : > { %7479 = vrot.lane.b32.xlu0 %v7478_v28, %s8650_s8  ;;  %v9378_v40 = vpop.permute.xlu1 %7259 }
 0x17e   : > { %12849 = vst [vmem:[#allocation52_spill] sm:$0xff] %v9378_v40  ;;  %v746_v40 = vld [vmem:[#allocation2 + $0x13a] sm:$0xff] }
 0x17f   : > { %v9380_v15 = vpop.permute.xlu0 %7269  ;;  %v7508_v51 = vpack.i.bf16 %v747_v6, %v746_v40  ;;  %v754_v6 = vld [vmem:[#allocation2 + $0x19a] sm:$0xff]  ;;  %v755_v40 = vld [vmem:[#allocation2 + $0x1a2] sm:$0xff] }
 0x180   : > { %12850 = vst [vmem:[#allocation53_spill] sm:$0xff] %v9380_v15  ;;  %7489 = vrot.lane.b32.xlu2 %v7488_v60, %s8650_s8 }
 0x182   : > { %v9383_v61 = vpop.permute.xlu2 %7324 }
 0x183   : > { %12851 = vst [vmem:[#allocation54_spill] sm:$0xff] %v9383_v61  ;;  %7484 = vrot.lane.b32.xlu1 %v7483_v52, %s8650_s8  ;;  %v748_v52 = vld [vmem:[#allocation2 + $0x152] sm:$0xff] }
 0x185   : > { %7494 = vrot.lane.b32.xlu0 %v7493_v53, %s8650_s8  ;;  %v9387_v28 = vpop.permute.xlu1 %7274 }
 0x186   : > { %12852 = vst [vmem:[#allocation55_spill] sm:$0xff] %v9387_v28  ;;  %v7513_v28 = vpack.i.bf16 %v749_v19, %v748_v52  ;;  %v6922_v52 = vunpack.i.h.bf16 %v9048_v22 }
 0x187   : > { %v9389_v15 = vpop.permute.xlu0 %7284 }
 0x188   : > { %7504 = vrot.lane.b32.xlu2 %v7503_v11, %s8650_s8 }
 0x18a   : > { %v9392_v60 = vpop.permute.xlu2 %7339 }
 0x18b   : > { %12853 = vst [vmem:[#allocation56_spill] sm:$0xff] %v9392_v60  ;;  %7499 = vrot.lane.b32.xlu1 %v7498_v17, %s8650_s8  ;;  %v7528_v17 = vpack.i.bf16 %v755_v40, %v754_v6  ;;  %v1791_v6 = vsel %vm278_vm0, %v9018_v56, %v6922_v52  ;;  %v7082_v40 = vunpack.i.h.bf16 %v9256_v18  ;;  %v7241_v56 = vunpack.i.l.bf16 %v9362_v57 }
 0x18d   : > { %7509 = vrot.lane.b32.xlu0 %v7508_v51, %s8650_s8  ;;  %v9396_v53 = vpop.permute.xlu1 %7289 }
 0x18f   : > { %v9398_v61 = vpop.permute.xlu0 %7299 }
 0x190   : > { %12854 = vst [vmem:[#allocation57_spill] sm:$0xff] %v9398_v61  ;;  %7519 = vrot.lane.b32.xlu2 %v7518_v9, %s8650_s8  ;;  %v7001_v9 = vunpack.i.l.bf16 %v9184_v30 }
 0x192   : > { %v9401_v38 = vpop.permute.xlu2 %7354 }
 0x193   : > { %12855 = vst [vmem:[#allocation58_spill] sm:$0xff] %v9401_v38  ;;  %7514 = vrot.lane.b32.xlu1 %v7513_v28, %s8650_s8  ;;  %v6921_v28 = vunpack.i.l.bf16 %v9048_v22  ;;  %v6937_v38 = vunpack.i.h.bf16 %v9064_v47  ;;  %v7162_v22 = vunpack.i.h.bf16 %v9274_v58 }
 0x195   : > { %7524 = vrot.lane.b32.xlu0 %v9246_v62, %s8650_s8  ;;  %v9406_v46 = vpop.permute.xlu1 %7304  ;;  %v7002_v62 = vunpack.i.h.bf16 %v9184_v30  ;;  %v7242_v30 = vunpack.i.h.bf16 %v9362_v57 }
 0x196   : > { %12856 = vst [vmem:[#allocation59_spill] sm:$0xff] %v9406_v46  ;;  %v6936_v46 = vunpack.i.l.bf16 %v9064_v47 }
 0x197   : > { %v9408_v11 = vpop.permute.xlu0 %7314 }
 0x19a   : > { %v9410_v51 = vpop.permute.xlu2 %7369 }
 0x19b   : > { %7529 = vrot.lane.b32.xlu1 %v7528_v17, %s8650_s8  ;;  %v7081_v17 = vunpack.i.l.bf16 %v9256_v18  ;;  %v1823_v18 = vsel %vm324_vm3, %v1791_v6, %v7002_v62  ;;  %v7016_v6 = vunpack.i.l.bf16 %v9196_v31  ;;  %v7176_v31 = vunpack.i.l.bf16 %v9286_v14 }
 0x19d   : > { %v7320_v36 = vpop.permute.xlu1 %7319 }
 0x19f   : > { %v9413_v42 = vpop.permute.xlu0 %7329 }
 0x1a0   : > { %12857 = vst [vmem:[#allocation60_spill] sm:$0xff] %v9413_v42  ;;  %v1790_v42 = vsel %vm278_vm0, %v9016_v55, %v6921_v28  ;;  %v7322_v55 = vunpack.i.h.bf16 %v7320_v36  ;;  %v7321_v28 = vunpack.i.l.bf16 %v7320_v36 }
 0x1a1   : > { %v1822_v61 = vsel %vm324_vm3, %v1790_v42, %v7001_v9 }
 0x1a2   : > { %v9417_v19 = vpop.permute.xlu2 %7384  ;;  %v1855_v37 = vsel %vm1844_vm4, %v1822_v61, %v7081_v17 }
 0x1a3   : > { %12858 = vst [vmem:[#allocation61_spill] sm:$0xff] %v9417_v19  ;;  %v7161_v19 = vunpack.i.l.bf16 %v9274_v58  ;;  %v1856_v58 = vsel %vm1844_vm4, %v1823_v18, %v7082_v40  ;;  %v1796_v18 = vsel %vm278_vm0, %v9036_v8, %v6936_v46 }
 0x1a4   : > { %v1889_v29 = vsel %vm1877_vm5, %v1856_v58, %v7162_v22 }
 0x1a5   : > { %v7335_v60 = vpop.permute.xlu1 %7334  ;;  %v1888_v47 = vsel %vm1877_vm5, %v1855_v37, %v7161_v19  ;;  %v1922_v42 = vsel %vm1910_vm6, %v1889_v29, %v7242_v30  ;;  %v7097_v37 = vunpack.i.h.bf16 %v9268_v41  ;;  %v7096_v19 = vunpack.i.l.bf16 %v9268_v41 }
 0x1a6   : > { %v1921_v62 = vsel %vm1910_vm6, %v1888_v47, %v7241_v56  ;;  %v1955_v40 = vsel %vm1943_vm7, %v1922_v42, %v7322_v55  ;;  %v7177_v30 = vunpack.i.h.bf16 %v9286_v14  ;;  %v1797_v56 = vsel %vm278_vm0, %v9038_v13, %v6937_v38 }
 0x1a7   : > { %v9433_v52 = vpop.permute.xlu0 %7344  ;;  %v1954_v61 = vsel %vm1943_vm7, %v1921_v62, %v7321_v28  ;;  %v7257_v41 = vunpack.i.h.bf16 %v9371_v2  ;;  %v7256_v55 = vunpack.i.l.bf16 %v9371_v2  ;;  %v1829_v58 = vsel %vm324_vm3, %v1797_v56, %v7017_v26 }
 0x1a8   : > { %v1828_v47 = vsel %vm324_vm3, %v1796_v18, %v7016_v6  ;;  %v7336_v62 = vunpack.i.l.bf16 %v7335_v60  ;;  %v1862_v42 = vsel %vm1844_vm4, %v1829_v58, %v7097_v37  ;;  %v6917_v37 = vunpack.i.h.bf16 %v9028_v3 }
 0x1a9   : > { %v1861_v14 = vsel %vm1844_vm4, %v1828_v47, %v7096_v19  ;;  %v1895_v8 = vsel %vm1877_vm5, %v1862_v42, %v7177_v30  ;;  %v6916_v19 = vunpack.i.l.bf16 %v9028_v3  ;;  %v6966_v56 = vunpack.i.l.bf16 %v9114_v32 }
 0x1aa   : > { %v7400_v57 = vpop.permute.xlu2 %7399  ;;  %v1894_v13 = vsel %vm1877_vm5, %v1861_v14, %v7176_v31  ;;  %v1928_v2 = vsel %vm1910_vm6, %v1895_v8, %v7257_v41  ;;  %v6967_v31 = vunpack.i.h.bf16 %v9114_v32  ;;  %v6997_v18 = vunpack.i.h.bf16 %v9138_v39 }
 0x1ab   : > { %v7402_v9 = vunpack.i.h.bf16 %v7400_v57  ;;  %v7401_v36 = vunpack.i.l.bf16 %v7400_v57  ;;  %v7337_v57 = vunpack.i.h.bf16 %v7335_v60  ;;  %v1927_v46 = vsel %vm1910_vm6, %v1894_v13, %v7256_v55 }
 0x1ac   : > { %v1960_v26 = vsel %vm1943_vm7, %v1927_v46, %v7336_v62  ;;  %v6996_v41 = vunpack.i.l.bf16 %v9138_v39  ;;  %v7047_v55 = vunpack.i.h.bf16 %v9220_v48  ;;  %v7046_v58 = vunpack.i.l.bf16 %v9220_v48 }
 0x1ad   : > { %v9449_v17 = vpop.permute.xlu1 %7349  ;;  %v9452_v22 = vsel %vm1976_vm8, %v1954_v61, %v7401_v36  ;;  %v9455_v29 = vsel %vm1976_vm8, %v1955_v40, %v7402_v9  ;;  %v1961_v6 = vsel %vm1943_vm7, %v1928_v2, %v7337_v57  ;;  %v1788_v57 = vsel %vm278_vm0, %v9002_v43, %v6916_v19  ;;  %v2062_v43 = vld [vmem:[%s12654_s1 + $0x10] sm:$0x3] }
 0x1ae   : > { %v1789_v3 = vsel %vm278_vm0, %v9004_v44, %v6917_v37  ;;  %v7127_v62 = vunpack.i.h.bf16 %v9292_v16  ;;  %v7126_v32 = vunpack.i.l.bf16 %v9292_v16  ;;  %v1809_v14 = vsel %vm278_vm0, %v9082_v5, %v6967_v31 }
 0x1af   : > { %v9465_v28 = vpop.permute.xlu0 %7359  ;;  %v1808_v39 = vsel %vm278_vm0, %v9080_v4, %v6966_v56  ;;  %v1821_v48 = vsel %vm324_vm3, %v1789_v3, %v6997_v18  ;;  %v7206_v42 = vunpack.i.l.bf16 %v9309_v24  ;;  %v1820_v44 = vsel %vm324_vm3, %v1788_v57, %v6996_v41 }
 0x1b0   : > { %v1841_v13 = vsel %vm324_vm3, %v1809_v14, %v7047_v55  ;;  %v7207_v16 = vunpack.i.h.bf16 %v9309_v24  ;;  %v2076_v5 = vunpack.c.l.b16 %v2062_v43  ;;  %v7077_v4 = vunpack.i.h.bf16 %v9244_v23 }
 0x1b1   : > { %v7287_v46 = vunpack.i.h.bf16 %v9389_v15  ;;  %v7286_v2 = vunpack.i.l.bf16 %v9389_v15  ;;  %v7157_v56 = vunpack.i.h.bf16 %v9314_v0  ;;  %v7156_v18 = vunpack.i.l.bf16 %v9314_v0 }
 0x1b2   : > { %v7415_v38 = vpop.permute.xlu2 %7414  ;;  %v2079_v24 = vpack.c.b16 %v2076_v5, %v2076_v5  ;;  %v7236_v55 = vunpack.i.l.bf16 %v9328_v35  ;;  %v7317_v0 = vunpack.i.h.bf16 %v9408_v11 }
 0x1b3   : > { %v7417_v9 = vunpack.i.h.bf16 %v7415_v38  ;;  %v7416_v36 = vunpack.i.l.bf16 %v7415_v38  ;;  %v1840_v38 = vsel %vm324_vm3, %v1808_v39, %v7046_v58  ;;  %v1854_v39 = vsel %vm1844_vm4, %v1821_v48, %v7077_v4 }
 0x1b4   : > { %v2133_v41 = vsel %vm2131_vm9, %v2079_v24, 0 }
 0x1b5   : > { %v7365_v60 = vpop.permute.xlu1 %7364  ;;  %v9478_v61 = vsel %vm1976_vm8, %v1960_v26, %v7416_v36  ;;  %v9481_v40 = vsel %vm1976_vm8, %v1961_v6, %v7417_v9  ;;  %v7076_v9 = vunpack.i.l.bf16 %v9244_v23  ;;  %v1873_v36 = vsel %vm1844_vm4, %v1840_v38, %v7126_v32  ;;  %2140 = vmatpush.bf16.msra.mxu0 %v2133_v41  ;;  %6832 = vmatpush.bf16.msra.mxu3 %v2133_v41 }
 0x1b6   : > { %v1874_v26 = vsel %vm1844_vm4, %v1841_v13, %v7127_v62  ;;  %v1906_v37 = vsel %vm1877_vm5, %v1873_v36, %v7206_v42  ;;  %v7367_v19 = vunpack.i.h.bf16 %v7365_v60  ;;  %v7366_v31 = vunpack.i.l.bf16 %v7365_v60  ;;  %v6743_v60 = vld [vmem:[%s12654_s1 + $0x8] sm:$0xff] }
 0x1b7   : > { %v9485_v30 = vpop.permute.xlu0 %7374  ;;  %v1907_v15 = vsel %vm1877_vm5, %v1874_v26, %v7207_v16  ;;  %v7237_v23 = vunpack.i.h.bf16 %v9328_v35  ;;  %v1939_v58 = vsel %vm1910_vm6, %v1906_v37, %v7286_v2  ;;  %v7316_v62 = vunpack.i.l.bf16 %v9408_v11  ;;  %v6742_v26 = vld [vmem:[%s12654_s1] sm:$0xff] }
 0x1b8   : > { %v1940_v57 = vsel %vm1910_vm6, %v1907_v15, %v7287_v46  ;;  %v1853_v35 = vsel %vm1844_vm4, %v1820_v44, %v7076_v9  ;;  %v1972_v42 = vsel %vm1943_vm7, %v1939_v58, %v7366_v31  ;;  %v1887_v16 = vsel %vm1877_vm5, %v1854_v39, %v7157_v56 }
 0x1b9   : > { %v1973_v43 = vsel %vm1943_vm7, %v1940_v57, %v7367_v19  ;;  %v1886_v13 = vsel %vm1877_vm5, %v1853_v35, %v7156_v18  ;;  %v1920_v48 = vsel %vm1910_vm6, %v1887_v16, %v7237_v23  ;;  %2141 = vmatpush.bf16.msra.mxu0 %v6743_v60  ;;  %6833 = vmatpush.bf16.msra.mxu3 %v6743_v60  ;;  %v6897_v23 = vunpack.i.h.bf16 %v9078_v1 }
 0x1ba   : > { %v9493_v47 = vpop.permute.xlu2 %7429  ;;  %v1919_v46 = vsel %vm1910_vm6, %v1886_v13, %v7236_v55  ;;  %v1953_v9 = vsel %vm1943_vm7, %v1920_v48, %v7317_v0  ;;  %v468_v55 = vld [vmem:[#allocation2 + $0x8] sm:$0xff]  ;;  %v6896_v58 = vunpack.i.l.bf16 %v9078_v1  ;;  %v467_v0 = vld [vmem:[#allocation2] sm:$0xff]  ;;  %v6977_v35 = vunpack.i.h.bf16 %v9168_v12 }
 0x1bb   : > { %v1952_v2 = vsel %vm1943_vm7, %v1919_v46, %v7316_v62  ;;  %v1781_v1 = vsel %vm278_vm0, %v468_v55, %v6897_v23  ;;  %v12859_v13 = vld [vmem:[#allocation8_spill] sm:$0xff]  ;;  %v7051_v46 = vunpack.i.l.bf16 %v9230_v63  ;;  %v7372_v55 = vunpack.i.h.bf16 %v9410_v51 }
 0x1bc   : > { %v6952_v16 = vunpack.i.h.bf16 %v12859_v13  ;;  %v6951_v48 = vunpack.i.l.bf16 %v12859_v13 }
 0x1bd   : > { %v9513_v8 = vpop.permute.xlu1 %7379  ;;  %2142 = vmatpush.bf16.msra.mxu0 %v6742_v26  ;;  %6834 = vmatpush.bf16.msra.mxu3 %v6742_v26 }
 0x1bf   : > { %v9522_v6 = vpop.permute.xlu0 %7389 }
 0x1c2   : > { %v7445_v3 = vpop.permute.xlu2 %7444 }
 0x1c3   : > { %v7447_v32 = vunpack.i.h.bf16 %v7445_v3  ;;  %v7446_v14 = vunpack.i.l.bf16 %v7445_v3 }
 0x1c5   : > { %v7395_v5 = vpop.permute.xlu1 %7394  ;;  %v9544_v38 = vsel %vm1976_vm8, %v1972_v42, %v7446_v14  ;;  %v9547_v11 = vsel %vm1976_vm8, %v1973_v43, %v7447_v32  ;;  %v6972_v32 = vunpack.i.h.bf16 %v9158_v45  ;;  %v6971_v14 = vunpack.i.l.bf16 %v9158_v45 }
 0x1c6   : > { %v7397_v44 = vunpack.i.h.bf16 %v7395_v5  ;;  %v7396_v4 = vunpack.i.l.bf16 %v7395_v5  ;;  %v6976_v42 = vunpack.i.l.bf16 %v9168_v12  ;;  %v1780_v43 = vsel %vm278_vm0, %v467_v0, %v6896_v58  ;;  %v12861_v12 = vld [vmem:[#allocation9_spill] sm:$0xff] }
 0x1c7   : > { %v9553_v36 = vpop.permute.xlu0 %7404  ;;  %v7052_v5 = vunpack.i.h.bf16 %v9230_v63  ;;  %v6907_v45 = vunpack.i.h.bf16 %v9104_v49  ;;  %v1810_v26 = vsel %vm278_vm0, %v12861_v12, %v6971_v14  ;;  %v1813_v63 = vsel %vm324_vm3, %v1781_v1, %v6977_v35 }
 0x1c8   : > { %v1985_v24 = vsel %vm1976_vm8, %v1952_v2, %v7396_v4  ;;  %v1986_v37 = vsel %vm1976_vm8, %v1953_v9, %v7397_v44  ;;  %v7132_v44 = vunpack.i.h.bf16 %v9250_v25  ;;  %v7131_v4 = vunpack.i.l.bf16 %v9250_v25  ;;  %v12860_v2 = vld [vmem:[#allocation10_spill] sm:$0xff] }
 0x1c9   : > { %v1811_v9 = vsel %vm278_vm0, %v12860_v2, %v6972_v32  ;;  %v1842_v25 = vsel %vm324_vm3, %v1810_v26, %v7051_v46  ;;  %v7371_v58 = vunpack.i.l.bf16 %v9410_v51  ;;  %v7056_v32 = vunpack.i.l.bf16 %v9188_v10 }
 0x1ca   : > { %v9560_v19 = vpop.permute.xlu2 %7459  ;;  %v1843_v23 = vsel %vm324_vm3, %v1811_v9, %v7052_v5  ;;  %v1875_v14 = vsel %vm1844_vm4, %v1842_v25, %v7131_v4  ;;  %v7136_v35 = vunpack.i.l.bf16 %v9294_v7  ;;  %v7216_v4 = vunpack.i.l.bf16 %v9350_v34 }
 0x1cb   : > { %v1876_v1 = vsel %vm1844_vm4, %v1843_v23, %v7132_v44  ;;  %v7296_v26 = vunpack.i.l.bf16 %v9365_v54  ;;  %v7376_v25 = vunpack.i.l.bf16 %v9485_v30  ;;  %v6906_v23 = vunpack.i.l.bf16 %v9104_v49 }
 0x1cd   : > { %v9562_v31 = vpop.permute.xlu1 %7409 }
 0x1cf   : > { %v9564_v56 = vpop.permute.xlu0 %7419 }
 0x1d2   : > { %v7475_v18 = vpop.permute.xlu2 %7474 }
 0x1d3   : > { %v7477_v15 = vunpack.i.h.bf16 %v7475_v18  ;;  %v7476_v41 = vunpack.i.l.bf16 %v7475_v18  ;;  %v1812_v18 = vsel %vm324_vm3, %v1780_v43, %v6976_v42 }
 0x1d5   : > { %v9568_v57 = vpop.permute.xlu1 %7424  ;;  %v9571_v3 = vsel %vm2009_vm10, %v1985_v24, %v7476_v41  ;;  %v9574_v60 = vsel %vm2009_vm10, %v1986_v37, %v7477_v15  ;;  %v7212_v24 = vunpack.i.h.bf16 %v9343_v21  ;;  %v7211_v37 = vunpack.i.l.bf16 %v9343_v21 }
 0x1d6   : > { %v7292_v15 = vunpack.i.h.bf16 %v9396_v53  ;;  %v7291_v41 = vunpack.i.l.bf16 %v9396_v53  ;;  %v7057_v21 = vunpack.i.h.bf16 %v9188_v10  ;;  %v7137_v53 = vunpack.i.h.bf16 %v9294_v7 }
 0x1d7   : > { %v9580_v39 = vpop.permute.xlu0 %7434  ;;  %v1908_v42 = vsel %vm1877_vm5, %v1875_v14, %v7211_v37  ;;  %v1909_v43 = vsel %vm1877_vm5, %v1876_v1, %v7212_v24  ;;  %v7217_v10 = vunpack.i.h.bf16 %v9350_v34  ;;  %v7297_v7 = vunpack.i.h.bf16 %v9365_v54 }
 0x1d8   : > { %v1941_v51 = vsel %vm1910_vm6, %v1908_v42, %v7291_v41  ;;  %v1942_v46 = vsel %vm1910_vm6, %v1909_v43, %v7292_v15  ;;  %v1846_v15 = vsel %vm1844_vm4, %v1813_v63, %v7057_v21  ;;  %v1845_v41 = vsel %vm1844_vm4, %v1812_v18, %v7056_v32 }
 0x1d9   : > { %v1974_v44 = vsel %vm1943_vm7, %v1941_v51, %v7371_v58  ;;  %v1975_v12 = vsel %vm1943_vm7, %v1942_v46, %v7372_v55  ;;  %v7377_v34 = vunpack.i.h.bf16 %v9485_v30  ;;  %v12862_v55 = vld [vmem:[#allocation11_spill] sm:$0xff]  ;;  %v1879_v54 = vsel %vm1877_vm5, %v1846_v15, %v7137_v53  ;;  %v8538_v15 = vld [vmem:[#allocation2 + $0x110] sm:$0xff] }
 0x1da   : > { %v6902_v58 = vunpack.i.h.bf16 %v12862_v55  ;;  %v1878_v14 = vsel %vm1877_vm5, %v1845_v41, %v7136_v35  ;;  %v6901_v1 = vunpack.i.l.bf16 %v12862_v55  ;;  %v6912_v42 = vunpack.i.h.bf16 %v9120_v27  ;;  %v8540_v55 = vld [vmem:[#allocation2 + $0x30] sm:$0xff] }
 0x1db   : > { %v1911_v63 = vsel %vm1910_vm6, %v1878_v14, %v7216_v4  ;;  %v1912_v18 = vsel %vm1910_vm6, %v1879_v54, %v7217_v10  ;;  %v6911_v51 = vunpack.i.l.bf16 %v9120_v27  ;;  %v6982_v53 = vunpack.i.h.bf16 %v9126_v50  ;;  %v8541_v14 = vld [vmem:[#allocation2 + $0x38] sm:$0xff] }
 0x1dc   : > { %v1944_v32 = vsel %vm1943_vm7, %v1911_v63, %v7296_v26  ;;  %v1945_v30 = vsel %vm1943_vm7, %v1912_v18, %v7297_v7  ;;  %v8537_v7 = vld [vmem:[#allocation2 + $0x20] sm:$0xff]  ;;  %v1803_v41 = vsel %vm278_vm0, %v8538_v15, %v6952_v16  ;;  %v1784_v54 = vsel %vm278_vm0, %v8540_v55, %v6906_v23  ;;  %v8542_v16 = vld [vmem:[#allocation2 + $0x50] sm:$0xff] }
 0x1dd   : > { %v9607_v0 = vpop.permute.xlu1 %7439  ;;  %v1977_v46 = vsel %vm1976_vm8, %v1944_v32, %v7376_v25  ;;  %v1783_v27 = vsel %vm278_vm0, %v8537_v7, %v6902_v58  ;;  %v6987_v25 = vunpack.i.h.bf16 %v9170_v20  ;;  %v1785_v58 = vsel %vm278_vm0, %v8541_v14, %v6907_v45  ;;  %v12863_v32 = vld [vmem:[#allocation36_spill] sm:$0xff]  ;;  %v12866_v7 = vld [vmem:[#allocation57_spill] sm:$0xff] }
 0x1de   : > { %v7061_v63 = vunpack.i.l.bf16 %v9232_v59  ;;  %v9671_v13 = vsel %vm278_vm0, %v8542_v16, %v6912_v42  ;;  %v1815_v49 = vsel %vm324_vm3, %v1783_v27, %v6982_v53  ;;  %v6957_v45 = vunpack.i.h.bf16 %v9146_v33 }
 0x1df   : > { %v7450_v5 = vpop.permute.xlu0 %7449  ;;  %v1817_v42 = vsel %vm324_vm3, %v1785_v58, %v6987_v25  ;;  %v7302_v27 = vunpack.i.h.bf16 %v12866_v7  ;;  %v7382_v55 = vunpack.i.h.bf16 %v9513_v8  ;;  %v7381_v14 = vunpack.i.l.bf16 %v9513_v8 }
 0x1e0   : > { %v7452_v2 = vunpack.i.h.bf16 %v7450_v5  ;;  %v7451_v9 = vunpack.i.l.bf16 %v7450_v5  ;;  %v7462_v58 = vunpack.i.h.bf16 %v9560_v19 }
 0x1e2   : > { %v9626_v24 = vsel %vm1976_vm8, %v1974_v44, %v7451_v9  ;;  %v9629_v37 = vsel %vm1976_vm8, %v1975_v12, %v7452_v2  ;;  %v1978_v2 = vsel %vm1976_vm8, %v1945_v30, %v7377_v34  ;;  %v6981_v9 = vunpack.i.l.bf16 %v9126_v50  ;;  %v8536_v44 = vld [vmem:[#allocation2 + $0x18] sm:$0xff]  ;;  %v8539_v34 = vld [vmem:[#allocation2 + $0x108] sm:$0xff] }
 0x1e3   : > { %v1782_v12 = vsel %vm278_vm0, %v8536_v44, %v6901_v1  ;;  %v1802_v50 = vsel %vm278_vm0, %v8539_v34, %v6951_v48  ;;  %v7062_v1 = vunpack.i.h.bf16 %v9232_v59  ;;  %v8543_v48 = vld [vmem:[#allocation2 + $0x48] sm:$0xff]  ;;  %v7142_v59 = vunpack.i.h.bf16 %v12863_v32 }
 0x1e4   : > { %v9674_v18 = vsel %vm278_vm0, %v8543_v48, %v6911_v51  ;;  %v1814_v23 = vsel %vm324_vm3, %v1782_v12, %v6981_v9  ;;  %v7141_v30 = vunpack.i.l.bf16 %v12863_v32  ;;  %v12864_v51 = vld [vmem:[#allocation24_spill] sm:$0xff] }
 0x1e5   : > { %v7455_v21 = vpop.permute.xlu1 %7454  ;;  %v1847_v53 = vsel %vm1844_vm4, %v1814_v23, %v7061_v63  ;;  %v1848_v9 = vsel %vm1844_vm4, %v1815_v49, %v7062_v1  ;;  %v7461_v1 = vunpack.i.l.bf16 %v9560_v19  ;;  %v12867_v32 = vld [vmem:[#allocation20_spill] sm:$0xff] }
 0x1e6   : > { %v7457_v43 = vunpack.i.h.bf16 %v7455_v21  ;;  %v7456_v5 = vunpack.i.l.bf16 %v7455_v21  ;;  %v6956_v21 = vunpack.i.l.bf16 %v9146_v33  ;;  %v1881_v25 = vsel %vm1877_vm5, %v1848_v9, %v7142_v59 }
 0x1e7   : > { %v9647_v35 = vpop.permute.xlu0 %7464  ;;  %v6992_v59 = vunpack.i.h.bf16 %v12867_v32  ;;  %v6991_v19 = vunpack.i.l.bf16 %v12867_v32 }
 0x1e8   : > { %v2010_v10 = vsel %vm2009_vm10, %v1977_v46, %v7456_v5  ;;  %v2011_v4 = vsel %vm2009_vm10, %v1978_v2, %v7457_v43  ;;  %v6986_v5 = vunpack.i.l.bf16 %v9170_v20  ;;  %v7032_v46 = vunpack.i.h.bf16 %v12864_v51 }
 0x1e9   : > { %v2042_v26 = vpack.c.bf16 %v2011_v4, %v2010_v10  ;;  %v7031_v2 = vunpack.i.l.bf16 %v12864_v51  ;;  %v12865_v10 = vld [vmem:[#allocation39_spill] sm:$0xff]  ;;  %v1880_v20 = vsel %vm1877_vm5, %v1847_v53, %v7141_v30  ;;  %v12868_v51 = vld [vmem:[#allocation22_spill] sm:$0xff]  ;;  %v12869_v53 = vld [vmem:[#allocation29_spill] sm:$0xff] }
 0x1ea   : > { %v7222_v4 = vunpack.i.h.bf16 %v12865_v10  ;;  %v7221_v44 = vunpack.i.l.bf16 %v12865_v10  ;;  %v1816_v48 = vsel %vm324_vm3, %v1784_v54, %v6986_v5  ;;  %v7066_v9 = vunpack.i.l.bf16 %v12869_v53 }
 0x1eb   : > { %6661 = vmatmul.msk.bf16.vlgmr.msra.gmra.mxu0 %vm2082_vm11, %v2042_v26  ;;  %v7301_v26 = vunpack.i.l.bf16 %v12866_v7 }
 0x1ec   : > { %v1913_v23 = vsel %vm1910_vm6, %v1880_v20, %v7221_v44  ;;  %v1914_v49 = vsel %vm1910_vm6, %v1881_v25, %v7222_v4  ;;  %v1835_v4 = vsel %vm324_vm3, %v1803_v41, %v7032_v46  ;;  %v1834_v44 = vsel %vm324_vm3, %v1802_v50, %v7031_v2  ;;  %v12871_v20 = vld [vmem:[#allocation28_spill] sm:$0xff]  ;;  %v12873_v2 = vld [vmem:[#allocation33_spill] sm:$0xff] }
 0x1ed   : > { %v9682_v43 = vpop.permute.xlu1 %7469  ;;  %v1947_v30 = vsel %vm1943_vm7, %v1914_v49, %v7302_v27  ;;  %v7117_v25 = vunpack.i.h.bf16 %v12871_v20  ;;  %v1849_v50 = vsel %vm1844_vm4, %v1816_v48, %v7066_v9  ;;  %v12875_v48 = vld [vmem:[#allocation53_spill] sm:$0xff] }
 0x1ee   : > { %v1980_v10 = vsel %vm1976_vm8, %v1947_v30, %v7382_v55  ;;  %v12874_v30 = vld [vmem:[#allocation35_spill] sm:$0xff]  ;;  %v7272_v9 = vunpack.i.h.bf16 %v12875_v48  ;;  %v7271_v8 = vunpack.i.l.bf16 %v12875_v48 }
 0x1ef   : > { %v7480_v12 = vpop.permute.xlu0 %7479  ;;  %v2013_v7 = vsel %vm2009_vm10, %v1980_v10, %v7462_v58  ;;  %v7111_v58 = vunpack.i.l.bf16 %v12873_v2 }
 0x1f0   : > { %v7482_v15 = vunpack.i.h.bf16 %v7480_v12  ;;  %v7481_v34 = vunpack.i.l.bf16 %v7480_v12 }
 0x1f2   : > { %v9702_v63 = vsel %vm2009_vm10, %v9452_v22, %v7481_v34  ;;  %v9706_v16 = vsel %vm2009_vm10, %v9455_v29, %v7482_v15  ;;  %v1946_v22 = vsel %vm1943_vm7, %v1913_v23, %v7301_v26  ;;  %v7072_v29 = vunpack.i.h.bf16 %v12868_v51  ;;  %v12870_v26 = vld [vmem:[#allocation26_spill] sm:$0xff] }
 0x1f3   : > { %v1979_v5 = vsel %vm1976_vm8, %v1946_v22, %v7381_v14  ;;  %v7037_v27 = vunpack.i.h.bf16 %v12870_v26  ;;  %v7036_v15 = vunpack.i.l.bf16 %v12870_v26  ;;  %v7067_v34 = vunpack.i.h.bf16 %v12869_v53  ;;  %v12872_v14 = vld [vmem:[#allocation31_spill] sm:$0xff] }
 0x1f4   : > { %v2012_v12 = vsel %vm2009_vm10, %v1979_v5, %v7461_v1  ;;  %v7147_v49 = vunpack.i.h.bf16 %v12872_v14  ;;  %v7146_v55 = vunpack.i.l.bf16 %v12872_v14  ;;  %v7112_v1 = vunpack.i.h.bf16 %v12873_v2  ;;  %v12879_v26 = vld [vmem:[#allocation43_spill] sm:$0xff] }
 0x1f5   : > { %v9719_v54 = vpop.permute.xlu1 %7484  ;;  %v2043_v22 = vpack.c.bf16 %v2013_v7, %v2012_v12  ;;  %v7192_v5 = vunpack.i.h.bf16 %v12874_v30  ;;  %v7191_v53 = vunpack.i.l.bf16 %v12874_v30  ;;  %v7431_v2 = vunpack.i.l.bf16 %v9493_v47 }
 0x1f6   : > { %v1882_v7 = vsel %vm1877_vm5, %v1849_v50, %v7146_v55  ;;  %v12876_v50 = vld [vmem:[#allocation47_spill] sm:$0xff] }
 0x1f7   : > { %v7495_v23 = vpop.permute.xlu0 %7494 }
 0x1f8   : > { %v7497_v41 = vunpack.i.h.bf16 %v7495_v23  ;;  %v7496_v46 = vunpack.i.l.bf16 %v7495_v23  ;;  %v1850_v23 = vsel %vm1844_vm4, %v1817_v42, %v7067_v34  ;;  %v1868_v42 = vsel %vm1844_vm4, %v1835_v4, %v7112_v1 }
 0x1f9   : > { %v7432_v34 = vunpack.i.h.bf16 %v9493_v47  ;;  %v1901_v55 = vsel %vm1877_vm5, %v1868_v42, %v7192_v5  ;;  %v12878_v5 = vld [vmem:[#allocation61_spill] sm:$0xff] }
 0x1fa   : > { %v9740_v10 = vsel %vm2009_vm10, %v9478_v61, %v7496_v46  ;;  %v9744_v14 = vsel %vm2009_vm10, %v9481_v40, %v7497_v41  ;;  %v1883_v61 = vsel %vm1877_vm5, %v1850_v23, %v7147_v49  ;;  %v7352_v46 = vunpack.i.h.bf16 %v9449_v17 }
 0x1fb   : > { %6662 = vmatmul.msk.bf16.gmra.mxu0 %vm2082_vm11, %v2043_v22  ;;  %v7351_v40 = vunpack.i.l.bf16 %v9449_v17  ;;  %v1867_v41 = vsel %vm1844_vm4, %v1834_v44, %v7111_v58  ;;  %v7227_v49 = vunpack.i.h.bf16 %v12876_v50  ;;  %v7226_v23 = vunpack.i.l.bf16 %v12876_v50  ;;  %v12877_v58 = vld [vmem:[#allocation59_spill] sm:$0xff] }
 0x1fc   : > { %v1900_v30 = vsel %vm1877_vm5, %v1867_v41, %v7191_v53  ;;  %v1934_v44 = vsel %vm1910_vm6, %v1901_v55, %v7272_v9  ;;  %v7307_v4 = vunpack.i.h.bf16 %v12877_v58  ;;  %v7306_v1 = vunpack.i.l.bf16 %v12877_v58 }
 0x1fd   : > { %v9760_v22 = vpop.permute.xlu1 %7499  ;;  %v1933_v17 = vsel %vm1910_vm6, %v1900_v30, %v7271_v8  ;;  %v1967_v12 = vsel %vm1943_vm7, %v1934_v44, %v7352_v46  ;;  %v7387_v42 = vunpack.i.h.bf16 %v12878_v5  ;;  %v7386_v62 = vunpack.i.l.bf16 %v12878_v5  ;;  %v12880_v5 = vld [vmem:[#allocation37_spill] sm:$0xff] }
 0x1fe   : > { %v1966_v47 = vsel %vm1943_vm7, %v1933_v17, %v7351_v40  ;;  %v2000_v8 = vsel %vm1976_vm8, %v1967_v12, %v7432_v34  ;;  %v7467_v9 = vunpack.i.h.bf16 %v9647_v35  ;;  %v7466_v30 = vunpack.i.l.bf16 %v9647_v35  ;;  %v8545_v34 = vld [vmem:[#allocation2 + $0x120] sm:$0xff] }
 0x1ff   : > { %v7510_v48 = vpop.permute.xlu0 %7509  ;;  %v1999_v50 = vsel %vm1976_vm8, %v1966_v47, %v7431_v2  ;;  %v7116_v46 = vunpack.i.l.bf16 %v12871_v20  ;;  %v1915_v17 = vsel %vm1910_vm6, %v1882_v7, %v7226_v23  ;;  %v1916_v44 = vsel %vm1910_vm6, %v1883_v61, %v7227_v49 }
 0x200   : > { %v7512_v53 = vunpack.i.h.bf16 %v7510_v48  ;;  %v7511_v41 = vunpack.i.l.bf16 %v7510_v48  ;;  %v8544_v48 = vld [vmem:[#allocation2 + $0x128] sm:$0xff]  ;;  %v1804_v35 = vsel %vm278_vm0, %v8545_v34, %v6956_v21  ;;  %v1948_v2 = vsel %vm1943_vm7, %v1915_v17, %v7306_v1 }
 0x201   : > { %v1805_v12 = vsel %vm278_vm0, %v8544_v48, %v6957_v45  ;;  %v1949_v47 = vsel %vm1943_vm7, %v1916_v44, %v7307_v4  ;;  %v1818_v7 = vsel %vm324_vm3, %v9674_v18, %v6991_v19  ;;  %v1819_v61 = vsel %vm324_vm3, %v9671_v13, %v6992_v59  ;;  %v9799_v45 = vpop.permute.xlu2 %7489  ;;  %v12883_v34 = vld [vmem:[#allocation49_spill] sm:$0xff] }
 0x202   : > { %v2032_v55 = vsel %vm2009_vm10, %v1999_v50, %v7511_v41  ;;  %v2033_v40 = vsel %vm2009_vm10, %v2000_v8, %v7512_v53  ;;  %v1981_v21 = vsel %vm1976_vm8, %v1948_v2, %v7386_v62  ;;  %v1982_v49 = vsel %vm1976_vm8, %v1949_v47, %v7387_v42  ;;  %v12881_v50 = vld [vmem:[#allocation55_spill] sm:$0xff] }
 0x203   : > { %v2053_v58 = vpack.c.bf16 %v2033_v40, %v2032_v55  ;;  %v1836_v23 = vsel %vm324_vm3, %v1804_v35, %v7036_v15  ;;  %v1837_v18 = vsel %vm324_vm3, %v1805_v12, %v7037_v27  ;;  %v2014_v32 = vsel %vm2009_vm10, %v1981_v21, %v7466_v30 }
 0x204   : > { %v2015_v13 = vsel %vm2009_vm10, %v1982_v49, %v7467_v9  ;;  %v1852_v59 = vsel %vm1844_vm4, %v1819_v61, %v7072_v29  ;;  %v7071_v62 = vunpack.i.l.bf16 %v12868_v51  ;;  %v1869_v19 = vsel %vm1844_vm4, %v1836_v23, %v7116_v46  ;;  %v12882_v9 = vld [vmem:[#allocation58_spill] sm:$0xff] }
 0x205   : > { %6672 = vmatmul.msk.bf16.vlgmr.msra.gmra.mxu3 %vm2082_vm11, %v2053_v58  ;;  %v7515_v33 = vpop.permute.xlu1 %7514  ;;  %v1870_v15 = vsel %vm1844_vm4, %v1837_v18, %v7117_v25  ;;  %v7197_v1 = vunpack.i.h.bf16 %v12879_v26  ;;  %v7196_v27 = vunpack.i.l.bf16 %v12879_v26  ;;  %v7152_v42 = vunpack.i.h.bf16 %v12880_v5  ;;  %v12884_v18 = vld [vmem:[#allocation51_spill] sm:$0xff] }
 0x206   : > { %v7277_v8 = vunpack.i.h.bf16 %v12881_v50  ;;  %v7276_v29 = vunpack.i.l.bf16 %v12881_v50  ;;  %v2044_v51 = vpack.c.bf16 %v2015_v13, %v2014_v32  ;;  %v7357_v30 = vunpack.i.h.bf16 %v12882_v9 }
 0x207   : > { %v7525_v4 = vpop.permute.xlu0 %7524  ;;  %v7356_v20 = vunpack.i.l.bf16 %v12882_v9  ;;  %v7151_v40 = vunpack.i.l.bf16 %v12880_v5  ;;  %v7437_v46 = vunpack.i.h.bf16 %v9580_v39  ;;  %v7436_v17 = vunpack.i.l.bf16 %v9580_v39 }
 0x208   : > { %v7527_v53 = vunpack.i.h.bf16 %v7525_v4  ;;  %v7526_v41 = vunpack.i.l.bf16 %v7525_v4  ;;  %v1902_v58 = vsel %vm1877_vm5, %v1869_v19, %v7196_v27  ;;  %v7517_v48 = vunpack.i.h.bf16 %v7515_v33 }
 0x209   : > { %v7516_v12 = vunpack.i.l.bf16 %v7515_v33  ;;  %v7231_v35 = vunpack.i.l.bf16 %v12883_v34  ;;  %v1935_v2 = vsel %vm1910_vm6, %v1902_v58, %v7276_v29  ;;  %v7312_v32 = vunpack.i.h.bf16 %v12884_v18  ;;  %v9851_v33 = vpop.permute.xlu2 %7504 }
 0x20a   : > { %v9829_v25 = vsel %vm2009_vm10, %v9544_v38, %v7526_v41  ;;  %v9833_v55 = vsel %vm2009_vm10, %v9547_v11, %v7527_v53  ;;  %v1903_v38 = vsel %vm1877_vm5, %v1870_v15, %v7197_v1  ;;  %v7232_v11 = vunpack.i.h.bf16 %v12883_v34 }
 0x20b   : > { %6663 = vmatmul.msk.bf16.gmra.mxu0 %vm2082_vm11, %v2044_v51  ;;  %v2056_v44 = vpack.c.bf16 %v9833_v55, %v9829_v25  ;;  %v1936_v47 = vsel %vm1910_vm6, %v1903_v38, %v7277_v8  ;;  %v1968_v61 = vsel %vm1943_vm7, %v1935_v2, %v7356_v20  ;;  %v7311_v13 = vunpack.i.l.bf16 %v12884_v18  ;;  %v12888_v2 = vld [vmem:[#allocation45_spill] sm:$0xff]  ;;  %v12895_v25 = vld [vmem:[#allocation38_spill] sm:$0xff] }
 0x20c   : > { %v1969_v21 = vsel %vm1943_vm7, %v1936_v47, %v7357_v30  ;;  %v2001_v19 = vsel %vm1976_vm8, %v1968_v61, %v7436_v17  ;;  %v1851_v53 = vsel %vm1844_vm4, %v1818_v7, %v7071_v62  ;;  %v7392_v41 = vunpack.i.h.bf16 %v9522_v6  ;;  %v12885_v62 = vld [vmem:[#allocation17_spill] sm:$0xff]  ;;  %v8547_v61 = vld [vmem:[#allocation2 + $0x138] sm:$0xff] }
 0x20d   : > { %v7530_v39 = vpop.permute.xlu1 %7529  ;;  %v2002_v15 = vsel %vm1976_vm8, %v1969_v21, %v7437_v46  ;;  %v2034_v4 = vsel %vm2009_vm10, %v2001_v19, %v7516_v12  ;;  %v7391_v5 = vunpack.i.l.bf16 %v9522_v6  ;;  %v1885_v8 = vsel %vm1877_vm5, %v1852_v59, %v7152_v42 }
 0x20e   : > { %v7532_v49 = vunpack.i.h.bf16 %v7530_v39  ;;  %v7531_v23 = vunpack.i.l.bf16 %v7530_v39  ;;  %v2035_v26 = vsel %vm2009_vm10, %v2002_v15, %v7517_v48  ;;  %v1884_v29 = vsel %vm1877_vm5, %v1851_v53, %v7151_v40  ;;  %v12887_v48 = vld [vmem:[#allocation34_spill] sm:$0xff] }
 0x20f   : > { %v7471_v51 = vunpack.i.l.bf16 %v9682_v43  ;;  %v1918_v9 = vsel %vm1910_vm6, %v1885_v8, %v7232_v11  ;;  %v2054_v7 = vpack.c.bf16 %v2035_v26, %v2034_v4  ;;  %v6962_v30 = vunpack.i.h.bf16 %v12885_v62  ;;  %v8546_v11 = vld [vmem:[#allocation2 + $0x140] sm:$0xff] }
 0x210   : > { %v9859_v1 = vsel %vm2009_vm10, %v9626_v24, %v7531_v23  ;;  %v9863_v27 = vsel %vm2009_vm10, %v9629_v37, %v7532_v49  ;;  %v7472_v24 = vunpack.i.h.bf16 %v9682_v43  ;;  %v1917_v37 = vsel %vm1910_vm6, %v1884_v29, %v7231_v35  ;;  %v12886_v43 = vld [vmem:[#allocation19_spill] sm:$0xff]  ;;  %v12889_v49 = vld [vmem:[#allocation48_spill] sm:$0xff] }
 0x211   : > { %v2057_v50 = vpack.c.bf16 %v9863_v27, %v9859_v1  ;;  %v1950_v6 = vsel %vm1943_vm7, %v1917_v37, %v7311_v13  ;;  %v1951_v20 = vsel %vm1943_vm7, %v1918_v9, %v7312_v32  ;;  %v6961_v46 = vunpack.i.l.bf16 %v12885_v62  ;;  %v7520_v32 = vpop.permute.xlu2 %7519  ;;  %v12900_v27 = vld [vmem:[#allocation30_spill] sm:$0xff] }
 0x212   : > { %v1983_v59 = vsel %vm1976_vm8, %v1950_v6, %v7391_v5  ;;  %v1984_v42 = vsel %vm1976_vm8, %v1951_v20, %v7392_v41  ;;  %v7042_v40 = vunpack.i.h.bf16 %v12886_v43  ;;  %v7041_v17 = vunpack.i.l.bf16 %v12886_v43 }
 0x213   : > { %v2016_v58 = vsel %vm2009_vm10, %v1983_v59, %v7471_v51  ;;  %v2017_v38 = vsel %vm2009_vm10, %v1984_v42, %v7472_v24  ;;  %v7122_v12 = vunpack.i.h.bf16 %v12887_v48  ;;  %v7121_v34 = vunpack.i.l.bf16 %v12887_v48  ;;  %v12891_v42 = vld [vmem:[#allocation12_spill] sm:$0xff] }
 0x214   : > { %v1807_v35 = vsel %vm278_vm0, %v8546_v11, %v6962_v30  ;;  %v7202_v47 = vunpack.i.h.bf16 %v12888_v2  ;;  %v7201_v39 = vunpack.i.l.bf16 %v12888_v2  ;;  %v1806_v21 = vsel %vm278_vm0, %v8547_v61, %v6961_v46 }
 0x215   : > { %6673 = vmatmul.msk.bf16.gmra.mxu3 %vm2082_vm11, %v2054_v7  ;;  %v7282_v23 = vunpack.i.h.bf16 %v12889_v49  ;;  %v7281_v18 = vunpack.i.l.bf16 %v12889_v49  ;;  %v2045_v13 = vpack.c.bf16 %v2017_v38, %v2016_v58  ;;  %v1839_v19 = vsel %vm324_vm3, %v1807_v35, %v7042_v40  ;;  %v12893_v58 = vld [vmem:[#allocation21_spill] sm:$0xff]  ;;  %v8549_v35 = vld [vmem:[#allocation2 + $0x90] sm:$0xff] }
 0x216   : > { %v1838_v15 = vsel %vm324_vm3, %v1806_v21, %v7041_v17  ;;  %v7362_v4 = vunpack.i.h.bf16 %v9465_v28  ;;  %v7361_v26 = vunpack.i.l.bf16 %v9465_v28  ;;  %v1872_v53 = vsel %vm1844_vm4, %v1839_v19, %v7122_v12  ;;  %v12897_v21 = vld [vmem:[#allocation54_spill] sm:$0xff] }
 0x217   : > { %v1871_v41 = vsel %vm1844_vm4, %v1838_v15, %v7121_v34  ;;  %v7442_v5 = vunpack.i.h.bf16 %v9607_v0  ;;  %v7441_v8 = vunpack.i.l.bf16 %v9607_v0  ;;  %v1905_v24 = vsel %vm1877_vm5, %v1872_v53, %v7202_v47  ;;  %v8548_v34 = vld [vmem:[#allocation2 + $0x98] sm:$0xff] }
 0x218   : > { %v1904_v29 = vsel %vm1877_vm5, %v1871_v41, %v7201_v39  ;;  %v7522_v51 = vunpack.i.h.bf16 %v7520_v32  ;;  %v7521_v37 = vunpack.i.l.bf16 %v7520_v32  ;;  %v1938_v28 = vsel %vm1910_vm6, %v1905_v24, %v7282_v23 }
 0x219   : > { %v1937_v9 = vsel %vm1910_vm6, %v1904_v29, %v7281_v18  ;;  %v1971_v62 = vsel %vm1943_vm7, %v1938_v28, %v7362_v4  ;;  %v12890_v59 = vpack.c.bf16 %v9574_v60, %v9571_v3  ;;  %v6927_v43 = vunpack.i.h.bf16 %v12891_v42  ;;  %v12894_v60 = vld [vmem:[#allocation25_spill] sm:$0xff] }
 0x21a   : > { %v1970_v7 = vsel %vm1943_vm7, %v1937_v9, %v7361_v26  ;;  %v2004_v0 = vsel %vm1976_vm8, %v1971_v62, %v7442_v5  ;;  %v6926_v40 = vunpack.i.l.bf16 %v12891_v42  ;;  %v12892_v17 = vpack.c.bf16 %v9706_v16, %v9702_v63  ;;  %v12896_v16 = vld [vmem:[#allocation50_spill] sm:$0xff]  ;;  %v12898_v9 = vld [vmem:[#allocation13_spill] sm:$0xff]  ;;  %v12899_v62 = vld [vmem:[#allocation16_spill] sm:$0xff] }
 0x21b   : > { %6664 = vmatmul.msk.bf16.gmra.mxu0 %vm2082_vm11, %v2045_v13  ;;  %v2003_v30 = vsel %vm1976_vm8, %v1970_v7, %v7441_v8  ;;  %v2037_v20 = vsel %vm2009_vm10, %v2004_v0, %v7522_v51  ;;  %v7007_v38 = vunpack.i.h.bf16 %v12893_v58  ;;  %v7006_v3 = vunpack.i.l.bf16 %v12893_v58 }
 0x21c   : > { %v2036_v6 = vsel %vm2009_vm10, %v2003_v30, %v7521_v37  ;;  %v7087_v48 = vunpack.i.h.bf16 %v12894_v60  ;;  %v7086_v12 = vunpack.i.l.bf16 %v12894_v60  ;;  %v7167_v55 = vunpack.i.h.bf16 %v12895_v25 }
 0x21d   : > { %v2055_v46 = vpack.c.bf16 %v2037_v20, %v2036_v6  ;;  %v1793_v11 = vsel %vm278_vm0, %v8548_v34, %v6927_v43  ;;  %v1792_v63 = vsel %vm278_vm0, %v8549_v35, %v6926_v40  ;;  %v7247_v2 = vunpack.i.h.bf16 %v12896_v16  ;;  %v8550_v6 = vld [vmem:[#allocation2 + $0xb0] sm:$0xff]  ;;  %v8551_v43 = vld [vmem:[#allocation2 + $0xa8] sm:$0xff] }
 0x21e   : > { %v7246_v47 = vunpack.i.l.bf16 %v12896_v16  ;;  %v1824_v39 = vsel %vm324_vm3, %v1792_v63, %v7006_v3  ;;  %v1825_v61 = vsel %vm324_vm3, %v1793_v11, %v7007_v38  ;;  %v7327_v49 = vunpack.i.h.bf16 %v12897_v21 }
 0x21f   : > { %v7326_v23 = vunpack.i.l.bf16 %v12897_v21  ;;  %v1857_v18 = vsel %vm1844_vm4, %v1824_v39, %v7086_v12  ;;  %v1858_v32 = vsel %vm1844_vm4, %v1825_v61, %v7087_v48  ;;  %v7407_v13 = vunpack.i.h.bf16 %v9553_v36  ;;  %v12903_v48 = vld [vmem:[#allocation60_spill] sm:$0xff] }
 0x220   : > { %v7406_v19 = vunpack.i.l.bf16 %v9553_v36  ;;  %v1891_v4 = vsel %vm1877_vm5, %v1858_v32, %v7167_v55  ;;  %v7487_v26 = vunpack.i.h.bf16 %v9719_v54  ;;  %v7486_v53 = vunpack.i.l.bf16 %v9719_v54 }
 0x221   : > { %v1924_v5 = vsel %vm1910_vm6, %v1891_v4, %v7247_v2  ;;  %v6932_v28 = vunpack.i.h.bf16 %v12898_v9  ;;  %v6931_v7 = vunpack.i.l.bf16 %v12898_v9  ;;  %v7012_v30 = vunpack.i.h.bf16 %v12899_v62  ;;  %v12905_v4 = vld [vmem:[#allocation14_spill] sm:$0xff]  ;;  %v8552_v9 = vld [vmem:[#allocation2 + $0xe0] sm:$0xff] }
 0x222   : > { %v1957_v29 = vsel %vm1943_vm7, %v1924_v5, %v7327_v49  ;;  %v7011_v1 = vunpack.i.l.bf16 %v12899_v62  ;;  %v7091_v0 = vunpack.i.l.bf16 %v12900_v27  ;;  %v7332_v12 = vunpack.i.h.bf16 %v12903_v48 }
 0x223   : > { %v1990_v24 = vsel %vm1976_vm8, %v1957_v29, %v7407_v13  ;;  %v1795_v20 = vsel %vm278_vm0, %v8550_v6, %v6932_v28  ;;  %v1794_v40 = vsel %vm278_vm0, %v8551_v43, %v6931_v7  ;;  %v12904_v55 = vmov 0.0   ;;  %v10042_v13 = vld [vmem:[%s12655_s2] ss:$0 sm:$0xff]  ;;  %v12909_v7 = vld [vmem:[#allocation41_spill] sm:$0xff] }
 0x224   : > { %v2023_v54 = vsel %vm2009_vm10, %v1990_v24, %v7487_v26  ;;  %v1827_v3 = vsel %vm324_vm3, %v1795_v20, %v7012_v30  ;;  %v1826_v60 = vsel %vm324_vm3, %v1794_v40, %v7011_v1  ;;  %353 = vst.msk [vmem:[#allocation3 + $0x29] sm:$0x1] %vm333_vm12, %v12904_v55  ;;  %v7412_v11 = vunpack.i.h.bf16 %v9562_v31  ;;  %v12908_v24 = vld [vmem:[#allocation27_spill] sm:$0xff] }
 0x225   : > { %6674 = vmatmul.msk.bf16.gmra.mxu3 %vm2082_vm11, %v2055_v46  ;;  %v12901_v46 = vld [vmem:[#allocation40_spill] sm:$0xff]  ;;  %v1859_v34 = vsel %vm1844_vm4, %v1826_v60, %v7091_v0  ;;  %v7411_v35 = vunpack.i.l.bf16 %v9562_v31  ;;  %334 = vst.msk [vmem:[#allocation3] sm:$0x1] %vm333_vm12, %v12904_v55  ;;  %v7492_v2 = vunpack.i.h.bf16 %v9799_v45  ;;  %v6942_v26 = vunpack.i.h.bf16 %v12905_v4 }
 0x226   : > { %v7171_v42 = vunpack.i.l.bf16 %v12901_v46  ;;  %335 = vst.msk [vmem:[#allocation3 + $0x18] sm:$0x1] %vm333_vm12, %v12904_v55  ;;  %v12907_v29 = vpack.c.bf16 %v9744_v14, %v9740_v10  ;;  %v8553_v14 = vld [vmem:[#allocation2 + $0xd8] sm:$0xff]  ;;  %v7182_v62 = vunpack.i.h.bf16 %v12909_v7  ;;  %v7181_v30 = vunpack.i.l.bf16 %v12909_v7 }
 0x227   : > { %336 = vst.msk [vmem:[#allocation3 + $0x30] sm:$0x1] %vm333_vm12, %v12904_v55  ;;  %v1799_v10 = vsel %vm278_vm0, %v8552_v9, %v6942_v26  ;;  %v8555_v9 = vld [vmem:[#allocation2 + $0xf0] sm:$0xff] }
 0x228   : > { %v1892_v63 = vsel %vm1877_vm5, %v1859_v34, %v7171_v42  ;;  %337 = vst.msk [vmem:[#allocation3 + $0x48] sm:$0x1] %vm333_vm12, %v12904_v55 }
 0x229   : > { %338 = vst.msk [vmem:[#allocation3 + $0x60] sm:$0x1] %vm333_vm12, %v12904_v55 }
 0x22a   : > { %339 = vst.msk [vmem:[#allocation3 + $0x78] sm:$0x1] %vm333_vm12, %v12904_v55 }
 0x22b   : > { %6665 = vmatmul.msk.bf16.gmra.mxu0 %vm2082_vm11, %v12890_v59  ;;  %v7172_v59 = vunpack.i.h.bf16 %v12901_v46  ;;  %340 = vst.msk [vmem:[#allocation3 + $0x90] sm:$0x1] %vm333_vm12, %v12904_v55  ;;  %v12911_v46 = vld [vmem:[#allocation56_spill] sm:$0xff] }
 0x22c   : > { %341 = vst.msk [vmem:[#allocation3 + $0xa8] sm:$0x1] %vm333_vm12, %v12904_v55  ;;  %v7341_v42 = vunpack.i.l.bf16 %v12911_v46 }
 0x22d   : > { %342 = vst.msk [vmem:[#allocation3 + $0xc0] sm:$0x1] %vm333_vm12, %v12904_v55 }
 0x22e   : > { %343 = vst.msk [vmem:[#allocation3 + $0xd8] sm:$0x1] %vm333_vm12, %v12904_v55 }
 0x22f   : > { %344 = vst.msk [vmem:[#allocation3 + $0xf0] sm:$0x1] %vm333_vm12, %v12904_v55 }
 0x230   : > { %345 = vst.msk [vmem:[#allocation3 + $0x108] sm:$0x1] %vm333_vm12, %v12904_v55 }
 0x231   : > { %346 = vst.msk [vmem:[#allocation3 + $0x120] sm:$0x1] %vm333_vm12, %v12904_v55 }
 0x232   : > { %347 = vst.msk [vmem:[#allocation3 + $0x138] sm:$0x1] %vm333_vm12, %v12904_v55 }
 0x233   : > { %348 = vst.msk [vmem:[#allocation3 + $0x150] sm:$0x1] %vm333_vm12, %v12904_v55 }
 0x234   : > { %349 = vst.msk [vmem:[#allocation3 + $0x168] sm:$0x1] %vm333_vm12, %v12904_v55 }
 0x235   : > { %6675 = vmatmul.msk.bf16.gmra.mxu3 %vm2082_vm11, %v2056_v44  ;;  %v7166_v44 = vunpack.i.l.bf16 %v12895_v25  ;;  %v7331_v25 = vunpack.i.l.bf16 %v12903_v48  ;;  %350 = vst.msk [vmem:[#allocation3 + $0x180] sm:$0x1] %vm333_vm12, %v12904_v55  ;;  %v7502_v48 = vunpack.i.h.bf16 %v9760_v22 }
 0x236   : > { %351 = vst.msk [vmem:[#allocation3 + $0x198] sm:$0x1] %vm333_vm12, %v12904_v55 }
 0x237   : > { %v1890_v15 = vsel %vm1877_vm5, %v1857_v18, %v7166_v44  ;;  %354 = vst.msk [vmem:[#allocation3 + $0x41] sm:$0x1] %vm333_vm12, %v12904_v55 }
 0x238   : > { %v1923_v41 = vsel %vm1910_vm6, %v1890_v15, %v7246_v47  ;;  %v7491_v47 = vunpack.i.l.bf16 %v9799_v45  ;;  %355 = vst.msk [vmem:[#allocation3 + $0x59] sm:$0x1] %vm333_vm12, %v12904_v55 }
 0x239   : > { %v1956_v8 = vsel %vm1943_vm7, %v1923_v41, %v7326_v23  ;;  %356 = vst.msk [vmem:[#allocation3 + $0x71] sm:$0x1] %vm333_vm12, %v12904_v55  ;;  %v12906_v41 = vld [vmem:[#allocation23_spill] sm:$0xff] }
 0x23a   : > { %v1989_v36 = vsel %vm1976_vm8, %v1956_v8, %v7406_v19  ;;  %357 = vst.msk [vmem:[#allocation3 + $0x89] sm:$0x1] %vm333_vm12, %v12904_v55  ;;  %v7021_v5 = vunpack.i.l.bf16 %v12906_v41 }
 0x23b   : > { %6666 = vmatmul.msk.bf16.gmra.mxu0 %vm2082_vm11, %v12892_v17  ;;  %v2022_v51 = vsel %vm2009_vm10, %v1989_v36, %v7486_v53  ;;  %v12902_v17 = vld [vmem:[#allocation44_spill] sm:$0xff]  ;;  %358 = vst.msk [vmem:[#allocation3 + $0xa1] sm:$0x1] %vm333_vm12, %v12904_v55  ;;  %v6941_v53 = vunpack.i.l.bf16 %v12905_v4  ;;  %v7022_v36 = vunpack.i.h.bf16 %v12906_v41 }
 0x23c   : > { %v2048_v37 = vpack.c.bf16 %v2023_v54, %v2022_v51  ;;  %v7252_v58 = vunpack.i.h.bf16 %v12902_v17  ;;  %v7251_v38 = vunpack.i.l.bf16 %v12902_v17  ;;  %359 = vst.msk [vmem:[#allocation3 + $0xb9] sm:$0x1] %vm333_vm12, %v12904_v55  ;;  %v7101_v51 = vunpack.i.l.bf16 %v12908_v24 }
 0x23d   : > { %360 = vst.msk [vmem:[#allocation3 + $0xd1] sm:$0x1] %vm333_vm12, %v12904_v55  ;;  %v7102_v54 = vunpack.i.h.bf16 %v12908_v24  ;;  %v1798_v28 = vsel %vm278_vm0, %v8553_v14, %v6941_v53  ;;  %v1831_v6 = vsel %vm324_vm3, %v1799_v10, %v7022_v36  ;;  %v7422_v17 = vunpack.i.h.bf16 %v9564_v56  ;;  %v12915_v24 = vld [vmem:[#allocation42_spill] sm:$0xff] }
 0x23e   : > { %v1925_v39 = vsel %vm1910_vm6, %v1892_v63, %v7251_v38  ;;  %361 = vst.msk [vmem:[#allocation3 + $0xe9] sm:$0x1] %vm333_vm12, %v12904_v55  ;;  %v1830_v1 = vsel %vm324_vm3, %v1798_v28, %v7021_v5  ;;  %v12916_v28 = vld [vmem:[#allocation46_spill] sm:$0xff] }
 0x23f   : > { %v1958_v31 = vsel %vm1943_vm7, %v1925_v39, %v7331_v25  ;;  %362 = vst.msk [vmem:[#allocation3 + $0x101] sm:$0x1] %vm333_vm12, %v12904_v55  ;;  %v1863_v20 = vsel %vm1844_vm4, %v1830_v1, %v7101_v51  ;;  %v1864_v40 = vsel %vm1844_vm4, %v1831_v6, %v7102_v54  ;;  %v7187_v51 = vunpack.i.h.bf16 %v12915_v24 }
 0x240   : > { %v1991_v49 = vsel %vm1976_vm8, %v1958_v31, %v7411_v35  ;;  %363 = vst.msk [vmem:[#allocation3 + $0x119] sm:$0x1] %vm333_vm12, %v12904_v55  ;;  %v1897_v60 = vsel %vm1877_vm5, %v1864_v40, %v7182_v62  ;;  %v7186_v54 = vunpack.i.l.bf16 %v12915_v24  ;;  %v7267_v7 = vunpack.i.h.bf16 %v12916_v28 }
 0x241   : > { %v2024_v23 = vsel %vm2009_vm10, %v1991_v49, %v7491_v47  ;;  %364 = vst.msk [vmem:[#allocation3 + $0x131] sm:$0x1] %vm333_vm12, %v12904_v55  ;;  %v2385_v47 = vld [vmem:[#allocation3 + $0x1] sm:$0xff]  ;;  %v7266_v62 = vunpack.i.l.bf16 %v12916_v28  ;;  %v7507_v40 = vunpack.i.h.bf16 %v9851_v33 }
 0x242   : > { %365 = vst.msk [vmem:[#allocation3 + $0x149] sm:$0x1] %vm333_vm12, %v12904_v55 }
 0x243   : > { %328 = vst.msk [vmem:[#allocation3 + $0x10] sm:$0x3] %vm327_vm14, %v12904_v55 }
 0x244   : > { %332 = vst.msk [vmem:[#allocation3 + $0x1a8] sm:$0x3] %vm327_vm14, %v12904_v55 }
 0x245   : > { %6676 = vmatmul.msk.bf16.gmra.mxu3 %vm2082_vm11, %v2057_v50  ;;  %v7092_v50 = vunpack.i.h.bf16 %v12900_v27  ;;  %v12910_v27 = vld [vmem:[#allocation52_spill] sm:$0xff]  ;;  %352 = vst.msk [vmem:[#allocation3 + $0x11] sm:$0x1] %vm333_vm12, %v12904_v55 }
 0x246   : > { %v7261_v0 = vunpack.i.l.bf16 %v12910_v27  ;;  %366 = vst.msk [vmem:[#allocation3 + $0x161] sm:$0x1] %vm333_vm12, %v12904_v55 }
 0x247   : > { %v1860_v44 = vsel %vm1844_vm4, %v1827_v3, %v7092_v50  ;;  %v7262_v50 = vunpack.i.h.bf16 %v12910_v27  ;;  %v1896_v3 = vsel %vm1877_vm5, %v1863_v20, %v7181_v30  ;;  %367 = vst.msk [vmem:[#allocation3 + $0x179] sm:$0x1] %vm333_vm12, %v12904_v55  ;;  %v7347_v27 = vunpack.i.h.bf16 %v9433_v52 }
 0x248   : > { %v1893_v16 = vsel %vm1877_vm5, %v1860_v44, %v7172_v59  ;;  %v7342_v59 = vunpack.i.h.bf16 %v12911_v46  ;;  %v1929_v25 = vsel %vm1910_vm6, %v1896_v3, %v7261_v0  ;;  %368 = vst.msk [vmem:[#allocation3 + $0x191] sm:$0x1] %vm333_vm12, %v12904_v55  ;;  %v7427_v20 = vunpack.i.h.bf16 %v9568_v57 }
 0x249   : > { %v1926_v61 = vsel %vm1910_vm6, %v1893_v16, %v7252_v58  ;;  %v7421_v58 = vunpack.i.l.bf16 %v9564_v56  ;;  %v1930_v44 = vsel %vm1910_vm6, %v1897_v60, %v7262_v50  ;;  %v1962_v34 = vsel %vm1943_vm7, %v1929_v25, %v7341_v42  ;;  %369 = vst.msk [vmem:[#allocation3 + $0x1a9] sm:$0x1] %vm333_vm12, %v12904_v55  ;;  %v12914_v55 = vld [vmem:[#allocation32_spill] sm:$0xff] }
 0x24a   : > { %v1959_v21 = vsel %vm1943_vm7, %v1926_v61, %v7332_v12  ;;  %v7501_v12 = vunpack.i.l.bf16 %v9760_v22  ;;  %v2386_v39 = vld [vmem:[#allocation3 + $0x9] sm:$0xff]  ;;  %v7107_v26 = vunpack.i.h.bf16 %v12914_v55  ;;  %v7106_v53 = vunpack.i.l.bf16 %v12914_v55 }
 0x24b   : > { %6667 = vmatmul.msk.bf16.gmra.mxu0 %vm2082_vm11, %v2048_v37  ;;  %v1992_v45 = vsel %vm1976_vm8, %v1959_v21, %v7412_v11  ;;  %v1963_v11 = vsel %vm1943_vm7, %v1930_v44, %v7342_v59  ;;  %v1995_v35 = vsel %vm1976_vm8, %v1962_v34, %v7421_v58  ;;  %v7533_v31 = vpack.i.bf16 %v2386_v39, %v2385_v47 }
 0x24c   : > { %v2025_v18 = vsel %vm2009_vm10, %v1992_v45, %v7492_v2  ;;  %v1996_v63 = vsel %vm1976_vm8, %v1963_v11, %v7422_v17  ;;  %v2028_v16 = vsel %vm2009_vm10, %v1995_v35, %v7501_v12  ;;  %v12912_v45 = vld [vmem:[#allocation15_spill] sm:$0xff]  ;;  %v7346_v50 = vunpack.i.l.bf16 %v9433_v52 }
 0x24d   : > { %v2049_v32 = vpack.c.bf16 %v2025_v18, %v2024_v23  ;;  %v2029_v2 = vsel %vm2009_vm10, %v1996_v63, %v7502_v48  ;;  %v6947_v23 = vunpack.i.h.bf16 %v12912_v45  ;;  %7534 = vrot.lane.b32.xlu2 %v7533_v31, %s8644_s19  ;;  %v6946_v18 = vunpack.i.l.bf16 %v12912_v45 }
 0x24e   : > { %v2051_v49 = vpack.c.bf16 %v2029_v2, %v2028_v16  ;;  %v7426_v46 = vunpack.i.l.bf16 %v9568_v57  ;;  %v7506_v52 = vunpack.i.l.bf16 %v9851_v33 }
 0x24f   : > { %v1800_v10 = vsel %vm278_vm0, %v8555_v9, %v6946_v18 }
 0x25b   : > { %6668 = vmatmul.msk.bf16.gmra.mxu0 %vm2082_vm11, %v2049_v32  ;;  %v12913_v32 = vld [vmem:[#allocation18_spill] sm:$0xff] }
 0x25c   : > { %v7026_v4 = vunpack.i.l.bf16 %v12913_v32 }
 0x25e   : > { %v1832_v30 = vsel %vm324_vm3, %v1800_v10, %v7026_v4 }
 0x25f   : > { %v1865_v6 = vsel %vm1844_vm4, %v1832_v30, %v7106_v53 }
 0x260   : > { %v1898_v42 = vsel %vm1877_vm5, %v1865_v6, %v7186_v54 }
 0x261   : > { %v1931_v17 = vsel %vm1910_vm6, %v1898_v42, %v7266_v62 }
 0x262   : > { %v1964_v3 = vsel %vm1943_vm7, %v1931_v17, %v7346_v50 }
 0x263   : > { %v1997_v48 = vsel %vm1976_vm8, %v1964_v3, %v7426_v46 }
 0x264   : > { %v2030_v25 = vsel %vm2009_vm10, %v1997_v48, %v7506_v52 }
 0x268   : > { %v2144_v19 = vpop.f32.mrf.mxu0 }
 0x269   : > { %v2145_v15 = vadd.f32 %v10042_v13, %v2144_v19  ;;  %v7027_v19 = vunpack.i.h.bf16 %v12913_v32 }
 0x26b   : > { %vm2224_vm13 = vcmp.gt.f32.partialorder %v2145_v15, 0.0  ;;  %v2256_v8 = vmul.f32 0.2, %v2145_v15  ;;  %6669 = vmatmul.msk.bf16.gmra.mxu0 %vm2082_vm11, %v12907_v29  ;;  %v8554_v29 = vld [vmem:[#allocation2 + $0xf8] sm:$0xff] }
 0x26c   : > { %v1801_v36 = vsel %vm278_vm0, %v8554_v29, %v6947_v23 }
 0x26d   : > { %v2288_v37 = vsel %vm2224_vm13, %v2145_v15, %v2256_v8  ;;  %v1833_v14 = vsel %vm324_vm3, %v1801_v36, %v7027_v19 }
 0x26e   : > { %2321 = vst.msk [vmem:[#allocation3 + $0x19] sm:$0xff] %vm324_vm3, %v2288_v37  ;;  %v1866_v1 = vsel %vm1844_vm4, %v1833_v14, %v7107_v26 }
 0x270   : > { %v2146_v43 = vpop.f32.mrf.mxu0 }
 0x271   : > { %v2147_v38 = vadd.f32 %v10042_v13, %v2146_v43  ;;  %v1899_v43 = vsel %vm1877_vm5, %v1866_v1, %v7187_v51 }
 0x272   : > { %v1932_v58 = vsel %vm1910_vm6, %v1899_v43, %v7267_v7 }
 0x273   : > { %vm2225_vm15 = vcmp.gt.f32.partialorder %v2147_v38, 0.0  ;;  %v2257_v56 = vmul.f32 0.2, %v2147_v38  ;;  %v1965_v57 = vsel %vm1943_vm7, %v1932_v58, %v7347_v27 }
 0x274   : > { %v1998_v12 = vsel %vm1976_vm8, %v1965_v57, %v7427_v20 }
 0x275   : > { %v2289_v22 = vsel %vm2225_vm15, %v2147_v38, %v2257_v56  ;;  %v2387_v5 = vld [vmem:[#allocation3 + $0x19] sm:$0xff]  ;;  %v2031_v33 = vsel %vm2009_vm10, %v1998_v12, %v7507_v40 }
 0x276   : > { %2322 = vst.msk [vmem:[#allocation3 + $0x21] sm:$0xff] %vm324_vm3, %v2289_v22  ;;  %v2052_v22 = vpack.c.bf16 %v2031_v33, %v2030_v25 }
 0x278   : > { %v2149_v61 = vpop.f32.mrf.mxu0 }
 0x279   : > { %v2150_v21 = vadd.f32 %v10042_v13, %v2149_v61 }
 0x27b   : > { %vm2226_vm1 = vcmp.gt.f32.partialorder %v2150_v21, 0.0  ;;  %v2258_v15 = vmul.f32 0.2, %v2150_v21  ;;  %6670 = vmatmul.msk.bf16.gmra.mxu0 %vm2082_vm11, %v2051_v49 }
 0x27d   : > { %v2290_v41 = vsel %vm2226_vm1, %v2150_v21, %v2258_v15  ;;  %v2388_v8 = vld [vmem:[#allocation3 + $0x21] sm:$0xff] }
 0x27e   : > { %2323 = vst.msk [vmem:[#allocation3 + $0x31] sm:$0xff] %vm324_vm3, %v2290_v41  ;;  %v10129_v37 = vpack.i.bf16 %v2388_v8, %v2387_v5 }
 0x280   : > { %7539 = vrot.lane.b32.xlu0 %v10129_v37, %s8644_s19  ;;  %v2151_v0 = vpop.f32.mrf.mxu0 }
 0x281   : > { %v2152_v59 = vadd.f32 %v10042_v13, %v2151_v0 }
 0x283   : > { %vm2227_vm0 = vcmp.gt.f32.partialorder %v2152_v59, 0.0  ;;  %v2259_v38 = vmul.f32 0.2, %v2152_v59 }
 0x285   : > { %v2291_v60 = vsel %vm2227_vm0, %v2152_v59, %v2259_v38  ;;  %v2389_v47 = vld [vmem:[#allocation3 + $0x31] sm:$0xff] }
 0x286   : > { %2324 = vst.msk [vmem:[#allocation3 + $0x39] sm:$0xff] %vm324_vm3, %v2291_v60 }
 0x288   : > { %v2199_v44 = vpop.f32.mrf.mxu3  ;;  %v2154_v56 = vpop.f32.mrf.mxu0 }
 0x289   : > { %v2200_v34 = vadd.f32 %v10042_v13, %v2199_v44  ;;  %v2155_v11 = vadd.f32 %v10042_v13, %v2154_v56 }
 0x28b   : > { %vm2246_vm2 = vcmp.gt.f32.partialorder %v2200_v34, 0.0  ;;  %v2278_v35 = vmul.f32 0.2, %v2200_v34  ;;  %vm2228_vm4 = vcmp.gt.f32.partialorder %v2155_v11, 0.0  ;;  %v2260_v63 = vmul.f32 0.2, %v2155_v11  ;;  %6671 = vmatmul.msk.bf16.gmra.mxu0 %vm2082_vm11, %v2052_v22 }
 0x28d   : > { %v2310_v16 = vsel %vm2246_vm2, %v2200_v34, %v2278_v35  ;;  %v2292_v2 = vsel %vm2228_vm4, %v2155_v11, %v2260_v63  ;;  %v2390_v39 = vld [vmem:[#allocation3 + $0x39] sm:$0xff]  ;;  %v2417_v63 = vld [vmem:[#allocation3 + $0x2] sm:$0xff] }
 0x28e   : > { %2343 = vst.msk [vmem:[#allocation3 + $0x121] sm:$0xff] %vm324_vm3, %v2310_v16  ;;  %v10162_v61 = vpack.i.bf16 %v2390_v39, %v2389_v47  ;;  %v2418_v16 = vld [vmem:[#allocation3 + $0xa] sm:$0xff] }
 0x28f   : > { %2325 = vst.msk [vmem:[#allocation3 + $0x49] sm:$0xff] %vm324_vm3, %v2292_v2 }
 0x290   : > { %v2201_v31 = vpop.f32.mrf.mxu3  ;;  %v2156_v21 = vpop.f32.mrf.mxu0  ;;  %7544 = vrot.lane.b32.xlu1 %v10162_v61, %s8644_s19 }
 0x291   : > { %v2202_v49 = vadd.f32 %v10042_v13, %v2201_v31  ;;  %v2157_v45 = vadd.f32 %v10042_v13, %v2156_v21  ;;  %v7588_v21 = vpack.i.bf16 %v2418_v16, %v2417_v63 }
 0x293   : > { %vm2247_vm6 = vcmp.gt.f32.partialorder %v2202_v49, 0.0  ;;  %v2279_v23 = vmul.f32 0.2, %v2202_v49  ;;  %vm2229_vm8 = vcmp.gt.f32.partialorder %v2157_v45, 0.0  ;;  %v2261_v18 = vmul.f32 0.2, %v2157_v45 }
 0x295   : > { %v2311_v32 = vsel %vm2247_vm6, %v2202_v49, %v2279_v23  ;;  %v2293_v19 = vsel %vm2229_vm8, %v2157_v45, %v2261_v18  ;;  %v2409_v1 = vld [vmem:[#allocation3 + $0x121] sm:$0xff] }
 0x296   : > { %2344 = vst.msk [vmem:[#allocation3 + $0x129] sm:$0xff] %vm324_vm3, %v2311_v32  ;;  %v2391_v29 = vld [vmem:[#allocation3 + $0x49] sm:$0xff] }
 0x297   : > { %2326 = vst.msk [vmem:[#allocation3 + $0x51] sm:$0xff] %vm324_vm3, %v2293_v19 }
 0x298   : > { %v2204_v15 = vpop.f32.mrf.mxu3  ;;  %v2159_v4 = vpop.f32.mrf.mxu0 }
 0x299   : > { %v2205_v55 = vadd.f32 %v10042_v13, %v2204_v15  ;;  %v2160_v26 = vadd.f32 %v10042_v13, %v2159_v4 }
 0x29b   : > { %vm2248_vm9 = vcmp.gt.f32.partialorder %v2205_v55, 0.0  ;;  %v2280_v53 = vmul.f32 0.2, %v2205_v55  ;;  %vm2230_vm11 = vcmp.gt.f32.partialorder %v2160_v26, 0.0  ;;  %v2262_v41 = vmul.f32 0.2, %v2160_v26 }
 0x29d   : > { %v2312_v5 = vsel %vm2248_vm9, %v2205_v55, %v2280_v53  ;;  %v2294_v8 = vsel %vm2230_vm11, %v2160_v26, %v2262_v41  ;;  %v2410_v7 = vld [vmem:[#allocation3 + $0x129] sm:$0xff] }
 0x29e   : > { %2345 = vst.msk [vmem:[#allocation3 + $0x139] sm:$0xff] %vm324_vm3, %v2312_v5  ;;  %v2392_v36 = vld [vmem:[#allocation3 + $0x51] sm:$0xff]  ;;  %v10183_v27 = vpack.i.bf16 %v2410_v7, %v2409_v1 }
 0x29f   : > { %2327 = vst.msk [vmem:[#allocation3 + $0x61] sm:$0xff] %vm324_vm3, %v2294_v8  ;;  %v10175_v24 = vpack.i.bf16 %v2392_v36, %v2391_v29 }
 0x2a0   : > { %v2206_v51 = vpop.f32.mrf.mxu3  ;;  %v2161_v54 = vpop.f32.mrf.mxu0 }
 0x2a1   : > { %v2207_v9 = vadd.f32 %v10042_v13, %v2206_v51  ;;  %v2162_v10 = vadd.f32 %v10042_v13, %v2161_v54  ;;  %7549 = vrot.lane.b32.xlu2 %v10175_v24, %s8644_s19 }
 0x2a3   : > { %vm2249_vm13 = vcmp.gt.f32.partialorder %v2207_v9, 0.0  ;;  %v2281_v14 = vmul.f32 0.2, %v2207_v9  ;;  %vm2231_vm14 = vcmp.gt.f32.partialorder %v2162_v10, 0.0  ;;  %v2263_v28 = vmul.f32 0.2, %v2162_v10 }
 0x2a5   : > { %v2313_v62 = vsel %vm2249_vm13, %v2207_v9, %v2281_v14  ;;  %v2295_v30 = vsel %vm2231_vm14, %v2162_v10, %v2263_v28  ;;  %v2411_v44 = vld [vmem:[#allocation3 + $0x139] sm:$0xff]  ;;  %v2420_v28 = vld [vmem:[#allocation3 + $0x22] sm:$0xff] }
 0x2a6   : > { %2346 = vst.msk [vmem:[#allocation3 + $0x141] sm:$0xff] %vm324_vm3, %v2313_v62  ;;  %v2393_v40 = vld [vmem:[#allocation3 + $0x61] sm:$0xff] }
 0x2a7   : > { %2328 = vst.msk [vmem:[#allocation3 + $0x69] sm:$0xff] %vm324_vm3, %v2295_v30  ;;  %v2419_v14 = vld [vmem:[#allocation3 + $0x1a] sm:$0xff] }
 0x2a8   : > { %v2209_v50 = vpop.f32.mrf.mxu3  ;;  %v2164_v0 = vpop.f32.mrf.mxu0 }
 0x2a9   : > { %v2210_v6 = vadd.f32 %v10042_v13, %v2209_v50  ;;  %v2165_v20 = vadd.f32 %v10042_v13, %v2164_v0  ;;  %7564 = vrot.lane.b32.xlu2 %v10183_v27, %s8644_s19  ;;  %v10226_v0 = vpack.i.bf16 %v2420_v28, %v2419_v14 }
 0x2ab   : > { %vm2250_vm15 = vcmp.gt.f32.partialorder %v2210_v6, 0.0  ;;  %v2282_v46 = vmul.f32 0.2, %v2210_v6  ;;  %vm2232_vm1 = vcmp.gt.f32.partialorder %v2165_v20, 0.0  ;;  %v2264_v59 = vmul.f32 0.2, %v2165_v20 }
 0x2ad   : > { %v2314_v42 = vsel %vm2250_vm15, %v2210_v6, %v2282_v46  ;;  %v2296_v43 = vsel %vm2232_vm1, %v2165_v20, %v2264_v59  ;;  %v2412_v12 = vld [vmem:[#allocation3 + $0x141] sm:$0xff] }
 0x2ae   : > { %2347 = vst.msk [vmem:[#allocation3 + $0x151] sm:$0xff] %vm324_vm3, %v2314_v42  ;;  %v2394_v52 = vld [vmem:[#allocation3 + $0x69] sm:$0xff]  ;;  %v10199_v56 = vpack.i.bf16 %v2412_v12, %v2411_v44  ;;  %v2421_v44 = vld [vmem:[#allocation3 + $0x32] sm:$0xff] }
 0x2af   : > { %2329 = vst.msk [vmem:[#allocation3 + $0x79] sm:$0xff] %vm324_vm3, %v2296_v43  ;;  %v10191_v17 = vpack.i.bf16 %v2394_v52, %v2393_v40  ;;  %v2425_v52 = vld [vmem:[#allocation3 + $0x62] sm:$0xff] }
 0x2b0   : > { %v2211_v58 = vpop.f32.mrf.mxu3  ;;  %v2166_v38 = vpop.f32.mrf.mxu0 }
 0x2b1   : > { %v2212_v3 = vadd.f32 %v10042_v13, %v2211_v58  ;;  %v2167_v57 = vadd.f32 %v10042_v13, %v2166_v38  ;;  %7554 = vrot.lane.b32.xlu0 %v10191_v17, %s8644_s19  ;;  %v2426_v58 = vld [vmem:[#allocation3 + $0x6a] sm:$0xff] }
 0x2b3   : > { %vm2251_vm0 = vcmp.gt.f32.partialorder %v2212_v3, 0.0  ;;  %v2283_v60 = vmul.f32 0.2, %v2212_v3  ;;  %vm2233_vm2 = vcmp.gt.f32.partialorder %v2167_v57, 0.0  ;;  %v2265_v48 = vmul.f32 0.2, %v2167_v57 }
 0x2b5   : > { %v2315_v25 = vsel %vm2251_vm0, %v2212_v3, %v2283_v60  ;;  %v2297_v33 = vsel %vm2233_vm2, %v2167_v57, %v2265_v48  ;;  %v2413_v5 = vld [vmem:[#allocation3 + $0x151] sm:$0xff]  ;;  %v10238_v48 = vpack.i.bf16 %v2426_v58, %v2425_v52 }
 0x2b6   : > { %2348 = vst.msk [vmem:[#allocation3 + $0x159] sm:$0xff] %vm324_vm3, %v2315_v25  ;;  %v2395_v49 = vld [vmem:[#allocation3 + $0x79] sm:$0xff] }
 0x2b7   : > { %2330 = vst.msk [vmem:[#allocation3 + $0x81] sm:$0xff] %vm324_vm3, %v2297_v33 }
 0x2b8   : > { %v2214_v34 = vpop.f32.mrf.mxu3  ;;  %v2169_v11 = vpop.f32.mrf.mxu0 }
 0x2b9   : > { %v2215_v22 = vadd.f32 %v10042_v13, %v2214_v34  ;;  %v2170_v35 = vadd.f32 %v10042_v13, %v2169_v11  ;;  %7569 = vrot.lane.b32.xlu0 %v10199_v56, %s8644_s19  ;;  %v2422_v34 = vld [vmem:[#allocation3 + $0x3a] sm:$0xff] }
 0x2bb   : > { %vm2252_vm4 = vcmp.gt.f32.partialorder %v2215_v22, 0.0  ;;  %v2284_v2 = vmul.f32 0.2, %v2215_v22  ;;  %vm2234_vm6 = vcmp.gt.f32.partialorder %v2170_v35, 0.0  ;;  %v2266_v47 = vmul.f32 0.2, %v2170_v35 }
 0x2bd   : > { %v2316_v39 = vsel %vm2252_vm4, %v2215_v22, %v2284_v2  ;;  %v2298_v31 = vsel %vm2234_vm6, %v2170_v35, %v2266_v47  ;;  %v2414_v26 = vld [vmem:[#allocation3 + $0x159] sm:$0xff]  ;;  %v10248_v47 = vpack.i.bf16 %v2422_v34, %v2421_v44 }
 0x2be   : > { %2349 = vst.msk [vmem:[#allocation3 + $0x169] sm:$0xff] %vm324_vm3, %v2316_v39  ;;  %v2396_v45 = vld [vmem:[#allocation3 + $0x81] sm:$0xff]  ;;  %v10216_v8 = vpack.i.bf16 %v2414_v26, %v2413_v5 }
 0x2bf   : > { %2331 = vst.msk [vmem:[#allocation3 + $0x91] sm:$0xff] %vm324_vm3, %v2298_v31  ;;  %v10207_v23 = vpack.i.bf16 %v2396_v45, %v2395_v49  ;;  %v2423_v45 = vld [vmem:[#allocation3 + $0x4a] sm:$0xff] }
 0x2c0   : > { %v2216_v18 = vpop.f32.mrf.mxu3  ;;  %v2171_v32 = vpop.f32.mrf.mxu0 }
 0x2c1   : > { %v2217_v19 = vadd.f32 %v10042_v13, %v2216_v18  ;;  %v2172_v15 = vadd.f32 %v10042_v13, %v2171_v32  ;;  %7559 = vrot.lane.b32.xlu1 %v10207_v23, %s8644_s19  ;;  %7589 = vrot.lane.b32.xlu0 %v7588_v21, %s8646_s21  ;;  %v2424_v18 = vld [vmem:[#allocation3 + $0x52] sm:$0xff]  ;;  %v2427_v32 = vld [vmem:[#allocation3 + $0x7a] sm:$0xff] }
 0x2c3   : > { %vm2253_vm8 = vcmp.gt.f32.partialorder %v2217_v19, 0.0  ;;  %v2285_v4 = vmul.f32 0.2, %v2217_v19  ;;  %vm2235_vm9 = vcmp.gt.f32.partialorder %v2172_v15, 0.0  ;;  %v2267_v55 = vmul.f32 0.2, %v2172_v15 }
 0x2c5   : > { %v2317_v53 = vsel %vm2253_vm8, %v2217_v19, %v2285_v4  ;;  %v2299_v41 = vsel %vm2235_vm9, %v2172_v15, %v2267_v55  ;;  %v2415_v57 = vld [vmem:[#allocation3 + $0x169] sm:$0xff]  ;;  %v10260_v4 = vpack.i.bf16 %v2424_v18, %v2423_v45 }
 0x2c6   : > { %2350 = vst.msk [vmem:[#allocation3 + $0x171] sm:$0xff] %vm324_vm3, %v2317_v53  ;;  %v2397_v30 = vld [vmem:[#allocation3 + $0x91] sm:$0xff]  ;;  %v2428_v19 = vld [vmem:[#allocation3 + $0x82] sm:$0xff] }
 0x2c7   : > { %2332 = vst.msk [vmem:[#allocation3 + $0x99] sm:$0xff] %vm324_vm3, %v2299_v41  ;;  %v10262_v55 = vpack.i.bf16 %v2428_v19, %v2427_v32  ;;  %v2456_v18 = vld [vmem:[#allocation3 + $0x68] sm:$0xff]  ;;  %v10314_v32 = vld [vmem:[#allocation3 + $0x38] sm:$0xff] }
 0x2c8   : > { %v2219_v29 = vpop.f32.mrf.mxu3  ;;  %v2174_v36 = vpop.f32.mrf.mxu0 }
 0x2c9   : > { %v2220_v51 = vadd.f32 %v10042_v13, %v2219_v29  ;;  %v2175_v54 = vadd.f32 %v10042_v13, %v2174_v36  ;;  %7574 = vrot.lane.b32.xlu1 %v10216_v8, %s8644_s19 }
 0x2cb   : > { %vm2254_vm11 = vcmp.gt.f32.partialorder %v2220_v51, 0.0  ;;  %v2286_v9 = vmul.f32 0.2, %v2220_v51  ;;  %vm2236_vm13 = vcmp.gt.f32.partialorder %v2175_v54, 0.0  ;;  %v2268_v10 = vmul.f32 0.2, %v2175_v54 }
 0x2cd   : > { %v2318_v7 = vsel %vm2254_vm11, %v2220_v51, %v2286_v9  ;;  %v2300_v62 = vsel %vm2236_vm13, %v2175_v54, %v2268_v10  ;;  %v2416_v40 = vld [vmem:[#allocation3 + $0x171] sm:$0xff]  ;;  %vm4031_vm13 = vcmask 1043456  }
 0x2ce   : > { %2351 = vst.msk [vmem:[#allocation3 + $0x181] sm:$0xff] %vm324_vm3, %v2318_v7  ;;  %v2398_v1 = vld [vmem:[#allocation3 + $0x99] sm:$0xff]  ;;  %v10236_v60 = vpack.i.bf16 %v2416_v40, %v2415_v57  ;;  %v2447_v19 = vld [vmem:[#allocation3 + $0x16a] sm:$0xff] }
 0x2cf   : > { %2333 = vst.msk [vmem:[#allocation3 + $0xa9] sm:$0xff] %vm324_vm3, %v2300_v62  ;;  %v10224_v50 = vpack.i.bf16 %v2398_v1, %v2397_v30  ;;  %v2429_v5 = vld [vmem:[#allocation3 + $0x92] sm:$0xff]  ;;  %v2430_v29 = vld [vmem:[#allocation3 + $0x9a] sm:$0xff] }
 0x2d0   : > { %v2221_v6 = vpop.f32.mrf.mxu3  ;;  %v2176_v20 = vpop.f32.mrf.mxu0  ;;  %v10274_v7 = vpack.i.bf16 %v2430_v29, %v2429_v5 }
 0x2d1   : > { %v2222_v46 = vadd.f32 %v10042_v13, %v2221_v6  ;;  %v2177_v59 = vadd.f32 %v10042_v13, %v2176_v20  ;;  %7579 = vrot.lane.b32.xlu2 %v10224_v50, %s8644_s19  ;;  %7594 = vrot.lane.b32.xlu1 %v10226_v0, %s8646_s21  ;;  %v2441_v6 = vld [vmem:[#allocation3 + $0x122] sm:$0xff]  ;;  %v2443_v20 = vld [vmem:[#allocation3 + $0x13a] sm:$0xff] }
 0x2d3   : > { %vm2255_vm14 = vcmp.gt.f32.partialorder %v2222_v46, 0.0  ;;  %v2287_v42 = vmul.f32 0.2, %v2222_v46  ;;  %vm2237_vm15 = vcmp.gt.f32.partialorder %v2177_v59, 0.0  ;;  %v2269_v43 = vmul.f32 0.2, %v2177_v59 }
 0x2d5   : > { %v2319_v38 = vsel %vm2255_vm14, %v2222_v46, %v2287_v42  ;;  %v2301_v3 = vsel %vm2237_vm15, %v2177_v59, %v2269_v43  ;;  %v2444_v46 = vld [vmem:[#allocation3 + $0x142] sm:$0xff]  ;;  %v2442_v59 = vld [vmem:[#allocation3 + $0x12a] sm:$0xff]  ;;  %v2445_v42 = vld [vmem:[#allocation3 + $0x152] sm:$0xff]  ;;  %vm3794_vm14 = vcmask 326656   ;;  %vm3860_vm15 = vcmask 457728  }
 0x2d6   : > { %2352 = vst.msk [vmem:[#allocation3 + $0x189] sm:$0xff] %vm324_vm3, %v2319_v38  ;;  %v2399_v22 = vld [vmem:[#allocation3 + $0xa9] sm:$0xff]  ;;  %v2446_v43 = vld [vmem:[#allocation3 + $0x15a] sm:$0xff]  ;;  %v10284_v52 = vpack.i.bf16 %v2444_v46, %v2443_v20  ;;  %v10286_v58 = vpack.i.bf16 %v2442_v59, %v2441_v6 }
 0x2d7   : > { %2334 = vst.msk [vmem:[#allocation3 + $0xb1] sm:$0xff] %vm324_vm3, %v2301_v3  ;;  %v10288_v38 = vpack.i.bf16 %v2446_v43, %v2445_v42  ;;  %v2457_v59 = vld [vmem:[#allocation3 + $0x78] sm:$0xff]  ;;  %v10339_v43 = vpop.permute.xlu2 %7534 }
 0x2d8   : > { %v2179_v12 = vpop.f32.mrf.mxu0 }
 0x2d9   : > { %v2180_v25 = vadd.f32 %v10042_v13, %v2179_v12  ;;  %7584 = vrot.lane.b32.xlu2 %v10236_v60, %s8644_s19  ;;  %7614 = vrot.lane.b32.xlu1 %v10238_v48, %s8646_s21  ;;  %v10297_v12 = vld [vmem:[#allocation3 + $0x20] sm:$0xff] }
 0x2db   : > { %vm2238_vm1 = vcmp.gt.f32.partialorder %v2180_v25, 0.0  ;;  %v2270_v33 = vmul.f32 0.2, %v2180_v25 }
 0x2dd   : > { %v2302_v11 = vsel %vm2238_vm1, %v2180_v25, %v2270_v33  ;;  %v10299_v33 = vld [vmem:[#allocation3 + $0x18] sm:$0xff]  ;;  %vm3827_vm1 = vcmask 392192  }
 0x2de   : > { %2335 = vst.msk [vmem:[#allocation3 + $0xc1] sm:$0xff] %vm324_vm3, %v2302_v11  ;;  %v2400_v35 = vld [vmem:[#allocation3 + $0xb1] sm:$0xff] }
 0x2df   : > { %v2431_v63 = vld [vmem:[#allocation3 + $0xaa] sm:$0xff]  ;;  %v2432_v16 = vld [vmem:[#allocation3 + $0xb2] sm:$0xff]  ;;  %v10246_v2 = vpack.i.bf16 %v2400_v35, %v2399_v22 }
 0x2e0   : > { %v10250_v39 = vpack.i.bf16 %v2432_v16, %v2431_v63  ;;  %v2181_v31 = vpop.f32.mrf.mxu0 }
 0x2e1   : > { %v2182_v21 = vadd.f32 %v10042_v13, %v2181_v31  ;;  %7604 = vrot.lane.b32.xlu0 %v10246_v2, %s8644_s19  ;;  %7599 = vrot.lane.b32.xlu2 %v10248_v47, %s8646_s21  ;;  %v7673_v31 = vpack.i.bf16 %v10297_v12, %v10299_v33 }
 0x2e2   : > { %7629 = vrot.lane.b32.xlu1 %v10250_v39, %s8646_s21 }
 0x2e3   : > { %vm2239_vm0 = vcmp.gt.f32.partialorder %v2182_v21, 0.0  ;;  %v2271_v49 = vmul.f32 0.2, %v2182_v21 }
 0x2e5   : > { %v2303_v15 = vsel %vm2239_vm0, %v2182_v21, %v2271_v49  ;;  %v2401_v36 = vld [vmem:[#allocation3 + $0xc1] sm:$0xff]  ;;  %vm3893_vm0 = vcmask 523264  }
 0x2e6   : > { %2336 = vst.msk [vmem:[#allocation3 + $0xc9] sm:$0xff] %vm324_vm3, %v2303_v15  ;;  %v2448_v15 = vld [vmem:[#allocation3 + $0x172] sm:$0xff] }
 0x2e7   : > { %v10321_v29 = vpack.i.bf16 %v2448_v15, %v2447_v19  ;;  %v2460_v19 = vld [vmem:[#allocation3 + $0x98] sm:$0xff] }
 0x2e8   : > { %v2184_v26 = vpop.f32.mrf.mxu0 }
 0x2e9   : > { %v2185_v53 = vadd.f32 %v10042_v13, %v2184_v26  ;;  %7609 = vrot.lane.b32.xlu0 %v10260_v4, %s8646_s21  ;;  %7619 = vrot.lane.b32.xlu2 %v10262_v55, %s8646_s21 }
 0x2eb   : > { %vm2240_vm2 = vcmp.gt.f32.partialorder %v2185_v53, 0.0  ;;  %v2272_v41 = vmul.f32 0.2, %v2185_v53 }
 0x2ed   : > { %v2304_v51 = vsel %vm2240_vm2, %v2185_v53, %v2272_v41  ;;  %v2433_v54 = vld [vmem:[#allocation3 + $0xc2] sm:$0xff]  ;;  %v2434_v9 = vld [vmem:[#allocation3 + $0xca] sm:$0xff]  ;;  %vm3982_vm2 = vcmask 588800  }
 0x2ee   : > { %v2402_v10 = vld [vmem:[#allocation3 + $0xc9] sm:$0xff]  ;;  %2337 = vst.msk [vmem:[#allocation3 + $0xd9] sm:$0xff] %vm324_vm3, %v2304_v51  ;;  %v10270_v14 = vpack.i.bf16 %v2434_v9, %v2433_v54  ;;  %v2455_v53 = vld [vmem:[#allocation3 + $0x60] sm:$0xff] }
 0x2ef   : > { %v10272_v28 = vpack.i.bf16 %v2402_v10, %v2401_v36  ;;  %v10317_v41 = vld [vmem:[#allocation3 + $0x30] sm:$0xff]  ;;  %v10319_v5 = vpack.i.bf16 %v2456_v18, %v2455_v53 }
 0x2f0   : > { %v2186_v62 = vpop.f32.mrf.mxu0  ;;  %v10325_v36 = vpack.i.bf16 %v10314_v32, %v10317_v41 }
 0x2f1   : > { %7639 = vrot.lane.b32.xlu1 %v10272_v28, %s8644_s19  ;;  %v2187_v30 = vadd.f32 %v10042_v13, %v2186_v62  ;;  %7624 = vrot.lane.b32.xlu0 %v10274_v7, %s8646_s21  ;;  %v2458_v62 = vld [vmem:[#allocation3 + $0x80] sm:$0xff] }
 0x2f2   : > { %7649 = vrot.lane.b32.xlu2 %v10270_v14, %s8646_s21 }
 0x2f3   : > { %vm2241_vm4 = vcmp.gt.f32.partialorder %v2187_v30, 0.0  ;;  %v2273_v1 = vmul.f32 0.2, %v2187_v30 }
 0x2f5   : > { %v2305_v40 = vsel %vm2241_vm4, %v2187_v30, %v2273_v1  ;;  %v2403_v44 = vld [vmem:[#allocation3 + $0xd9] sm:$0xff] }
 0x2f6   : > { %2338 = vst.msk [vmem:[#allocation3 + $0xe1] sm:$0xff] %vm324_vm3, %v2305_v40  ;;  %v10341_v40 = vpack.i.bf16 %v2458_v62, %v2457_v59 }
 0x2f8   : > { %v2189_v3 = vpop.f32.mrf.mxu0 }
 0x2f9   : > { %7644 = vrot.lane.b32.xlu1 %v10284_v52, %s8646_s21  ;;  %v2190_v57 = vadd.f32 %v10042_v13, %v2189_v3  ;;  %7634 = vrot.lane.b32.xlu0 %v10286_v58, %s8646_s21 }
 0x2fa   : > { %7654 = vrot.lane.b32.xlu2 %v10288_v38, %s8646_s21 }
 0x2fb   : > { %vm2242_vm6 = vcmp.gt.f32.partialorder %v2190_v57, 0.0  ;;  %v2274_v25 = vmul.f32 0.2, %v2190_v57  ;;  %v10365_v18 = vpop.permute.xlu2 %7549 }
 0x2fd   : > { %v2306_v34 = vsel %vm2242_vm6, %v2190_v57, %v2274_v25  ;;  %v2435_v11 = vld [vmem:[#allocation3 + $0xda] sm:$0xff]  ;;  %v2436_v22 = vld [vmem:[#allocation3 + $0xe2] sm:$0xff] }
 0x2fe   : > { %v2404_v35 = vld [vmem:[#allocation3 + $0xe1] sm:$0xff]  ;;  %2339 = vst.msk [vmem:[#allocation3 + $0xf1] sm:$0xff] %vm324_vm3, %v2306_v34  ;;  %v10302_v63 = vpack.i.bf16 %v2436_v22, %v2435_v11  ;;  %v10350_v34 = vld [vmem:[#allocation3 + $0x50] sm:$0xff] }
 0x2ff   : > { %v10304_v16 = vpack.i.bf16 %v2404_v35, %v2403_v44  ;;  %v2462_v44 = vld [vmem:[#allocation3 + $0xb0] sm:$0xff]  ;;  %v2464_v11 = vld [vmem:[#allocation3 + $0xc8] sm:$0xff] }
 0x300   : > { %v2191_v21 = vpop.f32.mrf.mxu0  ;;  %v2461_v35 = vld [vmem:[#allocation3 + $0xa8] sm:$0xff] }
 0x301   : > { %7674 = vrot.lane.b32.xlu1 %v7673_v31, %s8648_s23  ;;  %v2192_v49 = vadd.f32 %v10042_v13, %v2191_v21  ;;  %7664 = vrot.lane.b32.xlu0 %v10302_v63, %s8646_s21  ;;  %v10352_v31 = vld [vmem:[#allocation3 + $0x48] sm:$0xff]  ;;  %v2463_v21 = vld [vmem:[#allocation3 + $0xc0] sm:$0xff] }
 0x302   : > { %7659 = vrot.lane.b32.xlu2 %v10304_v16, %s8644_s19 }
 0x303   : > { %vm2243_vm8 = vcmp.gt.f32.partialorder %v2192_v49, 0.0  ;;  %v2275_v45 = vmul.f32 0.2, %v2192_v49 }
 0x305   : > { %v2307_v26 = vsel %vm2243_vm8, %v2192_v49, %v2275_v45  ;;  %v2405_v10 = vld [vmem:[#allocation3 + $0xf1] sm:$0xff]  ;;  %v10359_v49 = vpack.i.bf16 %v10350_v34, %v10352_v31  ;;  %v10361_v45 = vpack.i.bf16 %v2464_v11, %v2463_v21 }
 0x306   : > { %2340 = vst.msk [vmem:[#allocation3 + $0xf9] sm:$0xff] %vm324_vm3, %v2307_v26  ;;  %v10389_v59 = vld [vmem:[#allocation3 + $0xf0] sm:$0xff] }
 0x307   : > { %12919 = vst [vmem:[#allocation9_spill] sm:$0xff] %v10389_v59 }
 0x308   : > { %v2194_v51 = vpop.f32.mrf.mxu0 }
 0x309   : > { %7694 = vrot.lane.b32.xlu1 %v10319_v5, %s8648_s23  ;;  %v2195_v54 = vadd.f32 %v10042_v13, %v2194_v51  ;;  %7669 = vrot.lane.b32.xlu0 %v10321_v29, %s8646_s21 }
 0x30a   : > { %7679 = vrot.lane.b32.xlu2 %v10325_v36, %s8648_s23 }
 0x30b   : > { %vm2244_vm9 = vcmp.gt.f32.partialorder %v2195_v54, 0.0  ;;  %v2276_v9 = vmul.f32 0.2, %v2195_v54 }
 0x30d   : > { %v2308_v30 = vsel %vm2244_vm9, %v2195_v54, %v2276_v9  ;;  %v2406_v1 = vld [vmem:[#allocation3 + $0xf9] sm:$0xff]  ;;  %v2459_v54 = vld [vmem:[#allocation3 + $0x90] sm:$0xff] }
 0x30e   : > { %v2437_v6 = vld [vmem:[#allocation3 + $0xf2] sm:$0xff]  ;;  %v2438_v20 = vld [vmem:[#allocation3 + $0xfa] sm:$0xff]  ;;  %2341 = vst.msk [vmem:[#allocation3 + $0x109] sm:$0xff] %vm324_vm3, %v2308_v30  ;;  %v10335_v46 = vpack.i.bf16 %v2406_v1, %v2405_v10  ;;  %v10375_v62 = vpack.i.bf16 %v2460_v19, %v2459_v54  ;;  %v10383_v30 = vpop.permute.xlu2 %7564  ;;  %v10413_v19 = vld [vmem:[#allocation3 + $0x128] sm:$0xff] }
 0x30f   : > { %v10337_v42 = vpack.i.bf16 %v2438_v20, %v2437_v6  ;;  %v10385_v1 = vld [vmem:[#allocation3 + $0xf8] sm:$0xff]  ;;  %v2466_v6 = vld [vmem:[#allocation3 + $0xe0] sm:$0xff] }
 0x310   : > { %v2196_v3 = vpop.f32.mrf.mxu0  ;;  %12917 = vst [vmem:[#allocation8_spill] sm:$0xff] %v10385_v1 }
 0x311   : > { %7709 = vrot.lane.b32.xlu1 %v10337_v42, %s8646_s21  ;;  %v2197_v57 = vadd.f32 %v10042_v13, %v2196_v3  ;;  %7684 = vrot.lane.b32.xlu0 %v10335_v46, %s8644_s19  ;;  %v10355_v13 = vpack.i.bf16 %v2462_v44, %v2461_v35  ;;  %v2465_v3 = vld [vmem:[#allocation3 + $0xd8] sm:$0xff]  ;;  %v2380_v35 = vld [vmem:[#allocation3 + $0x140] sm:$0xff] }
 0x312   : > { %7699 = vrot.lane.b32.xlu2 %v10341_v40, %s8648_s23  ;;  %v10397_v44 = vpack.i.bf16 %v2466_v6, %v2465_v3  ;;  %v10419_v6 = vpop.permute.xlu0 %7539 }
 0x313   : > { %vm2245_vm11 = vcmp.gt.f32.partialorder %v2197_v57, 0.0  ;;  %v2277_v25 = vmul.f32 0.2, %v2197_v57 }
 0x315   : > { %v2309_v22 = vsel %vm2245_vm11, %v2197_v57, %v2277_v25  ;;  %v2407_v15 = vld [vmem:[#allocation3 + $0x109] sm:$0xff]  ;;  %v10395_v25 = vpack.i.bf16 %v10385_v1, %v10389_v59  ;;  %v2479_v59 = vld [vmem:[#allocation3 + $0x180] sm:$0xff] }
 0x316   : > { %2342 = vst.msk [vmem:[#allocation3 + $0x111] sm:$0xff] %vm324_vm3, %v2309_v22  ;;  %v10391_v57 = vld [vmem:[#allocation3 + $0x108] sm:$0xff]  ;;  %v10409_v22 = vpop.permute.xlu1 %7544 }
 0x317   : > { %12920 = vst [vmem:[#allocation11_spill] sm:$0xff] %v10391_v57  ;;  %v2383_v1 = vld [vmem:[#allocation3 + $0x168] sm:$0xff] }
 0x319   : > { %7714 = vrot.lane.b32.xlu1 %v10355_v13, %s8648_s23  ;;  %7689 = vrot.lane.b32.xlu0 %v10359_v49, %s8648_s23 }
 0x31a   : > { %7719 = vrot.lane.b32.xlu2 %v10361_v45, %s8648_s23 }
 0x31d   : > { %v2439_v26 = vld [vmem:[#allocation3 + $0x10a] sm:$0xff]  ;;  %v2440_v53 = vld [vmem:[#allocation3 + $0x112] sm:$0xff] }
 0x31e   : > { %v2408_v51 = vld [vmem:[#allocation3 + $0x111] sm:$0xff]  ;;  %v10371_v9 = vpack.i.bf16 %v2440_v53, %v2439_v26  ;;  %v10415_v53 = vld [vmem:[#allocation3 + $0x120] sm:$0xff] }
 0x31f   : > { %v10373_v10 = vpack.i.bf16 %v2408_v51, %v2407_v15  ;;  %v10387_v20 = vld [vmem:[#allocation3 + $0x110] sm:$0xff]  ;;  %v2476_v15 = vld [vmem:[#allocation3 + $0x158] sm:$0xff]  ;;  %12922 = vst [vmem:[#allocation24_spill] sm:$0xff] %v10415_v53  ;;  %v10423_v3 = vpack.i.bf16 %v10413_v19, %v10415_v53 }
 0x320   : > { %12918 = vst [vmem:[#allocation10_spill] sm:$0xff] %v10387_v20  ;;  %v10401_v11 = vpack.i.bf16 %v10387_v20, %v10391_v57  ;;  %v2379_v26 = vld [vmem:[#allocation3 + $0x138] sm:$0xff]  ;;  %v2475_v51 = vld [vmem:[#allocation3 + $0x150] sm:$0xff] }
 0x321   : > { %7729 = vrot.lane.b32.xlu1 %v10373_v10, %s8644_s19  ;;  %7704 = vrot.lane.b32.xlu0 %v10375_v62, %s8648_s23  ;;  %v10417_v54 = vpack.i.bf16 %v2380_v35, %v2379_v26  ;;  %v10425_v20 = vpack.i.bf16 %v2476_v15, %v2475_v51  ;;  %v2480_v26 = vld [vmem:[#allocation3 + $0x188] sm:$0xff]  ;;  %v2384_v57 = vld [vmem:[#allocation3 + $0x170] sm:$0xff] }
 0x322   : > { %7739 = vrot.lane.b32.xlu2 %v10371_v9, %s8646_s21  ;;  %v10437_v53 = vpack.i.bf16 %v2480_v26, %v2479_v59  ;;  %v10441_v51 = vpack.i.bf16 %v2384_v57, %v2383_v1 }
 0x323   : > { %v10439_v15 = vpop.permute.xlu0 %7554 }
 0x329   : > { %7734 = vrot.lane.b32.xlu1 %v10395_v25, %s8648_s23  ;;  %7724 = vrot.lane.b32.xlu0 %v10397_v44, %s8648_s23 }
 0x32a   : > { %7744 = vrot.lane.b32.xlu2 %v10401_v11, %s8648_s23 }
 0x32b   : > { %v10411_v21 = vpop.permute.xlu2 %7579  ;;  %v10455_v59 = vpop.permute.xlu0 %7569 }
 0x32c   : > { %12921 = vst [vmem:[#allocation36_spill] sm:$0xff] %v10411_v21 }
 0x331   : > { %7754 = vrot.lane.b32.xlu1 %v10417_v54, %s8648_s23  ;;  %7749 = vrot.lane.b32.xlu0 %v10423_v3, %s8648_s23 }
 0x332   : > { %7759 = vrot.lane.b32.xlu2 %v10425_v20, %s8648_s23 }
 0x333   : > { %v10433_v21 = vpop.permute.xlu2 %7584  ;;  %v10435_v35 = vpop.permute.xlu1 %7559 }
 0x334   : > { %12923 = vst [vmem:[#allocation39_spill] sm:$0xff] %v10433_v21 }
 0x335   : > { %12924 = vst [vmem:[#allocation57_spill] sm:$0xff] %v10435_v35 }
 0x339   : > { %7769 = vrot.lane.b32.xlu1 %v10437_v53, %s8648_s23  ;;  %7764 = vrot.lane.b32.xlu0 %v10441_v51, %s8648_s23 }
 0x33a   : > { %7774 = vrot.lane.b32.xlu2 %v10129_v37, %s8650_s8  ;;  %v10471_v37 = vpop.permute.xlu0 %7589 }
 0x33b   : > { %v10449_v35 = vpop.permute.xlu2 %7599  ;;  %v10451_v21 = vpop.permute.xlu1 %7574 }
 0x33c   : > { %12925 = vst [vmem:[#allocation20_spill] sm:$0xff] %v10451_v21  ;;  %v2618_v21 = vld [vmem:[#allocation3 + $0x92] sm:$0xff] }
 0x341   : > { %7784 = vrot.lane.b32.xlu1 %v10175_v24, %s8650_s8  ;;  %7779 = vrot.lane.b32.xlu0 %v10162_v61, %s8650_s8 }
 0x342   : > { %7789 = vrot.lane.b32.xlu2 %v10191_v17, %s8650_s8 }
 0x343   : > { %v10461_v1 = vpop.permute.xlu2 %7619  ;;  %v10463_v57 = vpop.permute.xlu1 %7594 }
 0x344   : > { %12926 = vst [vmem:[#allocation22_spill] sm:$0xff] %v10461_v1  ;;  %v2604_v1 = vld [vmem:[#allocation3 + $0x169] sm:$0xff] }
 0x349   : > { %7799 = vrot.lane.b32.xlu1 %v10224_v50, %s8650_s8  ;;  %7794 = vrot.lane.b32.xlu0 %v10207_v23, %s8650_s8 }
 0x34a   : > { %7804 = vrot.lane.b32.xlu2 %v10246_v2, %s8650_s8 }
 0x34b   : > { %v10475_v61 = vpop.permute.xlu1 %7614 }
 0x34c   : > { %v10473_v24 = vpop.permute.xlu2 %7649  ;;  %12928 = vst [vmem:[#allocation26_spill] sm:$0xff] %v10475_v61 }
 0x34d   : > { %12927 = vst [vmem:[#allocation29_spill] sm:$0xff] %v10473_v24  ;;  %v2579_v24 = vld [vmem:[#allocation3 + $0x39] sm:$0xff] }
 0x351   : > { %7814 = vrot.lane.b32.xlu1 %v10304_v16, %s8650_s8  ;;  %7809 = vrot.lane.b32.xlu0 %v10272_v28, %s8650_s8  ;;  %v2512_v16 = vld [vmem:[#allocation3 + $0x189] sm:$0xff] }
 0x352   : > { %7819 = vrot.lane.b32.xlu2 %v10335_v46, %s8650_s8  ;;  %v2511_v46 = vld [vmem:[#allocation3 + $0x181] sm:$0xff] }
 0x353   : > { %v10483_v17 = vpop.permute.xlu0 %7604  ;;  %v10499_v26 = vpack.i.bf16 %v2512_v16, %v2511_v46  ;;  %v2543_v46 = vld [vmem:[#allocation3 + $0x182] sm:$0xff] }
 0x354   : > { %12929 = vst [vmem:[#allocation28_spill] sm:$0xff] %v10483_v17  ;;  %v10485_v23 = vpop.permute.xlu2 %7654  ;;  %v10493_v50 = vpop.permute.xlu1 %7629  ;;  %v2587_v17 = vld [vmem:[#allocation3 + $0x99] sm:$0xff] }
 0x355   : > { %12930 = vst [vmem:[#allocation31_spill] sm:$0xff] %v10485_v23  ;;  %v2592_v23 = vld [vmem:[#allocation3 + $0xd9] sm:$0xff] }
 0x356   : > { %12931 = vst [vmem:[#allocation33_spill] sm:$0xff] %v10493_v50  ;;  %v2581_v50 = vld [vmem:[#allocation3 + $0x51] sm:$0xff] }
 0x359   : > { %7829 = vrot.lane.b32.xlu1 %v10183_v27, %s8650_s8  ;;  %7824 = vrot.lane.b32.xlu0 %v10373_v10, %s8650_s8 }
 0x35a   : > { %7834 = vrot.lane.b32.xlu2 %v10199_v56, %s8650_s8 }
 0x35b   : > { %v10495_v2 = vpop.permute.xlu0 %7609 }
 0x35c   : > { %v10497_v28 = vpop.permute.xlu2 %7659 }
 0x35d   : > { %12932 = vst [vmem:[#allocation35_spill] sm:$0xff] %v10497_v28 }
 0x361   : > { %7844 = vrot.lane.b32.xlu1 %v10236_v60, %s8650_s8  ;;  %7839 = vrot.lane.b32.xlu0 %v10216_v8, %s8650_s8 }
 0x362   : > { %7849 = vrot.lane.b32.xlu2 %v10499_v26, %s8650_s8 }
 0x363   : > { %v10507_v27 = vpop.permute.xlu1 %7639  ;;  %v10509_v56 = vpop.permute.xlu0 %7624 }
 0x364   : > { %12933 = vst [vmem:[#allocation53_spill] sm:$0xff] %v10507_v27  ;;  %v10511_v10 = vpop.permute.xlu2 %7679 }
 0x365   : > { %12934 = vst [vmem:[#allocation47_spill] sm:$0xff] %v10509_v56  ;;  %v2588_v56 = vld [vmem:[#allocation3 + $0xa9] sm:$0xff] }
 0x369   : > { %7859 = vrot.lane.b32.xlu1 %v10248_v47, %s8651_s22  ;;  %7854 = vrot.lane.b32.xlu0 %v10226_v0, %s8651_s22 }
 0x36a   : > { %7864 = vrot.lane.b32.xlu2 %v10260_v4, %s8651_s22 }
 0x36b   : > { %v10519_v8 = vpop.permute.xlu1 %7644  ;;  %v10521_v60 = vpop.permute.xlu0 %7634 }
 0x36c   : > { %12935 = vst [vmem:[#allocation59_spill] sm:$0xff] %v10519_v8  ;;  %v10523_v16 = vpop.permute.xlu2 %7699  ;;  %v2620_v8 = vld [vmem:[#allocation3 + $0xaa] sm:$0xff] }
 0x36d   : > { %12936 = vst [vmem:[#allocation61_spill] sm:$0xff] %v10521_v60 }
 0x36e   : > { %12937 = vst [vmem:[#allocation43_spill] sm:$0xff] %v10523_v16 }
 0x371   : > { %7874 = vrot.lane.b32.xlu1 %v10262_v55, %s8651_s22  ;;  %7869 = vrot.lane.b32.xlu0 %v10238_v48, %s8651_s22 }
 0x372   : > { %7879 = vrot.lane.b32.xlu2 %v10274_v7, %s8651_s22 }
 0x373   : > { %v10531_v47 = vpop.permute.xlu1 %7674  ;;  %v10533_v0 = vpop.permute.xlu0 %7664 }
 0x374   : > { %12938 = vst [vmem:[#allocation37_spill] sm:$0xff] %v10533_v0  ;;  %v10535_v4 = vpop.permute.xlu2 %7719  ;;  %v2544_v0 = vld [vmem:[#allocation3 + $0x18a] sm:$0xff] }
 0x375   : > { %12939 = vst [vmem:[#allocation55_spill] sm:$0xff] %v10535_v4  ;;  %v10573_v28 = vpack.i.bf16 %v2544_v0, %v2543_v46  ;;  %v2583_v4 = vld [vmem:[#allocation3 + $0x69] sm:$0xff] }
 0x379   : > { %7889 = vrot.lane.b32.xlu1 %v10270_v14, %s8651_s22  ;;  %7884 = vrot.lane.b32.xlu0 %v10250_v39, %s8651_s22 }
 0x37a   : > { %7894 = vrot.lane.b32.xlu2 %v10302_v63, %s8651_s22 }
 0x37b   : > { %v10543_v55 = vpop.permute.xlu1 %7694  ;;  %v10545_v48 = vpop.permute.xlu0 %7669 }
 0x37c   : > { %12940 = vst [vmem:[#allocation58_spill] sm:$0xff] %v10543_v55  ;;  %v10547_v7 = vpop.permute.xlu2 %7739 }
 0x37d   : > { %12941 = vst [vmem:[#allocation49_spill] sm:$0xff] %v10545_v48 }
 0x381   : > { %7904 = vrot.lane.b32.xlu1 %v10371_v9, %s8651_s22  ;;  %7899 = vrot.lane.b32.xlu0 %v10337_v42, %s8651_s22 }
 0x382   : > { %7909 = vrot.lane.b32.xlu2 %v10286_v58, %s8651_s22 }
 0x383   : > { %v10555_v14 = vpop.permute.xlu1 %7709  ;;  %v10557_v39 = vpop.permute.xlu0 %7684 }
 0x384   : > { %v10559_v63 = vpop.permute.xlu2 %7744 }
 0x389   : > { %7919 = vrot.lane.b32.xlu1 %v10288_v38, %s8651_s22  ;;  %7914 = vrot.lane.b32.xlu0 %v10284_v52, %s8651_s22 }
 0x38a   : > { %7924 = vrot.lane.b32.xlu2 %v10321_v29, %s8651_s22 }
 0x38b   : > { %v10567_v9 = vpop.permute.xlu1 %7714  ;;  %v10569_v42 = vpop.permute.xlu0 %7689 }
 0x38c   : > { %12942 = vst [vmem:[#allocation51_spill] sm:$0xff] %v10567_v9  ;;  %v10571_v58 = vpop.permute.xlu2 %7759  ;;  %v2591_v9 = vld [vmem:[#allocation3 + $0xc9] sm:$0xff] }
 0x38d   : > { %12943 = vst [vmem:[#allocation17_spill] sm:$0xff] %v10571_v58  ;;  %v2617_v58 = vld [vmem:[#allocation3 + $0x82] sm:$0xff] }
 0x391   : > { %7934 = vrot.lane.b32.xlu1 %v10325_v36, %s8652_s29  ;;  %7929 = vrot.lane.b32.xlu0 %v10573_v28, %s8651_s22 }
 0x392   : > { %7939 = vrot.lane.b32.xlu2 %v10359_v49, %s8652_s29 }
 0x393   : > { %v10581_v52 = vpop.permute.xlu1 %7729  ;;  %v10583_v38 = vpop.permute.xlu0 %7704 }
 0x394   : > { %12944 = vst [vmem:[#allocation19_spill] sm:$0xff] %v10583_v38  ;;  %v10585_v29 = vpop.permute.xlu2 %7774  ;;  %v2598_v38 = vld [vmem:[#allocation3 + $0x121] sm:$0xff] }
 0x395   : > { %v7776_v60 = vunpack.i.l.bf16 %v10585_v29 }
 0x399   : > { %7949 = vrot.lane.b32.xlu1 %v10341_v40, %s8652_s29  ;;  %7944 = vrot.lane.b32.xlu0 %v10319_v5, %s8652_s29 }
 0x39a   : > { %7954 = vrot.lane.b32.xlu2 %v10375_v62, %s8652_s29 }
 0x39b   : > { %v10593_v36 = vpop.permute.xlu1 %7734  ;;  %v10595_v0 = vpop.permute.xlu0 %7724 }
 0x39c   : > { %12945 = vst [vmem:[#allocation34_spill] sm:$0xff] %v10593_v36  ;;  %v10597_v49 = vpop.permute.xlu2 %7789 }
 0x39d   : > { %12946 = vst [vmem:[#allocation45_spill] sm:$0xff] %v10595_v0 }
 0x39e   : > { %12947 = vst [vmem:[#allocation48_spill] sm:$0xff] %v10597_v49 }
 0x3a1   : > { %7964 = vrot.lane.b32.xlu1 %v10361_v45, %s8652_s29  ;;  %7959 = vrot.lane.b32.xlu0 %v10355_v13, %s8652_s29 }
 0x3a2   : > { %7969 = vrot.lane.b32.xlu2 %v10397_v44, %s8652_s29 }
 0x3a3   : > { %v10605_v40 = vpop.permute.xlu1 %7754  ;;  %v10607_v5 = vpop.permute.xlu0 %7749 }
 0x3a4   : > { %12948 = vst [vmem:[#allocation12_spill] sm:$0xff] %v10605_v40  ;;  %v10609_v62 = vpop.permute.xlu2 %7804 }
 0x3a5   : > { %12949 = vst [vmem:[#allocation21_spill] sm:$0xff] %v10609_v62  ;;  %v2589_v62 = vld [vmem:[#allocation3 + $0xb1] sm:$0xff] }
 0x3a9   : > { %7979 = vrot.lane.b32.xlu1 %v10401_v11, %s8652_s29  ;;  %7974 = vrot.lane.b32.xlu0 %v10395_v25, %s8652_s29  ;;  %v2576_v11 = vld [vmem:[#allocation3 + $0x198] sm:$0xff]  ;;  %v2577_v25 = vld [vmem:[#allocation3 + $0x1a0] sm:$0xff] }
 0x3aa   : > { %7984 = vrot.lane.b32.xlu2 %v10423_v3, %s8652_s29  ;;  %v8008_v0 = vpack.i.bf16 %v2577_v25, %v2576_v11  ;;  %v2582_v11 = vld [vmem:[#allocation3 + $0x61] sm:$0xff]  ;;  %v2580_v25 = vld [vmem:[#allocation3 + $0x49] sm:$0xff] }
 0x3ab   : > { %v10617_v45 = vpop.permute.xlu1 %7769  ;;  %v10619_v13 = vpop.permute.xlu0 %7764 }
 0x3ac   : > { %12950 = vst [vmem:[#allocation25_spill] sm:$0xff] %v10617_v45  ;;  %v10621_v44 = vpop.permute.xlu2 %7819  ;;  %v2585_v45 = vld [vmem:[#allocation3 + $0x81] sm:$0xff] }
 0x3ad   : > { %12951 = vst [vmem:[#allocation38_spill] sm:$0xff] %v10619_v13  ;;  %v2586_v13 = vld [vmem:[#allocation3 + $0x91] sm:$0xff] }
 0x3ae   : > { %12952 = vst [vmem:[#allocation50_spill] sm:$0xff] %v10621_v44  ;;  %v2578_v44 = vld [vmem:[#allocation3 + $0x31] sm:$0xff] }
 0x3af   : > { %v8013_v27 = vpack.i.bf16 %v2579_v24, %v2578_v44  ;;  %v2584_v24 = vld [vmem:[#allocation3 + $0x79] sm:$0xff]  ;;  %v8023_v44 = vpack.i.bf16 %v2583_v4, %v2582_v11  ;;  %v2590_v4 = vld [vmem:[#allocation3 + $0xc1] sm:$0xff] }
 0x3b0   : > { %v8028_v48 = vpack.i.bf16 %v2585_v45, %v2584_v24  ;;  %v8033_v45 = vpack.i.bf16 %v2587_v17, %v2586_v13  ;;  %v8043_v11 = vpack.i.bf16 %v2591_v9, %v2590_v4 }
 0x3b1   : > { %7994 = vrot.lane.b32.xlu1 %v10425_v20, %s8652_s29  ;;  %7989 = vrot.lane.b32.xlu0 %v10417_v54, %s8652_s29 }
 0x3b2   : > { %7999 = vrot.lane.b32.xlu2 %v10441_v51, %s8652_s29 }
 0x3b3   : > { %v10629_v46 = vpop.permute.xlu1 %7784  ;;  %v10631_v3 = vpop.permute.xlu0 %7779 }
 0x3b4   : > { %v10633_v36 = vpop.permute.xlu2 %7834 }
 0x3b5   : > { %12953 = vst [vmem:[#allocation54_spill] sm:$0xff] %v10633_v36 }
 0x3b9   : > { %8009 = vrot.lane.b32.xlu1 %v8008_v0, %s8652_s29  ;;  %8004 = vrot.lane.b32.xlu0 %v10437_v53, %s8652_s29  ;;  %v8018_v0 = vpack.i.bf16 %v2581_v50, %v2580_v25  ;;  %v8038_v50 = vpack.i.bf16 %v2589_v62, %v2588_v56  ;;  %v2596_v56 = vld [vmem:[#allocation3 + $0x109] sm:$0xff] }
 0x3ba   : > { %8014 = vrot.lane.b32.xlu2 %v8013_v27, %s8653_s9 }
 0x3bb   : > { %v10639_v20 = vpop.permute.xlu1 %7799  ;;  %v10641_v54 = vpop.permute.xlu0 %7794 }
 0x3bc   : > { %12954 = vst [vmem:[#allocation13_spill] sm:$0xff] %v10639_v20  ;;  %v10643_v51 = vpop.permute.xlu2 %7849  ;;  %v2600_v20 = vld [vmem:[#allocation3 + $0x139] sm:$0xff] }
 0x3bd   : > { %12955 = vst [vmem:[#allocation16_spill] sm:$0xff] %v10641_v54  ;;  %v2629_v54 = vld [vmem:[#allocation3 + $0x112] sm:$0xff] }
 0x3be   : > { %12956 = vst [vmem:[#allocation30_spill] sm:$0xff] %v10643_v51 }
 0x3c1   : > { %8024 = vrot.lane.b32.xlu1 %v8023_v44, %s8653_s9  ;;  %8019 = vrot.lane.b32.xlu0 %v8018_v0, %s8653_s9  ;;  %v2595_v44 = vld [vmem:[#allocation3 + $0xf9] sm:$0xff]  ;;  %v2593_v0 = vld [vmem:[#allocation3 + $0xe1] sm:$0xff] }
 0x3c2   : > { %8029 = vrot.lane.b32.xlu2 %v8028_v48, %s8653_s9  ;;  %v8048_v9 = vpack.i.bf16 %v2593_v0, %v2592_v23 }
 0x3c3   : > { %v10648_v53 = vpop.permute.xlu1 %7814  ;;  %v10650_v27 = vpop.permute.xlu0 %7809 }
 0x3c4   : > { %12957 = vst [vmem:[#allocation40_spill] sm:$0xff] %v10648_v53  ;;  %v10652_v51 = vpop.permute.xlu2 %7864  ;;  %v2597_v53 = vld [vmem:[#allocation3 + $0x111] sm:$0xff] }
 0x3c5   : > { %12958 = vst [vmem:[#allocation44_spill] sm:$0xff] %v10650_v27  ;;  %v2594_v27 = vld [vmem:[#allocation3 + $0xf1] sm:$0xff]  ;;  %v8058_v62 = vpack.i.bf16 %v2597_v53, %v2596_v56  ;;  %v2608_v56 = vld [vmem:[#allocation3 + $0x199] sm:$0xff] }
 0x3c6   : > { %v8053_v17 = vpack.i.bf16 %v2595_v44, %v2594_v27  ;;  %v2602_v27 = vld [vmem:[#allocation3 + $0x151] sm:$0xff] }
 0x3c9   : > { %8039 = vrot.lane.b32.xlu1 %v8038_v50, %s8653_s9  ;;  %8034 = vrot.lane.b32.xlu0 %v8033_v45, %s8653_s9  ;;  %v2601_v45 = vld [vmem:[#allocation3 + $0x141] sm:$0xff] }
 0x3ca   : > { %8044 = vrot.lane.b32.xlu2 %v8043_v11, %s8653_s9  ;;  %v2599_v11 = vld [vmem:[#allocation3 + $0x129] sm:$0xff]  ;;  %v8068_v23 = vpack.i.bf16 %v2601_v45, %v2600_v20  ;;  %v2610_v45 = vld [vmem:[#allocation3 + $0x32] sm:$0xff] }
 0x3cb   : > { %v10657_v48 = vpop.permute.xlu1 %7829  ;;  %v10659_v25 = vpop.permute.xlu0 %7824  ;;  %v8063_v53 = vpack.i.bf16 %v2599_v11, %v2598_v38  ;;  %v2612_v11 = vld [vmem:[#allocation3 + $0x4a] sm:$0xff] }
 0x3cc   : > { %v10661_v24 = vpop.permute.xlu2 %7879 }
 0x3cd   : > { %12959 = vst [vmem:[#allocation60_spill] sm:$0xff] %v10661_v24  ;;  %v2603_v24 = vld [vmem:[#allocation3 + $0x159] sm:$0xff] }
 0x3ce   : > { %v8073_v44 = vpack.i.bf16 %v2603_v24, %v2602_v27  ;;  %v2613_v27 = vld [vmem:[#allocation3 + $0x52] sm:$0xff] }
 0x3d1   : > { %8054 = vrot.lane.b32.xlu1 %v8053_v17, %s8653_s9  ;;  %8049 = vrot.lane.b32.xlu0 %v8048_v9, %s8653_s9  ;;  %v2609_v17 = vld [vmem:[#allocation3 + $0x1a1] sm:$0xff] }
 0x3d2   : > { %8059 = vrot.lane.b32.xlu2 %v8058_v62, %s8653_s9 }
 0x3d3   : > { %v10666_v13 = vpop.permute.xlu1 %7844  ;;  %v10668_v4 = vpop.permute.xlu0 %7839 }
 0x3d4   : > { %12960 = vst [vmem:[#allocation14_spill] sm:$0xff] %v10666_v13  ;;  %v10670_v50 = vpop.permute.xlu2 %7894  ;;  %v8088_v13 = vpack.i.bf16 %v2609_v17, %v2608_v56 }
 0x3d5   : > { %12961 = vst [vmem:[#allocation23_spill] sm:$0xff] %v10668_v4  ;;  %v2619_v4 = vld [vmem:[#allocation3 + $0x9a] sm:$0xff] }
 0x3d6   : > { %12962 = vst [vmem:[#allocation27_spill] sm:$0xff] %v10670_v50  ;;  %v2605_v50 = vld [vmem:[#allocation3 + $0x171] sm:$0xff] }
 0x3d7   : > { %v8078_v20 = vpack.i.bf16 %v2605_v50, %v2604_v1  ;;  %v8098_v1 = vpack.i.bf16 %v2613_v27, %v2612_v11  ;;  %v8113_v11 = vpack.i.bf16 %v2619_v4, %v2618_v21  ;;  %v2627_v21 = vld [vmem:[#allocation3 + $0xfa] sm:$0xff] }
 0x3d9   : > { %8069 = vrot.lane.b32.xlu1 %v8068_v23, %s8653_s9  ;;  %8064 = vrot.lane.b32.xlu0 %v8063_v53, %s8653_s9  ;;  %v2611_v23 = vld [vmem:[#allocation3 + $0x3a] sm:$0xff]  ;;  %v2614_v53 = vld [vmem:[#allocation3 + $0x62] sm:$0xff] }
 0x3da   : > { %8074 = vrot.lane.b32.xlu2 %v8073_v44, %s8653_s9  ;;  %v2615_v44 = vld [vmem:[#allocation3 + $0x6a] sm:$0xff]  ;;  %v8093_v50 = vpack.i.bf16 %v2611_v23, %v2610_v45 }
 0x3db   : > { %v10675_v0 = vpop.permute.xlu1 %7859  ;;  %v10677_v9 = vpop.permute.xlu0 %7854  ;;  %v8103_v17 = vpack.i.bf16 %v2615_v44, %v2614_v53 }
 0x3dc   : > { %v10679_v62 = vpop.permute.xlu2 %7909 }
 0x3e1   : > { %8084 = vrot.lane.b32.xlu1 %v10499_v26, %s8653_s9  ;;  %8079 = vrot.lane.b32.xlu0 %v8078_v20, %s8653_s9  ;;  %v2616_v20 = vld [vmem:[#allocation3 + $0x7a] sm:$0xff] }
 0x3e2   : > { %8089 = vrot.lane.b32.xlu2 %v8088_v13, %s8653_s9  ;;  %v8108_v45 = vpack.i.bf16 %v2617_v58, %v2616_v20 }
 0x3e3   : > { %v10685_v38 = vpop.permute.xlu1 %7874  ;;  %v10687_v24 = vpop.permute.xlu0 %7869 }
 0x3e4   : > { %12963 = vst [vmem:[#allocation41_spill] sm:$0xff] %v10685_v38  ;;  %v10689_v56 = vpop.permute.xlu2 %7924  ;;  %v2628_v38 = vld [vmem:[#allocation3 + $0x10a] sm:$0xff] }
 0x3e5   : > { %12964 = vst [vmem:[#allocation52_spill] sm:$0xff] %v10687_v24 }
 0x3e6   : > { %12965 = vst [vmem:[#allocation56_spill] sm:$0xff] %v10689_v56  ;;  %v2621_v56 = vld [vmem:[#allocation3 + $0xb2] sm:$0xff] }
 0x3e7   : > { %v8118_v27 = vpack.i.bf16 %v2621_v56, %v2620_v8 }
 0x3e9   : > { %8099 = vrot.lane.b32.xlu1 %v8098_v1, %s8654_s13  ;;  %8094 = vrot.lane.b32.xlu0 %v8093_v50, %s8654_s13  ;;  %v2622_v1 = vld [vmem:[#allocation3 + $0xc2] sm:$0xff]  ;;  %v2624_v50 = vld [vmem:[#allocation3 + $0xda] sm:$0xff] }
 0x3ea   : > { %8104 = vrot.lane.b32.xlu2 %v8103_v17, %s8654_s13  ;;  %v2625_v17 = vld [vmem:[#allocation3 + $0xe2] sm:$0xff] }
 0x3eb   : > { %v10694_v26 = vpop.permute.xlu1 %7889  ;;  %v10696_v13 = vpop.permute.xlu0 %7884  ;;  %v8128_v58 = vpack.i.bf16 %v2625_v17, %v2624_v50  ;;  %v2633_v50 = vld [vmem:[#allocation3 + $0x142] sm:$0xff] }
 0x3ec   : > { %12966 = vst [vmem:[#allocation15_spill] sm:$0xff] %v10694_v26  ;;  %v10698_v23 = vpop.permute.xlu2 %7939  ;;  %v2623_v26 = vld [vmem:[#allocation3 + $0xca] sm:$0xff] }
 0x3ed   : > { %12967 = vst [vmem:[#allocation18_spill] sm:$0xff] %v10696_v13  ;;  %v2626_v13 = vld [vmem:[#allocation3 + $0xf2] sm:$0xff]  ;;  %v8123_v8 = vpack.i.bf16 %v2623_v26, %v2622_v1 }
 0x3ee   : > { %v8133_v4 = vpack.i.bf16 %v2627_v21, %v2626_v13  ;;  %v8138_v13 = vpack.i.bf16 %v2629_v54, %v2628_v38  ;;  %v2640_v38 = vld [vmem:[#allocation3 + $0x19a] sm:$0xff] }
 0x3f1   : > { %8114 = vrot.lane.b32.xlu1 %v8113_v11, %s8654_s13  ;;  %8109 = vrot.lane.b32.xlu0 %v8108_v45, %s8654_s13  ;;  %v2632_v45 = vld [vmem:[#allocation3 + $0x13a] sm:$0xff] }
 0x3f2   : > { %8119 = vrot.lane.b32.xlu2 %v8118_v27, %s8654_s13  ;;  %v2630_v27 = vld [vmem:[#allocation3 + $0x122] sm:$0xff]  ;;  %v8148_v1 = vpack.i.bf16 %v2633_v50, %v2632_v45 }
 0x3f3   : > { %v10703_v53 = vpop.permute.xlu1 %7904  ;;  %v10705_v44 = vpop.permute.xlu0 %7899  ;;  %v2641_v45 = vld [vmem:[#allocation3 + $0x1a2] sm:$0xff] }
 0x3f4   : > { %12968 = vst [vmem:[#allocation32_spill] sm:$0xff] %v10705_v44  ;;  %v10710_v56 = vpop.permute.xlu2 %7954  ;;  %v2631_v44 = vld [vmem:[#allocation3 + $0x12a] sm:$0xff]  ;;  %v8168_v50 = vpack.i.bf16 %v2641_v45, %v2640_v38 }
 0x3f5   : > { %12969 = vst [vmem:[#allocation42_spill] sm:$0xff] %v10710_v56  ;;  %v8143_v26 = vpack.i.bf16 %v2631_v44, %v2630_v27  ;;  %v2635_v56 = vld [vmem:[#allocation3 + $0x15a] sm:$0xff] }
 0x3f9   : > { %8129 = vrot.lane.b32.xlu1 %v8128_v58, %s8654_s13  ;;  %8124 = vrot.lane.b32.xlu0 %v8123_v8, %s8654_s13  ;;  %v2636_v58 = vld [vmem:[#allocation3 + $0x16a] sm:$0xff]  ;;  %v2637_v8 = vld [vmem:[#allocation3 + $0x172] sm:$0xff] }
 0x3fa   : > { %8134 = vrot.lane.b32.xlu2 %v8133_v4, %s8654_s13  ;;  %v8158_v16 = vpack.i.bf16 %v2637_v8, %v2636_v58 }
 0x3fb   : > { %v10712_v20 = vpop.permute.xlu1 %7919  ;;  %v10714_v11 = vpop.permute.xlu0 %7914 }
 0x3fc   : > { %12970 = vst [vmem:[#allocation46_spill] sm:$0xff] %v10712_v20  ;;  %v10723_v4 = vpop.permute.xlu2 %7969  ;;  %v2634_v20 = vld [vmem:[#allocation3 + $0x152] sm:$0xff] }
 0x3fd   : > { %12971 = vst [vmem:[#allocation62_spill] sm:$0xff] %v10714_v11  ;;  %v8153_v44 = vpack.i.bf16 %v2635_v56, %v2634_v20  ;;  %v2353_v11 = vld [vmem:[#allocation3] sm:$0xff] }
 0x3fe   : > { %12973 = vst [vmem:[#allocation64_spill] sm:$0xff] %v10723_v4 }
 0x401   : > { %8144 = vrot.lane.b32.xlu1 %v8143_v26, %s8654_s13  ;;  %8139 = vrot.lane.b32.xlu0 %v8138_v13, %s8654_s13 }
 0x402   : > { %8149 = vrot.lane.b32.xlu2 %v8148_v1, %s8654_s13 }
 0x403   : > { %v10719_v17 = vpop.permute.xlu1 %7934  ;;  %v10721_v21 = vpop.permute.xlu0 %7929 }
 0x404   : > { %12972 = vst [vmem:[#allocation63_spill] sm:$0xff] %v10721_v21  ;;  %v10733_v26 = vpop.permute.xlu2 %7984 }
 0x409   : > { %8159 = vrot.lane.b32.xlu1 %v8158_v16, %s8654_s13  ;;  %8154 = vrot.lane.b32.xlu0 %v8153_v44, %s8654_s13 }
 0x40a   : > { %8164 = vrot.lane.b32.xlu2 %v10573_v28, %s8654_s13 }
 0x40b   : > { %v10729_v54 = vpop.permute.xlu1 %7949  ;;  %v10731_v27 = vpop.permute.xlu0 %7944 }
 0x40c   : > { %12974 = vst [vmem:[#allocation65_spill] sm:$0xff] %v10729_v54  ;;  %v10740_v16 = vpop.permute.xlu2 %7999  ;;  %v7542_v54 = vunpack.i.h.bf16 %v10419_v6 }
 0x40d   : > { %12977 = vst [vmem:[#allocation68_spill] sm:$0xff] %v10740_v16 }
 0x411   : > { %8169 = vrot.lane.b32.xlu0 %v8168_v50, %s8654_s13  ;;  %v3950_v50 = vld [vmem:[%s12656_s3 + $0x20] sm:$0xf] }
 0x412   : > { %v3972_v4 = vunpack.c.l.b16 %v3950_v50  ;;  %v6746_v50 = vld [vmem:[%s12656_s3 + $0x10] sm:$0xff] }
 0x413   : > { %v10736_v13 = vpop.permute.xlu1 %7964  ;;  %v10738_v56 = vpop.permute.xlu0 %7959 }
 0x414   : > { %12975 = vst [vmem:[#allocation66_spill] sm:$0xff] %v10736_v13  ;;  %v10746_v1 = vpop.permute.xlu2 %8014 }
 0x415   : > { %12976 = vst [vmem:[#allocation67_spill] sm:$0xff] %v10738_v56  ;;  %v8017_v49 = vunpack.i.h.bf16 %v10746_v1 }
 0x41b   : > { %v10742_v20 = vpop.permute.xlu1 %7979  ;;  %v10744_v28 = vpop.permute.xlu0 %7974 }
 0x41c   : > { %12978 = vst [vmem:[#allocation69_spill] sm:$0xff] %v10742_v20  ;;  %v10756_v45 = vpop.permute.xlu2 %8029  ;;  %v3977_v20 = vpack.c.b16 %v3972_v4, %v3972_v4 }
 0x41d   : > { %12979 = vst [vmem:[#allocation70_spill] sm:$0xff] %v10744_v28 }
 0x41e   : > { %12983 = vst [vmem:[#allocation74_spill] sm:$0xff] %v10756_v45  ;;  %v4033_v21 = vsel %vm4031_vm13, %v3977_v20, 0  ;;  %v6745_v20 = vld [vmem:[%s12656_s3 + $0x8] sm:$0xff]  ;;  %v7677_v45 = vunpack.i.h.bf16 %v10531_v47 }
 0x41f   : > { %4038 = vmatpush.bf16.msra.mxu1 %v4033_v21  ;;  %6835 = vmatpush.bf16.msrb.mxu3 %v4033_v21  ;;  %v6744_v21 = vld [vmem:[%s12656_s3] sm:$0xff] }
 0x423   : > { %v10748_v58 = vpop.permute.xlu1 %7994  ;;  %v10750_v8 = vpop.permute.xlu0 %7989 }
 0x424   : > { %12980 = vst [vmem:[#allocation71_spill] sm:$0xff] %v10748_v58  ;;  %v7536_v58 = vunpack.i.l.bf16 %v10339_v43 }
 0x426   : > { %v3666_v40 = vsel %vm324_vm3, %v2353_v11, %v7536_v58  ;;  %v7856_v11 = vunpack.i.l.bf16 %v10677_v9 }
 0x42b   : > { %v10752_v44 = vpop.permute.xlu1 %8009  ;;  %v10754_v38 = vpop.permute.xlu0 %8004 }
 0x42c   : > { %12981 = vst [vmem:[#allocation72_spill] sm:$0xff] %v10752_v44  ;;  %v6747_v44 = vld [vmem:[%s12656_s3 + $0x18] sm:$0xff] }
 0x42d   : > { %12982 = vst [vmem:[#allocation73_spill] sm:$0xff] %v10754_v38  ;;  %v10768_v38 = vpop.permute.xlu2 %8044  ;;  %4039 = vmatpush.bf16.msra.mxu1 %v6747_v44  ;;  %6836 = vmatpush.bf16.msrb.mxu3 %v6747_v44 }
 0x42e   : > { %12984 = vst [vmem:[#allocation75_spill] sm:$0xff] %v10768_v38 }
 0x431   : > { %4040 = vmatpush.bf16.msra.mxu1 %v6746_v50  ;;  %6837 = vmatpush.bf16.msrb.mxu3 %v6746_v50  ;;  %v7537_v50 = vunpack.i.h.bf16 %v10339_v43  ;;  %v7676_v43 = vunpack.i.l.bf16 %v10531_v47 }
 0x433   : > { %v10761_v28 = vpop.permute.xlu1 %8024  ;;  %v10763_v13 = vpop.permute.xlu0 %8019 }
 0x435   : > { %4041 = vmatpush.bf16.msra.mxu1 %v6745_v20  ;;  %6838 = vmatpush.bf16.msrb.mxu3 %v6745_v20  ;;  %v10783_v38 = vpop.permute.xlu2 %8059  ;;  %v2354_v20 = vld [vmem:[#allocation3 + $0x8] sm:$0xff] }
 0x436   : > { %12987 = vst [vmem:[#allocation78_spill] sm:$0xff] %v10783_v38 }
 0x439   : > { %4042 = vmatpush.bf16.msra.mxu1 %v6744_v21  ;;  %6839 = vmatpush.bf16.msrb.mxu3 %v6744_v21  ;;  %v7591_v21 = vunpack.i.l.bf16 %v10471_v37 }
 0x43b   : > { %v10773_v4 = vpop.permute.xlu1 %8039  ;;  %v10775_v56 = vpop.permute.xlu0 %8034  ;;  %v3698_v47 = vsel %vm1877_vm5, %v3666_v40, %v7591_v21  ;;  %v7547_v40 = vunpack.i.h.bf16 %v10409_v22 }
 0x43c   : > { %12985 = vst [vmem:[#allocation76_spill] sm:$0xff] %v10773_v4 }
 0x43d   : > { %12986 = vst [vmem:[#allocation77_spill] sm:$0xff] %v10775_v56  ;;  %v10789_v4 = vpop.permute.xlu2 %8074 }
 0x43e   : > { %12990 = vst [vmem:[#allocation81_spill] sm:$0xff] %v10789_v4  ;;  %v3667_v4 = vsel %vm324_vm3, %v2354_v20, %v7537_v50  ;;  %v7857_v50 = vunpack.i.h.bf16 %v10677_v9  ;;  %v7937_v20 = vunpack.i.h.bf16 %v10719_v17 }
 0x443   : > { %v10785_v16 = vpop.permute.xlu1 %8054  ;;  %v10787_v44 = vpop.permute.xlu0 %8049 }
 0x444   : > { %12988 = vst [vmem:[#allocation79_spill] sm:$0xff] %v10785_v16  ;;  %v7592_v16 = vunpack.i.h.bf16 %v10471_v37  ;;  %v7552_v37 = vunpack.i.h.bf16 %v10365_v18 }
 0x445   : > { %12989 = vst [vmem:[#allocation80_spill] sm:$0xff] %v10787_v44  ;;  %v10803_v44 = vpop.permute.xlu2 %8089 }
 0x446   : > { %12993 = vst [vmem:[#allocation84_spill] sm:$0xff] %v10803_v44  ;;  %v7551_v44 = vunpack.i.l.bf16 %v10365_v18  ;;  %v3699_v58 = vsel %vm1877_vm5, %v3667_v4, %v7592_v16  ;;  %v8016_v18 = vunpack.i.l.bf16 %v10746_v1 }
 0x447   : > { %v3731_v24 = vsel %vm1943_vm7, %v3699_v58, %v7677_v45 }
 0x44b   : > { %v10791_v56 = vpop.permute.xlu1 %8069  ;;  %v10793_v61 = vpop.permute.xlu0 %8064 }
 0x453   : > { %v10797_v36 = vpop.permute.xlu1 %8084  ;;  %v10799_v38 = vpop.permute.xlu0 %8079 }
 0x454   : > { %12991 = vst [vmem:[#allocation82_spill] sm:$0xff] %v10797_v36  ;;  %v7541_v36 = vunpack.i.l.bf16 %v10419_v6  ;;  %v7936_v6 = vunpack.i.l.bf16 %v10719_v17 }
 0x455   : > { %12992 = vst [vmem:[#allocation83_spill] sm:$0xff] %v10799_v38  ;;  %v7777_v38 = vunpack.i.h.bf16 %v10585_v29  ;;  %v3730_v29 = vsel %vm1943_vm7, %v3698_v47, %v7676_v43  ;;  %v7567_v47 = vunpack.i.h.bf16 %v10383_v30 }
 0x456   : > { %v3762_v55 = vsel %vm2009_vm10, %v3730_v29, %v7776_v60  ;;  %v3669_v29 = vsel %vm324_vm3, %v10297_v12, %v7542_v54  ;;  %v12994_v54 = vld [vmem:[#allocation24_spill] sm:$0xff] }
 0x457   : > { %v3763_v9 = vsel %vm2009_vm10, %v3731_v24, %v7777_v38  ;;  %v3795_v17 = vsel %vm3794_vm14, %v3762_v55, %v7856_v11  ;;  %v7546_v24 = vunpack.i.l.bf16 %v10409_v22  ;;  %v10838_v55 = vpop.permute.xlu2 %8104  ;;  %v3668_v22 = vsel %vm324_vm3, %v10299_v33, %v7541_v36 }
 0x458   : > { %v3796_v45 = vsel %vm3794_vm14, %v3763_v9, %v7857_v50  ;;  %v3828_v21 = vsel %vm3827_vm1, %v3795_v17, %v7936_v6  ;;  %v7596_v9 = vunpack.i.l.bf16 %v10463_v57  ;;  %v10860_v33 = vsel %vm324_vm3, %v10413_v19, %v7567_v47 }
 0x459   : > { %v3829_v1 = vsel %vm3827_vm1, %v3796_v45, %v7937_v20  ;;  %v3861_v38 = vsel %vm3860_vm15, %v3828_v21, %v8016_v18  ;;  %v7566_v20 = vunpack.i.l.bf16 %v10383_v30  ;;  %v7597_v18 = vunpack.i.h.bf16 %v10463_v57 }
 0x45a   : > { %v3862_v58 = vsel %vm3860_vm15, %v3829_v1, %v8017_v49  ;;  %v10849_v49 = vsel %vm324_vm3, %v10352_v31, %v7551_v44  ;;  %v10856_v30 = vsel %vm324_vm3, %v10350_v34, %v7552_v37  ;;  %v3670_v12 = vsel %vm324_vm3, %v10317_v41, %v7546_v24 }
 0x45b   : > { %v10827_v16 = vpop.permute.xlu1 %8099  ;;  %v8095_v4 = vpop.permute.xlu0 %8094  ;;  %v3671_v31 = vsel %vm324_vm3, %v10314_v32, %v7547_v40  ;;  %v10870_v57 = vsel %vm324_vm3, %v12994_v54, %v7566_v20  ;;  %v7557_v44 = vunpack.i.h.bf16 %v10439_v15  ;;  %v7682_v34 = vunpack.i.h.bf16 %v10511_v10 }
 0x45c   : > { %v8097_v43 = vunpack.i.h.bf16 %v8095_v4  ;;  %v8096_v60 = vunpack.i.l.bf16 %v8095_v4  ;;  %v7681_v37 = vunpack.i.l.bf16 %v10511_v10  ;;  %v7602_v19 = vunpack.i.h.bf16 %v10449_v35 }
 0x45d   : > { %v7601_v17 = vunpack.i.l.bf16 %v10449_v35  ;;  %v7782_v41 = vunpack.i.h.bf16 %v10631_v3  ;;  %v7781_v32 = vunpack.i.l.bf16 %v10631_v3  ;;  %v3701_v40 = vsel %vm1877_vm5, %v3669_v29, %v7597_v18  ;;  %v12996_v29 = vld [vmem:[#allocation9_spill] sm:$0xff] }
 0x45e   : > { %v3894_v50 = vsel %vm3893_vm0, %v3861_v38, %v8096_v60  ;;  %v3895_v11 = vsel %vm3893_vm0, %v3862_v58, %v8097_v43  ;;  %v3700_v45 = vsel %vm1877_vm5, %v3668_v22, %v7596_v9  ;;  %v7862_v4 = vunpack.i.h.bf16 %v10675_v0  ;;  %v12995_v22 = vld [vmem:[#allocation8_spill] sm:$0xff] }
 0x45f   : > { %v3926_v6 = vpack.c.bf16 %v3895_v11, %v3894_v50  ;;  %v7861_v21 = vunpack.i.l.bf16 %v10675_v0  ;;  %v7687_v1 = vunpack.i.h.bf16 %v10557_v39  ;;  %v7686_v10 = vunpack.i.l.bf16 %v10557_v39  ;;  %v10893_v47 = vpop.permute.xlu2 %8119 }
 0x460   : > { %v7942_v43 = vunpack.i.h.bf16 %v10698_v23  ;;  %v7941_v35 = vunpack.i.l.bf16 %v10698_v23  ;;  %v3732_v60 = vsel %vm1943_vm7, %v3700_v45, %v7681_v37  ;;  %v3733_v3 = vsel %vm1943_vm7, %v3701_v40, %v7682_v34 }
 0x461   : > { %6693 = vmatmul.msk.bf16.vlgmr.msra.gmra.mxu1 %vm3982_vm2, %v3926_v6  ;;  %v8022_v24 = vunpack.i.h.bf16 %v10763_v13  ;;  %v8021_v38 = vunpack.i.l.bf16 %v10763_v13  ;;  %v3764_v58 = vsel %vm2009_vm10, %v3732_v60, %v7781_v32  ;;  %v3765_v0 = vsel %vm2009_vm10, %v3733_v3, %v7782_v41 }
 0x462   : > { %v8102_v39 = vunpack.i.h.bf16 %v10827_v16  ;;  %v8101_v50 = vunpack.i.l.bf16 %v10827_v16  ;;  %v7712_v23 = vunpack.i.h.bf16 %v10555_v14  ;;  %v7711_v11 = vunpack.i.l.bf16 %v10555_v14 }
 0x463   : > { %v10866_v36 = vpop.permute.xlu1 %8114  ;;  %v3797_v20 = vsel %vm3794_vm14, %v3764_v58, %v7861_v21  ;;  %v3798_v6 = vsel %vm3794_vm14, %v3765_v0, %v7862_v4  ;;  %v3687_v13 = vsel %vm324_vm3, %v12995_v22, %v7687_v1  ;;  %v3686_v18 = vsel %vm324_vm3, %v12996_v29, %v7686_v10 }
 0x464   : > { %v3830_v9 = vsel %vm3827_vm1, %v3797_v20, %v7941_v35  ;;  %v3831_v54 = vsel %vm3827_vm1, %v3798_v6, %v7942_v43  ;;  %v7556_v16 = vunpack.i.l.bf16 %v10439_v15  ;;  %v3702_v14 = vsel %vm1877_vm5, %v3670_v12, %v7601_v17  ;;  %v10925_v35 = vpop.permute.xlu0 %8109 }
 0x465   : > { %v3863_v37 = vsel %vm3860_vm15, %v3830_v9, %v8021_v38  ;;  %v3864_v41 = vsel %vm3860_vm15, %v3831_v54, %v8022_v24  ;;  %v3703_v32 = vsel %vm1877_vm5, %v3671_v31, %v7602_v19  ;;  %v7742_v40 = vunpack.i.h.bf16 %v10547_v7 }
 0x466   : > { %v3896_v45 = vsel %vm3893_vm0, %v3863_v37, %v8101_v50  ;;  %v3897_v4 = vsel %vm3893_vm0, %v3864_v41, %v8102_v39  ;;  %v3719_v21 = vsel %vm1877_vm5, %v3687_v13, %v7712_v23  ;;  %v3718_v1 = vsel %vm1877_vm5, %v3686_v18, %v7711_v11 }
 0x467   : > { %v7827_v10 = vunpack.i.h.bf16 %v10659_v25  ;;  %v7826_v12 = vunpack.i.l.bf16 %v10659_v25  ;;  %v7747_v17 = vunpack.i.h.bf16 %v10559_v63  ;;  %v7746_v43 = vunpack.i.l.bf16 %v10559_v63  ;;  %v10943_v22 = vpop.permute.xlu2 %8134 }
 0x468   : > { %v7907_v31 = vunpack.i.h.bf16 %v10703_v53  ;;  %v7906_v19 = vunpack.i.l.bf16 %v10703_v53  ;;  %v7741_v60 = vunpack.i.l.bf16 %v10547_v7  ;;  %v7987_v3 = vunpack.i.h.bf16 %v10733_v26 }
 0x469   : > { %v7986_v24 = vunpack.i.l.bf16 %v10733_v26  ;;  %v3927_v38 = vpack.c.bf16 %v3897_v4, %v3896_v45  ;;  %v3750_v58 = vsel %vm1943_vm7, %v3718_v1, %v7746_v43  ;;  %v3751_v25 = vsel %vm1943_vm7, %v3719_v21, %v7747_v17  ;;  %v12997_v43 = vld [vmem:[#allocation11_spill] sm:$0xff] }
 0x46a   : > { %v8067_v0 = vunpack.i.h.bf16 %v10793_v61  ;;  %v8066_v63 = vunpack.i.l.bf16 %v10793_v61  ;;  %v7692_v39 = vunpack.i.h.bf16 %v10569_v42  ;;  %v7691_v53 = vunpack.i.l.bf16 %v10569_v42 }
 0x46b   : > { %v10907_v34 = vpop.permute.xlu1 %8129  ;;  %v3782_v50 = vsel %vm2009_vm10, %v3750_v58, %v7826_v12  ;;  %v3783_v23 = vsel %vm2009_vm10, %v3751_v25, %v7827_v10  ;;  %v7732_v26 = vunpack.i.h.bf16 %v10581_v52  ;;  %v7731_v11 = vunpack.i.l.bf16 %v10581_v52 }
 0x46c   : > { %v3815_v20 = vsel %vm3794_vm14, %v3782_v50, %v7906_v19  ;;  %v3816_v6 = vsel %vm3794_vm14, %v3783_v23, %v7907_v31  ;;  %v7787_v9 = vunpack.i.h.bf16 %v10629_v46  ;;  %v7786_v54 = vunpack.i.l.bf16 %v10629_v46  ;;  %v10967_v58 = vpop.permute.xlu0 %8124 }
 0x46d   : > { %v3848_v13 = vsel %vm3827_vm1, %v3815_v20, %v7986_v24  ;;  %v3849_v42 = vsel %vm3827_vm1, %v3816_v6, %v7987_v3  ;;  %v7867_v41 = vunpack.i.h.bf16 %v10652_v51  ;;  %v7866_v45 = vunpack.i.l.bf16 %v10652_v51 }
 0x46e   : > { %v3881_v37 = vsel %vm3860_vm15, %v3848_v13, %v8066_v63  ;;  %v3882_v52 = vsel %vm3860_vm15, %v3849_v42, %v8067_v0  ;;  %v3734_v1 = vsel %vm1943_vm7, %v3702_v14, %v7691_v53  ;;  %v7947_v10 = vunpack.i.h.bf16 %v10731_v27 }
 0x46f   : > { %v7946_v12 = vunpack.i.l.bf16 %v10731_v27  ;;  %v3735_v46 = vsel %vm1943_vm7, %v3703_v32, %v7692_v39  ;;  %v3688_v31 = vsel %vm324_vm3, %v12997_v43, %v7731_v11  ;;  %v8027_v19 = vunpack.i.h.bf16 %v10761_v28  ;;  %v12998_v27 = vld [vmem:[#allocation10_spill] sm:$0xff] }
 0x470   : > { %v8026_v51 = vunpack.i.l.bf16 %v10761_v28  ;;  %v3766_v3 = vsel %vm2009_vm10, %v3734_v1, %v7786_v54  ;;  %v3767_v24 = vsel %vm2009_vm10, %v3735_v46, %v7787_v9  ;;  %v8107_v14 = vunpack.i.h.bf16 %v10838_v55 }
 0x471   : > { %6694 = vmatmul.msk.bf16.gmra.mxu1 %vm3982_vm2, %v3927_v38  ;;  %v8106_v38 = vunpack.i.l.bf16 %v10838_v55  ;;  %v3689_v32 = vsel %vm324_vm3, %v12998_v27, %v7732_v26  ;;  %v7751_v25 = vunpack.i.l.bf16 %v10607_v5  ;;  %v3799_v0 = vsel %vm3794_vm14, %v3766_v3, %v7866_v45  ;;  %v13001_v27 = vld [vmem:[#allocation48_spill] sm:$0xff] }
 0x472   : > { %v3800_v28 = vsel %vm3794_vm14, %v3767_v24, %v7867_v41  ;;  %v7752_v63 = vunpack.i.h.bf16 %v10607_v5  ;;  %v7831_v39 = vunpack.i.l.bf16 %v10657_v48  ;;  %v3832_v53 = vsel %vm3827_vm1, %v3799_v0, %v7946_v12  ;;  %v13000_v24 = vld [vmem:[#allocation36_spill] sm:$0xff] }
 0x473   : > { %v8145_v61 = vpop.permute.xlu1 %8144  ;;  %v3833_v55 = vsel %vm3827_vm1, %v3800_v28, %v7947_v10  ;;  %v3720_v50 = vsel %vm1877_vm5, %v3688_v31, %v7741_v60  ;;  %v7832_v23 = vunpack.i.h.bf16 %v10657_v48  ;;  %v3865_v26 = vsel %vm3860_vm15, %v3832_v53, %v8026_v51  ;;  %v12999_v31 = vld [vmem:[#allocation58_spill] sm:$0xff]  ;;  %v13002_v28 = vld [vmem:[#allocation52_spill] sm:$0xff]  ;;  %v13003_v53 = vld [vmem:[#allocation61_spill] sm:$0xff] }
 0x474   : > { %v8147_v29 = vunpack.i.h.bf16 %v8145_v61  ;;  %v8146_v18 = vunpack.i.l.bf16 %v8145_v61  ;;  %v3866_v11 = vsel %vm3860_vm15, %v3833_v55, %v8027_v19  ;;  %v7912_v20 = vunpack.i.h.bf16 %v10679_v62  ;;  %v8150_v61 = vpop.permute.xlu2 %8149 }
 0x475   : > { %v7911_v6 = vunpack.i.l.bf16 %v10679_v62  ;;  %v3898_v5 = vsel %vm3893_vm0, %v3865_v26, %v8106_v38  ;;  %v3899_v13 = vsel %vm3893_vm0, %v3866_v11, %v8107_v14  ;;  %v3721_v42 = vsel %vm1877_vm5, %v3689_v32, %v7742_v40  ;;  %v8556_v40 = vld [vmem:[#allocation3 + $0x60] sm:$0xff] }
 0x476   : > { %v3914_v4 = vsel %vm3893_vm0, %v3881_v37, %v8146_v18  ;;  %v3915_v21 = vsel %vm3893_vm0, %v3882_v52, %v8147_v29  ;;  %v3752_v60 = vsel %vm1943_vm7, %v3720_v50, %v7751_v25  ;;  %v7992_v48 = vunpack.i.h.bf16 %v10750_v8  ;;  %v13004_v50 = vld [vmem:[#allocation65_spill] sm:$0xff] }
 0x477   : > { %v3936_v17 = vpack.c.bf16 %v3915_v21, %v3914_v4  ;;  %v7991_v29 = vunpack.i.l.bf16 %v10750_v8  ;;  %v3753_v18 = vsel %vm1943_vm7, %v3721_v42, %v7752_v63  ;;  %v3784_v9 = vsel %vm2009_vm10, %v3752_v60, %v7831_v39  ;;  %v8557_v8 = vld [vmem:[#allocation3 + $0x68] sm:$0xff] }
 0x478   : > { %v8072_v62 = vunpack.i.h.bf16 %v10791_v56  ;;  %v8071_v54 = vunpack.i.l.bf16 %v10791_v56  ;;  %v3785_v37 = vsel %vm2009_vm10, %v3753_v18, %v7832_v23  ;;  %v8152_v52 = vunpack.i.h.bf16 %v8150_v61 }
 0x479   : > { %6703 = vmatmul.msk.bf16.vlgmr.msrb.gmra.mxu3 %vm3982_vm2, %v3936_v17  ;;  %v8151_v7 = vunpack.i.l.bf16 %v8150_v61  ;;  %v3928_v41 = vpack.c.bf16 %v3899_v13, %v3898_v5  ;;  %v11001_v45 = vsel %vm324_vm3, %v8556_v40, %v7556_v16  ;;  %v11006_v4 = vsel %vm324_vm3, %v8557_v8, %v7557_v44  ;;  %v11017_v44 = vpop.permute.xlu0 %8139  ;;  %v13005_v61 = vld [vmem:[#allocation74_spill] sm:$0xff] }
 0x47a   : > { %v3817_v21 = vsel %vm3794_vm14, %v3784_v9, %v7911_v6  ;;  %v3818_v56 = vsel %vm3794_vm14, %v3785_v37, %v7912_v20  ;;  %v7612_v1 = vunpack.i.h.bf16 %v10495_v2  ;;  %v7611_v10 = vunpack.i.l.bf16 %v10495_v2  ;;  %v13007_v37 = vld [vmem:[#allocation54_spill] sm:$0xff] }
 0x47b   : > { %v3850_v12 = vsel %vm3827_vm1, %v3817_v21, %v7991_v29  ;;  %v3851_v17 = vsel %vm3827_vm1, %v3818_v56, %v7992_v48  ;;  %v7572_v16 = vunpack.i.h.bf16 %v10455_v59  ;;  %v7571_v15 = vunpack.i.l.bf16 %v10455_v59  ;;  %v13006_v29 = vld [vmem:[#allocation12_spill] sm:$0xff]  ;;  %v13008_v56 = vld [vmem:[#allocation62_spill] sm:$0xff] }
 0x47c   : > { %v3883_v46 = vsel %vm3860_vm15, %v3850_v12, %v8071_v54  ;;  %v3884_v43 = vsel %vm3860_vm15, %v3851_v17, %v8072_v62  ;;  %v7697_v19 = vunpack.i.h.bf16 %v12999_v31  ;;  %v7696_v2 = vunpack.i.l.bf16 %v12999_v31  ;;  %v13009_v31 = vld [vmem:[#allocation71_spill] sm:$0xff] }
 0x47d   : > { %v3916_v51 = vsel %vm3893_vm0, %v3883_v46, %v8151_v7  ;;  %v3917_v3 = vsel %vm3893_vm0, %v3884_v43, %v8152_v52  ;;  %v7582_v14 = vunpack.i.h.bf16 %v13000_v24  ;;  %v7581_v38 = vunpack.i.l.bf16 %v13000_v24 }
 0x47e   : > { %v7792_v59 = vunpack.i.h.bf16 %v13001_v27  ;;  %v7791_v32 = vunpack.i.l.bf16 %v13001_v27  ;;  %v3704_v25 = vsel %vm1877_vm5, %v10849_v49, %v7611_v10  ;;  %v3705_v0 = vsel %vm1877_vm5, %v10856_v30, %v7612_v1  ;;  %v13010_v27 = vld [vmem:[#allocation81_spill] sm:$0xff] }
 0x47f   : > { %v7872_v63 = vunpack.i.h.bf16 %v13002_v28  ;;  %v7871_v39 = vunpack.i.l.bf16 %v13002_v28  ;;  %v7636_v55 = vunpack.i.l.bf16 %v13003_v53  ;;  %v7952_v23 = vunpack.i.h.bf16 %v13004_v50 }
 0x480   : > { %v7951_v26 = vunpack.i.l.bf16 %v13004_v50  ;;  %v3937_v11 = vpack.c.bf16 %v3917_v3, %v3916_v51  ;;  %v3737_v20 = vsel %vm1943_vm7, %v3705_v0, %v7697_v19  ;;  %v3736_v6 = vsel %vm1943_vm7, %v3704_v25, %v7696_v2 }
 0x481   : > { %6695 = vmatmul.msk.bf16.gmra.mxu1 %vm3982_vm2, %v3928_v41  ;;  %v8032_v49 = vunpack.i.h.bf16 %v13005_v61  ;;  %v8031_v5 = vunpack.i.l.bf16 %v13005_v61  ;;  %v3768_v30 = vsel %vm2009_vm10, %v3736_v6, %v7791_v32  ;;  %v3769_v13 = vsel %vm2009_vm10, %v3737_v20, %v7792_v59  ;;  %v8155_v12 = vpop.permute.xlu0 %8154 }
 0x482   : > { %v8112_v42 = vunpack.i.h.bf16 %v10925_v35  ;;  %v8111_v60 = vunpack.i.l.bf16 %v10925_v35  ;;  %v7637_v48 = vunpack.i.h.bf16 %v13003_v53  ;;  %v7756_v18 = vunpack.i.l.bf16 %v13006_v29  ;;  %v8559_v53 = vld [vmem:[#allocation3 + $0x138] sm:$0xff] }
 0x483   : > { %v3801_v9 = vsel %vm3794_vm14, %v3768_v30, %v7871_v39  ;;  %v3802_v62 = vsel %vm3794_vm14, %v3769_v13, %v7872_v63  ;;  %v7757_v54 = vunpack.i.h.bf16 %v13006_v29  ;;  %v7836_v52 = vunpack.i.l.bf16 %v13007_v37  ;;  %v13013_v13 = vld [vmem:[#allocation43_spill] sm:$0xff] }
 0x484   : > { %v3834_v7 = vsel %vm3827_vm1, %v3801_v9, %v7951_v26  ;;  %v3835_v41 = vsel %vm3827_vm1, %v3802_v62, %v7952_v23  ;;  %v3722_v35 = vsel %vm1877_vm5, %v10870_v57, %v7636_v55  ;;  %v7837_v40 = vunpack.i.h.bf16 %v13007_v37  ;;  %v13011_v26 = vld [vmem:[#allocation26_spill] sm:$0xff] }
 0x485   : > { %v3867_v8 = vsel %vm3860_vm15, %v3834_v7, %v8031_v5  ;;  %v3868_v21 = vsel %vm3860_vm15, %v3835_v41, %v8032_v49  ;;  %v7917_v1 = vunpack.i.h.bf16 %v13008_v56  ;;  %v7916_v10 = vunpack.i.l.bf16 %v13008_v56  ;;  %v13012_v49 = vld [vmem:[#allocation39_spill] sm:$0xff] }
 0x486   : > { %v3900_v17 = vsel %vm3893_vm0, %v3867_v8, %v8111_v60  ;;  %v3901_v46 = vsel %vm3893_vm0, %v3868_v21, %v8112_v42  ;;  %v3723_v43 = vsel %vm1877_vm5, %v10860_v33, %v7637_v48  ;;  %v3754_v57 = vsel %vm1943_vm7, %v3722_v35, %v7756_v18  ;;  %v8558_v33 = vld [vmem:[#allocation3 + $0x140] sm:$0xff]  ;;  %v13014_v18 = vld [vmem:[#allocation57_spill] sm:$0xff]  ;;  %v13017_v21 = vld [vmem:[#allocation59_spill] sm:$0xff] }
 0x487   : > { %v7997_v19 = vunpack.i.h.bf16 %v13009_v31  ;;  %v7996_v2 = vunpack.i.l.bf16 %v13009_v31  ;;  %v3755_v51 = vsel %vm1943_vm7, %v3723_v43, %v7757_v54  ;;  %v3786_v3 = vsel %vm2009_vm10, %v3754_v57, %v7836_v52  ;;  %v13015_v54 = vld [vmem:[#allocation16_spill] sm:$0xff]  ;;  %v13016_v35 = vld [vmem:[#allocation41_spill] sm:$0xff] }
 0x488   : > { %v8077_v59 = vunpack.i.h.bf16 %v13010_v27  ;;  %v8076_v32 = vunpack.i.l.bf16 %v13010_v27  ;;  %v3787_v25 = vsel %vm2009_vm10, %v3755_v51, %v7837_v40  ;;  %v8157_v0 = vunpack.i.h.bf16 %v8155_v12  ;;  %v13019_v57 = vld [vmem:[#allocation77_spill] sm:$0xff] }
 0x489   : > { %6704 = vmatmul.msk.bf16.gmra.mxu3 %vm3982_vm2, %v3937_v11  ;;  %v8156_v28 = vunpack.i.l.bf16 %v8155_v12  ;;  %v3929_v63 = vpack.c.bf16 %v3901_v46, %v3900_v17  ;;  %v3693_v39 = vsel %vm324_vm3, %v8558_v33, %v7572_v16  ;;  %v3692_v55 = vsel %vm324_vm3, %v8559_v53, %v7571_v15  ;;  %v13020_v27 = vld [vmem:[#allocation17_spill] sm:$0xff] }
 0x48a   : > { %v3819_v50 = vsel %vm3794_vm14, %v3786_v3, %v7916_v10  ;;  %v3820_v23 = vsel %vm3794_vm14, %v3787_v25, %v7917_v1  ;;  %v7617_v11 = vunpack.i.h.bf16 %v13011_v26  ;;  %v7616_v20 = vunpack.i.l.bf16 %v13011_v26  ;;  %v13018_v1 = vld [vmem:[#allocation42_spill] sm:$0xff] }
 0x48b   : > { %v3852_v6 = vsel %vm3827_vm1, %v3819_v50, %v7996_v2  ;;  %v3853_v61 = vsel %vm3827_vm1, %v3820_v23, %v7997_v19  ;;  %v7587_v5 = vunpack.i.h.bf16 %v13012_v49  ;;  %v7586_v16 = vunpack.i.l.bf16 %v13012_v49 }
 0x48c   : > { %v3885_v15 = vsel %vm3860_vm15, %v3852_v6, %v8076_v32  ;;  %v3886_v30 = vsel %vm3860_vm15, %v3853_v61, %v8077_v59  ;;  %v7702_v42 = vunpack.i.h.bf16 %v13013_v13  ;;  %v7701_v60 = vunpack.i.l.bf16 %v13013_v13  ;;  %v8160_v61 = vpop.permute.xlu1 %8159 }
 0x48d   : > { %v3918_v48 = vsel %vm3893_vm0, %v3885_v15, %v8156_v28  ;;  %v3919_v29 = vsel %vm3893_vm0, %v3886_v30, %v8157_v0  ;;  %v7562_v9 = vunpack.i.h.bf16 %v13014_v18  ;;  %v7561_v62 = vunpack.i.l.bf16 %v13014_v18  ;;  %v13021_v28 = vld [vmem:[#allocation23_spill] sm:$0xff] }
 0x48e   : > { %v7797_v37 = vunpack.i.h.bf16 %v13015_v54  ;;  %v7796_v52 = vunpack.i.l.bf16 %v13015_v54  ;;  %v3707_v7 = vsel %vm1877_vm5, %v11006_v4, %v7617_v11  ;;  %v3706_v41 = vsel %vm1877_vm5, %v11001_v45, %v7616_v20  ;;  %v13022_v11 = vld [vmem:[#allocation46_spill] sm:$0xff]  ;;  %v13024_v54 = vld [vmem:[#allocation83_spill] sm:$0xff] }
 0x48f   : > { %v7877_v40 = vunpack.i.h.bf16 %v13016_v35  ;;  %v7876_v8 = vunpack.i.l.bf16 %v13016_v35  ;;  %v7646_v56 = vunpack.i.l.bf16 %v13017_v21  ;;  %v7957_v10 = vunpack.i.h.bf16 %v13018_v1 }
 0x490   : > { %v7956_v12 = vunpack.i.l.bf16 %v13018_v1  ;;  %v3938_v17 = vpack.c.bf16 %v3919_v29, %v3918_v48  ;;  %v3738_v46 = vsel %vm1943_vm7, %v3706_v41, %v7701_v60  ;;  %v3739_v43 = vsel %vm1943_vm7, %v3707_v7, %v7702_v42 }
 0x491   : > { %6696 = vmatmul.msk.bf16.gmra.mxu1 %vm3982_vm2, %v3929_v63  ;;  %v8037_v4 = vunpack.i.h.bf16 %v13019_v57  ;;  %v8036_v31 = vunpack.i.l.bf16 %v13019_v57  ;;  %v3770_v45 = vsel %vm2009_vm10, %v3738_v46, %v7796_v52  ;;  %v3771_v19 = vsel %vm2009_vm10, %v3739_v43, %v7797_v37  ;;  %v8560_v57 = vld [vmem:[#allocation3 + $0x80] sm:$0xff] }
 0x492   : > { %v8117_v2 = vunpack.i.h.bf16 %v10866_v36  ;;  %v8116_v51 = vunpack.i.l.bf16 %v10866_v36  ;;  %v7647_v3 = vunpack.i.h.bf16 %v13017_v21  ;;  %v7761_v59 = vunpack.i.l.bf16 %v13020_v27 }
 0x493   : > { %v3803_v32 = vsel %vm3794_vm14, %v3770_v45, %v7876_v8  ;;  %v3804_v25 = vsel %vm3794_vm14, %v3771_v19, %v7877_v40  ;;  %v7762_v0 = vunpack.i.h.bf16 %v13020_v27  ;;  %v7841_v63 = vunpack.i.l.bf16 %v13021_v28 }
 0x494   : > { %v3836_v33 = vsel %vm3827_vm1, %v3803_v32, %v7956_v12  ;;  %v3837_v53 = vsel %vm3827_vm1, %v3804_v25, %v7957_v10  ;;  %v3724_v36 = vsel %vm1877_vm5, %v3692_v55, %v7646_v56  ;;  %v7842_v50 = vunpack.i.h.bf16 %v13021_v28  ;;  %v13023_v55 = vld [vmem:[#allocation68_spill] sm:$0xff]  ;;  %v13026_v10 = vld [vmem:[#allocation22_spill] sm:$0xff]  ;;  %v8562_v25 = vld [vmem:[#allocation3 + $0x158] sm:$0xff] }
 0x495   : > { %v3869_v23 = vsel %vm3860_vm15, %v3836_v33, %v8036_v31  ;;  %v3870_v26 = vsel %vm3860_vm15, %v3837_v53, %v8037_v4  ;;  %v7922_v20 = vunpack.i.h.bf16 %v13022_v11  ;;  %v7921_v6 = vunpack.i.l.bf16 %v13022_v11  ;;  %v8561_v31 = vld [vmem:[#allocation3 + $0x78] sm:$0xff]  ;;  %v8563_v28 = vld [vmem:[#allocation3 + $0x150] sm:$0xff]  ;;  %v13030_v11 = vld [vmem:[#allocation31_spill] sm:$0xff] }
 0x496   : > { %v3902_v15 = vsel %vm3893_vm0, %v3869_v23, %v8116_v51  ;;  %v3903_v30 = vsel %vm3893_vm0, %v3870_v26, %v8117_v2  ;;  %v3725_v13 = vsel %vm1877_vm5, %v3693_v39, %v7647_v3  ;;  %v3756_v42 = vsel %vm1943_vm7, %v3724_v36, %v7761_v59  ;;  %v13025_v39 = vld [vmem:[#allocation20_spill] sm:$0xff]  ;;  %v13027_v51 = vld [vmem:[#allocation19_spill] sm:$0xff] }
 0x497   : > { %v8002_v60 = vunpack.i.h.bf16 %v13023_v55  ;;  %v8001_v48 = vunpack.i.l.bf16 %v13023_v55  ;;  %v3757_v29 = vsel %vm1943_vm7, %v3725_v13, %v7762_v0  ;;  %v3788_v18 = vsel %vm2009_vm10, %v3756_v42, %v7841_v63  ;;  %v13028_v63 = vld [vmem:[#allocation13_spill] sm:$0xff]  ;;  %v13032_v55 = vld [vmem:[#allocation76_spill] sm:$0xff] }
 0x498   : > { %v8082_v37 = vunpack.i.h.bf16 %v13024_v54  ;;  %v8081_v52 = vunpack.i.l.bf16 %v13024_v54  ;;  %v3789_v7 = vsel %vm2009_vm10, %v3757_v29, %v7842_v50  ;;  %v8162_v41 = vunpack.i.h.bf16 %v8160_v61  ;;  %v13029_v50 = vld [vmem:[#allocation60_spill] sm:$0xff] }
 0x499   : > { %6705 = vmatmul.msk.bf16.gmra.mxu3 %vm3982_vm2, %v3938_v17  ;;  %v8161_v35 = vunpack.i.l.bf16 %v8160_v61  ;;  %v3930_v40 = vpack.c.bf16 %v3903_v30, %v3902_v15  ;;  %v7577_v8 = vunpack.i.h.bf16 %v13025_v39  ;;  %v7576_v21 = vunpack.i.l.bf16 %v13025_v39 }
 0x49a   : > { %v3821_v56 = vsel %vm3794_vm14, %v3788_v18, %v7921_v6  ;;  %v3822_v1 = vsel %vm3794_vm14, %v3789_v7, %v7922_v20  ;;  %v7622_v12 = vunpack.i.h.bf16 %v13026_v10  ;;  %v7621_v17 = vunpack.i.l.bf16 %v13026_v10  ;;  %v13031_v6 = vld [vmem:[#allocation67_spill] sm:$0xff]  ;;  %v13033_v7 = vld [vmem:[#allocation38_spill] sm:$0xff] }
 0x49b   : > { %v3854_v46 = vsel %vm3827_vm1, %v3821_v56, %v8001_v48  ;;  %v3855_v43 = vsel %vm3827_vm1, %v3822_v1, %v8002_v60  ;;  %v3677_v4 = vsel %vm324_vm3, %v8560_v57, %v7562_v9  ;;  %v3676_v45 = vsel %vm324_vm3, %v8561_v31, %v7561_v62 }
 0x49c   : > { %v3887_v19 = vsel %vm3860_vm15, %v3854_v46, %v8081_v52  ;;  %v3888_v2 = vsel %vm3860_vm15, %v3855_v43, %v8082_v37  ;;  %v7707_v3 = vunpack.i.h.bf16 %v13027_v51  ;;  %v7706_v27 = vunpack.i.l.bf16 %v13027_v51  ;;  %v13035_v46 = vld [vmem:[#allocation56_spill] sm:$0xff]  ;;  %v13036_v51 = vld [vmem:[#allocation73_spill] sm:$0xff] }
 0x49d   : > { %v3920_v59 = vsel %vm3893_vm0, %v3887_v19, %v8161_v35  ;;  %v3921_v32 = vsel %vm3893_vm0, %v3888_v2, %v8162_v41  ;;  %v3695_v0 = vsel %vm324_vm3, %v8562_v25, %v7577_v8  ;;  %v3694_v9 = vsel %vm324_vm3, %v8563_v28, %v7576_v21  ;;  %v13034_v8 = vld [vmem:[#allocation14_spill] sm:$0xff] }
 0x49e   : > { %v7802_v62 = vunpack.i.h.bf16 %v13028_v63  ;;  %v7801_v33 = vunpack.i.l.bf16 %v13028_v63  ;;  %v3708_v53 = vsel %vm1877_vm5, %v3676_v45, %v7621_v17  ;;  %v3709_v36 = vsel %vm1877_vm5, %v3677_v4, %v7622_v12  ;;  %v8165_v4 = vpop.permute.xlu2 %8164  ;;  %v13037_v25 = vld [vmem:[#allocation82_spill] sm:$0xff] }
 0x49f   : > { %v7882_v23 = vunpack.i.h.bf16 %v13029_v50  ;;  %v7881_v26 = vunpack.i.l.bf16 %v13029_v50  ;;  %v7656_v20 = vunpack.i.l.bf16 %v13030_v11  ;;  %v7962_v61 = vunpack.i.h.bf16 %v13031_v6  ;;  %v8565_v50 = vld [vmem:[#allocation3 + $0x90] sm:$0xff] }
 0x4a0   : > { %v7961_v15 = vunpack.i.l.bf16 %v13031_v6  ;;  %v3939_v30 = vpack.c.bf16 %v3921_v32, %v3920_v59  ;;  %v3740_v13 = vsel %vm1943_vm7, %v3708_v53, %v7706_v27  ;;  %v3741_v42 = vsel %vm1943_vm7, %v3709_v36, %v7707_v3 }
 0x4a1   : > { %6697 = vmatmul.msk.bf16.gmra.mxu1 %vm3982_vm2, %v3930_v40  ;;  %v8042_v60 = vunpack.i.h.bf16 %v13032_v55  ;;  %v8041_v48 = vunpack.i.l.bf16 %v13032_v55  ;;  %v3772_v29 = vsel %vm2009_vm10, %v3740_v13, %v7801_v33  ;;  %v3773_v18 = vsel %vm2009_vm10, %v3741_v42, %v7802_v62 }
 0x4a2   : > { %v8122_v54 = vunpack.i.h.bf16 %v10893_v47  ;;  %v8121_v37 = vunpack.i.l.bf16 %v10893_v47  ;;  %v7657_v52 = vunpack.i.h.bf16 %v13030_v11  ;;  %v7766_v41 = vunpack.i.l.bf16 %v13033_v7 }
 0x4a3   : > { %v3805_v35 = vsel %vm3794_vm14, %v3772_v29, %v7881_v26  ;;  %v3806_v40 = vsel %vm3794_vm14, %v3773_v18, %v7882_v23  ;;  %v7767_v39 = vunpack.i.h.bf16 %v13033_v7  ;;  %v7846_v21 = vunpack.i.l.bf16 %v13034_v8  ;;  %v13041_v7 = vld [vmem:[#allocation21_spill] sm:$0xff] }
 0x4a4   : > { %v3838_v56 = vsel %vm3827_vm1, %v3805_v35, %v7961_v15  ;;  %v3839_v1 = vsel %vm3827_vm1, %v3806_v40, %v7962_v61  ;;  %v3726_v47 = vsel %vm1877_vm5, %v3694_v9, %v7656_v20  ;;  %v7847_v10 = vunpack.i.h.bf16 %v13034_v8  ;;  %v13038_v20 = vld [vmem:[#allocation47_spill] sm:$0xff]  ;;  %v13042_v40 = vld [vmem:[#allocation18_spill] sm:$0xff] }
 0x4a5   : > { %v3871_v12 = vsel %vm3860_vm15, %v3838_v56, %v8041_v48  ;;  %v3872_v17 = vsel %vm3860_vm15, %v3839_v1, %v8042_v60  ;;  %v7927_v43 = vunpack.i.h.bf16 %v13035_v46  ;;  %v7926_v57 = vunpack.i.l.bf16 %v13035_v46  ;;  %v13039_v60 = vld [vmem:[#allocation51_spill] sm:$0xff]  ;;  %v13044_v1 = vld [vmem:[#allocation66_spill] sm:$0xff] }
 0x4a6   : > { %v3904_v31 = vsel %vm3893_vm0, %v3871_v12, %v8121_v37  ;;  %v3905_v45 = vsel %vm3893_vm0, %v3872_v17, %v8122_v54  ;;  %v3727_v19 = vsel %vm1877_vm5, %v3695_v0, %v7657_v52  ;;  %v3758_v2 = vsel %vm1943_vm7, %v3726_v47, %v7766_v41  ;;  %v8564_v0 = vld [vmem:[#allocation3 + $0x98] sm:$0xff]  ;;  %v13040_v37 = vld [vmem:[#allocation28_spill] sm:$0xff] }
 0x4a7   : > { %v8007_v3 = vunpack.i.h.bf16 %v13036_v51  ;;  %v8006_v27 = vunpack.i.l.bf16 %v13036_v51  ;;  %v3759_v59 = vsel %vm1943_vm7, %v3727_v19, %v7767_v39  ;;  %v3790_v32 = vsel %vm2009_vm10, %v3758_v2, %v7846_v21  ;;  %v13043_v21 = vld [vmem:[#allocation49_spill] sm:$0xff] }
 0x4a8   : > { %v8087_v28 = vunpack.i.h.bf16 %v13037_v25  ;;  %v8086_v9 = vunpack.i.l.bf16 %v13037_v25  ;;  %v3791_v63 = vsel %vm2009_vm10, %v3759_v59, %v7847_v10  ;;  %v8167_v62 = vunpack.i.h.bf16 %v8165_v4 }
 0x4a9   : > { %6706 = vmatmul.msk.bf16.gmra.mxu3 %vm3982_vm2, %v3939_v30  ;;  %v8166_v33 = vunpack.i.l.bf16 %v8165_v4  ;;  %v3931_v53 = vpack.c.bf16 %v3905_v45, %v3904_v31  ;;  %v3679_v36 = vsel %vm324_vm3, %v8564_v0, %v7582_v14  ;;  %v3678_v23 = vsel %vm324_vm3, %v8565_v50, %v7581_v38  ;;  %v8566_v14 = vld [vmem:[#allocation3 + $0x170] sm:$0xff]  ;;  %v8567_v38 = vld [vmem:[#allocation3 + $0x168] sm:$0xff] }
 0x4aa   : > { %v3823_v26 = vsel %vm3794_vm14, %v3790_v32, %v7926_v57  ;;  %v3824_v11 = vsel %vm3794_vm14, %v3791_v63, %v7927_v43  ;;  %v7627_v6 = vunpack.i.h.bf16 %v13038_v20  ;;  %v7626_v61 = vunpack.i.l.bf16 %v13038_v20  ;;  %v13045_v43 = vld [vmem:[#allocation75_spill] sm:$0xff] }
 0x4ab   : > { %v3856_v15 = vsel %vm3827_vm1, %v3823_v26, %v8006_v27  ;;  %v3857_v30 = vsel %vm3827_vm1, %v3824_v11, %v8007_v3  ;;  %v3697_v24 = vsel %vm324_vm3, %v8566_v14, %v7587_v5  ;;  %v3696_v13 = vsel %vm324_vm3, %v8567_v38, %v7586_v16  ;;  %v13046_v3 = vld [vmem:[#allocation25_spill] sm:$0xff]  ;;  %v8170_v26 = vpop.permute.xlu0 %8169 }
 0x4ac   : > { %v3889_v42 = vsel %vm3860_vm15, %v3856_v15, %v8086_v9  ;;  %v3890_v55 = vsel %vm3860_vm15, %v3857_v30, %v8087_v28  ;;  %v7717_v48 = vunpack.i.h.bf16 %v13039_v60  ;;  %v7716_v29 = vunpack.i.l.bf16 %v13039_v60  ;;  %v13047_v28 = vld [vmem:[#allocation30_spill] sm:$0xff]  ;;  %v13049_v15 = vld [vmem:[#allocation72_spill] sm:$0xff] }
 0x4ad   : > { %v3922_v18 = vsel %vm3893_vm0, %v3889_v42, %v8166_v33  ;;  %v3923_v54 = vsel %vm3893_vm0, %v3890_v55, %v8167_v62  ;;  %v7607_v52 = vunpack.i.h.bf16 %v13040_v37  ;;  %v7606_v5 = vunpack.i.l.bf16 %v13040_v37  ;;  %v13050_v42 = vld [vmem:[#allocation84_spill] sm:$0xff] }
 0x4ae   : > { %v7807_v49 = vunpack.i.h.bf16 %v13041_v7  ;;  %v7806_v16 = vunpack.i.l.bf16 %v13041_v7  ;;  %v3710_v41 = vsel %vm1877_vm5, %v3678_v23, %v7626_v61  ;;  %v3711_v35 = vsel %vm1877_vm5, %v3679_v36, %v7627_v6  ;;  %v13048_v36 = vld [vmem:[#allocation63_spill] sm:$0xff]  ;;  %v13051_v7 = vld [vmem:[#allocation33_spill] sm:$0xff] }
 0x4af   : > { %v7887_v39 = vunpack.i.h.bf16 %v13042_v40  ;;  %v7886_v8 = vunpack.i.l.bf16 %v13042_v40  ;;  %v7671_v56 = vunpack.i.l.bf16 %v13043_v21  ;;  %v7967_v47 = vunpack.i.h.bf16 %v13044_v1  ;;  %v8568_v40 = vld [vmem:[#allocation3 + $0xb0] sm:$0xff] }
 0x4b0   : > { %v7966_v10 = vunpack.i.l.bf16 %v13044_v1  ;;  %v3940_v12 = vpack.c.bf16 %v3923_v54, %v3922_v18  ;;  %v3743_v17 = vsel %vm1943_vm7, %v3711_v35, %v7717_v48  ;;  %v3742_v46 = vsel %vm1943_vm7, %v3710_v41, %v7716_v29 }
 0x4b1   : > { %6698 = vmatmul.msk.bf16.gmra.mxu1 %vm3982_vm2, %v3931_v53  ;;  %v8047_v57 = vunpack.i.h.bf16 %v13045_v43  ;;  %v8046_v4 = vunpack.i.l.bf16 %v13045_v43  ;;  %v3774_v31 = vsel %vm2009_vm10, %v3742_v46, %v7806_v16  ;;  %v3775_v45 = vsel %vm2009_vm10, %v3743_v17, %v7807_v49  ;;  %v13053_v43 = vld [vmem:[#allocation44_spill] sm:$0xff] }
 0x4b2   : > { %v8127_v19 = vunpack.i.h.bf16 %v10967_v58  ;;  %v8126_v2 = vunpack.i.l.bf16 %v10967_v58  ;;  %v7672_v51 = vunpack.i.h.bf16 %v13043_v21  ;;  %v7771_v27 = vunpack.i.l.bf16 %v13046_v3 }
 0x4b3   : > { %v3807_v59 = vsel %vm3794_vm14, %v3774_v31, %v7886_v8  ;;  %v3808_v32 = vsel %vm3794_vm14, %v3775_v45, %v7887_v39  ;;  %v7772_v25 = vunpack.i.h.bf16 %v13046_v3  ;;  %v7851_v9 = vunpack.i.l.bf16 %v13047_v28  ;;  %v8569_v8 = vld [vmem:[#allocation3 + $0xa8] sm:$0xff] }
 0x4b4   : > { %v3840_v63 = vsel %vm3827_vm1, %v3807_v59, %v7966_v10  ;;  %v3841_v62 = vsel %vm3827_vm1, %v3808_v32, %v7967_v47  ;;  %v3728_v58 = vsel %vm1877_vm5, %v3696_v13, %v7671_v56  ;;  %v7852_v33 = vunpack.i.h.bf16 %v13047_v28  ;;  %v13052_v47 = vld [vmem:[#allocation55_spill] sm:$0xff] }
 0x4b5   : > { %v3873_v53 = vsel %vm3860_vm15, %v3840_v63, %v8046_v4  ;;  %v3874_v0 = vsel %vm3860_vm15, %v3841_v62, %v8047_v57  ;;  %v7932_v50 = vunpack.i.h.bf16 %v13048_v36  ;;  %v7931_v23 = vunpack.i.l.bf16 %v13048_v36  ;;  %v13054_v31 = vld [vmem:[#allocation15_spill] sm:$0xff] }
 0x4b6   : > { %v3906_v11 = vsel %vm3893_vm0, %v3873_v53, %v8126_v2  ;;  %v3907_v20 = vsel %vm3893_vm0, %v3874_v0, %v8127_v19  ;;  %v3729_v6 = vsel %vm1877_vm5, %v3697_v24, %v7672_v51  ;;  %v3760_v61 = vsel %vm1943_vm7, %v3728_v58, %v7771_v27  ;;  %v13055_v2 = vld [vmem:[#allocation64_spill] sm:$0xff] }
 0x4b7   : > { %v8012_v30 = vunpack.i.h.bf16 %v13049_v15  ;;  %v8011_v14 = vunpack.i.l.bf16 %v13049_v15  ;;  %v3761_v38 = vsel %vm1943_vm7, %v3729_v6, %v7772_v25  ;;  %v3792_v13 = vsel %vm2009_vm10, %v3760_v61, %v7851_v9  ;;  %v13056_v25 = vld [vmem:[#allocation80_spill] sm:$0xff]  ;;  %v13057_v6 = vld [vmem:[#allocation53_spill] sm:$0xff] }
 0x4b8   : > { %v8092_v55 = vunpack.i.h.bf16 %v13050_v42  ;;  %v8091_v60 = vunpack.i.l.bf16 %v13050_v42  ;;  %v3793_v48 = vsel %vm2009_vm10, %v3761_v38, %v7852_v33  ;;  %v8172_v29 = vunpack.i.h.bf16 %v8170_v26  ;;  %v8571_v38 = vld [vmem:[#allocation3 + $0xc0] sm:$0xff]  ;;  %v13058_v42 = vld [vmem:[#allocation45_spill] sm:$0xff] }
 0x4b9   : > { %6707 = vmatmul.msk.bf16.gmra.mxu3 %vm3982_vm2, %v3940_v12  ;;  %v8171_v18 = vunpack.i.l.bf16 %v8170_v26  ;;  %v3932_v54 = vpack.c.bf16 %v3907_v20, %v3906_v11  ;;  %v3825_v24 = vsel %vm3794_vm14, %v3792_v13, %v7931_v23  ;;  %v3826_v37 = vsel %vm3794_vm14, %v3793_v48, %v7932_v50  ;;  %v13059_v48 = vld [vmem:[#allocation29_spill] sm:$0xff] }
 0x4ba   : > { %v7632_v49 = vunpack.i.h.bf16 %v13051_v7  ;;  %v7631_v16 = vunpack.i.l.bf16 %v13051_v7  ;;  %v3858_v41 = vsel %vm3827_vm1, %v3825_v24, %v8011_v14  ;;  %v3859_v35 = vsel %vm3827_vm1, %v3826_v37, %v8012_v30  ;;  %v8570_v30 = vld [vmem:[#allocation3 + $0xc8] sm:$0xff] }
 0x4bb   : > { %v3681_v39 = vsel %vm324_vm3, %v8568_v40, %v7607_v52  ;;  %v3680_v21 = vsel %vm324_vm3, %v8569_v8, %v7606_v5  ;;  %v3891_v56 = vsel %vm3860_vm15, %v3858_v41, %v8091_v60  ;;  %v3892_v1 = vsel %vm3860_vm15, %v3859_v35, %v8092_v55  ;;  %v13061_v7 = vld [vmem:[#allocation27_spill] sm:$0xff]  ;;  %v13062_v40 = vld [vmem:[#allocation70_spill] sm:$0xff] }
 0x4bc   : > { %v7722_v10 = vunpack.i.h.bf16 %v13052_v47  ;;  %v7721_v12 = vunpack.i.l.bf16 %v13052_v47  ;;  %v3924_v17 = vsel %vm3893_vm0, %v3891_v56, %v8171_v18  ;;  %v3925_v46 = vsel %vm3893_vm0, %v3892_v1, %v8172_v29  ;;  %v13063_v1 = vld [vmem:[#allocation79_spill] sm:$0xff] }
 0x4bd   : > { %v7812_v57 = vunpack.i.h.bf16 %v13053_v43  ;;  %v7811_v4 = vunpack.i.l.bf16 %v13053_v43  ;;  %v3713_v52 = vsel %vm1877_vm5, %v3681_v39, %v7632_v49  ;;  %v7892_v5 = vunpack.i.h.bf16 %v13054_v31 }
 0x4be   : > { %v7891_v45 = vunpack.i.l.bf16 %v13054_v31  ;;  %v3712_v19 = vsel %vm1877_vm5, %v3680_v21, %v7631_v16  ;;  %v7972_v51 = vunpack.i.h.bf16 %v13055_v2  ;;  %v7971_v3 = vunpack.i.l.bf16 %v13055_v2 }
 0x4bf   : > { %v3941_v27 = vpack.c.bf16 %v3925_v46, %v3924_v17  ;;  %v3744_v59 = vsel %vm1943_vm7, %v3712_v19, %v7721_v12  ;;  %v3745_v32 = vsel %vm1943_vm7, %v3713_v52, %v7722_v10  ;;  %v8052_v28 = vunpack.i.h.bf16 %v13056_v25 }
 0x4c0   : > { %v8051_v9 = vunpack.i.l.bf16 %v13056_v25  ;;  %v3776_v63 = vsel %vm2009_vm10, %v3744_v59, %v7811_v4  ;;  %v3777_v62 = vsel %vm2009_vm10, %v3745_v32, %v7812_v57  ;;  %v8132_v58 = vunpack.i.h.bf16 %v10907_v34  ;;  %v13064_v59 = vld [vmem:[#allocation35_spill] sm:$0xff] }
 0x4c1   : > { %6699 = vmatmul.msk.bf16.gmra.mxu1 %vm3982_vm2, %v3932_v54  ;;  %v8131_v33 = vunpack.i.l.bf16 %v10907_v34  ;;  %v3809_v53 = vsel %vm3794_vm14, %v3776_v63, %v7891_v45  ;;  %v3810_v0 = vsel %vm3794_vm14, %v3777_v62, %v7892_v5  ;;  %v7642_v34 = vunpack.i.h.bf16 %v13057_v6  ;;  %v13060_v54 = vld [vmem:[#allocation40_spill] sm:$0xff] }
 0x4c2   : > { %v3842_v36 = vsel %vm3827_vm1, %v3809_v53, %v7971_v3  ;;  %v3843_v50 = vsel %vm3827_vm1, %v3810_v0, %v7972_v51  ;;  %v7641_v61 = vunpack.i.l.bf16 %v13057_v6  ;;  %v7727_v55 = vunpack.i.h.bf16 %v13058_v42  ;;  %v11342_v5 = vld [vmem:[%s12657_s4] ss:$0 sm:$0xff] }
 0x4c3   : > { %v3875_v23 = vsel %vm3860_vm15, %v3842_v36, %v8051_v9  ;;  %v3876_v26 = vsel %vm3860_vm15, %v3843_v50, %v8052_v28  ;;  %v3683_v14 = vsel %vm324_vm3, %v8570_v30, %v7642_v34  ;;  %v7726_v60 = vunpack.i.l.bf16 %v13058_v42  ;;  %v13065_v28 = vld [vmem:[#allocation37_spill] sm:$0xff]  ;;  %v8572_v36 = vld [vmem:[#allocation3 + $0xe0] sm:$0xff] }
 0x4c4   : > { %v3908_v11 = vsel %vm3893_vm0, %v3875_v23, %v8131_v33  ;;  %v3909_v20 = vsel %vm3893_vm0, %v3876_v26, %v8132_v58  ;;  %v3682_v13 = vsel %vm324_vm3, %v8571_v38, %v7641_v61  ;;  %v7652_v29 = vunpack.i.h.bf16 %v13059_v48  ;;  %v13066_v58 = vld [vmem:[#allocation34_spill] sm:$0xff]  ;;  %v13068_v61 = vld [vmem:[#allocation32_spill] sm:$0xff] }
 0x4c5   : > { %v3933_v15 = vpack.c.bf16 %v3909_v20, %v3908_v11  ;;  %v7651_v18 = vunpack.i.l.bf16 %v13059_v48  ;;  %v7817_v24 = vunpack.i.h.bf16 %v13060_v54  ;;  %v7816_v37 = vunpack.i.l.bf16 %v13060_v54  ;;  %v13067_v23 = vld [vmem:[#allocation50_spill] sm:$0xff]  ;;  %v8573_v20 = vld [vmem:[#allocation3 + $0xd8] sm:$0xff] }
 0x4c6   : > { %v7897_v49 = vunpack.i.h.bf16 %v13061_v7  ;;  %v7896_v16 = vunpack.i.l.bf16 %v13061_v7  ;;  %v3715_v35 = vsel %vm1877_vm5, %v3683_v14, %v7652_v29  ;;  %v7977_v39 = vunpack.i.h.bf16 %v13062_v40  ;;  %v13070_v29 = vld [vmem:[#allocation78_spill] sm:$0xff] }
 0x4c7   : > { %v3714_v41 = vsel %vm1877_vm5, %v3682_v13, %v7651_v18  ;;  %v7976_v8 = vunpack.i.l.bf16 %v13062_v40  ;;  %v3747_v56 = vsel %vm1943_vm7, %v3715_v35, %v7727_v55  ;;  %v8057_v47 = vunpack.i.h.bf16 %v13063_v1  ;;  %v13069_v13 = vld [vmem:[#allocation69_spill] sm:$0xff] }
 0x4c8   : > { %v3746_v21 = vsel %vm1943_vm7, %v3714_v41, %v7726_v60  ;;  %v8056_v10 = vunpack.i.l.bf16 %v13063_v1  ;;  %v3779_v17 = vsel %vm2009_vm10, %v3747_v56, %v7817_v24  ;;  %v8137_v46 = vunpack.i.h.bf16 %v10943_v22 }
 0x4c9   : > { %6708 = vmatmul.msk.bf16.gmra.mxu3 %vm3982_vm2, %v3941_v27  ;;  %v3778_v12 = vsel %vm2009_vm10, %v3746_v21, %v7816_v37  ;;  %v8136_v43 = vunpack.i.l.bf16 %v10943_v22  ;;  %v3812_v4 = vsel %vm3794_vm14, %v3779_v17, %v7897_v49  ;;  %v7662_v32 = vunpack.i.h.bf16 %v13064_v59 }
 0x4ca   : > { %v3811_v57 = vsel %vm3794_vm14, %v3778_v12, %v7896_v16  ;;  %v3845_v31 = vsel %vm3827_vm1, %v3812_v4, %v7977_v39  ;;  %v7661_v25 = vunpack.i.l.bf16 %v13064_v59  ;;  %v7667_v9 = vunpack.i.h.bf16 %v13065_v28 }
 0x4cb   : > { %v3844_v52 = vsel %vm3827_vm1, %v3811_v57, %v7976_v8  ;;  %v3878_v19 = vsel %vm3860_vm15, %v3845_v31, %v8057_v47  ;;  %v7666_v62 = vunpack.i.l.bf16 %v13065_v28  ;;  %v7737_v33 = vunpack.i.h.bf16 %v13066_v58 }
 0x4cc   : > { %v3877_v45 = vsel %vm3860_vm15, %v3844_v52, %v8056_v10  ;;  %v3911_v22 = vsel %vm3893_vm0, %v3878_v19, %v8137_v46  ;;  %v7736_v53 = vunpack.i.l.bf16 %v13066_v58  ;;  %v3685_v50 = vsel %vm324_vm3, %v8572_v36, %v7662_v32 }
 0x4cd   : > { %v3910_v2 = vsel %vm3893_vm0, %v3877_v45, %v8136_v43  ;;  %v7822_v26 = vunpack.i.h.bf16 %v13067_v23  ;;  %v7821_v11 = vunpack.i.l.bf16 %v13067_v23  ;;  %v3684_v6 = vsel %vm324_vm3, %v8573_v20, %v7661_v25 }
 0x4ce   : > { %v3934_v27 = vpack.c.bf16 %v3911_v22, %v3910_v2  ;;  %v3717_v34 = vsel %vm1877_vm5, %v3685_v50, %v7667_v9  ;;  %v7901_v30 = vunpack.i.l.bf16 %v13068_v61  ;;  %v3716_v14 = vsel %vm1877_vm5, %v3684_v6, %v7666_v62 }
 0x4cf   : > { %v3749_v38 = vsel %vm1943_vm7, %v3717_v34, %v7737_v33  ;;  %v7982_v42 = vunpack.i.h.bf16 %v13069_v13  ;;  %v7981_v55 = vunpack.i.l.bf16 %v13069_v13  ;;  %v3748_v48 = vsel %vm1943_vm7, %v3716_v14, %v7736_v53 }
 0x4d0   : > { %v8062_v18 = vunpack.i.h.bf16 %v13070_v29  ;;  %v8061_v54 = vunpack.i.l.bf16 %v13070_v29  ;;  %v3780_v37 = vsel %vm2009_vm10, %v3748_v48, %v7821_v11  ;;  %v3781_v7 = vsel %vm2009_vm10, %v3749_v38, %v7822_v26 }
 0x4d1   : > { %6700 = vmatmul.msk.bf16.gmra.mxu1 %vm3982_vm2, %v3933_v15  ;;  %v7902_v15 = vunpack.i.h.bf16 %v13068_v61  ;;  %v8142_v49 = vunpack.i.h.bf16 %v11017_v44  ;;  %v8141_v16 = vunpack.i.l.bf16 %v11017_v44  ;;  %v3813_v41 = vsel %vm3794_vm14, %v3780_v37, %v7901_v30 }
 0x4d2   : > { %v3846_v39 = vsel %vm3827_vm1, %v3813_v41, %v7981_v55 }
 0x4d3   : > { %v3814_v35 = vsel %vm3794_vm14, %v3781_v7, %v7902_v15  ;;  %v3879_v1 = vsel %vm3860_vm15, %v3846_v39, %v8061_v54 }
 0x4d4   : > { %v3847_v8 = vsel %vm3827_vm1, %v3814_v35, %v7982_v42  ;;  %v3912_v44 = vsel %vm3893_vm0, %v3879_v1, %v8141_v16 }
 0x4d5   : > { %v3880_v47 = vsel %vm3860_vm15, %v3847_v8, %v8062_v18 }
 0x4d6   : > { %v3913_v10 = vsel %vm3893_vm0, %v3880_v47, %v8142_v49 }
 0x4d7   : > { %v3935_v46 = vpack.c.bf16 %v3913_v10, %v3912_v44 }
 0x4de   : > { %v4044_v51 = vpop.f32.mrf.mxu1 }
 0x4df   : > { %v4045_v3 = vadd.f32 %v11342_v5, %v4044_v51 }
 0x4e1   : > { %vm4124_vm4 = vcmp.gt.f32.partialorder %v4045_v3, 0.0  ;;  %v4156_v63 = vmul.f32 0.2, %v4045_v3  ;;  %6701 = vmatmul.msk.bf16.gmra.mxu1 %vm3982_vm2, %v3934_v27 }
 0x4e3   : > { %v4188_v0 = vsel %vm4124_vm4, %v4045_v3, %v4156_v63 }
 0x4e4   : > { %4221 = vst.msk [vmem:[#allocation4 + $0x19] sm:$0xff] %vm324_vm3, %v4188_v0 }
 0x4e6   : > { %v4046_v60 = vpop.f32.mrf.mxu1 }
 0x4e7   : > { %v4047_v24 = vadd.f32 %v11342_v5, %v4046_v60 }
 0x4e9   : > { %vm4125_vm6 = vcmp.gt.f32.partialorder %v4047_v24, 0.0  ;;  %v4157_v40 = vmul.f32 0.2, %v4047_v24 }
 0x4eb   : > { %v4259_v21 = vld [vmem:[#allocation4 + $0x1a] sm:$0x1]  ;;  %v4189_v56 = vsel %vm4125_vm6, %v4047_v24, %v4157_v40 }
 0x4ec   : > { %4277 = vst.msk [vmem:[#allocation4 + $0x18] sm:$0x1] %vm333_vm12, %v4259_v21  ;;  %v4428_v63 = vld [vmem:[#allocation4 + $0x19] sm:$0xff] }
 0x4ed   : > { %4222 = vst.msk [vmem:[#allocation4 + $0x21] sm:$0xff] %vm324_vm3, %v4189_v56  ;;  %v4460_v11 = vmul.f32 0.125, %v4428_v63  ;;  %v4746_v14 = vmul.f32 0.25, %v4428_v63 }
 0x4ee   : > { %v4049_v12 = vpop.f32.mrf.mxu1 }
 0x4ef   : > { %v4050_v17 = vadd.f32 %v11342_v5, %v4049_v12 }
 0x4f1   : > { %vm4126_vm8 = vcmp.gt.f32.partialorder %v4050_v17, 0.0  ;;  %v4158_v43 = vmul.f32 0.2, %v4050_v17  ;;  %6702 = vmatmul.msk.bf16.gmra.mxu1 %vm3982_vm2, %v3935_v46 }
 0x4f3   : > { %v4190_v57 = vsel %vm4126_vm8, %v4050_v17, %v4158_v43  ;;  %v4332_v25 = vld [vmem:[#allocation4 + $0x18] sm:$0xff] }
 0x4f4   : > { %v4295_v4 = vld [vmem:[#allocation4 + $0x27] sm:$0x1]  ;;  %4223 = vst.msk [vmem:[#allocation4 + $0x31] sm:$0xff] %vm324_vm3, %v4190_v57  ;;  %v4364_v33 = vmul.f32 0.0625, %v4332_v25  ;;  %v4650_v30 = vmul.f32 0.125, %v4332_v25  ;;  %v4524_v38 = vld [vmem:[#allocation4 + $0x1a] sm:$0xff] }
 0x4f5   : > { %4313 = vst.msk [vmem:[#allocation4 + $0x29] sm:$0x1] %vm333_vm12, %v4295_v4  ;;  %v4333_v50 = vld [vmem:[#allocation4 + $0x20] sm:$0xff]  ;;  %v4556_v16 = vmul.f32 0.0625, %v4524_v38  ;;  %v4842_v44 = vmul.f32 0.125, %v4524_v38 }
 0x4f6   : > { %v4051_v52 = vpop.f32.mrf.mxu1  ;;  %4253 = vst.msk [vmem:[#allocation4 + $0x1] sm:$0xff] %vm324_vm3, %v4190_v57  ;;  %v4429_v20 = vld [vmem:[#allocation4 + $0x21] sm:$0xff]  ;;  %v4492_v55 = vadd.f32 %v4460_v11, %v4364_v33  ;;  %v4365_v60 = vmul.f32 0.0625, %v4333_v50  ;;  %v4651_v37 = vmul.f32 0.125, %v4333_v50 }
 0x4f7   : > { %v4052_v31 = vadd.f32 %v11342_v5, %v4051_v52  ;;  %v4461_v54 = vmul.f32 0.125, %v4429_v20  ;;  %v4747_v40 = vmul.f32 0.25, %v4429_v20 }
 0x4f8   : > { %v4588_v47 = vadd.f32 %v4556_v16, %v4492_v55 }
 0x4f9   : > { %vm4127_vm9 = vcmp.gt.f32.partialorder %v4052_v31, 0.0  ;;  %v4159_v45 = vmul.f32 0.2, %v4052_v31  ;;  %v4493_v57 = vadd.f32 %v4461_v54, %v4365_v60 }
 0x4fb   : > { %v4191_v19 = vsel %vm4127_vm9, %v4052_v31, %v4159_v45  ;;  %v4260_v51 = vld [vmem:[#allocation4 + $0x32] sm:$0x1] }
 0x4fc   : > { %v4094_v2 = vpop.f32.mrf.mxu3  ;;  %4224 = vst.msk [vmem:[#allocation4 + $0x39] sm:$0xff] %vm324_vm3, %v4191_v19  ;;  %v4525_v24 = vld [vmem:[#allocation4 + $0x22] sm:$0xff]  ;;  %v4430_v4 = vld [vmem:[#allocation4 + $0x31] sm:$0xff] }
 0x4fd   : > { %v4095_v22 = vadd.f32 %v11342_v5, %v4094_v2  ;;  %4254 = vst.msk [vmem:[#allocation4 + $0x9] sm:$0xff] %vm324_vm3, %v4191_v19  ;;  %v4258_v3 = vld [vmem:[#allocation4 + $0x2] sm:$0x1]  ;;  %v4557_v1 = vmul.f32 0.0625, %v4525_v24  ;;  %v4843_v2 = vmul.f32 0.125, %v4525_v24 }
 0x4fe   : > { %4278 = vst.msk [vmem:[#allocation4 + $0x30] sm:$0x1] %vm333_vm12, %v4260_v51  ;;  %v4054_v27 = vpop.f32.mrf.mxu1  ;;  %v4426_v53 = vld [vmem:[#allocation4 + $0x1] sm:$0xff] }
 0x4ff   : > { %4276 = vst.msk [vmem:[#allocation4] sm:$0x1] %vm333_vm12, %v4258_v3  ;;  %vm4144_vm11 = vcmp.gt.f32.partialorder %v4095_v22, 0.0  ;;  %v4176_v59 = vmul.f32 0.2, %v4095_v22  ;;  %v4055_v32 = vadd.f32 %v11342_v5, %v4054_v27  ;;  %v4458_v42 = vmul.f32 0.125, %v4426_v53 }
 0x501   : > { %v4208_v28 = vsel %vm4144_vm11, %v4095_v22, %v4176_v59  ;;  %vm4128_vm13 = vcmp.gt.f32.partialorder %v4055_v32, 0.0  ;;  %v4160_v9 = vmul.f32 0.2, %v4055_v32 }
 0x502   : > { %4241 = vst.msk [vmem:[#allocation4 + $0x109] sm:$0xff] %vm324_vm3, %v4208_v28 }
 0x503   : > { %v4296_v62 = vld [vmem:[#allocation4 + $0x3f] sm:$0x1]  ;;  %v4192_v36 = vsel %vm4128_vm13, %v4055_v32, %v4160_v9  ;;  %v4748_v9 = vmul.f32 0.25, %v4430_v4 }
 0x504   : > { %v4096_v58 = vpop.f32.mrf.mxu3  ;;  %v4294_v0 = vld [vmem:[#allocation4 + $0xf] sm:$0x1]  ;;  %4314 = vst.msk [vmem:[#allocation4 + $0x41] sm:$0x1] %vm333_vm12, %v4296_v62  ;;  %v4522_v34 = vld [vmem:[#allocation4 + $0x2] sm:$0xff]  ;;  %v4335_v51 = vld [vmem:[#allocation4 + $0x38] sm:$0xff] }
 0x505   : > { %4312 = vst.msk [vmem:[#allocation4 + $0x11] sm:$0x1] %vm333_vm12, %v4294_v0  ;;  %v4331_v23 = vld [vmem:[#allocation4 + $0x8] sm:$0xff]  ;;  %v4097_v61 = vadd.f32 %v11342_v5, %v4096_v58  ;;  %v4334_v48 = vld [vmem:[#allocation4 + $0x30] sm:$0xff]  ;;  %v4554_v49 = vmul.f32 0.0625, %v4522_v34  ;;  %v4653_v33 = vmul.f32 0.125, %v4335_v51 }
 0x506   : > { %v4427_v26 = vld [vmem:[#allocation4 + $0x9] sm:$0xff]  ;;  %v4330_v6 = vld [vmem:[#allocation4] sm:$0xff]  ;;  %v4056_v15 = vpop.f32.mrf.mxu1  ;;  %4225 = vst.msk [vmem:[#allocation4 + $0x49] sm:$0xff] %vm324_vm3, %v4192_v36  ;;  %v4363_v29 = vmul.f32 0.0625, %v4331_v23  ;;  %v4652_v39 = vmul.f32 0.125, %v4334_v48  ;;  %v4366_v28 = vmul.f32 0.0625, %v4334_v48 }
 0x507   : > { %v4362_v13 = vmul.f32 0.0625, %v4330_v6  ;;  %v4459_v18 = vmul.f32 0.125, %v4427_v26  ;;  %vm4145_vm4 = vcmp.gt.f32.partialorder %v4097_v61, 0.0  ;;  %v4177_v35 = vmul.f32 0.2, %v4097_v61  ;;  %v4526_v58 = vld [vmem:[#allocation4 + $0x32] sm:$0xff] }
 0x508   : > { %v4057_v21 = vadd.f32 %v11342_v5, %v4056_v15  ;;  %v4684_v22 = vadd.f32 %v4652_v39, %v4588_v47  ;;  %v4462_v36 = vmul.f32 0.125, %v4430_v4  ;;  %v4431_v23 = vld [vmem:[#allocation4 + $0x39] sm:$0xff]  ;;  %v4589_v6 = vadd.f32 %v4557_v1, %v4493_v57 }
 0x509   : > { %v4490_v7 = vadd.f32 %v4458_v42, %v4362_v13  ;;  %v4269_v41 = vld [vmem:[#allocation4 + $0x10a] sm:$0x1]  ;;  %v4491_v10 = vadd.f32 %v4459_v18, %v4363_v29  ;;  %v4209_v43 = vsel %vm4145_vm4, %v4097_v61, %v4177_v35  ;;  %v11411_v34 = vmul.f32 0.0625, %v4335_v51 }
 0x50a   : > { %4287 = vst.msk [vmem:[#allocation4 + $0x108] sm:$0x1] %vm333_vm12, %v4269_v41  ;;  %vm4129_vm6 = vcmp.gt.f32.partialorder %v4057_v21, 0.0  ;;  %v4161_v31 = vmul.f32 0.2, %v4057_v21  ;;  %v4780_v50 = vadd.f32 %v4748_v9, %v4684_v22  ;;  %v11414_v55 = vmul.f32 0.125, %v4431_v23 }
 0x50b   : > { %v4586_v8 = vadd.f32 %v4554_v49, %v4490_v7  ;;  %4242 = vst.msk [vmem:[#allocation4 + $0x111] sm:$0xff] %vm324_vm3, %v4209_v43  ;;  %v4527_v15 = vld [vmem:[#allocation4 + $0x3a] sm:$0xff]  ;;  %v4685_v60 = vadd.f32 %v4653_v33, %v4589_v6  ;;  %v4749_v49 = vmul.f32 0.25, %v4431_v23  ;;  %v4494_v1 = vadd.f32 %v4462_v36, %v4366_v28 }
 0x50c   : > { %v4099_v56 = vpop.f32.mrf.mxu3  ;;  %v4523_v12 = vld [vmem:[#allocation4 + $0xa] sm:$0xff]  ;;  %v4193_v59 = vsel %vm4129_vm6, %v4057_v21, %v4161_v31  ;;  %v4845_v16 = vmul.f32 0.125, %v4527_v15 }
 0x50d   : > { %v4555_v17 = vmul.f32 0.0625, %v4523_v12  ;;  %v4682_v46 = vadd.f32 %v4650_v30, %v4586_v8  ;;  %v4261_v52 = vld [vmem:[#allocation4 + $0x4a] sm:$0x1]  ;;  %v4100_v45 = vadd.f32 %v11342_v5, %v4099_v56  ;;  %4226 = vst.msk [vmem:[#allocation4 + $0x51] sm:$0xff] %vm324_vm3, %v4193_v59  ;;  %v4558_v30 = vmul.f32 0.0625, %v4526_v58 }
 0x50e   : > { %v4059_v19 = vpop.f32.mrf.mxu1  ;;  %4279 = vst.msk [vmem:[#allocation4 + $0x48] sm:$0x1] %vm333_vm12, %v4261_v52  ;;  %v4432_v29 = vld [vmem:[#allocation4 + $0x49] sm:$0xff]  ;;  %v4781_v47 = vadd.f32 %v4749_v49, %v4685_v60 }
 0x50f   : > { %v4587_v3 = vadd.f32 %v4555_v17, %v4491_v10  ;;  %v4778_v27 = vadd.f32 %v4746_v14, %v4682_v46  ;;  %vm4146_vm8 = vcmp.gt.f32.partialorder %v4100_v45, 0.0  ;;  %v4178_v32 = vmul.f32 0.2, %v4100_v45 }
 0x510   : > { %v4060_v25 = vadd.f32 %v11342_v5, %v4059_v19  ;;  %v4844_v14 = vmul.f32 0.125, %v4526_v58  ;;  %v11426_v8 = vmul.f32 0.125, %v4432_v29  ;;  %v4877_v57 = vadd.f32 %v4845_v16, %v4781_v47 }
 0x511   : > { %v4683_v63 = vadd.f32 %v4651_v37, %v4587_v3  ;;  %v4874_v62 = vadd.f32 %v4842_v44, %v4778_v27  ;;  %v4210_v53 = vsel %vm4146_vm8, %v4100_v45, %v4178_v32  ;;  %v11449_v32 = vld [vmem:[#allocation4 + $0x109] sm:$0xff] }
 0x512   : > { %vm4130_vm9 = vcmp.gt.f32.partialorder %v4060_v25, 0.0  ;;  %v4162_v0 = vmul.f32 0.2, %v4060_v25  ;;  %4243 = vst.msk [vmem:[#allocation4 + $0x121] sm:$0xff] %vm324_vm3, %v4210_v53  ;;  %v4305_v42 = vld [vmem:[#allocation4 + $0x117] sm:$0x1]  ;;  %v4876_v54 = vadd.f32 %v4844_v14, %v4780_v50 }
 0x513   : > { %v4779_v26 = vadd.f32 %v4747_v40, %v4683_v63  ;;  %v4971_v11 = vadd.f32 %v4874_v62, %v4366_v28  ;;  %4323 = vst.msk [vmem:[#allocation4 + $0x119] sm:$0x1] %vm333_vm12, %v4305_v42  ;;  %v11422_v40 = vmul.f32 0.0625, %v4527_v15  ;;  %v4750_v62 = vmul.f32 0.25, %v4432_v29  ;;  %v11469_v6 = vld [vmem:[#allocation4 + $0x110] sm:$0xff] }
 0x514   : > { %v4101_v20 = vpop.f32.mrf.mxu3  ;;  %v4194_v61 = vsel %vm4130_vm9, %v4060_v25, %v4162_v0  ;;  %v4297_v41 = vld [vmem:[#allocation4 + $0x57] sm:$0x1]  ;;  %v4528_v56 = vld [vmem:[#allocation4 + $0x4a] sm:$0xff]  ;;  %v11464_v23 = vmul.f32 0.125, %v11449_v32 }
 0x515   : > { %v4875_v38 = vadd.f32 %v4843_v2, %v4779_v26  ;;  %v5067_v13 = vadd.f32 %v4971_v11, %v4462_v36  ;;  %4227 = vst.msk [vmem:[#allocation4 + $0x61] sm:$0xff] %vm324_vm3, %v4194_v61  ;;  %v4336_v48 = vld [vmem:[#allocation4 + $0x48] sm:$0xff]  ;;  %v11420_v35 = vld [vmem:[#allocation4 + $0x50] sm:$0xff]  ;;  %v11435_v17 = vmul.f32 0.0625, %v4528_v56  ;;  %v4102_v52 = vadd.f32 %v11342_v5, %v4101_v20 }
 0x516   : > { %v4061_v18 = vpop.f32.mrf.mxu1  ;;  %v11418_v7 = vmul.f32 0.0625, %v4336_v48  ;;  %4315 = vst.msk [vmem:[#allocation4 + $0x59] sm:$0x1] %vm333_vm12, %v4297_v41  ;;  %v11431_v44 = vmul.f32 0.0625, %v11420_v35  ;;  %v4654_v4 = vmul.f32 0.125, %v4336_v48  ;;  %v11440_v31 = vld [vmem:[#allocation4 + $0x51] sm:$0xff]  ;;  %v4590_v2 = vadd.f32 %v4558_v30, %v4494_v1 }
 0x517   : > { %v4972_v24 = vadd.f32 %v4875_v38, %v11411_v34  ;;  %v5163_v37 = vadd.f32 %v5067_v13, %v4558_v30  ;;  %v11447_v27 = vmul.f32 0.125, %v11440_v31  ;;  %vm4147_vm11 = vcmp.gt.f32.partialorder %v4102_v52, 0.0  ;;  %v11460_v0 = vld [vmem:[#allocation4 + $0x108] sm:$0xff]  ;;  %v4449_v61 = vld [vmem:[#allocation4 + $0x111] sm:$0xff] }
 0x518   : > { %v4973_v21 = vadd.f32 %v4876_v54, %v11418_v7  ;;  %v4974_v22 = vadd.f32 %v4877_v57, %v11431_v44  ;;  %v4686_v3 = vadd.f32 %v4654_v4, %v4590_v2  ;;  %v4179_v59 = vmul.f32 0.2, %v4102_v52 }
 0x519   : > { %v5068_v39 = vadd.f32 %v4972_v24, %v11414_v55  ;;  %5195 = vst.msk [vmem:[#allocation3 + $0x19] sm:$0xff] %vm324_vm3, %v5163_v37  ;;  %v4270_v46 = vld [vmem:[#allocation4 + $0x122] sm:$0x1]  ;;  %v4062_v28 = vadd.f32 %v11342_v5, %v4061_v18  ;;  %v4495_v20 = vadd.f32 %v11414_v55, %v11411_v34  ;;  %v11472_v38 = vmul.f32 0.0625, %v11460_v0  ;;  %v4544_v37 = vld [vmem:[#allocation4 + $0x10a] sm:$0xff] }
 0x51a   : > { %v5069_v12 = vadd.f32 %v4973_v21, %v11426_v8  ;;  %4288 = vst.msk [vmem:[#allocation4 + $0x120] sm:$0x1] %vm333_vm12, %v4270_v46  ;;  %v5070_v33 = vadd.f32 %v4974_v22, %v11447_v27  ;;  %v4211_v53 = vsel %vm4147_vm11, %v4102_v52, %v4179_v59  ;;  %v4782_v26 = vadd.f32 %v4750_v62, %v4686_v3  ;;  %v4545_v49 = vld [vmem:[#allocation4 + $0x112] sm:$0xff] }
 0x51b   : > { %v5164_v10 = vadd.f32 %v5068_v39, %v11422_v40  ;;  %4244 = vst.msk [vmem:[#allocation4 + $0x129] sm:$0xff] %vm324_vm3, %v4211_v53  ;;  %vm4131_vm13 = vcmp.gt.f32.partialorder %v4062_v28, 0.0  ;;  %v4163_v36 = vmul.f32 0.2, %v4062_v28  ;;  %v4846_v13 = vmul.f32 0.125, %v4528_v56 }
 0x51c   : > { %v4104_v43 = vpop.f32.mrf.mxu3  ;;  %v5165_v45 = vadd.f32 %v5069_v12, %v11435_v17  ;;  %v4262_v19 = vld [vmem:[#allocation4 + $0x62] sm:$0x1]  ;;  %v4655_v29 = vmul.f32 0.125, %v11420_v35  ;;  %v11483_v54 = vmul.f32 0.0625, %v11469_v6  ;;  %v11485_v24 = vmul.f32 0.125, %v4449_v61 }
 0x51d   : > { %5196 = vst.msk [vmem:[#allocation3 + $0x21] sm:$0xff] %vm324_vm3, %v5164_v10  ;;  %v11451_v25 = vld [vmem:[#allocation4 + $0x52] sm:$0xff]  ;;  %v4105_v9 = vadd.f32 %v11342_v5, %v4104_v43  ;;  %v4195_v30 = vsel %vm4131_vm13, %v4062_v28, %v4163_v36  ;;  %v4878_v16 = vadd.f32 %v4846_v13, %v4782_v26  ;;  %v4591_v35 = vadd.f32 %v11422_v40, %v4495_v20  ;;  %v11490_v39 = vld [vmem:[#allocation4 + $0x61] sm:$0xff] }
 0x51e   : > { %4280 = vst.msk [vmem:[#allocation4 + $0x60] sm:$0x1] %vm333_vm12, %v4262_v19  ;;  %v4064_v51 = vpop.f32.mrf.mxu1  ;;  %v11457_v58 = vmul.f32 0.0625, %v11451_v25  ;;  %v4512_v56 = vadd.f32 %v11464_v23, %v11472_v38  ;;  %v11500_v43 = vmul.f32 0.0625, %v4544_v37  ;;  %v11502_v40 = vmul.f32 0.0625, %v4545_v49  ;;  %v4450_v61 = vld [vmem:[#allocation4 + $0x121] sm:$0xff] }
 0x51f   : > { %5197 = vst.msk [vmem:[#allocation3 + $0x31] sm:$0xff] %vm324_vm3, %v5165_v45  ;;  %v4065_v63 = vadd.f32 %v11342_v5, %v4064_v51  ;;  %vm4148_vm4 = vcmp.gt.f32.partialorder %v4105_v9, 0.0  ;;  %v4180_v14 = vmul.f32 0.2, %v4105_v9  ;;  %v4687_v57 = vadd.f32 %v4655_v29, %v4591_v35 }
 0x520   : > { %v5166_v11 = vadd.f32 %v5070_v33, %v11457_v58  ;;  %4228 = vst.msk [vmem:[#allocation4 + $0x69] sm:$0xff] %vm324_vm3, %v4195_v30  ;;  %v4496_v52 = vadd.f32 %v11426_v8, %v11418_v7  ;;  %v4751_v45 = vmul.f32 0.25, %v11440_v31  ;;  %v11509_v19 = vmul.f32 0.125, %v11490_v39 }
 0x521   : > { %vm4132_vm6 = vcmp.gt.f32.partialorder %v4065_v63, 0.0  ;;  %v4164_v60 = vmul.f32 0.2, %v4065_v63  ;;  %v4212_v34 = vsel %vm4148_vm4, %v4105_v9, %v4180_v14  ;;  %v11495_v1 = vld [vmem:[#allocation4 + $0x120] sm:$0xff]  ;;  %13071 = vst [vmem:[#allocation24_spill] sm:$0xff] %v11502_v40  ;;  %v4513_v51 = vadd.f32 %v11485_v24, %v11483_v54 }
 0x522   : > { %5198 = vst.msk [vmem:[#allocation3 + $0x39] sm:$0xff] %vm324_vm3, %v5166_v11  ;;  %v4306_v10 = vld [vmem:[#allocation4 + $0x12f] sm:$0x1]  ;;  %v4847_v3 = vmul.f32 0.125, %v11451_v25  ;;  %v4672_v59 = vmul.f32 0.125, %v11495_v1  ;;  %v4608_v36 = vadd.f32 %v11500_v43, %v4512_v56  ;;  %v4592_v20 = vadd.f32 %v11435_v17, %v4496_v52 }
 0x523   : > { %4245 = vst.msk [vmem:[#allocation4 + $0x139] sm:$0xff] %vm324_vm3, %v4212_v34  ;;  %v4196_v41 = vsel %vm4132_vm6, %v4065_v63, %v4164_v60  ;;  %v11498_v12 = vld [vmem:[#allocation4 + $0x128] sm:$0xff]  ;;  %v4609_v25 = vadd.f32 %v11502_v40, %v4513_v51  ;;  %v4768_v17 = vmul.f32 0.25, %v4450_v61  ;;  %v11543_v56 = vmul.f32 0.25, %v11449_v32 }
 0x524   : > { %v4106_v50 = vpop.f32.mrf.mxu3  ;;  %4229 = vst.msk [vmem:[#allocation4 + $0x79] sm:$0xff] %vm324_vm3, %v4196_v41  ;;  %v4673_v7 = vmul.f32 0.125, %v11498_v12  ;;  %v4704_v60 = vadd.f32 %v4672_v59, %v4608_v36  ;;  %v11558_v51 = vmul.f32 0.125, %v11460_v0  ;;  %v11571_v0 = vmul.f32 0.0625, %v11495_v1  ;;  %v11678_v40 = vld [vmem:[#allocation3 + $0x20] sm:$0xff] }
 0x525   : > { %v4338_v15 = vld [vmem:[#allocation4 + $0x60] sm:$0xff]  ;;  %v4107_v55 = vadd.f32 %v11342_v5, %v4106_v50  ;;  %4324 = vst.msk [vmem:[#allocation4 + $0x131] sm:$0x1] %vm333_vm12, %v4306_v10  ;;  %v4783_v50 = vadd.f32 %v4751_v45, %v4687_v57  ;;  %v4752_v10 = vmul.f32 0.25, %v11490_v39 }
 0x526   : > { %v11475_v42 = vmul.f32 0.0625, %v4338_v15  ;;  %v4066_v48 = vpop.f32.mrf.mxu1  ;;  %v5245_v8 = vld [vmem:[#allocation3 + $0x31] sm:$0xff]  ;;  %v4656_v28 = vmul.f32 0.125, %v4338_v15  ;;  %v4451_v15 = vld [vmem:[#allocation4 + $0x129] sm:$0xff] }
 0x527   : > { %v4067_v18 = vadd.f32 %v11342_v5, %v4066_v48  ;;  %vm4149_vm8 = vcmp.gt.f32.partialorder %v4107_v55, 0.0  ;;  %v4181_v21 = vmul.f32 0.2, %v4107_v55  ;;  %v4298_v63 = vld [vmem:[#allocation4 + $0x6f] sm:$0x1]  ;;  %v4530_v11 = vld [vmem:[#allocation4 + $0x62] sm:$0xff]  ;;  %v4879_v13 = vadd.f32 %v4847_v3, %v4783_v50 }
 0x528   : > { %v4975_v47 = vadd.f32 %v4878_v16, %v11475_v42  ;;  %v4339_v62 = vld [vmem:[#allocation4 + $0x68] sm:$0xff]  ;;  %4316 = vst.msk [vmem:[#allocation4 + $0x71] sm:$0x1] %vm333_vm12, %v4298_v63  ;;  %v11530_v30 = vmul.f32 0.0625, %v4530_v11  ;;  %v4705_v48 = vadd.f32 %v4673_v7, %v4609_v25  ;;  %v4688_v34 = vadd.f32 %v4656_v28, %v4592_v20 }
 0x529   : > { %vm4133_vm9 = vcmp.gt.f32.partialorder %v4067_v18, 0.0  ;;  %v4165_v46 = vmul.f32 0.2, %v4067_v18  ;;  %v4213_v4 = vsel %vm4149_vm8, %v4107_v55, %v4181_v21  ;;  %v5246_v31 = vld [vmem:[#allocation3 + $0x39] sm:$0xff]  ;;  %v11527_v26 = vmul.f32 0.0625, %v4339_v62 }
 0x52a   : > { %4246 = vst.msk [vmem:[#allocation4 + $0x141] sm:$0xff] %vm324_vm3, %v4213_v4  ;;  %v5071_v9 = vadd.f32 %v4975_v47, %v11509_v19  ;;  %v8178_v33 = vpack.i.bf16 %v5246_v31, %v5245_v8  ;;  %v4271_v14 = vld [vmem:[#allocation4 + $0x13a] sm:$0x1]  ;;  %v4769_v49 = vmul.f32 0.25, %v4451_v15  ;;  %v4497_v47 = vadd.f32 %v11447_v27, %v11431_v44 }
 0x52b   : > { %v4197_v2 = vsel %vm4133_vm9, %v4067_v18, %v4165_v46  ;;  %4289 = vst.msk [vmem:[#allocation4 + $0x138] sm:$0x1] %vm333_vm12, %v4271_v14  ;;  %v4263_v29 = vld [vmem:[#allocation4 + $0x7a] sm:$0x1]  ;;  %v4435_v18 = vld [vmem:[#allocation4 + $0x69] sm:$0xff]  ;;  %v4976_v41 = vadd.f32 %v4879_v13, %v11527_v26  ;;  %v4657_v57 = vmul.f32 0.125, %v4339_v62  ;;  %v4800_v4 = vadd.f32 %v4768_v17, %v4704_v60 }
 0x52c   : > { %v11513_v22 = vpop.f32.mrf.mxu3  ;;  %4230 = vst.msk [vmem:[#allocation4 + $0x81] sm:$0xff] %vm324_vm3, %v4197_v2  ;;  %8179 = vrot.lane.b32.xlu2 %v8178_v33, %s8644_s19  ;;  %v11534_v55 = vld [vmem:[#allocation4 + $0x12a] sm:$0xff]  ;;  %v5167_v37 = vadd.f32 %v5071_v9, %v11530_v30  ;;  %v11548_v46 = vld [vmem:[#allocation4 + $0x122] sm:$0xff]  ;;  %v4801_v52 = vadd.f32 %v4769_v49, %v4705_v48  ;;  %v11551_v45 = vmul.f32 0.125, %v4435_v18  ;;  %v4593_v44 = vadd.f32 %v11457_v58, %v4497_v47  ;;  %v11578_v36 = vld [vmem:[#allocation4 + $0x139] sm:$0xff] }
 0x52d   : > { %4281 = vst.msk [vmem:[#allocation4 + $0x78] sm:$0x1] %vm333_vm12, %v4263_v29  ;;  %v4865_v16 = vmul.f32 0.125, %v11534_v55  ;;  %v11561_v27 = vmul.f32 0.125, %v4450_v61  ;;  %v4784_v39 = vadd.f32 %v4752_v10, %v4688_v34  ;;  %v4864_v8 = vmul.f32 0.125, %v11548_v46  ;;  %v11588_v1 = vld [vmem:[#allocation4 + $0x79] sm:$0xff] }
 0x52e   : > { %v11522_v53 = vpop.f32.mrf.mxu1  ;;  %5199 = vst.msk [vmem:[#allocation3 + $0x49] sm:$0xff] %vm324_vm3, %v5167_v37  ;;  %v5072_v9 = vadd.f32 %v4976_v41, %v11551_v45  ;;  %v11574_v58 = vmul.f32 0.0625, %v11498_v12  ;;  %v4689_v63 = vadd.f32 %v4657_v57, %v4593_v44  ;;  %v4848_v62 = vmul.f32 0.125, %v4530_v11 }
 0x52f   : > { %13072 = vst [vmem:[#allocation8_spill] sm:$0xff] %v11561_v27  ;;  %v4531_v3 = vld [vmem:[#allocation4 + $0x6a] sm:$0xff]  ;;  %v4897_v31 = vadd.f32 %v4865_v16, %v4801_v52  ;;  %v4896_v50 = vadd.f32 %v4864_v8, %v4800_v4  ;;  %v11593_v13 = vmul.f32 0.125, %v4451_v15  ;;  %v4753_v60 = vmul.f32 0.25, %v4435_v18 }
 0x530   : > { %v11567_v28 = vmul.f32 0.0625, %v4531_v3  ;;  %v4880_v48 = vadd.f32 %v4848_v62, %v4784_v39  ;;  %v4849_v37 = vmul.f32 0.125, %v4531_v3  ;;  %v11602_v17 = vmul.f32 0.125, %v11578_v36 }
 0x531   : > { %v4307_v35 = vld [vmem:[#allocation4 + $0x147] sm:$0x1]  ;;  %v11590_v12 = vld [vmem:[#allocation4 + $0x13a] sm:$0xff]  ;;  %13073 = vst [vmem:[#allocation9_spill] sm:$0xff] %v11593_v13  ;;  %v4785_v15 = vadd.f32 %v4753_v60, %v4689_v63  ;;  %v11609_v18 = vmul.f32 0.125, %v11588_v1  ;;  %v11628_v44 = vmul.f32 0.125, %v11469_v6  ;;  %v4514_v62 = vadd.f32 %v11561_v27, %v11571_v0 }
 0x532   : > { %v11540_v21 = vld [vmem:[#allocation4 + $0x140] sm:$0xff]  ;;  %4325 = vst.msk [vmem:[#allocation4 + $0x149] sm:$0x1] %vm333_vm12, %v4307_v35  ;;  %v11576_v33 = vld [vmem:[#allocation4 + $0x138] sm:$0xff]  ;;  %v5168_v20 = vadd.f32 %v5072_v9, %v11567_v28  ;;  %v11615_v47 = vmul.f32 0.0625, %v11590_v12  ;;  %v4070_v9 = vadd.f32 %v11342_v5, %v11522_v53  ;;  %v11646_v60 = vmul.f32 0.0625, %v11548_v46 }
 0x533   : > { %v11555_v2 = vmul.f32 0.0625, %v11540_v21  ;;  %v4299_v32 = vld [vmem:[#allocation4 + $0x87] sm:$0x1]  ;;  %v11584_v61 = vmul.f32 0.0625, %v11576_v33 }
 0x534   : > { %4317 = vst.msk [vmem:[#allocation4 + $0x89] sm:$0x1] %vm333_vm12, %v4299_v32  ;;  %v4111_v59 = vpop.f32.mrf.mxu3  ;;  %v11580_v25 = vld [vmem:[#allocation4 + $0x141] sm:$0xff]  ;;  %v11586_v14 = vld [vmem:[#allocation4 + $0x78] sm:$0xff]  ;;  %vm4134_vm13 = vcmp.gt.f32.partialorder %v4070_v9, 0.0 }
 0x535   : > { %v4994_v11 = vadd.f32 %v4897_v31, %v11555_v2  ;;  %v11596_v29 = vmul.f32 0.0625, %v11586_v14  ;;  %v11598_v34 = vld [vmem:[#allocation4 + $0x80] sm:$0xff]  ;;  %5200 = vst.msk [vmem:[#allocation3 + $0x51] sm:$0xff] %vm324_vm3, %v5168_v20  ;;  %v4993_v49 = vadd.f32 %v4896_v50, %v11584_v61  ;;  %v11606_v16 = vmul.f32 0.125, %v11580_v25 }
 0x536   : > { %v11564_v7 = vpop.f32.mrf.mxu1  ;;  %v11623_v52 = vmul.f32 0.0625, %v11598_v34  ;;  %v11625_v32 = vld [vmem:[#allocation4 + $0x7a] sm:$0xff]  ;;  %v4110_v31 = vadd.f32 %v11342_v5, %v11513_v22  ;;  %v4881_v50 = vadd.f32 %v4849_v37, %v4785_v15  ;;  %13074 = vst [vmem:[#allocation11_spill] sm:$0xff] %v11646_v60  ;;  %v4112_v53 = vadd.f32 %v11342_v5, %v4111_v59 }
 0x537   : > { %v4977_v41 = vadd.f32 %v4880_v48, %v11596_v29  ;;  %v5089_v10 = vadd.f32 %v4993_v49, %v11602_v17  ;;  %v5090_v4 = vadd.f32 %v4994_v11, %v11606_v16  ;;  %v11631_v3 = vld [vmem:[#allocation4 + $0x81] sm:$0xff]  ;;  %v4498_v11 = vadd.f32 %v11509_v19, %v11475_v42 }
 0x538   : > { %v11649_v22 = vmul.f32 0.0625, %v11625_v32  ;;  %v4515_v49 = vadd.f32 %v11593_v13, %v11574_v58  ;;  %v11656_v37 = vmul.f32 0.125, %v11631_v3  ;;  %v4978_v42 = vadd.f32 %v4881_v50, %v11623_v52 }
 0x539   : > { %v11612_v35 = vld [vmem:[#allocation4 + $0x142] sm:$0xff]  ;;  %v5073_v39 = vadd.f32 %v4977_v41, %v11609_v18  ;;  %v5185_v6 = vadd.f32 %v5089_v10, %v11615_v47  ;;  %vm4150_vm11 = vcmp.gt.f32.partialorder %v4110_v31, 0.0  ;;  %v4182_v46 = vmul.f32 0.2, %v4110_v31 }
 0x53a   : > { %v11619_v57 = vmul.f32 0.0625, %v11612_v35  ;;  %v11665_v59 = vmul.f32 0.0625, %v11534_v55  ;;  %v4675_v41 = vmul.f32 0.125, %v11540_v21  ;;  %v5074_v10 = vadd.f32 %v4978_v42, %v11656_v37 }
 0x53b   : > { %v11633_v8 = vld [vmem:[#allocation4 + $0x82] sm:$0xff]  ;;  %5217 = vst.msk [vmem:[#allocation3 + $0x121] sm:$0xff] %vm324_vm3, %v5185_v6  ;;  %v5169_v19 = vadd.f32 %v5073_v39, %v11649_v22  ;;  %v4214_v6 = vsel %vm4150_vm11, %v4110_v31, %v4182_v46  ;;  %vm4151_vm4 = vcmp.gt.f32.partialorder %v4112_v53, 0.0  ;;  %v4183_v50 = vmul.f32 0.2, %v4112_v53 }
 0x53c   : > { %v5186_v20 = vadd.f32 %v5090_v4, %v11619_v57  ;;  %v4114_v48 = vpop.f32.mrf.mxu3  ;;  %v11659_v15 = vmul.f32 0.0625, %v11633_v8  ;;  %13075 = vst [vmem:[#allocation10_spill] sm:$0xff] %v11665_v59  ;;  %v4166_v4 = vmul.f32 0.2, %v4070_v9  ;;  %v4674_v39 = vmul.f32 0.125, %v11576_v33 }
 0x53d   : > { %5201 = vst.msk [vmem:[#allocation3 + $0x61] sm:$0xff] %vm324_vm3, %v5169_v19  ;;  %v4115_v21 = vadd.f32 %v11342_v5, %v4114_v48  ;;  %v4215_v42 = vsel %vm4151_vm4, %v4112_v53, %v4183_v50  ;;  %v4611_v33 = vadd.f32 %v11665_v59, %v4515_v49  ;;  %v5261_v48 = vld [vmem:[#allocation3 + $0x32] sm:$0xff]  ;;  %v4658_v53 = vmul.f32 0.125, %v11586_v14 }
 0x53e   : > { %v4074_v63 = vpop.f32.mrf.mxu1  ;;  %5218 = vst.msk [vmem:[#allocation3 + $0x129] sm:$0xff] %vm324_vm3, %v5186_v20  ;;  %v4072_v20 = vadd.f32 %v11342_v5, %v11564_v7  ;;  %v5170_v13 = vadd.f32 %v5074_v10, %v11659_v15  ;;  %v4198_v55 = vsel %vm4134_vm13, %v4070_v9, %v4166_v4  ;;  %v4610_v7 = vadd.f32 %v11646_v60, %v4514_v62  ;;  %v11683_v10 = vld [vmem:[#allocation3 + $0x18] sm:$0xff] }
 0x53f   : > { %4247 = vst.msk [vmem:[#allocation4 + $0x151] sm:$0xff] %vm324_vm3, %v4214_v6  ;;  %v4075_v31 = vadd.f32 %v11342_v5, %v4074_v63  ;;  %vm4152_vm8 = vcmp.gt.f32.partialorder %v4115_v21, 0.0  ;;  %v4184_v9 = vmul.f32 0.2, %v4115_v21  ;;  %v5262_v6 = vld [vmem:[#allocation3 + $0x3a] sm:$0xff]  ;;  %v4499_v62 = vadd.f32 %v11551_v45, %v11527_v26 }
 0x540   : > { %4231 = vst.msk [vmem:[#allocation4 + $0x91] sm:$0xff] %vm324_vm3, %v4198_v55  ;;  %vm4135_vm6 = vcmp.gt.f32.partialorder %v4072_v20, 0.0  ;;  %v4167_v19 = vmul.f32 0.2, %v4072_v20  ;;  %v4707_v50 = vadd.f32 %v4675_v41, %v4611_v33  ;;  %v8213_v49 = vpack.i.bf16 %v11678_v40, %v11683_v10 }
 0x541   : > { %5202 = vst.msk [vmem:[#allocation3 + $0x69] sm:$0xff] %vm324_vm3, %v5170_v13  ;;  %vm4136_vm9 = vcmp.gt.f32.partialorder %v4075_v31, 0.0  ;;  %v4168_v63 = vmul.f32 0.2, %v4075_v31  ;;  %v4216_v13 = vsel %vm4152_vm8, %v4115_v21, %v4184_v9  ;;  %v4594_v55 = vadd.f32 %v11530_v30, %v4498_v11 }
 0x542   : > { %4248 = vst.msk [vmem:[#allocation4 + $0x159] sm:$0xff] %vm324_vm3, %v4215_v42  ;;  %v4199_v4 = vsel %vm4135_vm6, %v4072_v20, %v4167_v19  ;;  %v4706_v59 = vadd.f32 %v4674_v39, %v4610_v7  ;;  %v4659_v14 = vmul.f32 0.125, %v11598_v34  ;;  %v4770_v19 = vmul.f32 0.25, %v11578_v36 }
 0x543   : > { %4232 = vst.msk [vmem:[#allocation4 + $0x99] sm:$0xff] %vm324_vm3, %v4199_v4  ;;  %v4200_v20 = vsel %vm4136_vm9, %v4075_v31, %v4168_v63  ;;  %v4754_v26 = vmul.f32 0.25, %v11588_v1  ;;  %v4771_v45 = vmul.f32 0.25, %v11580_v25  ;;  %v11699_v41 = vpack.i.bf16 %v5262_v6, %v5261_v48 }
 0x544   : > { %4249 = vst.msk [vmem:[#allocation4 + $0x169] sm:$0xff] %vm324_vm3, %v4216_v13  ;;  %v4116_v42 = vpop.f32.mrf.mxu3  ;;  %v4595_v21 = vadd.f32 %v11567_v28, %v4499_v62  ;;  %v4516_v30 = vadd.f32 %v11602_v17, %v11584_v61  ;;  %v4690_v34 = vadd.f32 %v4658_v53, %v4594_v55  ;;  %v4517_v11 = vadd.f32 %v11606_v16, %v11555_v2 }
 0x545   : > { %4256 = vst.msk [vmem:[#allocation4 + $0x199] sm:$0xff] %vm324_vm3, %v4216_v13  ;;  %v4803_v36 = vadd.f32 %v4771_v45, %v4707_v50  ;;  %v4866_v1 = vmul.f32 0.125, %v11590_v12  ;;  %v4867_v25 = vmul.f32 0.125, %v11612_v35  ;;  %v4117_v28 = vadd.f32 %v11342_v5, %v4116_v42 }
 0x546   : > { %v4076_v46 = vpop.f32.mrf.mxu1  ;;  %v4272_v39 = vld [vmem:[#allocation4 + $0x152] sm:$0x1]  ;;  %4233 = vst.msk [vmem:[#allocation4 + $0xa9] sm:$0xff] %vm324_vm3, %v4200_v20  ;;  %v4802_v7 = vadd.f32 %v4770_v19, %v4706_v59  ;;  %v11713_v61 = vadd.f32 %v11656_v37, %v11623_v52  ;;  %v4691_v17 = vadd.f32 %v4659_v14, %v4595_v21  ;;  %v4500_v35 = vadd.f32 %v11609_v18, %v11596_v29 }
 0x547   : > { %4290 = vst.msk [vmem:[#allocation4 + $0x150] sm:$0x1] %vm333_vm12, %v4272_v39  ;;  %v4264_v31 = vld [vmem:[#allocation4 + $0x92] sm:$0x1]  ;;  %v4077_v2 = vadd.f32 %v11342_v5, %v4076_v46  ;;  %v4755_v9 = vmul.f32 0.25, %v11631_v3  ;;  %v4850_v59 = vmul.f32 0.125, %v11625_v32  ;;  %v4786_v37 = vadd.f32 %v4754_v26, %v4690_v34 }
 0x548   : > { %4282 = vst.msk [vmem:[#allocation4 + $0x90] sm:$0x1] %vm333_vm12, %v4264_v31  ;;  %v5263_v16 = vld [vmem:[#allocation3 + $0x62] sm:$0xff]  ;;  %v5264_v33 = vld [vmem:[#allocation3 + $0x6a] sm:$0xff]  ;;  %v4612_v4 = vadd.f32 %v11615_v47, %v4516_v30  ;;  %v4851_v5 = vmul.f32 0.125, %v11633_v8  ;;  %v11731_v29 = vadd.f32 %v11619_v57, %v4517_v11  ;;  %v4899_v18 = vadd.f32 %v4867_v25, %v4803_v36 }
 0x549   : > { %v4308_v48 = vld [vmem:[#allocation4 + $0x15f] sm:$0x1]  ;;  %v11723_v52 = vpack.i.bf16 %v5264_v33, %v5263_v16  ;;  %v4454_v46 = vld [vmem:[#allocation4 + $0x151] sm:$0xff]  ;;  %vm4153_vm11 = vcmp.gt.f32.partialorder %v4117_v28, 0.0  ;;  %v4185_v62 = vmul.f32 0.2, %v4117_v28  ;;  %v4898_v47 = vadd.f32 %v4866_v1, %v4802_v7 }
 0x54a   : > { %v4359_v53 = vld [vmem:[#allocation4 + $0x158] sm:$0xff]  ;;  %4326 = vst.msk [vmem:[#allocation4 + $0x161] sm:$0x1] %vm333_vm12, %v4308_v48  ;;  %v4787_v50 = vadd.f32 %v4755_v9, %v4691_v17  ;;  %vm4137_vm13 = vcmp.gt.f32.partialorder %v4077_v2, 0.0  ;;  %v4169_v13 = vmul.f32 0.2, %v4077_v2  ;;  %v4596_v19 = vadd.f32 %v11649_v22, %v4500_v35 }
 0x54b   : > { %13076 = vst [vmem:[#allocation58_spill] sm:$0xff] %v11723_v52  ;;  %v4438_v63 = vld [vmem:[#allocation4 + $0x91] sm:$0xff]  ;;  %v11728_v6 = vmul.f32 0.0625, %v4359_v53  ;;  %v4300_v32 = vld [vmem:[#allocation4 + $0x9f] sm:$0x1]  ;;  %8204 = vrot.lane.b32.xlu2 %v11723_v52, %s8646_s21  ;;  %v11738_v55 = vmul.f32 0.125, %v4454_v46  ;;  %v4217_v25 = vsel %vm4153_vm11, %v4117_v28, %v4185_v62  ;;  %v4882_v22 = vadd.f32 %v4850_v59, %v4786_v37 }
 0x54c   : > { %v4343_v3 = vld [vmem:[#allocation4 + $0x98] sm:$0xff]  ;;  %4318 = vst.msk [vmem:[#allocation4 + $0xa1] sm:$0x1] %vm333_vm12, %v4300_v32  ;;  %v4772_v57 = vmul.f32 0.25, %v4454_v46  ;;  %v11740_v14 = vmul.f32 0.125, %v4438_v63  ;;  %v4883_v26 = vadd.f32 %v4851_v5, %v4787_v50  ;;  %v4756_v21 = vmul.f32 0.25, %v4438_v63 }
 0x54d   : > { %v11735_v8 = vld [vmem:[#allocation4 + $0x159] sm:$0xff]  ;;  %v11742_v20 = vmul.f32 0.0625, %v4343_v3  ;;  %v4273_v42 = vld [vmem:[#allocation4 + $0x16a] sm:$0x1]  ;;  %v4996_v30 = vadd.f32 %v4899_v18, %v11728_v6  ;;  %v4201_v35 = vsel %vm4137_vm13, %v4077_v2, %v4169_v13  ;;  %v4677_v63 = vmul.f32 0.125, %v4359_v53  ;;  %4250 = vst.msk [vmem:[#allocation4 + $0x171] sm:$0xff] %vm324_vm3, %v4217_v25 }
 0x54e   : > { %v11717_v12 = vpop.f32.mrf.mxu1  ;;  %v4358_v45 = vld [vmem:[#allocation4 + $0x150] sm:$0xff]  ;;  %v4275_v34 = vld [vmem:[#allocation4 + $0x19a] sm:$0x1]  ;;  %4291 = vst.msk [vmem:[#allocation4 + $0x168] sm:$0x1] %vm333_vm12, %v4273_v42  ;;  %v11750_v1 = vmul.f32 0.125, %v11735_v8  ;;  %v4597_v40 = vadd.f32 %v11659_v15, %v11713_v61 }
 0x54f   : > { %v11747_v11 = vmul.f32 0.0625, %v4358_v45  ;;  %v4676_v39 = vmul.f32 0.125, %v4358_v45  ;;  %v4342_v36 = vld [vmem:[#allocation4 + $0x90] sm:$0xff]  ;;  %4293 = vst.msk [vmem:[#allocation4 + $0x198] sm:$0x1] %vm333_vm12, %v4275_v34  ;;  %v11756_v16 = vld [vmem:[#allocation4 + $0x99] sm:$0xff]  ;;  %v4980_v28 = vadd.f32 %v4883_v26, %v11742_v20 }
 0x550   : > { %v11754_v31 = vmul.f32 0.0625, %v4342_v36  ;;  %v4660_v7 = vmul.f32 0.125, %v4342_v36  ;;  %v4550_v17 = vld [vmem:[#allocation4 + $0x152] sm:$0xff]  ;;  %v4265_v33 = vld [vmem:[#allocation4 + $0xaa] sm:$0x1]  ;;  %v5092_v62 = vadd.f32 %v4996_v30, %v11750_v1  ;;  %v4471_v53 = vmul.f32 0.125, %v11756_v16 }
 0x551   : > { %v4708_v48 = vadd.f32 %v4676_v39, %v4612_v4  ;;  %v4995_v5 = vadd.f32 %v4898_v47, %v11747_v11  ;;  %v4551_v46 = vld [vmem:[#allocation4 + $0x15a] sm:$0xff]  ;;  %v4534_v18 = vld [vmem:[#allocation4 + $0x92] sm:$0xff]  ;;  %4283 = vst.msk [vmem:[#allocation4 + $0xa8] sm:$0x1] %vm333_vm12, %v4265_v33  ;;  %v4582_v47 = vmul.f32 0.0625, %v4550_v17  ;;  %v4661_v26 = vmul.f32 0.125, %v4343_v3 }
 0x552   : > { %v4692_v59 = vadd.f32 %v4660_v7, %v4596_v19  ;;  %v4979_v37 = vadd.f32 %v4882_v22, %v11754_v31  ;;  %v11765_v32 = vmul.f32 0.0625, %v4551_v46  ;;  %4257 = vst.msk [vmem:[#allocation4 + $0x1a1] sm:$0xff] %vm324_vm3, %v4217_v25  ;;  %v11776_v13 = vld [vmem:[#allocation3 + $0x50] sm:$0xff]  ;;  %v4868_v45 = vmul.f32 0.125, %v4550_v17  ;;  %v4119_v25 = vpop.f32.mrf.mxu3  ;;  %v11781_v22 = vld [vmem:[#allocation3 + $0x48] sm:$0xff] }
 0x553   : > { %v4804_v2 = vadd.f32 %v4772_v57, %v4708_v48  ;;  %v5091_v4 = vadd.f32 %v4995_v5, %v11738_v55  ;;  %v4535_v50 = vld [vmem:[#allocation4 + $0x9a] sm:$0xff]  ;;  %8214 = vrot.lane.b32.xlu2 %v8213_v49, %s8648_s23  ;;  %v4566_v57 = vmul.f32 0.0625, %v4534_v18  ;;  %4234 = vst.msk [vmem:[#allocation4 + $0xb1] sm:$0xff] %vm324_vm3, %v4201_v35  ;;  %v5076_v39 = vadd.f32 %v4980_v28, %v4471_v53  ;;  %v4456_v48 = vld [vmem:[#allocation4 + $0x169] sm:$0xff] }
 0x554   : > { %v5075_v42 = vadd.f32 %v4979_v37, %v11740_v14  ;;  %v5188_v19 = vadd.f32 %v5092_v62, %v11765_v32  ;;  %v4567_v34 = vmul.f32 0.0625, %v4535_v50  ;;  %v4788_v10 = vadd.f32 %v4756_v21, %v4692_v59  ;;  %v11797_v21 = vld [vmem:[%s12657_s4] ss:$0 sm:$0xff]  ;;  %v4309_v62 = vld [vmem:[#allocation4 + $0x177] sm:$0x1] }
 0x555   : > { %v5187_v30 = vadd.f32 %v5091_v4, %v4582_v47  ;;  %v4360_v36 = vld [vmem:[#allocation4 + $0x168] sm:$0xff]  ;;  %v4709_v7 = vadd.f32 %v4677_v63, %v11731_v29  ;;  %v4900_v17 = vadd.f32 %v4868_v45, %v4804_v2  ;;  %v4773_v5 = vmul.f32 0.25, %v11735_v8  ;;  %v11808_v2 = vld [vmem:[#allocation4 + $0x170] sm:$0xff]  ;;  %4327 = vst.msk [vmem:[#allocation4 + $0x179] sm:$0x1] %vm333_vm12, %v4309_v62 }
 0x556   : > { %v11759_v9 = vpop.f32.mrf.mxu1  ;;  %5220 = vst.msk [vmem:[#allocation3 + $0x141] sm:$0xff] %vm324_vm3, %v5188_v19  ;;  %v5171_v49 = vadd.f32 %v5075_v42, %v4566_v57  ;;  %v5172_v33 = vadd.f32 %v5076_v39, %v4567_v34  ;;  %v11790_v35 = vmul.f32 0.0625, %v4360_v36  ;;  %v4693_v28 = vadd.f32 %v4661_v26, %v4597_v40  ;;  %v4937_v62 = vld [vmem:[#allocation4 + $0x198] sm:$0xff] }
 0x557   : > { %5219 = vst.msk [vmem:[#allocation3 + $0x139] sm:$0xff] %vm324_vm3, %v5187_v30  ;;  %v4852_v15 = vmul.f32 0.125, %v4534_v18  ;;  %v11800_v29 = vadd.f32 %v11797_v21, %v4119_v25  ;;  %v4518_v59 = vadd.f32 %v11738_v55, %v11747_v11  ;;  %v4869_v37 = vmul.f32 0.125, %v4551_v46  ;;  %v4440_v55 = vld [vmem:[#allocation4 + $0xa9] sm:$0xff] }
 0x558   : > { %5203 = vst.msk [vmem:[#allocation3 + $0x79] sm:$0xff] %vm324_vm3, %v5171_v49  ;;  %v4344_v61 = vld [vmem:[#allocation4 + $0xa8] sm:$0xff]  ;;  %v4997_v8 = vadd.f32 %v4900_v17, %v11790_v35  ;;  %v4502_v4 = vadd.f32 %v11740_v14, %v11754_v31  ;;  %v4757_v42 = vmul.f32 0.25, %v11756_v16  ;;  %v4488_v26 = vmul.f32 0.125, %v4456_v48  ;;  %v5033_v17 = vld [vmem:[#allocation4 + $0x199] sm:$0xff] }
 0x559   : > { %5204 = vst.msk [vmem:[#allocation3 + $0x81] sm:$0xff] %vm324_vm3, %v5172_v33  ;;  %v4376_v18 = vmul.f32 0.0625, %v4344_v61  ;;  %v4884_v19 = vadd.f32 %v4852_v15, %v4788_v10  ;;  %v4311_v45 = vld [vmem:[#allocation4 + $0x1a7] sm:$0x1]  ;;  %v4805_v30 = vadd.f32 %v4773_v5, %v4709_v7  ;;  %v4853_v39 = vmul.f32 0.125, %v4535_v50  ;;  %v11815_v46 = vld [vmem:[#allocation4 + $0x16a] sm:$0xff] }
 0x55a   : > { %v4393_v11 = vmul.f32 0.0625, %v11808_v2  ;;  %v11819_v25 = vadd.f32 %v11797_v21, %v11717_v12  ;;  %v4519_v14 = vadd.f32 %v11750_v1, %v11728_v6  ;;  %v4678_v31 = vmul.f32 0.125, %v4360_v36  ;;  %4329 = vst.msk [vmem:[#allocation4 + $0x1a9] sm:$0x1] %vm333_vm12, %v4311_v45  ;;  %v4301_v33 = vld [vmem:[#allocation4 + $0xb7] sm:$0x1] }
 0x55b   : > { %v5093_v16 = vadd.f32 %v4997_v8, %v4488_v26  ;;  %v4981_v40 = vadd.f32 %v4884_v19, %v4376_v18  ;;  %v4614_v50 = vadd.f32 %v4582_v47, %v4518_v59  ;;  %v4901_v10 = vadd.f32 %v4869_v37, %v4805_v30  ;;  %v11825_v5 = vld [vmem:[#allocation4 + $0xb0] sm:$0xff]  ;;  %4319 = vst.msk [vmem:[#allocation4 + $0xb9] sm:$0x1] %vm333_vm12, %v4301_v33  ;;  %v5248_v37 = vld [vmem:[#allocation3 + $0x69] sm:$0xff] }
 0x55c   : > { %v4503_v49 = vadd.f32 %v4471_v53, %v11742_v20  ;;  %v4789_v7 = vadd.f32 %v4757_v42, %v4693_v28  ;;  %v11828_v12 = vadd.f32 %v11765_v32, %v4519_v14  ;;  %v4598_v15 = vadd.f32 %v4566_v57, %v4502_v4  ;;  %v4457_v1 = vld [vmem:[#allocation4 + $0x171] sm:$0xff] }
 0x55d   : > { %v4472_v6 = vmul.f32 0.125, %v4440_v55  ;;  %v4584_v36 = vmul.f32 0.0625, %v11815_v46  ;;  %v4662_v20 = vmul.f32 0.125, %v4344_v61  ;;  %v4998_v53 = vadd.f32 %v4901_v10, %v4393_v11  ;;  %v11834_v28 = vld [vmem:[#allocation4 + $0xaa] sm:$0xff]  ;;  %v11846_v10 = vld [vmem:[#allocation4 + $0x172] sm:$0xff] }
 0x55e   : > { %v11802_v63 = vpop.f32.mrf.mxu1  ;;  %v11832_v47 = vadd.f32 %v4567_v34, %v4503_v49  ;;  %v4885_v59 = vadd.f32 %v4853_v39, %v4789_v7  ;;  %v4710_v8 = vadd.f32 %v4678_v31, %v4614_v50  ;;  %v11837_v57 = vmul.f32 0.0625, %v11825_v5  ;;  %v11843_v14 = vld [vmem:[#allocation4 + $0xb1] sm:$0xff] }
 0x55f   : > { %v5077_v42 = vadd.f32 %v4981_v40, %v4472_v6  ;;  %v5189_v32 = vadd.f32 %v5093_v16, %v4584_v36  ;;  %v4774_v19 = vmul.f32 0.25, %v4456_v48  ;;  %v11839_v45 = vmul.f32 0.0625, %v4937_v62  ;;  %v5247_v61 = vld [vmem:[#allocation3 + $0x61] sm:$0xff] }
 0x560   : > { %v11841_v30 = vmul.f32 0.125, %v5033_v17  ;;  %v4489_v34 = vmul.f32 0.125, %v4457_v1  ;;  %v4520_v39 = vadd.f32 %v4488_v26, %v11790_v35  ;;  %v11850_v31 = vmul.f32 0.0625, %v11834_v28  ;;  %v5243_v62 = vld [vmem:[#allocation3 + $0x1] sm:$0xff] }
 0x561   : > { %5221 = vst.msk [vmem:[#allocation3 + $0x151] sm:$0xff] %vm324_vm3, %v5189_v32  ;;  %v4982_v16 = vadd.f32 %v4885_v59, %v11837_v57  ;;  %v11853_v48 = vpack.i.bf16 %v5248_v37, %v5247_v61  ;;  %v4694_v40 = vadd.f32 %v4662_v20, %v4598_v15  ;;  %v4758_v50 = vmul.f32 0.25, %v4440_v55  ;;  %v5244_v59 = vld [vmem:[#allocation3 + $0x9] sm:$0xff]  ;;  %v4121_v32 = vpop.f32.mrf.mxu3 }
 0x562   : > { %v11856_v49 = vmul.f32 0.0625, %v11846_v10  ;;  %v5094_v7 = vadd.f32 %v4998_v53, %v4489_v34  ;;  %v11858_v17 = vadd.f32 %v4774_v19, %v4710_v8  ;;  %v11860_v35 = vadd.f32 %v4472_v6, %v4376_v18  ;;  %v11872_v37 = vld [vmem:[#allocation4 + $0xb2] sm:$0xff]  ;;  %v5260_v6 = vld [vmem:[#allocation3 + $0xa] sm:$0xff] }
 0x563   : > { %13077 = vst [vmem:[#allocation36_spill] sm:$0xff] %v11853_v48  ;;  %v11863_v26 = vmul.f32 0.125, %v11843_v14  ;;  %v5173_v33 = vadd.f32 %v5077_v42, %v11850_v31  ;;  %8184 = vrot.lane.b32.xlu0 %v11853_v48, %s8644_s19  ;;  %v11868_v15 = vadd.f32 %v4489_v34, %v4393_v11  ;;  %v4679_v55 = vmul.f32 0.125, %v11808_v2  ;;  %v5259_v18 = vld [vmem:[#allocation3 + $0x2] sm:$0xff] }
 0x564   : > { %v4775_v20 = vmul.f32 0.25, %v4457_v1  ;;  %v5190_v53 = vadd.f32 %v5094_v7, %v11856_v49  ;;  %v11875_v8 = vmul.f32 0.0625, %v11872_v37  ;;  %vm4154_vm4 = vcmp.gt.f32.partialorder %v11800_v29, 0.0 }
 0x565   : > { %v5078_v42 = vadd.f32 %v4982_v16, %v11863_v26  ;;  %5205 = vst.msk [vmem:[#allocation3 + $0x91] sm:$0xff] %vm324_vm3, %v5173_v33  ;;  %v4186_v11 = vmul.f32 0.2, %v11800_v29  ;;  %v11881_v2 = vadd.f32 %v4758_v50, %v4694_v40  ;;  %vm4138_vm6 = vcmp.gt.f32.partialorder %v11819_v25, 0.0 }
 0x566   : > { %v4086_v4 = vpop.f32.mrf.mxu1  ;;  %5222 = vst.msk [vmem:[#allocation3 + $0x159] sm:$0xff] %vm324_vm3, %v5190_v53  ;;  %v4170_v1 = vmul.f32 0.2, %v11819_v25  ;;  %v8173_v19 = vpack.i.bf16 %v5244_v59, %v5243_v62  ;;  %v11886_v34 = vadd.f32 %v4584_v36, %v4520_v39  ;;  %v8193_v7 = vpack.i.bf16 %v5260_v6, %v5259_v18  ;;  %v4938_v62 = vld [vmem:[#allocation4 + $0x1a0] sm:$0xff] }
 0x567   : > { %v5174_v61 = vadd.f32 %v5078_v42, %v11875_v8  ;;  %v4218_v16 = vsel %vm4154_vm4, %v11800_v29, %v4186_v11  ;;  %v4870_v3 = vmul.f32 0.125, %v11815_v46  ;;  %v4122_v50 = vadd.f32 %v11797_v21, %v4121_v32  ;;  %v5034_v59 = vld [vmem:[#allocation4 + $0x1a1] sm:$0xff] }
 0x568   : > { %4251 = vst.msk [vmem:[#allocation4 + $0x181] sm:$0xff] %vm324_vm3, %v4218_v16  ;;  %v4202_v40 = vsel %vm4138_vm6, %v11819_v25, %v4170_v1  ;;  %8174 = vrot.lane.b32.xlu1 %v8173_v19, %s8644_s19  ;;  %v4082_v36 = vadd.f32 %v11797_v21, %v11759_v9  ;;  %v4711_v39 = vadd.f32 %v4679_v55, %v11828_v12  ;;  %v5129_v29 = vld [vmem:[#allocation4 + $0x19a] sm:$0xff]  ;;  %v4663_v18 = vmul.f32 0.125, %v11825_v5  ;;  %v5130_v19 = vld [vmem:[#allocation4 + $0x1a2] sm:$0xff] }
 0x569   : > { %5206 = vst.msk [vmem:[#allocation3 + $0x99] sm:$0xff] %vm324_vm3, %v5174_v61  ;;  %v4085_v46 = vadd.f32 %v11797_v21, %v11802_v63  ;;  %v4087_v53 = vadd.f32 %v11797_v21, %v4086_v4  ;;  %vm4155_vm8 = vcmp.gt.f32.partialorder %v4122_v50, 0.0  ;;  %v4187_v9 = vmul.f32 0.2, %v4122_v50 }
 0x56a   : > { %4235 = vst.msk [vmem:[#allocation4 + $0xc1] sm:$0xff] %vm324_vm3, %v4202_v40  ;;  %vm4139_vm9 = vcmp.gt.f32.partialorder %v4082_v36, 0.0  ;;  %v4171_v12 = vmul.f32 0.2, %v4082_v36  ;;  %v11906_v6 = vmul.f32 0.0625, %v4938_v62  ;;  %v11908_v11 = vmul.f32 0.125, %v5034_v59 }
 0x56b   : > { %8194 = vrot.lane.b32.xlu0 %v8193_v7, %s8646_s21  ;;  %vm4140_vm11 = vcmp.gt.f32.partialorder %v4085_v46, 0.0  ;;  %v4172_v55 = vmul.f32 0.2, %v4085_v46  ;;  %vm4141_vm13 = vcmp.gt.f32.partialorder %v4087_v53, 0.0  ;;  %v4219_v63 = vsel %vm4155_vm8, %v4122_v50, %v4187_v9 }
 0x56c   : > { %v4173_v42 = vmul.f32 0.2, %v4087_v53  ;;  %4252 = vst.msk [vmem:[#allocation4 + $0x189] sm:$0xff] %vm324_vm3, %v4219_v63  ;;  %v4203_v5 = vsel %vm4139_vm9, %v4082_v36, %v4171_v12  ;;  %v4871_v1 = vmul.f32 0.125, %v11846_v10  ;;  %v11912_v61 = vmul.f32 0.0625, %v5129_v29  ;;  %v5249_v10 = vld [vmem:[#allocation3 + $0x91] sm:$0xff] }
 0x56d   : > { %v4204_v32 = vsel %vm4140_vm11, %v4085_v46, %v4172_v55  ;;  %v4695_v16 = vadd.f32 %v4663_v18, %v11832_v47  ;;  %4236 = vst.msk [vmem:[#allocation4 + $0xc9] sm:$0xff] %vm324_vm3, %v4203_v5  ;;  %v11917_v40 = vadd.f32 %v4870_v3, %v11858_v17  ;;  %v4759_v50 = vmul.f32 0.25, %v11843_v14 }
 0x56e   : > { %v4089_v33 = vpop.f32.mrf.mxu1  ;;  %v4205_v7 = vsel %vm4141_vm13, %v4087_v53, %v4173_v42  ;;  %v4854_v36 = vmul.f32 0.125, %v11834_v28  ;;  %4237 = vst.msk [vmem:[#allocation4 + $0xd9] sm:$0xff] %vm324_vm3, %v4204_v32  ;;  %v4505_v29 = vadd.f32 %v11863_v26, %v11837_v57  ;;  %v4855_v47 = vmul.f32 0.125, %v11872_v37 }
 0x56f   : > { %v4090_v25 = vadd.f32 %v11797_v21, %v4089_v33  ;;  %v4807_v33 = vadd.f32 %v4775_v20, %v4711_v39  ;;  %v4274_v62 = vld [vmem:[#allocation4 + $0x182] sm:$0x1]  ;;  %v11928_v28 = vmul.f32 0.0625, %v5130_v19  ;;  %v11932_v46 = vadd.f32 %v11850_v31, %v11860_v35  ;;  %4238 = vst.msk [vmem:[#allocation4 + $0xe1] sm:$0xff] %vm324_vm3, %v4205_v7  ;;  %v11945_v31 = vld [vmem:[#allocation3 + $0x78] sm:$0xff]  ;;  %v11947_v35 = vld [vmem:[#allocation3 + $0x80] sm:$0xff] }
 0x570   : > { %4292 = vst.msk [vmem:[#allocation4 + $0x180] sm:$0x1] %vm333_vm12, %v4274_v62  ;;  %v4744_v20 = vld [vmem:[#allocation4 + $0x181] sm:$0xff]  ;;  %v5250_v39 = vld [vmem:[#allocation3 + $0x99] sm:$0xff]  ;;  %v11935_v53 = vadd.f32 %v4854_v36, %v11881_v2  ;;  %v4791_v9 = vadd.f32 %v4759_v50, %v4695_v16  ;;  %v11949_v2 = vld [vmem:[#allocation3 + $0x81] sm:$0xff]  ;;  %vm6158_vm8 = vcmask 621568  }
 0x571   : > { %v4174_v4 = vmul.f32 0.2, %v4090_v25  ;;  %vm4142_vm4 = vcmp.gt.f32.partialorder %v4090_v25, 0.0  ;;  %v5265_v3 = vld [vmem:[#allocation3 + $0x92] sm:$0xff]  ;;  %v11938_v37 = vpack.i.bf16 %v5250_v39, %v5249_v10  ;;  %v5266_v18 = vld [vmem:[#allocation3 + $0x9a] sm:$0xff]  ;;  %v4776_v55 = vmul.f32 0.25, %v4744_v20 }
 0x572   : > { %v4266_v57 = vld [vmem:[#allocation4 + $0xc2] sm:$0x1]  ;;  %v11943_v12 = vpack.i.bf16 %v5266_v18, %v5265_v3  ;;  %v5063_v63 = vmul.f32 0.125, %v4744_v20  ;;  %v4887_v5 = vadd.f32 %v4855_v47, %v4791_v9  ;;  %vm6552_vm9 = vcmask 1042434  }
 0x573   : > { %v4206_v17 = vsel %vm4142_vm4, %v4090_v25, %v4174_v4  ;;  %v4442_v26 = vld [vmem:[#allocation4 + $0xc1] sm:$0xff]  ;;  %13078 = vst [vmem:[#allocation48_spill] sm:$0xff] %v11938_v37  ;;  %v4617_v25 = vadd.f32 %v11856_v49, %v11868_v15  ;;  %8189 = vrot.lane.b32.xlu1 %v11938_v37, %s8644_s19  ;;  %v11956_v15 = vld [vmem:[#allocation3 + $0x79] sm:$0xff]  ;;  %v4601_v4 = vadd.f32 %v11875_v8, %v4505_v29  ;;  %vm6555_vm11 = vcmask 1043459  }
 0x574   : > { %4284 = vst.msk [vmem:[#allocation4 + $0xc0] sm:$0x1] %vm333_vm12, %v4266_v57  ;;  %v11951_v42 = vmul.f32 0.125, %v4442_v26  ;;  %v4760_v32 = vmul.f32 0.25, %v4442_v26  ;;  %v4649_v19 = vld [vmem:[#allocation4 + $0x188] sm:$0xff]  ;;  %8209 = vrot.lane.b32.xlu0 %v11943_v12, %s8646_s21  ;;  %vm6558_vm13 = vcmask 1044484  }
 0x575   : > { %13079 = vst [vmem:[#allocation52_spill] sm:$0xff] %v11943_v12  ;;  %v4745_v16 = vld [vmem:[#allocation4 + $0x189] sm:$0xff]  ;;  %v4681_v7 = vmul.f32 0.125, %v4649_v19  ;;  %v4968_v36 = vmul.f32 0.0625, %v4649_v19 }
 0x576   : > { %v4091_v59 = vpop.f32.mrf.mxu1  ;;  %4239 = vst.msk [vmem:[#allocation4 + $0xf1] sm:$0xff] %vm324_vm3, %v4206_v17  ;;  %v4840_v50 = vld [vmem:[#allocation4 + $0x182] sm:$0xff]  ;;  %v5064_v8 = vmul.f32 0.125, %v4745_v16  ;;  %v4302_v29 = vld [vmem:[#allocation4 + $0xcf] sm:$0x1] }
 0x577   : > { %v4092_v14 = vadd.f32 %v11797_v21, %v4091_v59  ;;  %v4903_v21 = vadd.f32 %v4871_v1, %v4807_v33  ;;  %v4310_v1 = vld [vmem:[#allocation4 + $0x18f] sm:$0x1]  ;;  %v4777_v33 = vmul.f32 0.25, %v4745_v16  ;;  %v4872_v10 = vmul.f32 0.125, %v4840_v50  ;;  %v4648_v39 = vld [vmem:[#allocation4 + $0x180] sm:$0xff] }
 0x578   : > { %4328 = vst.msk [vmem:[#allocation4 + $0x191] sm:$0x1] %vm333_vm12, %v4310_v1  ;;  %v5159_v59 = vmul.f32 0.0625, %v4840_v50  ;;  %v4347_v47 = vld [vmem:[#allocation4 + $0xc8] sm:$0xff]  ;;  %v4713_v3 = vadd.f32 %v4681_v7, %v4617_v25  ;;  %v4680_v1 = vmul.f32 0.125, %v4648_v39  ;;  %v4967_v19 = vmul.f32 0.0625, %v4648_v39 }
 0x579   : > { %v4175_v49 = vmul.f32 0.2, %v4092_v14  ;;  %vm4143_vm6 = vcmp.gt.f32.partialorder %v4092_v14, 0.0  ;;  %v5000_v17 = vadd.f32 %v4968_v36, %v4903_v21  ;;  %4320 = vst.msk [vmem:[#allocation4 + $0xd1] sm:$0x1] %vm333_vm12, %v4302_v29  ;;  %v4379_v57 = vmul.f32 0.0625, %v4347_v47 }
 0x57a   : > { %v4443_v26 = vld [vmem:[#allocation4 + $0xc9] sm:$0xff]  ;;  %v4267_v50 = vld [vmem:[#allocation4 + $0xda] sm:$0x1]  ;;  %v4809_v37 = vadd.f32 %v4777_v33, %v4713_v3  ;;  %v4665_v48 = vmul.f32 0.125, %v4347_v47  ;;  %v4712_v25 = vadd.f32 %v4680_v1, %v11886_v34  ;;  %v4999_v21 = vadd.f32 %v4967_v19, %v11917_v40  ;;  %v4303_v29 = vld [vmem:[#allocation4 + $0xe7] sm:$0x1] }
 0x57b   : > { %v4538_v18 = vld [vmem:[#allocation4 + $0xc2] sm:$0xff]  ;;  %v4207_v9 = vsel %vm4143_vm6, %v4092_v14, %v4175_v49  ;;  %v4475_v62 = vmul.f32 0.125, %v4443_v26  ;;  %v5096_v52 = vadd.f32 %v5064_v8, %v5000_v17  ;;  %v4761_v20 = vmul.f32 0.25, %v4443_v26  ;;  %4285 = vst.msk [vmem:[#allocation4 + $0xd8] sm:$0x1] %vm333_vm12, %v4267_v50  ;;  %8199 = vrot.lane.b32.xlu1 %v11699_v41, %s8646_s21  ;;  %v4444_v1 = vld [vmem:[#allocation4 + $0xd9] sm:$0xff] }
 0x57c   : > { %v4570_v16 = vmul.f32 0.0625, %v4538_v18  ;;  %v4346_v12 = vld [vmem:[#allocation4 + $0xc0] sm:$0xff]  ;;  %v4697_v49 = vadd.f32 %v4665_v48, %v4601_v4  ;;  %v4856_v39 = vmul.f32 0.125, %v4538_v18  ;;  %v4984_v60 = vadd.f32 %v4887_v5, %v4379_v57  ;;  %4321 = vst.msk [vmem:[#allocation4 + $0xe9] sm:$0x1] %vm333_vm12, %v4303_v29 }
 0x57d   : > { %v4378_v7 = vmul.f32 0.0625, %v4346_v12  ;;  %v4664_v36 = vmul.f32 0.125, %v4346_v12  ;;  %v4507_v14 = vadd.f32 %v4475_v62, %v4379_v57  ;;  %v4268_v27 = vld [vmem:[#allocation4 + $0xf2] sm:$0x1]  ;;  %v4808_v33 = vadd.f32 %v4776_v55, %v4712_v25  ;;  %4240 = vst.msk [vmem:[#allocation4 + $0xf9] sm:$0xff] %vm324_vm3, %v4207_v9 }
 0x57e   : > { %v5095_v8 = vadd.f32 %v5063_v63, %v4999_v21  ;;  %4286 = vst.msk [vmem:[#allocation4 + $0xf0] sm:$0x1] %vm333_vm12, %v4268_v27  ;;  %v4793_v5 = vadd.f32 %v4761_v20, %v4697_v49  ;;  %v13080_v3 = vpack.i.bf16 %v11776_v13, %v11781_v22  ;;  %v5080_v22 = vadd.f32 %v4984_v60, %v4475_v62 }
 0x57f   : > { %v4506_v47 = vadd.f32 %v11951_v42, %v4378_v7  ;;  %v4696_v34 = vadd.f32 %v4664_v36, %v11932_v46  ;;  %v4841_v40 = vld [vmem:[#allocation4 + $0x18a] sm:$0xff]  ;;  %v4983_v12 = vadd.f32 %v11935_v53, %v4378_v7  ;;  %v4904_v63 = vadd.f32 %v4872_v10, %v4808_v33  ;;  %v4540_v7 = vld [vmem:[#allocation4 + $0xda] sm:$0xff] }
 0x580   : > { %v4873_v48 = vmul.f32 0.125, %v4841_v40  ;;  %v5160_v4 = vmul.f32 0.0625, %v4841_v40  ;;  %8219 = vrot.lane.b32.xlu0 %v13080_v3, %s8648_s23  ;;  %v5191_v17 = vadd.f32 %v5159_v59, %v5095_v8  ;;  %v4539_v57 = vld [vmem:[#allocation4 + $0xca] sm:$0xff]  ;;  %v4762_v62 = vmul.f32 0.25, %v4444_v1 }
 0x581   : > { %v4792_v55 = vadd.f32 %v4760_v32, %v4696_v34  ;;  %v4602_v46 = vadd.f32 %v4570_v16, %v4506_v47  ;;  %v5079_v26 = vadd.f32 %v4983_v12, %v11951_v42  ;;  %v4571_v53 = vmul.f32 0.0625, %v4539_v57  ;;  %v4349_v42 = vld [vmem:[#allocation4 + $0xe0] sm:$0xff] }
 0x582   : > { %v4905_v27 = vadd.f32 %v4873_v48, %v4809_v37  ;;  %v5192_v18 = vadd.f32 %v5160_v4, %v5096_v52  ;;  %v5001_v20 = vadd.f32 %v11839_v45, %v4904_v63  ;;  %5223 = vst.msk [vmem:[#allocation3 + $0x169] sm:$0xff] %vm324_vm3, %v5191_v17  ;;  %v4857_v19 = vmul.f32 0.125, %v4539_v57  ;;  %v4348_v50 = vld [vmem:[#allocation4 + $0xd8] sm:$0xff]  ;;  %v4445_v37 = vld [vmem:[#allocation4 + $0xe1] sm:$0xff] }
 0x583   : > { %v4888_v13 = vadd.f32 %v4856_v39, %v4792_v55  ;;  %v4603_v10 = vadd.f32 %v4571_v53, %v4507_v14  ;;  %v5175_v59 = vadd.f32 %v5079_v26, %v4570_v16  ;;  %v4380_v9 = vmul.f32 0.0625, %v4348_v50  ;;  %v4541_v29 = vld [vmem:[#allocation4 + $0xe2] sm:$0xff]  ;;  %v4446_v4 = vld [vmem:[#allocation4 + $0xf1] sm:$0xff] }
 0x584   : > { %v5002_v32 = vadd.f32 %v11906_v6, %v4905_v27  ;;  %5224 = vst.msk [vmem:[#allocation3 + $0x171] sm:$0xff] %vm324_vm3, %v5192_v18  ;;  %v5097_v52 = vadd.f32 %v11841_v30, %v5001_v20  ;;  %v4889_v25 = vadd.f32 %v4857_v19, %v4793_v5  ;;  %v5176_v21 = vadd.f32 %v5080_v22, %v4571_v53  ;;  %v4304_v33 = vld [vmem:[#allocation4 + $0xff] sm:$0x1] }
 0x585   : > { %v4476_v45 = vmul.f32 0.125, %v4444_v1  ;;  %5207 = vst.msk [vmem:[#allocation3 + $0xa9] sm:$0xff] %vm324_vm3, %v5175_v59  ;;  %v4666_v60 = vmul.f32 0.125, %v4348_v50  ;;  %v4985_v6 = vadd.f32 %v4888_v13, %v4380_v9  ;;  %v13081_v16 = vpack.i.bf16 %v11947_v35, %v11945_v31  ;;  %v4350_v48 = vld [vmem:[#allocation4 + $0xf0] sm:$0xff]  ;;  %v4351_v63 = vld [vmem:[#allocation4 + $0xf8] sm:$0xff] }
 0x586   : > { %v5098_v36 = vadd.f32 %v11908_v11, %v5002_v32  ;;  %v5193_v14 = vadd.f32 %v11912_v61, %v5097_v52  ;;  %5208 = vst.msk [vmem:[#allocation3 + $0xb1] sm:$0xff] %vm324_vm3, %v5176_v21  ;;  %v4381_v49 = vmul.f32 0.0625, %v4349_v42  ;;  %v4477_v39 = vmul.f32 0.125, %v4445_v37  ;;  %v4542_v1 = vld [vmem:[#allocation4 + $0xf2] sm:$0xff] }
 0x587   : > { %8224 = vrot.lane.b32.xlu1 %v13081_v16, %s8648_s23  ;;  %v4508_v30 = vadd.f32 %v4476_v45, %v4380_v9  ;;  %v4698_v8 = vadd.f32 %v4666_v60, %v4602_v46  ;;  %v5081_v47 = vadd.f32 %v4985_v6, %v4476_v45  ;;  %v4572_v34 = vmul.f32 0.0625, %v4540_v7  ;;  %4322 = vst.msk [vmem:[#allocation4 + $0x101] sm:$0x1] %vm333_vm12, %v4304_v33 }
 0x588   : > { %v5194_v11 = vadd.f32 %v11928_v28, %v5098_v36  ;;  %v13082_v31 = vpack.i.bf16 %v11949_v2, %v11956_v15  ;;  %5225 = vst.msk [vmem:[#allocation3 + $0x181] sm:$0xff] %vm324_vm3, %v5193_v14  ;;  %v4509_v61 = vadd.f32 %v4477_v39, %v4381_v49  ;;  %v4573_v35 = vmul.f32 0.0625, %v4541_v29  ;;  %v4447_v15 = vld [vmem:[#allocation4 + $0xf9] sm:$0xff] }
 0x589   : > { %v4667_v40 = vmul.f32 0.125, %v4349_v42  ;;  %v4763_v12 = vmul.f32 0.25, %v4445_v37  ;;  %v4794_v28 = vadd.f32 %v4762_v62, %v4698_v8  ;;  %v4604_v5 = vadd.f32 %v4572_v34, %v4508_v30 }
 0x58a   : > { %8254 = vrot.lane.b32.xlu0 %v13082_v31, %s8650_s8  ;;  %5226 = vst.msk [vmem:[#allocation3 + $0x189] sm:$0xff] %vm324_vm3, %v5194_v11  ;;  %v4858_v3 = vmul.f32 0.125, %v4540_v7  ;;  %v4859_v55 = vmul.f32 0.125, %v4541_v29  ;;  %v4605_v17 = vadd.f32 %v4573_v35, %v4509_v61  ;;  %v4986_v46 = vadd.f32 %v4889_v25, %v4381_v49  ;;  %v8575_v31 = vld [vmem:[#allocation4 + $0x111] sm:$0xff] }
 0x58b   : > { %v4699_v57 = vadd.f32 %v4667_v40, %v4603_v10  ;;  %v5177_v2 = vadd.f32 %v5081_v47, %v4572_v34  ;;  %v4382_v27 = vmul.f32 0.0625, %v4350_v48  ;;  %v4478_v18 = vmul.f32 0.125, %v4446_v4 }
 0x58c   : > { %v4890_v26 = vadd.f32 %v4858_v3, %v4794_v28  ;;  %v4668_v53 = vmul.f32 0.125, %v4350_v48  ;;  %v5082_v19 = vadd.f32 %v4986_v46, %v4477_v39  ;;  %v4764_v13 = vmul.f32 0.25, %v4446_v4  ;;  %v5281_v33 = vld [vmem:[#allocation3 + $0xa8] sm:$0xff] }
 0x58d   : > { %v4795_v20 = vadd.f32 %v4763_v12, %v4699_v57  ;;  %5209 = vst.msk [vmem:[#allocation3 + $0xc1] sm:$0xff] %vm324_vm3, %v5177_v2  ;;  %v4383_v22 = vmul.f32 0.0625, %v4351_v63  ;;  %v4510_v50 = vadd.f32 %v4478_v18, %v4382_v27  ;;  %v4479_v9 = vmul.f32 0.125, %v4447_v15  ;;  %v5282_v60 = vld [vmem:[#allocation3 + $0xb0] sm:$0xff]  ;;  %v8576_v12 = vld [vmem:[#allocation4 + $0x10a] sm:$0xff] }
 0x58e   : > { %v4700_v32 = vadd.f32 %v4668_v53, %v4604_v5  ;;  %v4987_v59 = vadd.f32 %v4890_v26, %v4382_v27  ;;  %v5178_v10 = vadd.f32 %v5082_v19, %v4573_v35  ;;  %v4543_v37 = vld [vmem:[#allocation4 + $0xfa] sm:$0xff]  ;;  %v4574_v52 = vmul.f32 0.0625, %v4542_v1 }
 0x58f   : > { %v4891_v42 = vadd.f32 %v4859_v55, %v4795_v20  ;;  %v4669_v25 = vmul.f32 0.125, %v4351_v63  ;;  %v4511_v7 = vadd.f32 %v4479_v9, %v4383_v22  ;;  %v4575_v36 = vmul.f32 0.0625, %v4543_v37  ;;  %v13084_v19 = vld [vmem:[#allocation24_spill] sm:$0xff] }
 0x590   : > { %v4796_v21 = vadd.f32 %v4764_v13, %v4700_v32  ;;  %v5083_v45 = vadd.f32 %v4987_v59, %v4478_v18  ;;  %5210 = vst.msk [vmem:[#allocation3 + $0xc9] sm:$0xff] %vm324_vm3, %v5178_v10  ;;  %v4606_v62 = vadd.f32 %v4574_v52, %v4510_v50  ;;  %v4765_v29 = vmul.f32 0.25, %v4447_v15  ;;  %v5292_v32 = vld [vmem:[#allocation3 + $0x21] sm:$0xff]  ;;  %v5294_v10 = vld [vmem:[#allocation3 + $0x51] sm:$0xff] }
 0x591   : > { %v4701_v6 = vadd.f32 %v4669_v25, %v4605_v17  ;;  %v4860_v16 = vmul.f32 0.125, %v4542_v1  ;;  %v4607_v14 = vadd.f32 %v4575_v36, %v4511_v7  ;;  %v4861_v30 = vmul.f32 0.125, %v4543_v37  ;;  %v5293_v25 = vld [vmem:[#allocation3 + $0x49] sm:$0xff]  ;;  %v5298_v7 = vld [vmem:[#allocation3 + $0xb1] sm:$0xff] }
 0x592   : > { %v4988_v49 = vadd.f32 %v4891_v42, %v4383_v22  ;;  %v5179_v39 = vadd.f32 %v5083_v45, %v4574_v52  ;;  %v4702_v11 = vadd.f32 %v11558_v51, %v4606_v62  ;;  %v8228_v34 = vpack.i.bf16 %v5282_v60, %v5281_v33  ;;  %v8577_v51 = vld [vmem:[#allocation4 + $0x112] sm:$0xff]  ;;  %v5291_v42 = vld [vmem:[#allocation3 + $0x19] sm:$0xff] }
 0x593   : > { %v4797_v8 = vadd.f32 %v4765_v29, %v4701_v6  ;;  %v4892_v47 = vadd.f32 %v4860_v16, %v4796_v21  ;;  %v4767_v61 = vmul.f32 0.25, %v8575_v31  ;;  %v4703_v35 = vadd.f32 %v11628_v44, %v4607_v14  ;;  %v13086_v22 = vld [vmem:[#allocation11_spill] sm:$0xff]  ;;  %v5310_v33 = vld [vmem:[#allocation3 + $0x52] sm:$0xff] }
 0x594   : > { %v5084_v40 = vadd.f32 %v4988_v49, %v4479_v9  ;;  %5211 = vst.msk [vmem:[#allocation3 + $0xd9] sm:$0xff] %vm324_vm3, %v5179_v39  ;;  %v4862_v48 = vmul.f32 0.125, %v8576_v12  ;;  %v4798_v4 = vadd.f32 %v11543_v56, %v4702_v11  ;;  %8229 = vrot.lane.b32.xlu2 %v8228_v34, %s8648_s23  ;;  %v4863_v3 = vmul.f32 0.125, %v8577_v51  ;;  %v5251_v53 = vld [vmem:[#allocation3 + $0xc1] sm:$0xff]  ;;  %v5297_v62 = vld [vmem:[#allocation3 + $0xa9] sm:$0xff] }
 0x595   : > { %v4893_v28 = vadd.f32 %v4861_v30, %v4797_v8  ;;  %v4989_v5 = vadd.f32 %v4892_v47, %v11472_v38  ;;  %v4799_v55 = vadd.f32 %v4767_v61, %v4703_v35  ;;  %v8243_v52 = vpack.i.bf16 %v5292_v32, %v5291_v42  ;;  %v5307_v30 = vld [vmem:[#allocation3 + $0x1a] sm:$0xff]  ;;  %v5308_v49 = vld [vmem:[#allocation3 + $0x22] sm:$0xff]  ;;  %v5309_v39 = vld [vmem:[#allocation3 + $0x4a] sm:$0xff] }
 0x596   : > { %v5180_v63 = vadd.f32 %v5084_v40, %v4575_v36  ;;  %v4894_v17 = vadd.f32 %v4862_v48, %v4798_v4  ;;  %v8248_v21 = vpack.i.bf16 %v5294_v10, %v5293_v25  ;;  %v8258_v16 = vpack.i.bf16 %v5298_v7, %v5297_v62  ;;  %v5311_v48 = vld [vmem:[#allocation3 + $0x7a] sm:$0xff]  ;;  %v5312_v4 = vld [vmem:[#allocation3 + $0x82] sm:$0xff] }
 0x597   : > { %v4990_v57 = vadd.f32 %v4893_v28, %v11483_v54  ;;  %v5085_v44 = vadd.f32 %v4989_v5, %v11464_v23  ;;  %v4895_v46 = vadd.f32 %v4863_v3, %v4799_v55  ;;  %v5267_v2 = vld [vmem:[#allocation3 + $0xc2] sm:$0xff]  ;;  %v5268_v15 = vld [vmem:[#allocation3 + $0xca] sm:$0xff]  ;;  %v8278_v47 = vpack.i.bf16 %v5308_v49, %v5307_v30  ;;  %v5314_v55 = vld [vmem:[#allocation3 + $0xb2] sm:$0xff] }
 0x598   : > { %5212 = vst.msk [vmem:[#allocation3 + $0xe1] sm:$0xff] %vm324_vm3, %v5180_v63  ;;  %v5252_v56 = vld [vmem:[#allocation3 + $0xc9] sm:$0xff]  ;;  %v4991_v26 = vadd.f32 %v4894_v17, %v11571_v0  ;;  %v12019_v18 = vpack.i.bf16 %v5268_v15, %v5267_v2  ;;  %v13085_v0 = vld [vmem:[#allocation9_spill] sm:$0xff]  ;;  %v8283_v34 = vpack.i.bf16 %v5310_v33, %v5309_v39  ;;  %v8293_v51 = vpack.i.bf16 %v5312_v4, %v5311_v48  ;;  %v5304_v42 = vld [vmem:[#allocation3 + $0x141] sm:$0xff] }
 0x599   : > { %v5086_v38 = vadd.f32 %v4990_v57, %v11485_v24  ;;  %v5181_v27 = vadd.f32 %v5085_v44, %v11500_v43  ;;  %v4992_v1 = vadd.f32 %v4895_v46, %v11574_v58  ;;  %v12022_v54 = vpack.i.bf16 %v5252_v56, %v5251_v53  ;;  %v13083_v23 = vld [vmem:[#allocation8_spill] sm:$0xff]  ;;  %v13087_v58 = vld [vmem:[#allocation10_spill] sm:$0xff]  ;;  %v5287_v62 = vld [vmem:[#allocation3 + $0x138] sm:$0xff] }
 0x59a   : > { %v5087_v20 = vadd.f32 %v4991_v26, %v13083_v23  ;;  %8239 = vrot.lane.b32.xlu1 %v12019_v18, %s8646_s21  ;;  %v5313_v3 = vld [vmem:[#allocation3 + $0xaa] sm:$0xff]  ;;  %v5271_v56 = vld [vmem:[#allocation3 + $0x122] sm:$0xff]  ;;  %vm6183_vm12 = vcmask 1045504  }
 0x59b   : > { %v5182_v13 = vadd.f32 %v5086_v38, %v13084_v19  ;;  %5213 = vst.msk [vmem:[#allocation3 + $0xf1] sm:$0xff] %vm324_vm3, %v5181_v27  ;;  %v5088_v24 = vadd.f32 %v4992_v1, %v13085_v0  ;;  %v5283_v59 = vld [vmem:[#allocation3 + $0xd8] sm:$0xff]  ;;  %v8308_v46 = vpack.i.bf16 %v5314_v55, %v5313_v3  ;;  %v5272_v26 = vld [vmem:[#allocation3 + $0x12a] sm:$0xff]  ;;  %v5255_v53 = vld [vmem:[#allocation3 + $0x121] sm:$0xff] }
 0x59c   : > { %v5183_v43 = vadd.f32 %v5087_v20, %v13086_v22  ;;  %8234 = vrot.lane.b32.xlu2 %v12022_v54, %s8644_s19  ;;  %v5299_v6 = vld [vmem:[#allocation3 + $0xd9] sm:$0xff]  ;;  %v5256_v38 = vld [vmem:[#allocation3 + $0x129] sm:$0xff]  ;;  %v12060_v1 = vpack.i.bf16 %v5272_v26, %v5271_v56  ;;  %v5372_v30 = vld [vmem:[#allocation2 + $0x21] sm:$0xff] }
 0x59d   : > { %5214 = vst.msk [vmem:[#allocation3 + $0xf9] sm:$0xff] %vm324_vm3, %v5182_v13  ;;  %v5184_v50 = vadd.f32 %v5088_v24, %v13087_v58  ;;  %v12058_v27 = vld [vmem:[#allocation3 + $0x38] sm:$0xff]  ;;  %v12062_v23 = vpack.i.bf16 %v5256_v38, %v5255_v53  ;;  %v12064_v20 = vld [vmem:[#allocation3 + $0x30] sm:$0xff]  ;;  %v12072_v13 = vpop.permute.xlu2 %8179  ;;  %v5232_v0 = vld [vmem:[#allocation3 + $0x68] sm:$0xff] }
 0x59e   : > { %5215 = vst.msk [vmem:[#allocation3 + $0x109] sm:$0xff] %vm324_vm3, %v5183_v43  ;;  %v8323_v19 = vpack.i.bf16 %v12058_v27, %v12064_v20  ;;  %v5340_v24 = vld [vmem:[#allocation3 + $0x39] sm:$0xff]  ;;  %v5339_v43 = vld [vmem:[#allocation3 + $0x31] sm:$0xff] }
 0x59f   : > { %v5284_v9 = vld [vmem:[#allocation3 + $0xe0] sm:$0xff]  ;;  %5216 = vst.msk [vmem:[#allocation3 + $0x111] sm:$0xff] %vm324_vm3, %v5184_v50  ;;  %v8343_v50 = vpack.i.bf16 %v5340_v24, %v5339_v43  ;;  %v5327_v26 = vld [vmem:[#allocation3 + $0x90] sm:$0xff] }
 0x5a0   : > { %v8263_v37 = vpack.i.bf16 %v5284_v9, %v5283_v59  ;;  %v5300_v36 = vld [vmem:[#allocation3 + $0xe1] sm:$0xff] }
 0x5a1   : > { %v8268_v14 = vpack.i.bf16 %v5300_v36, %v5299_v6  ;;  %v5315_v63 = vld [vmem:[#allocation3 + $0xda] sm:$0xff]  ;;  %v5316_v17 = vld [vmem:[#allocation3 + $0xe2] sm:$0xff] }
 0x5a2   : > { %8264 = vrot.lane.b32.xlu0 %v8263_v37, %s8648_s23  ;;  %8244 = vrot.lane.b32.xlu1 %v8243_v52, %s8650_s8  ;;  %v5253_v60 = vld [vmem:[#allocation3 + $0xf1] sm:$0xff]  ;;  %v8313_v2 = vpack.i.bf16 %v5316_v17, %v5315_v63  ;;  %v5231_v22 = vld [vmem:[#allocation3 + $0x60] sm:$0xff] }
 0x5a3   : > { %v8338_v58 = vpack.i.bf16 %v5232_v0, %v5231_v22  ;;  %v5319_v59 = vld [vmem:[#allocation3 + $0x13a] sm:$0xff]  ;;  %v5320_v9 = vld [vmem:[#allocation3 + $0x142] sm:$0xff]  ;;  %v13088_v63 = vld [vmem:[#allocation36_spill] sm:$0xff] }
 0x5a4   : > { %8249 = vrot.lane.b32.xlu2 %v8248_v21, %s8650_s8  ;;  %v5254_v45 = vld [vmem:[#allocation3 + $0xf9] sm:$0xff]  ;;  %v8363_v25 = vpack.i.bf16 %v5320_v9, %v5319_v59  ;;  %v13090_v9 = vld [vmem:[#allocation48_spill] sm:$0xff] }
 0x5a5   : > { %v12040_v29 = vpack.i.bf16 %v5254_v45, %v5253_v60  ;;  %v5269_v11 = vld [vmem:[#allocation3 + $0xf2] sm:$0xff]  ;;  %v5270_v8 = vld [vmem:[#allocation3 + $0xfa] sm:$0xff]  ;;  %v5301_v40 = vld [vmem:[#allocation3 + $0x109] sm:$0xff]  ;;  %v8205_v32 = vpop.permute.xlu2 %8204 }
 0x5a6   : > { %v12048_v31 = vpack.i.bf16 %v5270_v8, %v5269_v11  ;;  %v5302_v61 = vld [vmem:[#allocation3 + $0x111] sm:$0xff]  ;;  %v5285_v12 = vld [vmem:[#allocation3 + $0x108] sm:$0xff]  ;;  %v5303_v37 = vld [vmem:[#allocation3 + $0x139] sm:$0xff]  ;;  %v8207_v36 = vunpack.i.h.bf16 %v8205_v32  ;;  %v8206_v60 = vunpack.i.l.bf16 %v8205_v32 }
 0x5a7   : > { %v5286_v35 = vld [vmem:[#allocation3 + $0x110] sm:$0xff]  ;;  %v8303_v28 = vpack.i.bf16 %v5302_v61, %v5301_v40  ;;  %v5288_v52 = vld [vmem:[#allocation3 + $0x140] sm:$0xff]  ;;  %v8358_v7 = vpack.i.bf16 %v5304_v42, %v5303_v37  ;;  %v5228_v11 = vld [vmem:[#allocation3 + $0x8] sm:$0xff]  ;;  %v8182_v42 = vunpack.i.h.bf16 %v12072_v13 }
 0x5a8   : > { %v8298_v5 = vpack.i.bf16 %v5286_v35, %v5285_v12  ;;  %v5317_v57 = vld [vmem:[#allocation3 + $0x10a] sm:$0xff]  ;;  %v5318_v44 = vld [vmem:[#allocation3 + $0x112] sm:$0xff]  ;;  %v5227_v33 = vld [vmem:[#allocation3] sm:$0xff] }
 0x5a9   : > { %v8318_v15 = vpack.i.bf16 %v5318_v44, %v5317_v57  ;;  %v5373_v17 = vld [vmem:[#allocation2 + $0x49] sm:$0xff]  ;;  %v5374_v57 = vld [vmem:[#allocation2 + $0x51] sm:$0xff] }
 0x5aa   : > { %8274 = vrot.lane.b32.xlu0 %v12040_v29, %s8644_s19  ;;  %8259 = vrot.lane.b32.xlu1 %v8258_v16, %s8650_s8  ;;  %v8383_v56 = vpack.i.bf16 %v5374_v57, %v5373_v17  ;;  %v5273_v37 = vld [vmem:[#allocation3 + $0x152] sm:$0xff] }
 0x5ac   : > { %8269 = vrot.lane.b32.xlu2 %v8268_v14, %s8650_s8  ;;  %v5371_v14 = vld [vmem:[#allocation2 + $0x19] sm:$0xff] }
 0x5ad   : > { %v8368_v61 = vpack.i.bf16 %v5372_v30, %v5371_v14  ;;  %v8215_v35 = vpop.permute.xlu2 %8214 }
 0x5b2   : > { %8279 = vrot.lane.b32.xlu0 %v8278_v47, %s8651_s22  ;;  %8284 = vrot.lane.b32.xlu1 %v8283_v34, %s8651_s22 }
 0x5b4   : > { %8289 = vrot.lane.b32.xlu2 %v12048_v31, %s8646_s21 }
 0x5ba   : > { %8304 = vrot.lane.b32.xlu0 %v8303_v28, %s8650_s8  ;;  %8299 = vrot.lane.b32.xlu1 %v8298_v5, %s8648_s23  ;;  %v8217_v5 = vunpack.i.h.bf16 %v8215_v35 }
 0x5bc   : > { %8294 = vrot.lane.b32.xlu2 %v8293_v51, %s8651_s22  ;;  %v8216_v51 = vunpack.i.l.bf16 %v8215_v35  ;;  %v5376_v35 = vld [vmem:[#allocation2 + $0x81] sm:$0xff] }
 0x5c2   : > { %8309 = vrot.lane.b32.xlu0 %v8308_v46, %s8651_s22  ;;  %8314 = vrot.lane.b32.xlu1 %v8313_v2, %s8651_s22  ;;  %v13089_v2 = vld [vmem:[#allocation58_spill] sm:$0xff] }
 0x5c4   : > { %8319 = vrot.lane.b32.xlu2 %v8318_v15, %s8651_s22  ;;  %v5328_v15 = vld [vmem:[#allocation3 + $0x98] sm:$0xff] }
 0x5c5   : > { %v8388_v53 = vpack.i.bf16 %v5328_v15, %v5327_v26 }
 0x5ca   : > { %8334 = vrot.lane.b32.xlu0 %v12060_v1, %s8646_s21  ;;  %8329 = vrot.lane.b32.xlu1 %v12062_v23, %s8644_s19 }
 0x5cc   : > { %8324 = vrot.lane.b32.xlu2 %v8323_v19, %s8652_s29 }
 0x5d2   : > { %8339 = vrot.lane.b32.xlu0 %v8338_v58, %s8652_s29  ;;  %8344 = vrot.lane.b32.xlu1 %v8343_v50, %s8653_s9 }
 0x5d4   : > { %8349 = vrot.lane.b32.xlu2 %v11699_v41, %s8654_s13  ;;  %v8353_v41 = vpack.i.bf16 %v5288_v52, %v5287_v62  ;;  %v5274_v52 = vld [vmem:[#allocation3 + $0x15a] sm:$0xff] }
 0x5d5   : > { %v8185_v10 = vpop.permute.xlu0 %8184  ;;  %v12115_v62 = vpack.i.bf16 %v5274_v52, %v5273_v37  ;;  %v5377_v37 = vld [vmem:[#allocation2 + $0xa9] sm:$0xff]  ;;  %v5378_v52 = vld [vmem:[#allocation2 + $0xb1] sm:$0xff] }
 0x5d6   : > { %v8187_v21 = vunpack.i.h.bf16 %v8185_v10  ;;  %v8186_v45 = vunpack.i.l.bf16 %v8185_v10  ;;  %v8181_v10 = vunpack.i.l.bf16 %v12072_v13  ;;  %v5966_v13 = vsel %vm324_vm3, %v12058_v27, %v8182_v42  ;;  %v5375_v27 = vld [vmem:[#allocation2 + $0x79] sm:$0xff] }
 0x5d8   : > { %v5967_v6 = vsel %vm324_vm3, %v5231_v22, %v8186_v45  ;;  %v5968_v16 = vsel %vm324_vm3, %v5232_v0, %v8187_v21  ;;  %v5965_v14 = vsel %vm324_vm3, %v12064_v20, %v8181_v10  ;;  %v5332_v10 = vld [vmem:[#allocation3 + $0xf8] sm:$0xff] }
 0x5d9   : > { %v12084_v49 = vsel %vm1877_vm5, %v5967_v6, %v8206_v60  ;;  %v12087_v39 = vsel %vm1877_vm5, %v5968_v16, %v8207_v36  ;;  %v5257_v36 = vld [vmem:[#allocation3 + $0x151] sm:$0xff] }
 0x5da   : > { %8364 = vrot.lane.b32.xlu0 %v8363_v25, %s8651_s22  ;;  %8359 = vrot.lane.b32.xlu1 %v8358_v7, %s8650_s8  ;;  %v8175_v8 = vpop.permute.xlu1 %8174  ;;  %v5258_v25 = vld [vmem:[#allocation3 + $0x159] sm:$0xff] }
 0x5db   : > { %v8177_v47 = vunpack.i.h.bf16 %v8175_v8  ;;  %v8176_v34 = vunpack.i.l.bf16 %v8175_v8  ;;  %v12117_v6 = vpack.i.bf16 %v5258_v25, %v5257_v36 }
 0x5dc   : > { %8354 = vrot.lane.b32.xlu2 %v8353_v41, %s8648_s23 }
 0x5dd   : > { %v5964_v40 = vsel %vm324_vm3, %v5228_v11, %v8177_v47  ;;  %v5963_v12 = vsel %vm324_vm3, %v5227_v33, %v8176_v34  ;;  %v8195_v48 = vpop.permute.xlu0 %8194  ;;  %v13091_v33 = vld [vmem:[#allocation52_spill] sm:$0xff] }
 0x5de   : > { %v8197_v4 = vunpack.i.h.bf16 %v8195_v48  ;;  %v8196_v28 = vunpack.i.l.bf16 %v8195_v48  ;;  %v5290_v48 = vld [vmem:[#allocation3 + $0x170] sm:$0xff] }
 0x5e0   : > { %v5980_v3 = vsel %vm1877_vm5, %v5964_v40, %v8197_v4  ;;  %v5979_v55 = vsel %vm1877_vm5, %v5963_v12, %v8196_v28  ;;  %v5236_v4 = vld [vmem:[#allocation3 + $0xc8] sm:$0xff] }
 0x5e1   : > { %v12098_v44 = vsel %vm1943_vm7, %v5979_v55, %v8216_v51  ;;  %v12101_v46 = vsel %vm1943_vm7, %v5980_v3, %v8217_v5  ;;  %v8413_v5 = vpack.i.bf16 %v5376_v35, %v5375_v27  ;;  %v5289_v51 = vld [vmem:[#allocation3 + $0x168] sm:$0xff] }
 0x5e2   : > { %8369 = vrot.lane.b32.xlu0 %v8368_v61, %s8655_s16  ;;  %8374 = vrot.lane.b32.xlu1 %v13088_v63, %s8653_s9  ;;  %v8423_v55 = vpack.i.bf16 %v5290_v48, %v5289_v51  ;;  %v5235_v63 = vld [vmem:[#allocation3 + $0xc0] sm:$0xff] }
 0x5e4   : > { %8379 = vrot.lane.b32.xlu2 %v13089_v2, %s8654_s13  ;;  %v8418_v2 = vpack.i.bf16 %v5236_v4, %v5235_v63 }
 0x5e5   : > { %v8190_v38 = vpop.permute.xlu1 %8189 }
 0x5e6   : > { %v8192_v19 = vunpack.i.h.bf16 %v8190_v38  ;;  %v8191_v0 = vunpack.i.l.bf16 %v8190_v38  ;;  %v8210_v24 = vpop.permute.xlu0 %8209 }
 0x5e7   : > { %v8212_v22 = vunpack.i.h.bf16 %v8210_v24  ;;  %v8211_v43 = vunpack.i.l.bf16 %v8210_v24  ;;  %v5321_v24 = vld [vmem:[#allocation3 + $0x16a] sm:$0xff] }
 0x5e8   : > { %v5969_v58 = vsel %vm324_vm3, %v5327_v26, %v8191_v0  ;;  %v5970_v50 = vsel %vm324_vm3, %v5328_v15, %v8192_v19 }
 0x5e9   : > { %v5986_v32 = vsel %vm1877_vm5, %v5970_v50, %v8212_v22  ;;  %v5985_v59 = vsel %vm1877_vm5, %v5969_v58, %v8211_v43  ;;  %v5322_v22 = vld [vmem:[#allocation3 + $0x172] sm:$0xff] }
 0x5ea   : > { %8384 = vrot.lane.b32.xlu0 %v8383_v56, %s8655_s16  ;;  %8389 = vrot.lane.b32.xlu1 %v8388_v53, %s8652_s29 }
 0x5ec   : > { %8394 = vrot.lane.b32.xlu2 %v13090_v9, %s8653_s9  ;;  %v5305_v9 = vld [vmem:[#allocation3 + $0x169] sm:$0xff] }
 0x5ed   : > { %v8200_v60 = vpop.permute.xlu1 %8199 }
 0x5ee   : > { %v8230_v21 = vpop.permute.xlu2 %8229  ;;  %v8202_v16 = vunpack.i.h.bf16 %v8200_v60  ;;  %v8201_v41 = vunpack.i.l.bf16 %v8200_v60 }
 0x5ef   : > { %v8232_v45 = vunpack.i.h.bf16 %v8230_v21  ;;  %v8231_v7 = vunpack.i.l.bf16 %v8230_v21  ;;  %v5331_v21 = vld [vmem:[#allocation3 + $0xf0] sm:$0xff] }
 0x5f0   : > { %v5981_v47 = vsel %vm1877_vm5, %v5965_v14, %v8201_v41  ;;  %v5982_v20 = vsel %vm1877_vm5, %v5966_v13, %v8202_v16  ;;  %v5380_v16 = vld [vmem:[#allocation2 + $0xe1] sm:$0xff] }
 0x5f1   : > { %v12126_v11 = vsel %vm1943_vm7, %v5985_v59, %v8231_v7  ;;  %v12129_v8 = vsel %vm1943_vm7, %v5986_v32, %v8232_v45  ;;  %v5306_v32 = vld [vmem:[#allocation3 + $0x171] sm:$0xff]  ;;  %v8453_v45 = vpack.i.bf16 %v5332_v10, %v5331_v21  ;;  %v8448_v7 = vpack.i.bf16 %v5378_v52, %v5377_v37  ;;  %v5338_v37 = vld [vmem:[#allocation3 + $0x188] sm:$0xff] }
 0x5f2   : > { %v8220_v30 = vpop.permute.xlu0 %8219  ;;  %8399 = vrot.lane.b32.xlu0 %v13091_v33, %s8654_s13  ;;  %8409 = vrot.lane.b32.xlu1 %v12115_v62, %s8646_s21  ;;  %v8433_v42 = vpack.i.bf16 %v5306_v32, %v5305_v9  ;;  %v12210_v32 = vld [vmem:[#allocation3 + $0x158] sm:$0xff]  ;;  %v5383_v52 = vld [vmem:[#allocation2 + $0x139] sm:$0xff] }
 0x5f3   : > { %v8222_v34 = vunpack.i.h.bf16 %v8220_v30  ;;  %v8221_v61 = vunpack.i.l.bf16 %v8220_v30 }
 0x5f4   : > { %8404 = vrot.lane.b32.xlu2 %v12117_v6, %s8644_s19 }
 0x5f5   : > { %v5998_v40 = vsel %vm1943_vm7, %v5982_v20, %v8222_v34  ;;  %v5997_v12 = vsel %vm1943_vm7, %v5981_v47, %v8221_v61 }
 0x5f6   : > { %v8235_v28 = vpop.permute.xlu2 %8234 }
 0x5f7   : > { %v8237_v36 = vunpack.i.h.bf16 %v8235_v28  ;;  %v8236_v60 = vunpack.i.l.bf16 %v8235_v28 }
 0x5f9   : > { %v8225_v3 = vpop.permute.xlu1 %8224  ;;  %v5972_v33 = vsel %vm324_vm3, %v5236_v4, %v8237_v36  ;;  %v5971_v47 = vsel %vm324_vm3, %v5235_v63, %v8236_v60  ;;  %v5381_v63 = vld [vmem:[#allocation2 + $0x109] sm:$0xff]  ;;  %v5386_v60 = vld [vmem:[#allocation2 + $0x171] sm:$0xff] }
 0x5fa   : > { %v8227_v17 = vunpack.i.h.bf16 %v8225_v3  ;;  %v8226_v57 = vunpack.i.l.bf16 %v8225_v3  ;;  %8424 = vrot.lane.b32.xlu0 %v8423_v55, %s8648_s23  ;;  %8414 = vrot.lane.b32.xlu1 %v8413_v5, %s8655_s16  ;;  %v12183_v3 = vld [vmem:[#allocation3 + $0x120] sm:$0xff] }
 0x5fc   : > { %v8255_v15 = vpop.permute.xlu0 %8254  ;;  %v5999_v56 = vsel %vm1943_vm7, %v12084_v49, %v8226_v57  ;;  %v6000_v26 = vsel %vm1943_vm7, %v12087_v39, %v8227_v17  ;;  %8419 = vrot.lane.b32.xlu2 %v8418_v2, %s8652_s29  ;;  %v8438_v49 = vpack.i.bf16 %v5322_v22, %v5321_v24  ;;  %v5382_v17 = vld [vmem:[#allocation2 + $0x111] sm:$0xff] }
 0x5fd   : > { %v8257_v38 = vunpack.i.h.bf16 %v8255_v15  ;;  %v8256_v53 = vunpack.i.l.bf16 %v8255_v15 }
 0x5fe   : > { %v8250_v43 = vpop.permute.xlu2 %8249 }
 0x5ff   : > { %v12147_v19 = vsel %vm2009_vm10, %v5999_v56, %v8256_v53  ;;  %v12150_v0 = vsel %vm2009_vm10, %v6000_v26, %v8257_v38  ;;  %v8252_v58 = vunpack.i.h.bf16 %v8250_v43  ;;  %v8251_v50 = vunpack.i.l.bf16 %v8250_v43 }
 0x600   : > { %v8488_v53 = vpack.i.bf16 %v5382_v17, %v5381_v63 }
 0x601   : > { %v12153_v59 = vsel %vm2009_vm10, %v5997_v12, %v8251_v50  ;;  %v12156_v39 = vsel %vm2009_vm10, %v5998_v40, %v8252_v58  ;;  %v12177_v12 = vld [vmem:[#allocation3 + $0x128] sm:$0xff] }
 0x602   : > { %8429 = vrot.lane.b32.xlu0 %v12022_v54, %s8653_s9  ;;  %8439 = vrot.lane.b32.xlu1 %v8438_v49, %s8651_s22  ;;  %v5379_v54 = vld [vmem:[#allocation2 + $0xd9] sm:$0xff] }
 0x603   : > { %v8468_v30 = vpack.i.bf16 %v5380_v16, %v5379_v54 }
 0x604   : > { %8434 = vrot.lane.b32.xlu2 %v8433_v42, %s8650_s8  ;;  %v12214_v42 = vld [vmem:[#allocation3 + $0x150] sm:$0xff] }
 0x606   : > { %v8270_v25 = vpop.permute.xlu2 %8269 }
 0x607   : > { %v8272_v48 = vunpack.i.h.bf16 %v8270_v25  ;;  %v8271_v4 = vunpack.i.l.bf16 %v8270_v25  ;;  %v5384_v25 = vld [vmem:[#allocation2 + $0x141] sm:$0xff] }
 0x608   : > { %v8508_v36 = vpack.i.bf16 %v5384_v25, %v5383_v52  ;;  %v6750_v52 = vld [vmem:[%s12658_s5 + $0x10] sm:$0xff] }
 0x60a   : > { %8454 = vrot.lane.b32.xlu0 %v8453_v45, %s8652_s29  ;;  %8444 = vrot.lane.b32.xlu1 %v12019_v18, %s8654_s13  ;;  %v5337_v45 = vld [vmem:[#allocation3 + $0x180] sm:$0xff] }
 0x60c   : > { %8449 = vrot.lane.b32.xlu2 %v8448_v7, %s8655_s16  ;;  %v8240_v41 = vpop.permute.xlu1 %8239  ;;  %v8513_v7 = vpack.i.bf16 %v5338_v37, %v5337_v45 }
 0x60d   : > { %v8242_v14 = vunpack.i.h.bf16 %v8240_v41  ;;  %v8241_v13 = vunpack.i.l.bf16 %v8240_v41 }
 0x60e   : > { %v8290_v20 = vpop.permute.xlu2 %8289 }
 0x60f   : > { %v5987_v34 = vsel %vm1877_vm5, %v5971_v47, %v8241_v13  ;;  %v5988_v61 = vsel %vm1877_vm5, %v5972_v33, %v8242_v14  ;;  %v8292_v24 = vunpack.i.h.bf16 %v8290_v20  ;;  %v8291_v22 = vunpack.i.l.bf16 %v8290_v20  ;;  %v5354_v33 = vld [vmem:[#allocation3 + $0x189] sm:$0xff] }
 0x612   : > { %8469 = vrot.lane.b32.xlu0 %v8468_v30, %s8655_s16  ;;  %8459 = vrot.lane.b32.xlu1 %v12040_v29, %s8653_s9  ;;  %v8473_v29 = vpack.i.bf16 %v12177_v12, %v12183_v3 }
 0x614   : > { %v8265_v18 = vpop.permute.xlu0 %8264  ;;  %8464 = vrot.lane.b32.xlu2 %v12048_v31, %s8654_s13  ;;  %v12175_v27 = vpop.permute.xlu1 %8244 }
 0x615   : > { %v8267_v35 = vunpack.i.h.bf16 %v8265_v18  ;;  %v8266_v40 = vunpack.i.l.bf16 %v8265_v18  ;;  %v5353_v18 = vld [vmem:[#allocation3 + $0x181] sm:$0xff] }
 0x616   : > { %v12179_v28 = vpop.permute.xlu2 %8294 }
 0x617   : > { %v6004_v5 = vsel %vm1943_vm7, %v5988_v61, %v8267_v35  ;;  %v6003_v51 = vsel %vm1943_vm7, %v5987_v34, %v8266_v40  ;;  %v5370_v35 = vld [vmem:[#allocation3 + $0x18a] sm:$0xff]  ;;  %v8518_v40 = vpack.i.bf16 %v5354_v33, %v5353_v18 }
 0x618   : > { %v12188_v31 = vsel %vm2009_vm10, %v6003_v51, %v8271_v4  ;;  %v12191_v55 = vsel %vm2009_vm10, %v6004_v5, %v8272_v48  ;;  %v6727_v5 = vld [vmem:[%s12658_s5 + $0x20] sm:$0xf]  ;;  %v6752_v51 = vld [vmem:[%s12658_s5 + $0x20] sm:$0x30] }
 0x619   : > { %v6728_v17 = vor.u32 %v6752_v51, %v6727_v5  ;;  %v6748_v33 = vld [vmem:[%s12658_s5] sm:$0xff] }
 0x61a   : > { %8484 = vrot.lane.b32.xlu0 %v12060_v1, %s8654_s13  ;;  %8474 = vrot.lane.b32.xlu1 %v8473_v29, %s8652_s29 }
 0x61c   : > { %v8275_v57 = vpop.permute.xlu0 %8274  ;;  %8479 = vrot.lane.b32.xlu2 %v12062_v23, %s8653_s9  ;;  %v8260_v2 = vpop.permute.xlu1 %8259 }
 0x61d   : > { %v8277_v15 = vunpack.i.h.bf16 %v8275_v57  ;;  %v8276_v56 = vunpack.i.l.bf16 %v8275_v57  ;;  %v8262_v26 = vunpack.i.h.bf16 %v8260_v2  ;;  %v8261_v38 = vunpack.i.l.bf16 %v8260_v2 }
 0x61e   : > { %v12198_v43 = vpop.permute.xlu2 %8319 }
 0x61f   : > { %v5974_v1 = vsel %vm324_vm3, %v5332_v10, %v8277_v15  ;;  %v5973_v58 = vsel %vm324_vm3, %v5331_v21, %v8276_v56  ;;  %v12204_v50 = vsel %vm2009_vm10, %v12126_v11, %v8261_v38  ;;  %v12208_v23 = vsel %vm2009_vm10, %v12129_v8, %v8262_v26 }
 0x620   : > { %v5989_v49 = vsel %vm1877_vm5, %v5973_v58, %v8291_v22  ;;  %v5990_v9 = vsel %vm1877_vm5, %v5974_v1, %v8292_v24  ;;  %v8493_v11 = vpack.i.bf16 %v12210_v32, %v12214_v42  ;;  %v8321_v29 = vunpack.i.l.bf16 %v12198_v43  ;;  %v6751_v1 = vld [vmem:[%s12658_s5 + $0x18] sm:$0xff] }
 0x621   : > { %v8322_v57 = vunpack.i.h.bf16 %v12198_v43  ;;  %v6185_v38 = vsel %vm6183_vm12, %v6728_v17, 0 }
 0x622   : > { %8499 = vrot.lane.b32.xlu0 %v12117_v6, %s8653_s9  ;;  %8489 = vrot.lane.b32.xlu1 %v8488_v53, %s8655_s16  ;;  %v5385_v6 = vld [vmem:[#allocation2 + $0x169] sm:$0xff] }
 0x623   : > { %v8528_v47 = vpack.i.bf16 %v5386_v60, %v5385_v6  ;;  %6190 = vmatpush.bf16.msra.mxu2 %v6185_v38 }
 0x624   : > { %v12221_v10 = vpop.permute.xlu0 %8279  ;;  %8494 = vrot.lane.b32.xlu2 %v8493_v11, %s8652_s29  ;;  %v12224_v8 = vpop.permute.xlu1 %8284 }
 0x625   : > { %v8282_v18 = vunpack.i.h.bf16 %v12221_v10 }
 0x626   : > { %v12226_v21 = vpop.permute.xlu2 %8324 }
 0x627   : > { %6191 = vmatpush.bf16.msra.mxu2 %v6751_v1 }
 0x62a   : > { %8514 = vrot.lane.b32.xlu0 %v8513_v7, %s8652_s29  ;;  %8504 = vrot.lane.b32.xlu1 %v12115_v62, %s8654_s13  ;;  %v5369_v62 = vld [vmem:[#allocation3 + $0x182] sm:$0xff] }
 0x62b   : > { %v8523_v63 = vpack.i.bf16 %v5370_v35, %v5369_v62  ;;  %6192 = vmatpush.bf16.msra.mxu2 %v6750_v52  ;;  %v8281_v62 = vunpack.i.l.bf16 %v12221_v10  ;;  %v8327_v10 = vunpack.i.h.bf16 %v12226_v21 }
 0x62c   : > { %v8305_v54 = vpop.permute.xlu0 %8304  ;;  %8509 = vrot.lane.b32.xlu2 %v8508_v36, %s8655_s16  ;;  %v8300_v16 = vpop.permute.xlu1 %8299 }
 0x62d   : > { %v8307_v41 = vunpack.i.h.bf16 %v8305_v54  ;;  %v8306_v14 = vunpack.i.l.bf16 %v8305_v54  ;;  %v8302_v13 = vunpack.i.h.bf16 %v8300_v16  ;;  %v8301_v30 = vunpack.i.l.bf16 %v8300_v16 }
 0x62e   : > { %v12232_v20 = vpop.permute.xlu2 %8349 }
 0x62f   : > { %v6005_v34 = vsel %vm1943_vm7, %v5989_v49, %v8301_v30  ;;  %v6006_v61 = vsel %vm1943_vm7, %v5990_v9, %v8302_v13 }
 0x630   : > { %v6021_v48 = vsel %vm2009_vm10, %v6005_v34, %v8306_v14  ;;  %v6022_v4 = vsel %vm2009_vm10, %v6006_v61, %v8307_v41  ;;  %v8246_v34 = vunpack.i.l.bf16 %v12175_v27 }
 0x631   : > { %v12250_v53 = vsel %vm3794_vm14, %v6021_v48, %v8321_v29  ;;  %v12256_v58 = vsel %vm3794_vm14, %v6022_v4, %v8322_v57 }
 0x632   : > { %8529 = vrot.lane.b32.xlu0 %v8528_v47, %s8655_s16  ;;  %8519 = vrot.lane.b32.xlu1 %v8518_v40, %s8653_s9  ;;  %v6011_v5 = vsel %vm2009_vm10, %v12098_v44, %v8246_v34 }
 0x634   : > { %v8310_v2 = vpop.permute.xlu0 %8309  ;;  %8524 = vrot.lane.b32.xlu2 %v8523_v63, %s8654_s13  ;;  %v8315_v15 = vpop.permute.xlu1 %8314  ;;  %s8598_s13 = scalar_lea.hbm %s12660_s7, 16 }
 0x635   : > { %v8312_v56 = vunpack.i.h.bf16 %v8310_v2  ;;  %v8311_v26 = vunpack.i.l.bf16 %v8310_v2  ;;  %v8317_v24 = vunpack.i.h.bf16 %v8315_v15  ;;  %v8316_v22 = vunpack.i.l.bf16 %v8315_v15 }
 0x636   : > { %v8355_v43 = vpop.permute.xlu2 %8354  ;;  %v8326_v15 = vunpack.i.l.bf16 %v12226_v21  ;;  %v8352_v21 = vunpack.i.h.bf16 %v12232_v20 }
 0x637   : > { %v12260_v49 = vsel %vm3794_vm14, %v12204_v50, %v8311_v26  ;;  %v12264_v9 = vsel %vm3794_vm14, %v12208_v23, %v8312_v56  ;;  %v12268_v11 = vsel %vm3794_vm14, %v12188_v31, %v8316_v22  ;;  %v12272_v37 = vsel %vm3794_vm14, %v12191_v55, %v8317_v24  ;;  %v6749_v31 = vld [vmem:[%s12658_s5 + $0x8] sm:$0xff] }
 0x638   : > { %v8357_v6 = vunpack.i.h.bf16 %v8355_v43  ;;  %v8356_v60 = vunpack.i.l.bf16 %v8355_v43  ;;  %6193 = vmatpush.bf16.msra.mxu2 %v6749_v31  ;;  %v8351_v43 = vunpack.i.l.bf16 %v12232_v20 }
 0x63c   : > { %v8335_v25 = vpop.permute.xlu0 %8334  ;;  %v8330_v50 = vpop.permute.xlu1 %8329  ;;  %6194 = vmatpush.bf16.msra.mxu2 %v6748_v33 }
 0x63d   : > { %v8337_v45 = vunpack.i.h.bf16 %v8335_v25  ;;  %v8336_v7 = vunpack.i.l.bf16 %v8335_v25  ;;  %v8332_v36 = vunpack.i.h.bf16 %v8330_v50  ;;  %v8331_v23 = vunpack.i.l.bf16 %v8330_v50 }
 0x63e   : > { %v12284_v16 = vpop.permute.xlu2 %8379  ;;  %v8287_v50 = vunpack.i.h.bf16 %v12224_v8 }
 0x63f   : > { %v5976_v55 = vsel %vm324_vm3, %v12177_v12, %v8332_v36  ;;  %v5975_v54 = vsel %vm324_vm3, %v12183_v3, %v8331_v23  ;;  %v8247_v3 = vunpack.i.h.bf16 %v12175_v27  ;;  %v6027_v27 = vsel %vm3794_vm14, %v6011_v5, %v8281_v62 }
 0x640   : > { %v5992_v41 = vsel %vm1877_vm5, %v5976_v55, %v8337_v45  ;;  %v5991_v14 = vsel %vm1877_vm5, %v5975_v54, %v8336_v7  ;;  %v6043_v38 = vsel %vm3827_vm1, %v6027_v27, %v8326_v15  ;;  %v8286_v45 = vunpack.i.l.bf16 %v12224_v8 }
 0x641   : > { %v6007_v13 = vsel %vm1943_vm7, %v5991_v14, %v8356_v60  ;;  %v6008_v30 = vsel %vm1943_vm7, %v5992_v41, %v8357_v6  ;;  %v6012_v51 = vsel %vm2009_vm10, %v12101_v46, %v8247_v3  ;;  %v6030_v8 = vsel %vm3794_vm14, %v12156_v39, %v8287_v50 }
 0x642   : > { %v6028_v17 = vsel %vm3794_vm14, %v6012_v51, %v8282_v18  ;;  %v8382_v34 = vunpack.i.h.bf16 %v12284_v16  ;;  %v8381_v18 = vunpack.i.l.bf16 %v12284_v16  ;;  %v8297_v16 = vunpack.i.h.bf16 %v12179_v28 }
 0x643   : > { %v6044_v24 = vsel %vm3827_vm1, %v6028_v17, %v8327_v10 }
 0x644   : > { %v8340_v47 = vpop.permute.xlu0 %8339  ;;  %v8345_v12 = vpop.permute.xlu1 %8344 }
 0x645   : > { %v8347_v57 = vunpack.i.h.bf16 %v8345_v12  ;;  %v8346_v2 = vunpack.i.l.bf16 %v8345_v12  ;;  %v8342_v31 = vunpack.i.h.bf16 %v8340_v47  ;;  %v8341_v6 = vunpack.i.l.bf16 %v8340_v47 }
 0x646   : > { %v12295_v61 = vpop.permute.xlu2 %8394 }
 0x647   : > { %v6059_v22 = vsel %vm3860_vm15, %v6043_v38, %v8346_v2  ;;  %v6060_v1 = vsel %vm3860_vm15, %v6044_v24, %v8347_v57  ;;  %v6046_v47 = vsel %vm3827_vm1, %v6030_v8, %v8342_v31  ;;  %v8296_v57 = vunpack.i.l.bf16 %v12179_v28 }
 0x648   : > { %v6075_v60 = vsel %vm3893_vm0, %v6059_v22, %v8351_v43  ;;  %v6076_v55 = vsel %vm3893_vm0, %v6060_v1, %v8352_v21  ;;  %v6032_v28 = vsel %vm3794_vm14, %v12150_v0, %v8297_v16 }
 0x649   : > { %v6031_v43 = vsel %vm3794_vm14, %v12147_v19, %v8296_v57 }
 0x64c   : > { %v8365_v35 = vpop.permute.xlu0 %8364  ;;  %v8360_v40 = vpop.permute.xlu1 %8359 }
 0x64d   : > { %v8367_v48 = vunpack.i.h.bf16 %v8365_v35  ;;  %v8366_v4 = vunpack.i.l.bf16 %v8365_v35  ;;  %v8362_v29 = vunpack.i.h.bf16 %v8360_v40  ;;  %v8361_v63 = vunpack.i.l.bf16 %v8360_v40 }
 0x64e   : > { %v8405_v52 = vpop.permute.xlu2 %8404 }
 0x64f   : > { %v6023_v56 = vsel %vm2009_vm10, %v6007_v13, %v8361_v63  ;;  %v6024_v26 = vsel %vm2009_vm10, %v6008_v30, %v8362_v29  ;;  %v6029_v13 = vsel %vm3794_vm14, %v12153_v59, %v8286_v45  ;;  %v8407_v63 = vunpack.i.h.bf16 %v8405_v52 }
 0x650   : > { %v12310_v44 = vsel %vm3794_vm14, %v6023_v56, %v8366_v4  ;;  %v12313_v46 = vsel %vm3794_vm14, %v6024_v26, %v8367_v48  ;;  %v6045_v33 = vsel %vm3827_vm1, %v6029_v13, %v8341_v6  ;;  %v8406_v27 = vunpack.i.l.bf16 %v8405_v52 }
 0x651   : > { %v5978_v38 = vsel %vm324_vm3, %v12210_v32, %v8407_v63  ;;  %v8397_v45 = vunpack.i.h.bf16 %v12295_v61 }
 0x652   : > { %v5977_v24 = vsel %vm324_vm3, %v12214_v42, %v8406_v27  ;;  %v8396_v42 = vunpack.i.l.bf16 %v12295_v61 }
 0x654   : > { %v8370_v25 = vpop.permute.xlu0 %8369  ;;  %v8375_v7 = vpop.permute.xlu1 %8374 }
 0x655   : > { %v8372_v36 = vunpack.i.h.bf16 %v8370_v25  ;;  %v8371_v23 = vunpack.i.l.bf16 %v8370_v25  ;;  %v8377_v54 = vunpack.i.h.bf16 %v8375_v7  ;;  %v8376_v41 = vunpack.i.l.bf16 %v8375_v7 }
 0x656   : > { %v12338_v39 = vpop.permute.xlu2 %8419 }
 0x657   : > { %v6091_v14 = vsel %vm3982_vm2, %v6075_v60, %v8371_v23  ;;  %v6092_v20 = vsel %vm3982_vm2, %v6076_v55, %v8372_v36  ;;  %v6061_v12 = vsel %vm3860_vm15, %v6045_v33, %v8376_v41  ;;  %v6062_v3 = vsel %vm3860_vm15, %v6046_v47, %v8377_v54 }
 0x658   : > { %v6107_v30 = vpack.c.bf16 %v6092_v20, %v6091_v14  ;;  %v6077_v48 = vsel %vm3893_vm0, %v6061_v12, %v8381_v18  ;;  %v6078_v4 = vsel %vm3893_vm0, %v6062_v3, %v8382_v34 }
 0x65a   : > { %6729 = vmatmul.msk.bf16.vlgmr.msra.gmra.mxu2 %vm6158_vm8, %v6107_v30 }
 0x65c   : > { %v8385_v62 = vpop.permute.xlu0 %8384  ;;  %v8390_v59 = vpop.permute.xlu1 %8389 }
 0x65d   : > { %v8387_v35 = vunpack.i.h.bf16 %v8385_v62  ;;  %v8386_v40 = vunpack.i.l.bf16 %v8385_v62  ;;  %v8392_v10 = vunpack.i.h.bf16 %v8390_v59  ;;  %v8391_v15 = vunpack.i.l.bf16 %v8390_v59 }
 0x65e   : > { %v8435_v22 = vpop.permute.xlu2 %8434  ;;  %v8422_v59 = vunpack.i.h.bf16 %v12338_v39 }
 0x65f   : > { %v6093_v5 = vsel %vm3982_vm2, %v6077_v48, %v8386_v40  ;;  %v6094_v51 = vsel %vm3982_vm2, %v6078_v4, %v8387_v35  ;;  %v6047_v52 = vsel %vm3827_vm1, %v6031_v43, %v8391_v15  ;;  %v6048_v25 = vsel %vm3827_vm1, %v6032_v28, %v8392_v10 }
 0x660   : > { %v6108_v29 = vpack.c.bf16 %v6094_v51, %v6093_v5  ;;  %v8437_v7 = vunpack.i.h.bf16 %v8435_v22  ;;  %v8436_v36 = vunpack.i.l.bf16 %v8435_v22  ;;  %v6063_v19 = vsel %vm3860_vm15, %v6047_v52, %v8396_v42 }
 0x661   : > { %v6064_v0 = vsel %vm3860_vm15, %v6048_v25, %v8397_v45  ;;  %v8421_v35 = vunpack.i.l.bf16 %v12338_v39 }
 0x663   : > { %v6049_v51 = vsel %vm3827_vm1, %v12260_v49, %v8421_v35 }
 0x664   : > { %v8400_v17 = vpop.permute.xlu0 %8399  ;;  %v8410_v2 = vpop.permute.xlu1 %8409 }
 0x665   : > { %v8412_v56 = vunpack.i.h.bf16 %v8410_v2  ;;  %v8411_v26 = vunpack.i.l.bf16 %v8410_v2  ;;  %v8402_v50 = vunpack.i.h.bf16 %v8400_v17  ;;  %v8401_v32 = vunpack.i.l.bf16 %v8400_v17 }
 0x666   : > { %v8450_v47 = vpop.permute.xlu2 %8449 }
 0x667   : > { %v5993_v1 = vsel %vm1877_vm5, %v5977_v24, %v8411_v26  ;;  %v5994_v21 = vsel %vm1877_vm5, %v5978_v38, %v8412_v56  ;;  %v6079_v41 = vsel %vm3893_vm0, %v6063_v19, %v8401_v32  ;;  %v6080_v14 = vsel %vm3893_vm0, %v6064_v0, %v8402_v50 }
 0x668   : > { %v8452_v17 = vunpack.i.h.bf16 %v8450_v47  ;;  %v8451_v39 = vunpack.i.l.bf16 %v8450_v47 }
 0x66a   : > { %6730 = vmatmul.msk.bf16.gmra.mxu2 %vm6158_vm8, %v6108_v29  ;;  %v6050_v29 = vsel %vm3827_vm1, %v12264_v9, %v8422_v59 }
 0x66c   : > { %v8425_v23 = vpop.permute.xlu0 %8424  ;;  %v8415_v31 = vpop.permute.xlu1 %8414 }
 0x66d   : > { %v8427_v6 = vunpack.i.h.bf16 %v8425_v23  ;;  %v8426_v60 = vunpack.i.l.bf16 %v8425_v23  ;;  %v8417_v55 = vunpack.i.h.bf16 %v8415_v31  ;;  %v8416_v54 = vunpack.i.l.bf16 %v8415_v31 }
 0x66e   : > { %v8465_v63 = vpop.permute.xlu2 %8464 }
 0x66f   : > { %v6010_v61 = vsel %vm1943_vm7, %v5994_v21, %v8427_v6  ;;  %v6009_v20 = vsel %vm1943_vm7, %v5993_v1, %v8426_v60  ;;  %v6095_v30 = vsel %vm3982_vm2, %v6079_v41, %v8416_v54  ;;  %v6096_v33 = vsel %vm3982_vm2, %v6080_v14, %v8417_v55 }
 0x670   : > { %v6026_v13 = vsel %vm2009_vm10, %v6010_v61, %v8437_v7  ;;  %v6025_v8 = vsel %vm2009_vm10, %v6009_v20, %v8436_v36  ;;  %v6109_v12 = vpack.c.bf16 %v6096_v33, %v6095_v30  ;;  %v8467_v42 = vunpack.i.h.bf16 %v8465_v63 }
 0x671   : > { %v8466_v7 = vunpack.i.l.bf16 %v8465_v63 }
 0x674   : > { %v8430_v3 = vpop.permute.xlu0 %8429  ;;  %v8440_v34 = vpop.permute.xlu1 %8439 }
 0x675   : > { %v8442_v18 = vunpack.i.h.bf16 %v8440_v34  ;;  %v8441_v62 = vunpack.i.l.bf16 %v8440_v34  ;;  %v8432_v4 = vunpack.i.h.bf16 %v8430_v3  ;;  %v8431_v5 = vunpack.i.l.bf16 %v8430_v3 }
 0x676   : > { %v8480_v52 = vpop.permute.xlu2 %8479 }
 0x677   : > { %v12374_v40 = vsel %vm3794_vm14, %v6025_v8, %v8441_v62  ;;  %v12377_v48 = vsel %vm3794_vm14, %v6026_v13, %v8442_v18  ;;  %v6065_v57 = vsel %vm3860_vm15, %v6049_v51, %v8431_v5  ;;  %v6066_v2 = vsel %vm3860_vm15, %v6050_v29, %v8432_v4 }
 0x678   : > { %v8482_v8 = vunpack.i.h.bf16 %v8480_v52  ;;  %v8481_v30 = vunpack.i.l.bf16 %v8480_v52 }
 0x67a   : > { %6731 = vmatmul.msk.bf16.gmra.mxu2 %vm6158_vm8, %v6109_v12 }
 0x67c   : > { %v8455_v27 = vpop.permute.xlu0 %8454  ;;  %v8445_v16 = vpop.permute.xlu1 %8444 }
 0x67d   : > { %v8447_v10 = vunpack.i.h.bf16 %v8445_v16  ;;  %v8446_v15 = vunpack.i.l.bf16 %v8445_v16  ;;  %v8457_v38 = vunpack.i.h.bf16 %v8455_v27  ;;  %v8456_v49 = vunpack.i.l.bf16 %v8455_v27 }
 0x67e   : > { %v8495_v41 = vpop.permute.xlu2 %8494 }
 0x67f   : > { %v6081_v56 = vsel %vm3893_vm0, %v6065_v57, %v8446_v15  ;;  %v6082_v26 = vsel %vm3893_vm0, %v6066_v2, %v8447_v10  ;;  %v6051_v43 = vsel %vm3827_vm1, %v12268_v11, %v8456_v49  ;;  %v6052_v28 = vsel %vm3827_vm1, %v12272_v37, %v8457_v38 }
 0x680   : > { %v6097_v24 = vsel %vm3982_vm2, %v6081_v56, %v8451_v39  ;;  %v6098_v9 = vsel %vm3982_vm2, %v6082_v26, %v8452_v17  ;;  %v8496_v35 = vunpack.i.l.bf16 %v8495_v41 }
 0x681   : > { %v6110_v22 = vpack.c.bf16 %v6098_v9, %v6097_v24 }
 0x682   : > { %v6055_v27 = vsel %vm3827_vm1, %v12310_v44, %v8496_v35 }
 0x684   : > { %v8470_v1 = vpop.permute.xlu0 %8469  ;;  %v8460_v21 = vpop.permute.xlu1 %8459 }
 0x685   : > { %v8462_v25 = vunpack.i.h.bf16 %v8460_v21  ;;  %v8461_v50 = vunpack.i.l.bf16 %v8460_v21  ;;  %v8472_v32 = vunpack.i.h.bf16 %v8470_v1  ;;  %v8471_v45 = vunpack.i.l.bf16 %v8470_v1 }
 0x686   : > { %v8510_v63 = vpop.permute.xlu2 %8509 }
 0x687   : > { %v6067_v36 = vsel %vm3860_vm15, %v6051_v43, %v8461_v50  ;;  %v6068_v23 = vsel %vm3860_vm15, %v6052_v28, %v8462_v25  ;;  %v8512_v16 = vunpack.i.h.bf16 %v8510_v63  ;;  %v8511_v57 = vunpack.i.l.bf16 %v8510_v63 }
 0x688   : > { %v6083_v31 = vsel %vm3893_vm0, %v6067_v36, %v8466_v7  ;;  %v6084_v19 = vsel %vm3893_vm0, %v6068_v23, %v8467_v42 }
 0x689   : > { %v6099_v11 = vsel %vm3982_vm2, %v6083_v31, %v8471_v45  ;;  %v6100_v0 = vsel %vm3982_vm2, %v6084_v19, %v8472_v32 }
 0x68a   : > { %6732 = vmatmul.msk.bf16.gmra.mxu2 %vm6158_vm8, %v6110_v22  ;;  %v6111_v37 = vpack.c.bf16 %v6100_v0, %v6099_v11  ;;  %v12438_v0 = vld [vmem:[%s12659_s6] ss:$0 sm:$0xff] }
 0x68c   : > { %v8485_v6 = vpop.permute.xlu0 %8484  ;;  %v8475_v60 = vpop.permute.xlu1 %8474 }
 0x68d   : > { %v8477_v55 = vunpack.i.h.bf16 %v8475_v60  ;;  %v8476_v54 = vunpack.i.l.bf16 %v8475_v60  ;;  %v8487_v20 = vunpack.i.h.bf16 %v8485_v6  ;;  %v8486_v13 = vunpack.i.l.bf16 %v8485_v6 }
 0x68e   : > { %v8525_v1 = vpop.permute.xlu2 %8524 }
 0x68f   : > { %v6053_v14 = vsel %vm3827_vm1, %v12250_v53, %v8476_v54  ;;  %v6054_v61 = vsel %vm3827_vm1, %v12256_v58, %v8477_v55  ;;  %v8497_v53 = vunpack.i.h.bf16 %v8495_v41  ;;  %v8527_v42 = vunpack.i.h.bf16 %v8525_v1 }
 0x690   : > { %v6069_v33 = vsel %vm3860_vm15, %v6053_v14, %v8481_v30  ;;  %v6070_v47 = vsel %vm3860_vm15, %v6054_v61, %v8482_v8  ;;  %v8526_v7 = vunpack.i.l.bf16 %v8525_v1 }
 0x691   : > { %v6085_v34 = vsel %vm3893_vm0, %v6069_v33, %v8486_v13  ;;  %v6086_v18 = vsel %vm3893_vm0, %v6070_v47, %v8487_v20  ;;  %v6056_v17 = vsel %vm3827_vm1, %v12313_v46, %v8497_v53 }
 0x694   : > { %v8500_v12 = vpop.permute.xlu0 %8499  ;;  %v8490_v3 = vpop.permute.xlu1 %8489 }
 0x695   : > { %v8492_v62 = vunpack.i.h.bf16 %v8490_v3  ;;  %v8491_v59 = vunpack.i.l.bf16 %v8490_v3  ;;  %v8502_v5 = vunpack.i.h.bf16 %v8500_v12  ;;  %v8501_v51 = vunpack.i.l.bf16 %v8500_v12 }
 0x697   : > { %v6101_v58 = vsel %vm3982_vm2, %v6085_v34, %v8491_v59  ;;  %v6102_v4 = vsel %vm3982_vm2, %v6086_v18, %v8492_v62  ;;  %v6071_v10 = vsel %vm3860_vm15, %v6055_v27, %v8501_v51  ;;  %v6072_v15 = vsel %vm3860_vm15, %v6056_v17, %v8502_v5 }
 0x698   : > { %v6112_v29 = vpack.c.bf16 %v6102_v4, %v6101_v58 }
 0x69a   : > { %6733 = vmatmul.msk.bf16.gmra.mxu2 %vm6158_vm8, %v6111_v37 }
 0x69c   : > { %v8515_v39 = vpop.permute.xlu0 %8514  ;;  %v8505_v2 = vpop.permute.xlu1 %8504 }
 0x69d   : > { %v8507_v56 = vunpack.i.h.bf16 %v8505_v2  ;;  %v8506_v26 = vunpack.i.l.bf16 %v8505_v2  ;;  %v8517_v24 = vunpack.i.h.bf16 %v8515_v39  ;;  %v8516_v9 = vunpack.i.l.bf16 %v8515_v39 }
 0x69f   : > { %v6087_v38 = vsel %vm3893_vm0, %v6071_v10, %v8506_v26  ;;  %v6088_v49 = vsel %vm3893_vm0, %v6072_v15, %v8507_v56  ;;  %v6057_v28 = vsel %vm3827_vm1, %v12374_v40, %v8516_v9  ;;  %v6058_v52 = vsel %vm3827_vm1, %v12377_v48, %v8517_v24 }
 0x6a0   : > { %v6103_v44 = vsel %vm3982_vm2, %v6087_v38, %v8511_v57  ;;  %v6104_v46 = vsel %vm3982_vm2, %v6088_v49, %v8512_v16 }
 0x6a1   : > { %v6113_v22 = vpack.c.bf16 %v6104_v46, %v6103_v44 }
 0x6a4   : > { %v8530_v21 = vpop.permute.xlu0 %8529  ;;  %v8520_v43 = vpop.permute.xlu1 %8519 }
 0x6a5   : > { %v8522_v25 = vunpack.i.h.bf16 %v8520_v43  ;;  %v8521_v50 = vunpack.i.l.bf16 %v8520_v43  ;;  %v8532_v32 = vunpack.i.h.bf16 %v8530_v21  ;;  %v8531_v45 = vunpack.i.l.bf16 %v8530_v21 }
 0x6a7   : > { %v6073_v36 = vsel %vm3860_vm15, %v6057_v28, %v8521_v50  ;;  %v6074_v23 = vsel %vm3860_vm15, %v6058_v52, %v8522_v25 }
 0x6a8   : > { %v6089_v31 = vsel %vm3893_vm0, %v6073_v36, %v8526_v7  ;;  %v6090_v19 = vsel %vm3893_vm0, %v6074_v23, %v8527_v42 }
 0x6a9   : > { %v6105_v11 = vsel %vm3982_vm2, %v6089_v31, %v8531_v45  ;;  %v6106_v40 = vsel %vm3982_vm2, %v6090_v19, %v8532_v32  ;;  %vm6549_vm2 = vcmask 1041409  }
 0x6aa   : > { %6734 = vmatmul.msk.bf16.gmra.mxu2 %vm6158_vm8, %v6112_v29  ;;  %v6114_v48 = vpack.c.bf16 %v6106_v40, %v6105_v11 }
 0x6ba   : > { %6735 = vmatmul.msk.bf16.gmra.mxu2 %vm6158_vm8, %v6113_v22 }
 0x6ca   : > { %6736 = vmatmul.msk.bf16.gmra.mxu2 %vm6158_vm8, %v6114_v48 }
 0x6dd   : > { %v6196_v37 = vpop.f32.mrf.mxu2 }
 0x6de   : > { %v6197_v6 = vadd.f32 %v12438_v0, %v6196_v37 }
 0x6e0   : > { %v12441_v60 = vmul.f32 0.70710677, %v6197_v6 }
 0x6e2   : > { %v6324_v55 = vrot.slane %v12441_v60, 6  ;;  %v6292_v54 = vrot.slane %v12441_v60, 4  ;;  %v6260_v41 = vrot.slane %v12441_v60, 2 }
 0x6e4   : > { %6332 = vrot.lane.b32.xlu2 %v6324_v55, %s8648_s23  ;;  %6300 = vrot.lane.b32.xlu0 %v6292_v54, %s8646_s21 }
 0x6e5   : > { %6268 = vrot.lane.b32.xlu1 %v6260_v41, %s8644_s19  ;;  %v6198_v14 = vpop.f32.mrf.mxu2 }
 0x6e6   : > { %v6199_v61 = vadd.f32 %v12438_v0, %v6198_v14 }
 0x6e8   : > { %v6237_v20 = vmul.f32 0.70710677, %v6199_v61 }
 0x6ea   : > { %v6452_v13 = vrot.slane %v6237_v20, 6  ;;  %v6388_v8 = vrot.slane %v6237_v20, 2  ;;  %v6420_v34 = vrot.slane %v6237_v20, 4 }
 0x6ec   : > { %6460 = vrot.lane.b32.xlu2 %v6452_v13, %s8653_s9  ;;  %6396 = vrot.lane.b32.xlu0 %v6388_v8, %s8651_s22 }
 0x6ed   : > { %6364 = vrot.lane.b32.xlu1 %v6237_v20, %s8650_s8  ;;  %v6201_v30 = vpop.f32.mrf.mxu2 }
 0x6ee   : > { %v6202_v33 = vadd.f32 %v12438_v0, %v6201_v30 }
 0x6f0   : > { %v12454_v47 = vmul.f32 0.70710677, %v6202_v33 }
 0x6f2   : > { %v6261_v12 = vrot.slane %v12454_v47, 2  ;;  %v6325_v3 = vrot.slane %v12454_v47, 6  ;;  %v6293_v35 = vrot.slane %v12454_v47, 4 }
 0x6f4   : > { %6270 = vrot.lane.b32.xlu2 %v6261_v12, %s8644_s19  ;;  %6334 = vrot.lane.b32.xlu0 %v6325_v3, %s8648_s23 }
 0x6f5   : > { %6428 = vrot.lane.b32.xlu1 %v6420_v34, %s8652_s29  ;;  %v6203_v18 = vpop.f32.mrf.mxu2 }
 0x6f6   : > { %v6204_v62 = vadd.f32 %v12438_v0, %v6203_v18 }
 0x6f8   : > { %v6239_v59 = vmul.f32 0.70710677, %v6204_v62 }
 0x6fa   : > { %v6453_v53 = vrot.slane %v6239_v59, 6  ;;  %v6389_v63 = vrot.slane %v6239_v59, 2  ;;  %v6421_v57 = vrot.slane %v6239_v59, 4 }
 0x6fc   : > { %6366 = vrot.lane.b32.xlu2 %v6239_v59, %s8650_s8  ;;  %6462 = vrot.lane.b32.xlu0 %v6453_v53, %s8653_s9 }
 0x6fd   : > { %6302 = vrot.lane.b32.xlu1 %v6293_v35, %s8646_s21  ;;  %v6206_v58 = vpop.f32.mrf.mxu2 }
 0x6fe   : > { %v6207_v4 = vadd.f32 %v12438_v0, %v6206_v58 }
 0x700   : > { %v12467_v5 = vmul.f32 0.70710677, %v6207_v4 }
 0x702   : > { %v6294_v51 = vrot.slane %v12467_v5, 4  ;;  %v6262_v29 = vrot.slane %v12467_v5, 2  ;;  %v6326_v26 = vrot.slane %v12467_v5, 6 }
 0x704   : > { %6304 = vrot.lane.b32.xlu2 %v6294_v51, %s8646_s21  ;;  %6272 = vrot.lane.b32.xlu0 %v6262_v29, %s8644_s19 }
 0x705   : > { %6398 = vrot.lane.b32.xlu1 %v6389_v63, %s8651_s22  ;;  %v6208_v27 = vpop.f32.mrf.mxu2 }
 0x706   : > { %v6209_v17 = vadd.f32 %v12438_v0, %v6208_v27 }
 0x708   : > { %v6241_v39 = vmul.f32 0.70710677, %v6209_v17 }
 0x70a   : > { %v6390_v16 = vrot.slane %v6241_v39, 2  ;;  %v6422_v15 = vrot.slane %v6241_v39, 4  ;;  %v6454_v56 = vrot.slane %v6241_v39, 6 }
 0x70c   : > { %6400 = vrot.lane.b32.xlu2 %v6390_v16, %s8651_s22  ;;  %6368 = vrot.lane.b32.xlu0 %v6241_v39, %s8650_s8 }
 0x70d   : > { %6430 = vrot.lane.b32.xlu1 %v6421_v57, %s8652_s29  ;;  %v6211_v2 = vpop.f32.mrf.mxu2 }
 0x70e   : > { %v6212_v10 = vadd.f32 %v12438_v0, %v6211_v2 }
 0x710   : > { %v12483_v49 = vmul.f32 0.70710677, %v6212_v10 }
 0x712   : > { %v6327_v9 = vrot.slane %v12483_v49, 6  ;;  %v6295_v44 = vrot.slane %v12483_v49, 4  ;;  %v6263_v46 = vrot.slane %v12483_v49, 2 }
 0x714   : > { %6432 = vrot.lane.b32.xlu2 %v6422_v15, %s8652_s29  ;;  %6464 = vrot.lane.b32.xlu0 %v6454_v56, %s8653_s9 }
 0x715   : > { %6336 = vrot.lane.b32.xlu1 %v6326_v26, %s8648_s23  ;;  %v6213_v38 = vpop.f32.mrf.mxu2 }
 0x716   : > { %v6214_v24 = vadd.f32 %v12438_v0, %v6213_v38 }
 0x718   : > { %v6243_v1 = vmul.f32 0.70710677, %v6214_v24 }
 0x71a   : > { %v6423_v43 = vrot.slane %v6243_v1, 4  ;;  %v6391_v28 = vrot.slane %v6243_v1, 2  ;;  %v6455_v32 = vrot.slane %v6243_v1, 6 }
 0x71c   : > { %6338 = vrot.lane.b32.xlu2 %v6327_v9, %s8648_s23  ;;  %6306 = vrot.lane.b32.xlu0 %v6295_v44, %s8646_s21 }
 0x71d   : > { %6274 = vrot.lane.b32.xlu1 %v6263_v46, %s8644_s19  ;;  %v6216_v22 = vpop.f32.mrf.mxu2 }
 0x71e   : > { %v6217_v21 = vadd.f32 %v12438_v0, %v6216_v22 }
 0x720   : > { %v12496_v25 = vmul.f32 0.70710677, %v6217_v21 }
 0x722   : > { %v6264_v50 = vrot.slane %v12496_v25, 2  ;;  %v6296_v42 = vrot.slane %v12496_v25, 4  ;;  %v6328_v31 = vrot.slane %v12496_v25, 6 }
 0x724   : > { %6434 = vrot.lane.b32.xlu2 %v6423_v43, %s8652_s29  ;;  %6402 = vrot.lane.b32.xlu0 %v6391_v28, %s8651_s22 }
 0x725   : > { %6370 = vrot.lane.b32.xlu1 %v6243_v1, %s8650_s8  ;;  %v6218_v52 = vpop.f32.mrf.mxu2 }
 0x726   : > { %v6219_v45 = vadd.f32 %v12438_v0, %v6218_v52 }
 0x728   : > { %v6245_v36 = vmul.f32 0.70710677, %v6219_v45 }
 0x72a   : > { %v6392_v19 = vrot.slane %v6245_v36, 2  ;;  %v6456_v48 = vrot.slane %v6245_v36, 6  ;;  %v6424_v6 = vrot.slane %v6245_v36, 4 }
 0x72c   : > { %6276 = vrot.lane.b32.xlu2 %v6264_v50, %s8644_s19  ;;  %6466 = vrot.lane.b32.xlu0 %v6455_v32, %s8653_s9 }
 0x72d   : > { %6308 = vrot.lane.b32.xlu1 %v6296_v42, %s8646_s21  ;;  %v6221_v7 = vpop.f32.mrf.mxu2 }
 0x72e   : > { %v6222_v23 = vadd.f32 %v12438_v0, %v6221_v7 }
 0x730   : > { %v12509_v40 = vmul.f32 0.70710677, %v6222_v23 }
 0x732   : > { %v6265_v37 = vrot.slane %v12509_v40, 2  ;;  %v6297_v20 = vrot.slane %v12509_v40, 4  ;;  %v6329_v13 = vrot.slane %v12509_v40, 6 }
 0x734   : > { %6372 = vrot.lane.b32.xlu2 %v6245_v36, %s8650_s8  ;;  %6340 = vrot.lane.b32.xlu0 %v6328_v31, %s8648_s23 }
 0x735   : > { %6404 = vrot.lane.b32.xlu1 %v6392_v19, %s8651_s22  ;;  %v6223_v11 = vpop.f32.mrf.mxu2 }
 0x736   : > { %v6224_v54 = vadd.f32 %v12438_v0, %v6223_v11 }
 0x738   : > { %v6247_v14 = vmul.f32 0.70710677, %v6224_v54 }
 0x73a   : > { %v6393_v3 = vrot.slane %v6247_v14, 2  ;;  %v6425_v18 = vrot.slane %v6247_v14, 4  ;;  %v6457_v58 = vrot.slane %v6247_v14, 6 }
 0x73c   : > { %6468 = vrot.lane.b32.xlu2 %v6456_v48, %s8653_s9  ;;  %6278 = vrot.lane.b32.xlu0 %v6265_v37, %s8644_s19 }
 0x73d   : > { %6436 = vrot.lane.b32.xlu1 %v6424_v6, %s8652_s29  ;;  %v6226_v55 = vpop.f32.mrf.mxu2 }
 0x73e   : > { %v6333_v41 = vpop.permute.xlu2 %6332  ;;  %v6227_v61 = vadd.f32 %v12438_v0, %v6226_v55 }
 0x740   : > { %v12522_v30 = vmul.f32 0.70710677, %v6227_v61 }
 0x742   : > { %v6298_v34 = vrot.slane %v12522_v30, 4  ;;  %v6266_v51 = vrot.slane %v12522_v30, 2  ;;  %v6330_v10 = vrot.slane %v12522_v30, 6 }
 0x744   : > { %6310 = vrot.lane.b32.xlu2 %v6297_v20, %s8646_s21  ;;  %6374 = vrot.lane.b32.xlu0 %v6247_v14, %s8650_s8 }
 0x745   : > { %6342 = vrot.lane.b32.xlu1 %v6329_v13, %s8648_s23  ;;  %v6228_v8 = vpop.f32.mrf.mxu2 }
 0x746   : > { %v6461_v33 = vpop.permute.xlu2 %6460  ;;  %v6229_v12 = vadd.f32 %v12438_v0, %v6228_v8 }
 0x748   : > { %v6249_v59 = vmul.f32 0.70710677, %v6229_v12 }
 0x74a   : > { %v6394_v4 = vrot.slane %v6249_v59, 2  ;;  %v6426_v22 = vrot.slane %v6249_v59, 4  ;;  %v6458_v48 = vrot.slane %v6249_v59, 6 }
 0x74c   : > { %6406 = vrot.lane.b32.xlu2 %v6393_v3, %s8651_s22  ;;  %6312 = vrot.lane.b32.xlu0 %v6298_v34, %s8646_s21 }
 0x74d   : > { %6438 = vrot.lane.b32.xlu1 %v6425_v18, %s8652_s29  ;;  %v6231_v62 = vpop.f32.mrf.mxu2 }
 0x74e   : > { %v6271_v53 = vpop.permute.xlu2 %6270  ;;  %v6232_v35 = vadd.f32 %v12438_v0, %v6231_v62 }
 0x74f   : > { %v6485_v7 = vsel %vm324_vm3, %v12454_v47, %v6271_v53 }
 0x750   : > { %v12534_v29 = vmul.f32 0.70710677, %v6232_v35 }
 0x752   : > { %v6331_v15 = vrot.slane %v12534_v29, 6  ;;  %v6267_v44 = vrot.slane %v12534_v29, 2  ;;  %v6299_v32 = vrot.slane %v12534_v29, 4 }
 0x754   : > { %6470 = vrot.lane.b32.xlu2 %v6457_v58, %s8653_s9  ;;  %6408 = vrot.lane.b32.xlu0 %v6394_v4, %s8651_s22 }
 0x755   : > { %6280 = vrot.lane.b32.xlu1 %v6266_v51, %s8644_s19  ;;  %v6233_v17 = vpop.f32.mrf.mxu2 }
 0x756   : > { %v6367_v63 = vpop.permute.xlu2 %6366  ;;  %v6301_v27 = vpop.permute.xlu0 %6300  ;;  %v6234_v2 = vadd.f32 %v12438_v0, %v6233_v17 }
 0x757   : > { %v6269_v39 = vpop.permute.xlu1 %6268 }
 0x758   : > { %v6484_v16 = vsel %vm324_vm3, %v12441_v60, %v6269_v39  ;;  %v6251_v26 = vmul.f32 0.70710677, %v6234_v2 }
 0x759   : > { %v6492_v57 = vsel %vm1877_vm5, %v6484_v16, %v6301_v27 }
 0x75a   : > { %v6500_v56 = vsel %vm1943_vm7, %v6492_v57, %v6333_v41  ;;  %v6395_v46 = vrot.slane %v6251_v26, 2  ;;  %v6427_v50 = vrot.slane %v6251_v26, 4  ;;  %v6459_v19 = vrot.slane %v6251_v26, 6 }
 0x75c   : > { %6344 = vrot.lane.b32.xlu2 %v6330_v10, %s8648_s23  ;;  %6346 = vrot.lane.b32.xlu0 %v6331_v15, %s8648_s23  ;;  %s6738_s23 = sshll.u32 %s8717_s28, 3 }
 0x75d   : > { %6376 = vrot.lane.b32.xlu1 %v6249_v59, %s8650_s8 }
 0x75e   : > { %v6397_v38 = vpop.permute.xlu0 %6396  ;;  %v6305_v24 = vpop.permute.xlu2 %6304 }
 0x75f   : > { %v6365_v60 = vpop.permute.xlu1 %6364 }
 0x760   : > { %v6508_v9 = vsel %vm2009_vm10, %v6500_v56, %v6365_v60 }
 0x761   : > { %v6516_v0 = vsel %vm3794_vm14, %v6508_v9, %v6397_v38 }
 0x764   : > { %6282 = vrot.lane.b32.xlu2 %v6267_v44, %s8644_s19  ;;  %6410 = vrot.lane.b32.xlu0 %v6395_v46, %s8651_s22  ;;  %s269_s19 = sand.u32 1, %s8632_s25  }
 0x765   : > { %6440 = vrot.lane.b32.xlu1 %v6426_v22, %s8652_s29  ;;  %s6572_s18 = scalar_lea.sflag [#allocation6], %s269_s19 }
 0x766   : > { %v6335_v1 = vpop.permute.xlu0 %6334  ;;  %v6401_v21 = vpop.permute.xlu2 %6400 }
 0x767   : > { %v6429_v43 = vpop.permute.xlu1 %6428 }
 0x768   : > { %v6524_v28 = vsel %vm3827_vm1, %v6516_v0, %v6429_v43 }
 0x769   : > { %v6532_v52 = vsel %vm3860_vm15, %v6524_v28, %v6461_v33 }
 0x76c   : > { %6378 = vrot.lane.b32.xlu2 %v6251_v26, %s8650_s8  ;;  %6442 = vrot.lane.b32.xlu0 %v6427_v50, %s8652_s29  ;;  %s6582_s29 = scalar_lea.hbm %s12660_s7, %s6738_s23 }
 0x76d   : > { %6314 = vrot.lane.b32.xlu1 %v6299_v32, %s8646_s21  ;;  %s6650_s21 = sshll.u32 %s269_s19, 3  ;;  %s6586_s17 = sshll.u32 %s6582_s29, 4  ;;  %s6587_s17 = int_to_ptr.hbm [resolvable:$true] %s6586_s17 }
 0x76e   : > { %v6463_v45 = vpop.permute.xlu0 %6462  ;;  %v6433_v42 = vpop.permute.xlu2 %6432  ;;  %s271_s28 = scalar_lea.vmem [#allocation5], %s6650_s21  ;;  %s8592_s20 = sshra.s32 %s6587_s17, 4  ;;  %s8593_s20 = int_to_ptr.hbm [resolvable:$true] %s8592_s20 }
 0x76f   : > { %v6303_v36 = vpop.permute.xlu1 %6302  ;;  %s8594_s14 = scalar_lea.hbm %s8593_s20, 8  ;;  %p8599_p0 = scmp.lt.s32.totalorder %s8593_s20, %s12660_s7 }
 0x770   : > { %v6493_v23 = vsel %vm1877_vm5, %v6485_v7, %v6303_v36  ;;  %p8595_p11 = scmp.ne.s32.totalorder %s8593_s20, %s8594_s14  ;;  %p8600_p1 = scmp.lt.s32.totalorder %s8598_s13, %s8594_s14 }
 0x771   : > { %v6501_v31 = vsel %vm1943_vm7, %v6493_v23, %v6335_v1 }
 0x772   : > { %v6509_v11 = vsel %vm2009_vm10, %v6501_v31, %v6367_v63  ;;  %p8596_p12 = pnand %p8595_p11, %p8734_p5  ;;  %p8601_p2 = por %p8600_p1, %p8599_p0 }
 0x774   : > { %6474 = vrot.lane.b32.xlu2 %v6459_v19, %s8653_s9  ;;  %p8597_p13 = pneg %p8596_p12 }
 0x775   : > { %6472 = vrot.lane.b32.xlu1 %v6458_v48, %s8653_s9  ;;  %s6584_s9 = sshll.u32 %s271_s28, 4  ;;  %s6585_s9 = int_to_ptr.vmem [resolvable:$true] %s6584_s9 }
 0x776   : > { %v6273_v37 = vpop.permute.xlu0 %6272  ;;  %v6339_v54 = vpop.permute.xlu2 %6338  ;;  %p8602_p3 = pnand %p8601_p2, %p8597_p13 }
 0x777   : > { %v6399_v6 = vpop.permute.xlu1 %6398  ;;  %v6486_v55 = vsel %vm324_vm3, %v12467_v5, %v6273_v37 }
 0x778   : > { %v6517_v47 = vsel %vm3794_vm14, %v6509_v11, %v6399_v6  ;;  %v6494_v41 = vsel %vm1877_vm5, %v6486_v55, %v6305_v24 }
 0x77e   : > { %v6369_v14 = vpop.permute.xlu0 %6368  ;;  %v6435_v33 = vpop.permute.xlu2 %6434 }
 0x77f   : > { %v6431_v61 = vpop.permute.xlu1 %6430 }
 0x780   : > { %v6525_v20 = vsel %vm3827_vm1, %v6517_v47, %v6431_v61 }
 0x781   : > { %v6533_v13 = vsel %vm3860_vm15, %v6525_v20, %v6463_v45 }
 0x782   : > { %v6548_v8 = vrot.slane %v6533_v13, 7 }
 0x784   : > { %v6550_v12 = vsel %vm6549_vm2, %v6548_v8, %v6532_v52 }
 0x786   : > { %v6465_v3 = vpop.permute.xlu0 %6464  ;;  %v6277_v53 = vpop.permute.xlu2 %6276 }
 0x787   : > { %v6337_v34 = vpop.permute.xlu1 %6336  ;;  %v6488_v44 = vsel %vm324_vm3, %v12496_v25, %v6277_v53 }
 0x788   : > { %v6502_v18 = vsel %vm1943_vm7, %v6494_v41, %v6337_v34 }
 0x789   : > { %v6510_v5 = vsel %vm2009_vm10, %v6502_v18, %v6369_v14 }
 0x78a   : > { %v6518_v62 = vsel %vm3794_vm14, %v6510_v5, %v6401_v21 }
 0x78b   : > { %v6526_v59 = vsel %vm3827_vm1, %v6518_v62, %v6433_v42 }
 0x78c   : > { %v6534_v35 = vsel %vm3860_vm15, %v6526_v59, %v6465_v3 }
 0x78d   : > { %v6551_v58 = vrot.slane %v6534_v35, 6 }
 0x78e   : > { %v6307_v4 = vpop.permute.xlu0 %6306  ;;  %v6373_v16 = vpop.permute.xlu2 %6372 }
 0x78f   : > { %v6553_v51 = vsel %vm6552_vm9, %v6551_v58, %v6550_v12  ;;  %v6275_v63 = vpop.permute.xlu1 %6274 }
 0x790   : > { %v6487_v27 = vsel %vm324_vm3, %v12483_v49, %v6275_v63 }
 0x791   : > { %v6495_v17 = vsel %vm1877_vm5, %v6487_v27, %v6307_v4 }
 0x792   : > { %v6503_v39 = vsel %vm1943_vm7, %v6495_v17, %v6339_v54 }
 0x796   : > { %v6403_v57 = vpop.permute.xlu0 %6402  ;;  %v6469_v60 = vpop.permute.xlu2 %6468 }
 0x797   : > { %v6371_v2 = vpop.permute.xlu1 %6370 }
 0x798   : > { %v6511_v10 = vsel %vm2009_vm10, %v6503_v39, %v6371_v2 }
 0x799   : > { %v6519_v15 = vsel %vm3794_vm14, %v6511_v10, %v6403_v57 }
 0x79a   : > { %v6527_v56 = vsel %vm3827_vm1, %v6519_v15, %v6435_v33 }
 0x79e   : > { %v6467_v26 = vpop.permute.xlu0 %6466  ;;  %v6311_v21 = vpop.permute.xlu2 %6310 }
 0x79f   : > { %v6309_v38 = vpop.permute.xlu1 %6308  ;;  %v6535_v24 = vsel %vm3860_vm15, %v6527_v56, %v6467_v26 }
 0x7a0   : > { %v6554_v49 = vrot.slane %v6535_v24, 5  ;;  %v6496_v22 = vsel %vm1877_vm5, %v6488_v44, %v6309_v38 }
 0x7a2   : > { %v6556_v9 = vsel %vm6555_vm11, %v6554_v49, %v6553_v51 }
 0x7a6   : > { %v6341_v0 = vpop.permute.xlu0 %6340  ;;  %v6407_v7 = vpop.permute.xlu2 %6406 }
 0x7a7   : > { %v6405_v46 = vpop.permute.xlu1 %6404  ;;  %v6504_v1 = vsel %vm1943_vm7, %v6496_v22, %v6341_v0 }
 0x7a8   : > { %v6512_v43 = vsel %vm2009_vm10, %v6504_v1, %v6373_v16 }
 0x7a9   : > { %v6520_v50 = vsel %vm3794_vm14, %v6512_v43, %v6405_v46 }
 0x7ae   : > { %v6279_v28 = vpop.permute.xlu0 %6278  ;;  %v6471_v31 = vpop.permute.xlu2 %6470 }
 0x7af   : > { %v6437_v52 = vpop.permute.xlu1 %6436  ;;  %v6489_v41 = vsel %vm324_vm3, %v12509_v40, %v6279_v28 }
 0x7b0   : > { %v6528_v32 = vsel %vm3827_vm1, %v6520_v50, %v6437_v52  ;;  %v6497_v61 = vsel %vm1877_vm5, %v6489_v41, %v6311_v21 }
 0x7b1   : > { %v6536_v45 = vsel %vm3860_vm15, %v6528_v32, %v6469_v60 }
 0x7b2   : > { %v6557_v42 = vrot.slane %v6536_v45, 4 }
 0x7b4   : > { %v6559_v25 = vsel %vm6558_vm13, %v6557_v42, %v6556_v9 }
 0x7b6   : > { %v6375_v36 = vpop.permute.xlu0 %6374  ;;  %v6345_v6 = vpop.permute.xlu2 %6344 }
 0x7b7   : > { %v6343_v23 = vpop.permute.xlu1 %6342 }
 0x7b8   : > { %v6505_v20 = vsel %vm1943_vm7, %v6497_v61, %v6343_v23 }
 0x7b9   : > { %v6513_v8 = vsel %vm2009_vm10, %v6505_v20, %v6375_v36 }
 0x7ba   : > { %v6521_v3 = vsel %vm3794_vm14, %v6513_v8, %v6407_v7 }
 0x7be   : > { %v6313_v19 = vpop.permute.xlu0 %6312  ;;  %v6283_v54 = vpop.permute.xlu2 %6282 }
 0x7bf   : > { %v6439_v11 = vpop.permute.xlu1 %6438  ;;  %v6491_v34 = vsel %vm324_vm3, %v12534_v29, %v6283_v54 }
 0x7c0   : > { %v6529_v5 = vsel %vm3827_vm1, %v6521_v3, %v6439_v11 }
 0x7c1   : > { %v6537_v35 = vsel %vm3860_vm15, %v6529_v5, %v6471_v31 }
 0x7c2   : > { %v6560_v63 = vrot.slane %v6537_v35, 3 }
 0x7c6   : > { %v6409_v48 = vpop.permute.xlu0 %6408  ;;  %v6379_v12 = vpop.permute.xlu2 %6378 }
 0x7c7   : > { %v6281_v37 = vpop.permute.xlu1 %6280 }
 0x7c8   : > { %v6490_v33 = vsel %vm324_vm3, %v12522_v30, %v6281_v37  ;;  %vm6561_vm3 = vcmask 1045509  }
 0x7c9   : > { %v6498_v40 = vsel %vm1877_vm5, %v6490_v33, %v6313_v19  ;;  %v6562_v56 = vsel %vm6561_vm3, %v6560_v63, %v6559_v25 }
 0x7ca   : > { %v6506_v53 = vsel %vm1943_vm7, %v6498_v40, %v6345_v6 }
 0x7ce   : > { %v6347_v47 = vpop.permute.xlu0 %6346  ;;  %v6475_v27 = vpop.permute.xlu2 %6474 }
 0x7cf   : > { %v6377_v55 = vpop.permute.xlu1 %6376 }
 0x7d0   : > { %v6514_v29 = vsel %vm2009_vm10, %v6506_v53, %v6377_v55 }
 0x7d1   : > { %v6522_v17 = vsel %vm3794_vm14, %v6514_v29, %v6409_v48 }
 0x7d6   : > { %v6411_v13 = vpop.permute.xlu0 %6410 }
 0x7d7   : > { %v6441_v14 = vpop.permute.xlu1 %6440 }
 0x7d8   : > { %v6530_v39 = vsel %vm3827_vm1, %v6522_v17, %v6441_v14 }
 0x7de   : > { %v6443_v4 = vpop.permute.xlu0 %6442 }
 0x7df   : > { %v6315_v18 = vpop.permute.xlu1 %6314 }
 0x7e0   : > { %v6499_v62 = vsel %vm1877_vm5, %v6491_v34, %v6315_v18  ;;  %vm6564_vm5 = vcmask 1046534  }
 0x7e1   : > { %v6507_v59 = vsel %vm1943_vm7, %v6499_v62, %v6347_v47  ;;  %vm6567_vm7 = vcmask 1047559  }
 0x7e2   : > { %v6515_v30 = vsel %vm2009_vm10, %v6507_v59, %v6379_v12 }
 0x7e3   : > { %v6523_v58 = vsel %vm3794_vm14, %v6515_v30, %v6411_v13 }
 0x7e4   : > { %v6531_v51 = vsel %vm3827_vm1, %v6523_v58, %v6443_v4 }
 0x7e5   : > { %v6539_v16 = vsel %vm3860_vm15, %v6531_v51, %v6475_v27 }
 0x7e6   : > { %v6566_v15 = vrot.slane %v6539_v16, 1 }
 0x7e7   : > { %v6473_v57 = vpop.permute.xlu1 %6472 }
 0x7e8   : > { %v6538_v2 = vsel %vm3860_vm15, %v6530_v39, %v6473_v57 }
 0x7e9   : > { %v6563_v10 = vrot.slane %v6538_v2, 2 }
 0x7eb   : > { %v6565_v26 = vsel %vm6564_vm5, %v6563_v10, %v6562_v56 }
 0x7ec   : > { %v6568_v38 = vsel %vm6567_vm7, %v6566_v15, %v6565_v26 }
 0x7ed   : > { %6570 = vst.msk [vmem:[%s271_s28] sm:$0xff] %vm3893_vm0, %v6568_v38 }
 0x7ee   : > { %8605 = shalt.err (!%p8602_p3)
}
 0x7ef   : > { %6840 = dma.vmem_to_hbm [thread:$0]  (%p8734_p5), %s6585_s9, 128, %s6587_s17, %s6572_s18  }
 0x7f0 PF: > { %p6846_p4 = scmp.ge.s32.totalorder %s8640_s27, 2  ;;  %s6598_s19 = sand.u32 1, %s8628_s24  }
 0x7f1   : > { %s6599_s8 = scalar_lea.sflag [#allocation6], %s6598_s19 }
 0x7f2   : > { %p6843_p7 = pnand %p6846_p4, %p8738_p6 }
 0x7f4   : > { %p6844_p8 = pneg %p6843_p7 }
 0x7f6   : > { %8623 = dma.done.wait (%p6844_p8), %s6599_s8, 128  }
 0x7f7   : > { %8625 = vsyncadd (%p6844_p8), %s6599_s8, 4294967168  ;;  %p17_p9 = scmp.ge.s32.totalorder %s8721_s30, 4   ;;  %s13092_s24 = smov %s8632_s25 }
 0x7f8   : > { %s13093_s25 = smov %s8636_s26  ;;  %s13094_s26 = smov %s8732_s10 }
 0x7f9   : > { %s13095_s27 = smov %s8721_s30  ;;  %19 = sbr.rel (!%p17_p9) target bundleno = 3 (0x3), region = 92 }
 0x7fe   :  { %6605 = vsyncpa [#allocation6], 1 }
 0x7ff   :  { %6607 = vsyncpa [#allocation6 + $0x1], 1 }

</bundles_post_ra>
